<compile_context>
chip_gen: v7x
topology: tpu7x:2x2x1
jax: 0.10.0
libtpu: 0.0.40
codegen_flags: <defaults>
</compile_context>

<pallas_src>
import math
from functools import partial

import jax
import jax.numpy as jnp
from jax import lax
from jax.experimental import pallas as pl
from jax.experimental.pallas import tpu as pltpu

MATMUL_DTYPE = jnp.bfloat16  # MXU operand / hidden-stream storage dtype


# ----------------------------------------------------------------------------
# VMEM-budget-aware time-chunk selection
# ----------------------------------------------------------------------------
def _tpu_vmem_capacity():
    default = 64 * 1024 * 1024
    try:
        info = pltpu.get_tpu_info()
        cap = getattr(info, "vmem_capacity_bytes", None)
        return int(cap) if cap else default
    except Exception:
        return default


def _vmem_bytes_estimate(Tc, B, in_dims, H):
    """Rough per-grid-step VMEM footprint of the fused recurrent kernel."""
    bpe = 2                                               # bf16 operands/outputs
    G = 4 * H
    x_buf = 2 * sum(Tc * B * d * bpe for d in in_dims)    # double-buffered x chunks
    out_buf = 2 * Tc * B * H * bpe                        # double-buffered out chunk
    w_blk = (sum(in_dims) + H) * G * bpe                  # W_ih + W_hh (one dir block)
    b_blk = G * 4
    state = 2 * B * H * 4                                 # h / c scratch (f32)
    work = 12 * B * G * 4                                 # f32 gate temporaries (generous)
    return x_buf + out_buf + 2 * (w_blk + b_blk) + state + work


def _pick_time_chunk(T, B, in_dims, H, vmem_cap, max_time_chunk=None):
    # Generation-aware unroll cap: larger on 128 MiB parts (v5e/v6e), smaller on
    # 64 MiB v7x; then shrink until the estimated footprint fits the budget.
    base_cap = 64 if vmem_cap >= 96 * 2**20 else 32
    if max_time_chunk is not None:
        base_cap = min(base_cap, int(max_time_chunk))
    budget = int(0.45 * vmem_cap)
    cap = max(1, min(base_cap, T))
    while cap > 1 and _vmem_bytes_estimate(cap, B, in_dims, H) > budget:
        cap -= 1
    S = -(-T // cap)          # number of time chunks (ceil)
    Tc = -(-T // S)           # balanced chunk size (<= cap)
    T_pad = S * Tc
    return Tc, S, T_pad


def _sigmoid(x):
    # One EUP tanh instead of exp + reciprocal; mathematically identical.
    return 0.5 * (jnp.tanh(0.5 * x) + 1.0)


# ----------------------------------------------------------------------------
# Fused bidirectional LSTM layer kernel.
# Grid = (direction, time_chunk): direction is "parallel" (2 TCs on v7x),
# time is "arbitrary" (sequential recurrence).  For direction 1 the chunk
# index_map is reversed and the in-chunk loop runs in descending (static) order.
# Gate order matches PyTorch: [i, f, g, o].
# ----------------------------------------------------------------------------
def _make_fused_bilstm_kernel(n_in, Tc, H, S, T_real, T_pad):
    need_mask = (T_pad != T_real)

    def kernel(*refs):
        x_refs = refs[:n_in]                      # each (1, Tc, B, D_p)
        w_ih_refs = refs[n_in:2 * n_in]           # each (1, D_p, 4H)
        w_hh_ref = refs[2 * n_in]                 # (1, H, 4H)
        b_ref = refs[2 * n_in + 1]                # (1, 1, 4H)
        out_ref = refs[2 * n_in + 2]              # (1, Tc, B, H)
        h_st = refs[2 * n_in + 3]                 # (B, H) f32
        c_st = refs[2 * n_in + 4]                 # (B, H) f32

        d = pl.program_id(0)
        s = pl.program_id(1)

        @pl.when(s == 0)
        def _():
            # nn.LSTM default: h0 = c0 = 0 for both directions.
            h_st[...] = jnp.zeros_like(h_st)
            c_st[...] = jnp.zeros_like(c_st)

        # Resident weights, hoisted out of the time loop (bf16 MXU operands).
        # TODO(synk): keep W_hh staged in MXU weight registers across the
        # unrolled steps via pltpu.matmul_push_rhs/acc_lhs for small B.
        w_hh = w_hh_ref[0]
        w_ihs = [w[0] for w in w_ih_refs]
        bias = b_ref[0]                           # (1, 4H) f32

        def run_direction(reverse, tblk):
            def step(k, carry):
                j = (Tc - 1 - k) if reverse else k   # static under unroll
                h_prev = h_st[...]
                c_prev = c_st[...]
                # Recurrent matmul (serial dependence) ...
                gates = bias + jnp.dot(h_prev.astype(w_hh.dtype), w_hh,
                                       preferred_element_type=jnp.float32)
                # ... plus the fused input projection (independent of h, overlaps).
                for x_ref, w_ih in zip(x_refs, w_ihs):
                    gates = gates + jnp.dot(x_ref[0, j].astype(w_ih.dtype), w_ih,
                                            preferred_element_type=jnp.float32)
                i_g = _sigmoid(gates[:, 0 * H:1 * H])
                f_g = _sigmoid(gates[:, 1 * H:2 * H])
                g_g = jnp.tanh(gates[:, 2 * H:3 * H])
                o_g = _sigmoid(gates[:, 3 * H:4 * H])
                c_new = f_g * c_prev + i_g * g_g
                h_new = o_g * jnp.tanh(c_new)
                if need_mask:
                    # Freeze the state on padded time steps (beyond T_real).
                    valid = ((tblk * Tc + j) < T_real).astype(jnp.float32)
                    c_new = valid * c_new + (1.0 - valid) * c_prev
                    h_new = valid * h_new + (1.0 - valid) * h_prev
                h_st[...] = h_new
                c_st[...] = c_new
                out_ref[0, j] = h_new.astype(out_ref.dtype)
                return carry

            lax.fori_loop(0, Tc, step, 0, unroll=True)

        @pl.when(d == 0)
        def _():
            run_direction(False, s)

        @pl.when(d == 1)
        def _():
            run_direction(True, S - 1 - s)

    return kernel


def fused_bilstm_layer(x_pieces, w_ih_pieces, w_hh, b, *, Tc, S, T_real, vmem_cap):
    """x_pieces: tuple of (array, stream_idx); arrays are (n_streams, T_pad, B, D_p)
    bf16.  Returns the direction-stacked hidden stream (2, T_pad, B, H) bf16."""
    T_pad = x_pieces[0][0].shape[1]
    B = x_pieces[0][0].shape[2]
    H = w_hh.shape[1]
    G = 4 * H
    n_in = len(x_pieces)

    def tmap(si):
        # forward direction reads chunk s, backward reads chunk S-1-s
        return lambda d, s, si=si: (si, s * (1 - d) + (S - 1 - s) * d, 0, 0)

    in_specs, call_args = [], []
    for arr, si in x_pieces:
        Dp = arr.shape[-1]
        in_specs.append(pl.BlockSpec((1, Tc, B, Dp), tmap(si)))
        call_args.append(arr)
    # Resident weights / biases (constant block per direction).
    # TODO(synk): mark these pipeline_mode=pl.Buffered(1) to skip double-buffering.
    for w in w_ih_pieces:
        in_specs.append(pl.BlockSpec((1,) + w.shape[1:], lambda d, s: (d, 0, 0)))
        call_args.append(w)
    in_specs.append(pl.BlockSpec((1, H, G), lambda d, s: (d, 0, 0)))
    call_args.append(w_hh)
    in_specs.append(pl.BlockSpec((1, 1, G), lambda d, s: (d, 0, 0)))
    call_args.append(b)

    est = _vmem_bytes_estimate(Tc, B, [a.shape[-1] for a, _ in x_pieces], H)
    vmem_limit = int(min(0.9 * vmem_cap,
                         max(32 * 2**20, 1.5 * est + 4 * 2**20)))

    return pl.pallas_call(
        _make_fused_bilstm_kernel(n_in, Tc, H, S, T_real, T_pad),
        out_shape=jax.ShapeDtypeStruct((2, T_pad, B, H), MATMUL_DTYPE),
        grid_spec=pltpu.PrefetchScalarGridSpec(
            num_scalar_prefetch=0,
            grid=(2, S),
            in_specs=in_specs,
            out_specs=pl.BlockSpec(
                (1, Tc, B, H),
                lambda d, s: (d, s * (1 - d) + (S - 1 - s) * d, 0, 0)),
            scratch_shapes=[pltpu.VMEM((B, H), jnp.float32),
                            pltpu.VMEM((B, H), jnp.float32)],
        ),
        compiler_params=pltpu.CompilerParams(
            dimension_semantics=("parallel", "arbitrary"),
            vmem_limit_bytes=vmem_limit),
    )(*call_args)


# ----------------------------------------------------------------------------
# Stacked bidirectional LSTM wrapper (matches nn.LSTM output `x`, eval mode)
# ----------------------------------------------------------------------------
def stack_bi_lstm_forward(x, params, *, batch_first=True, max_time_chunk=None):
    # x: (B, T, input_size) if batch_first else (T, B, input_size)
    # TODO(synk): unidirectional (bidirectional=False) variant not implemented;
    # the module is bidirectional by construction (Stack_Bi_LSTM).
    if batch_first:
        x = jnp.transpose(x, (1, 0, 2))          # -> (T, B, D)
    T, B, D_in = x.shape
    H = params[0]["w_hh"].shape[1]

    vmem_cap = _tpu_vmem_capacity()
    worst_in = [H, H] if (len(params) > 1 and 2 * H > D_in) else [D_in]
    Tc, S, T_pad = _pick_time_chunk(T, B, worst_in, H, vmem_cap, max_time_chunk)

    x0 = x.astype(MATMUL_DTYPE)
    if T_pad != T:
        x0 = jnp.pad(x0, ((0, T_pad - T), (0, 0), (0, 0)))
    x0 = x0[None]                                # (1, T_pad, B, D)

    # TODO(synk): for H not a multiple of 128 (and B < 8) the gate slices /
    # output stores are lane/sublane-partial; pad H/B for production shapes.
    pieces = ((x0, 0),)
    out = None
    for layer in params:
        out = fused_bilstm_layer(pieces, layer["w_ih"], layer["w_hh"], layer["b"],
                                 Tc=Tc, S=S, T_real=T, vmem_cap=vmem_cap)
        # Feed both direction streams of the stacked output directly to the
        # next layer (same HBM buffer passed twice; no copies, no concat).
        pieces = ((out, 0), (out, 1))
        # TODO(synk): inter-layer dropout only applies in nn.LSTM training mode;
        # eval semantics (no dropout) are implemented here.

    y = jnp.concatenate([out[0, :T], out[1, :T]], axis=-1).astype(jnp.float32)
    if batch_first:
        y = jnp.transpose(y, (1, 0, 2))          # -> (B, T, 2H)
    return y


# ----------------------------------------------------------------------------
# Parameter init (PyTorch nn.LSTM layout, stored direction-stacked / transposed)
# ----------------------------------------------------------------------------
def init_lstm_params(key, input_size, hidden_size, num_layers, bias,
                     *, matmul_dtype=MATMUL_DTYPE):
    H = hidden_size
    G = 4 * H
    bound = 1.0 / math.sqrt(H)
    params = []
    for layer in range(num_layers):
        in_dims = (input_size,) if layer == 0 else (H, H)   # [fwd-half, bwd-half]
        in_dim = sum(in_dims)
        key, *ks = jax.random.split(key, 9)

        def u(k, shape):
            return jax.random.uniform(k, shape, jnp.float32, -bound, bound)

        w_ih = jnp.stack([u(ks[0], (G, in_dim)), u(ks[4], (G, in_dim))])  # (2,G,D)
        w_hh = jnp.stack([u(ks[1], (G, H)), u(ks[5], (G, H))])            # (2,G,H)
        if bias:
            b_ih = jnp.stack([u(ks[2], (G,)), u(ks[6], (G,))])
            b_hh = jnp.stack([u(ks[3], (G,)), u(ks[7], (G,))])
        else:
            b_ih = b_hh = jnp.zeros((2, G), jnp.float32)

        w_ih_t = jnp.transpose(w_ih, (0, 2, 1)).astype(matmul_dtype)      # (2,D,G)
        pieces, off = [], 0
        for dci in in_dims:
            pieces.append(w_ih_t[:, off:off + dci, :])                    # (2,D_p,G)
            off += dci
        params.append({
            "w_ih": tuple(pieces),
            "w_hh": jnp.transpose(w_hh, (0, 2, 1)).astype(matmul_dtype),  # (2,H,G)
            "b": (b_ih + b_hh).reshape(2, 1, G).astype(jnp.float32),
        })
    return params


# ----------------------------------------------------------------------------
# Pure-JAX reference (same bf16 operand / f32 accumulation numerics)
# ----------------------------------------------------------------------------
def reference_bilstm(x, params, *, batch_first=True):
    if batch_first:
        x = jnp.transpose(x, (1, 0, 2))
    T, B, _ = x.shape
    H = params[0]["w_hh"].shape[1]
    xs = (x.astype(MATMUL_DTYPE),)
    outs = None
    for layer in params:
        w_ih = jnp.concatenate(layer["w_ih"], axis=1)   # (2, D, 4H)
        w_hh = layer["w_hh"]
        b = layer["b"]
        x_cat = jnp.concatenate(xs, axis=-1)            # (T, B, D) bf16

        def run_dir(d, reverse):
            def step(carry, x_t):
                h, c = carry
                gates = (b[d]
                         + jnp.dot(h.astype(MATMUL_DTYPE), w_hh[d],
                                   preferred_element_type=jnp.float32)
                         + jnp.dot(x_t, w_ih[d],
                                   preferred_element_type=jnp.float32))
                i = _sigmoid(gates[:, 0 * H:1 * H])
                f = _sigmoid(gates[:, 1 * H:2 * H])
                g = jnp.tanh(gates[:, 2 * H:3 * H])
                o = _sigmoid(gates[:, 3 * H:4 * H])
                c = f * c + i * g
                h = o * jnp.tanh(c)
                return (h, c), h

            init = (jnp.zeros((B, H), jnp.float32), jnp.zeros((B, H), jnp.float32))
            _, hs = lax.scan(step, init, x_cat, reverse=reverse)
            return hs

        hf, hb = run_dir(0, False), run_dir(1, True)
        outs = (hf, hb)
        xs = (hf.astype(MATMUL_DTYPE), hb.astype(MATMUL_DTYPE))
    y = jnp.concatenate(outs, axis=-1).astype(MATMUL_DTYPE).astype(jnp.float32)
    if batch_first:
        y = jnp.transpose(y, (1, 0, 2))
    return y


if __name__ == "__main__":
    INPUT_SIZE = 16
    HIDDEN_SIZE = 32
    NUM_LAYERS = 2
    BIAS = True
    BATCH, SEQ = 2, 8

    key = jax.random.PRNGKey(0)
    k_params, k_x, k_x2 = jax.random.split(key, 3)

    params = init_lstm_params(k_params, INPUT_SIZE, HIDDEN_SIZE, NUM_LAYERS, BIAS)
    x = jax.random.normal(k_x, (BATCH, SEQ, INPUT_SIZE), jnp.float32)

    fwd = jax.jit(partial(stack_bi_lstm_forward, batch_first=True))
    out = jax.block_until_ready(fwd(x, params))
    assert out.shape == (BATCH, SEQ, 2 * HIDDEN_SIZE), out.shape
    assert bool(jnp.all(jnp.isfinite(out)))

    ref = jax.jit(partial(reference_bilstm, batch_first=True))(x, params)
    err = float(jnp.max(jnp.abs(out - ref)))
    assert err < 5e-2, f"mismatch vs reference: {err}"

    # Exercise the padded / masked-tail path (T not a multiple of the chunk).
    SEQ2 = 11
    x2 = jax.random.normal(k_x2, (BATCH, SEQ2, INPUT_SIZE), jnp.float32)
    fwd2 = jax.jit(partial(stack_bi_lstm_forward, batch_first=True, max_time_chunk=4))
    out2 = jax.block_until_ready(fwd2(x2, params))
    assert out2.shape == (BATCH, SEQ2, 2 * HIDDEN_SIZE), out2.shape
    ref2 = jax.jit(partial(reference_bilstm, batch_first=True))(x2, params)
    err2 = float(jnp.max(jnp.abs(out2 - ref2)))
    assert err2 < 5e-2, f"padded-path mismatch vs reference: {err2}"

    print("KERNEL_OK")
</pallas_src>

<mosaic_0001>
module attributes {stable_mosaic.version = 11 : i64} {
  func.func @kernel(%arg0: i32, %arg1: i32, %arg2: memref<1x8x2x16xbf16, #tpu.memory_space<vmem>>, %arg3: memref<1x16x128xbf16, #tpu.memory_space<vmem>>, %arg4: memref<1x32x128xbf16, #tpu.memory_space<vmem>>, %arg5: memref<1x1x128xf32, #tpu.memory_space<vmem>>, %arg6: memref<1x8x2x32xbf16, #tpu.memory_space<vmem>>, %arg7: memref<2x32xf32, #tpu.memory_space<vmem>>, %arg8: memref<2x32xf32, #tpu.memory_space<vmem>>) attributes {dimension_semantics = [#tpu.dimension_semantics<parallel>, #tpu.dimension_semantics<arbitrary>], iteration_bounds = array<i64: 2, 1>, scalar_prefetch = 0 : i64, scratch_operands = 2 : i64, tpu.core_type = #tpu.core_type<tc>, window_params = [{transform_indices = @transform_0, window_bounds = array<i64: 1, 8, 2, 16>}, {transform_indices = @transform_1, window_bounds = array<i64: 1, 16, 128>}, {transform_indices = @transform_2, window_bounds = array<i64: 1, 32, 128>}, {transform_indices = @transform_3, window_bounds = array<i64: 1, 1, 128>}, {transform_indices = @transform_4, window_bounds = array<i64: 1, 8, 2, 32>}]} {
    %c0_i32 = arith.constant 0 : i32
    %0 = arith.cmpi eq, %arg1, %c0_i32 : i32
    %1 = arith.extui %0 : i1 to i32
    %c0_i32_0 = arith.constant 0 : i32
    %2 = arith.cmpi ne, %1, %c0_i32_0 : i32
    scf.if %2 {
      %cst = arith.constant 0.000000e+00 : f32
      %15 = vector.broadcast %cst : f32 to vector<2x32xf32>
      %c0_12 = arith.constant 0 : index
      %c0_13 = arith.constant 0 : index
      %16 = vector.load %arg7[%c0_12, %c0_13] : memref<2x32xf32, #tpu.memory_space<vmem>>, vector<2x32xf32>
      tpu.vector_store %arg7[%c0_12, %c0_13], %15 {strides = array<i32>} : memref<2x32xf32, #tpu.memory_space<vmem>>, vector<2x32xf32>,
      %cst_14 = arith.constant 0.000000e+00 : f32
      %17 = vector.broadcast %cst_14 : f32 to vector<2x32xf32>
      %c0_15 = arith.constant 0 : index
      %c0_16 = arith.constant 0 : index
      %18 = vector.load %arg8[%c0_15, %c0_16] : memref<2x32xf32, #tpu.memory_space<vmem>>, vector<2x32xf32>
      tpu.vector_store %arg8[%c0_15, %c0_16], %17 {strides = array<i32>} : memref<2x32xf32, #tpu.memory_space<vmem>>, vector<2x32xf32>,
    } else {
    }
    %c0 = arith.constant 0 : index
    %c0_1 = arith.constant 0 : index
    %c0_2 = arith.constant 0 : index
    %3 = vector.load %arg4[%c0, %c0_1, %c0_2] : memref<1x32x128xbf16, #tpu.memory_space<vmem>>, vector<1x32x128xbf16>
    %4 = vector.shape_cast %3 : vector<1x32x128xbf16> to vector<32x128xbf16>
    %c0_3 = arith.constant 0 : index
    %c0_4 = arith.constant 0 : index
    %c0_5 = arith.constant 0 : index
    %5 = vector.load %arg3[%c0_3, %c0_4, %c0_5] : memref<1x16x128xbf16, #tpu.memory_space<vmem>>, vector<1x16x128xbf16>
    %6 = vector.shape_cast %5 : vector<1x16x128xbf16> to vector<16x128xbf16>
    %c0_6 = arith.constant 0 : index
    %c0_7 = arith.constant 0 : index
    %c0_8 = arith.constant 0 : index
    %7 = vector.load %arg5[%c0_6, %c0_7, %c0_8] : memref<1x1x128xf32, #tpu.memory_space<vmem>>, vector<1x1x128xf32>
    %8 = vector.shape_cast %7 : vector<1x1x128xf32> to vector<1x128xf32>
    %c0_i32_9 = arith.constant 0 : i32
    %9 = arith.cmpi eq, %arg0, %c0_i32_9 : i32
    %10 = arith.extui %9 : i1 to i32
    %c0_i32_10 = arith.constant 0 : i32
    %11 = arith.cmpi ne, %10, %c0_i32_10 : i32
    scf.if %11 {
      %c0_i32_12 = arith.constant 0 : i32
      %c0_13 = arith.constant 0 : index
      %c0_14 = arith.constant 0 : index
      %15 = vector.load %arg7[%c0_13, %c0_14] : memref<2x32xf32, #tpu.memory_space<vmem>>, vector<2x32xf32>
      %c0_15 = arith.constant 0 : index
      %c0_16 = arith.constant 0 : index
      %16 = vector.load %arg8[%c0_15, %c0_16] : memref<2x32xf32, #tpu.memory_space<vmem>>, vector<2x32xf32>
      %17 = arith.truncf %15 : vector<2x32xf32> to vector<2x32xbf16>
      %cst = arith.constant dense<0.000000e+00> : vector<2x128xf32>
      %18 = tpu.matmul %17, %4, %cst {dimension_numbers = #tpu.dot_dimension_numbers<[1], [0], [0], [1], [0, 0, 1, 1], [], []>} : vector<2x32xbf16>, vector<32x128xbf16>, vector<2x128xf32> -> vector<2x128xf32>
      %19 = vector.broadcast %8 : vector<1x128xf32> to vector<2x128xf32>
      %20 = arith.addf %19, %18 : vector<2x128xf32>
      %c0_17 = arith.constant 0 : index
      %21 = arith.index_cast %c0_i32_12 : i32 to index
      %c0_18 = arith.constant 0 : index
      %c0_19 = arith.constant 0 : index
      %22 = vector.load %arg2[%c0_17, %21, %c0_18, %c0_19] : memref<1x8x2x16xbf16, #tpu.memory_space<vmem>>, vector<1x1x2x16xbf16>
      %23 = vector.shape_cast %22 : vector<1x1x2x16xbf16> to vector<2x16xbf16>
      %cst_20 = arith.constant dense<0.000000e+00> : vector<2x128xf32>
      %24 = tpu.matmul %23, %6, %cst_20 {dimension_numbers = #tpu.dot_dimension_numbers<[1], [0], [0], [1], [0, 0, 1, 1], [], []>} : vector<2x16xbf16>, vector<16x128xbf16>, vector<2x128xf32> -> vector<2x128xf32>
      %25 = arith.addf %20, %24 : vector<2x128xf32>
      %26 = vector.extract_strided_slice %25 {offsets = [0, 0], sizes = [2, 32], strides = [1, 1]} : vector<2x128xf32> to vector<2x32xf32>
      %cst_21 = arith.constant 5.000000e-01 : f32
      %27 = vector.broadcast %cst_21 : f32 to vector<2x32xf32>
      %28 = arith.mulf %27, %26 : vector<2x32xf32>
      %29 = math.tanh %28 : vector<2x32xf32>
      %cst_22 = arith.constant 1.000000e+00 : f32
      %30 = vector.broadcast %cst_22 : f32 to vector<2x32xf32>
      %31 = arith.addf %29, %30 : vector<2x32xf32>
      %cst_23 = arith.constant 5.000000e-01 : f32
      %32 = vector.broadcast %cst_23 : f32 to vector<2x32xf32>
      %33 = arith.mulf %32, %31 : vector<2x32xf32>
      %34 = vector.extract_strided_slice %25 {offsets = [0, 32], sizes = [2, 32], strides = [1, 1]} : vector<2x128xf32> to vector<2x32xf32>
      %cst_24 = arith.constant 5.000000e-01 : f32
      %35 = vector.broadcast %cst_24 : f32 to vector<2x32xf32>
      %36 = arith.mulf %35, %34 : vector<2x32xf32>
      %37 = math.tanh %36 : vector<2x32xf32>
      %cst_25 = arith.constant 1.000000e+00 : f32
      %38 = vector.broadcast %cst_25 : f32 to vector<2x32xf32>
      %39 = arith.addf %37, %38 : vector<2x32xf32>
      %cst_26 = arith.constant 5.000000e-01 : f32
      %40 = vector.broadcast %cst_26 : f32 to vector<2x32xf32>
      %41 = arith.mulf %40, %39 : vector<2x32xf32>
      %42 = vector.extract_strided_slice %25 {offsets = [0, 64], sizes = [2, 32], strides = [1, 1]} : vector<2x128xf32> to vector<2x32xf32>
      %43 = math.tanh %42 : vector<2x32xf32>
      %44 = vector.extract_strided_slice %25 {offsets = [0, 96], sizes = [2, 32], strides = [1, 1]} : vector<2x128xf32> to vector<2x32xf32>
      %cst_27 = arith.constant 5.000000e-01 : f32
      %45 = vector.broadcast %cst_27 : f32 to vector<2x32xf32>
      %46 = arith.mulf %45, %44 : vector<2x32xf32>
      %47 = math.tanh %46 : vector<2x32xf32>
      %cst_28 = arith.constant 1.000000e+00 : f32
      %48 = vector.broadcast %cst_28 : f32 to vector<2x32xf32>
      %49 = arith.addf %47, %48 : vector<2x32xf32>
      %cst_29 = arith.constant 5.000000e-01 : f32
      %50 = vector.broadcast %cst_29 : f32 to vector<2x32xf32>
      %51 = arith.mulf %50, %49 : vector<2x32xf32>
      %52 = arith.mulf %41, %16 : vector<2x32xf32>
      %53 = arith.mulf %33, %43 : vector<2x32xf32>
      %54 = arith.addf %52, %53 : vector<2x32xf32>
      %55 = math.tanh %54 : vector<2x32xf32>
      %56 = arith.mulf %51, %55 : vector<2x32xf32>
      %c0_30 = arith.constant 0 : index
      %c0_31 = arith.constant 0 : index
      %57 = vector.load %arg7[%c0_30, %c0_31] : memref<2x32xf32, #tpu.memory_space<vmem>>, vector<2x32xf32>
      tpu.vector_store %arg7[%c0_30, %c0_31], %56 {strides = array<i32>} : memref<2x32xf32, #tpu.memory_space<vmem>>, vector<2x32xf32>,
      %c0_32 = arith.constant 0 : index
      %c0_33 = arith.constant 0 : index
      %58 = vector.load %arg8[%c0_32, %c0_33] : memref<2x32xf32, #tpu.memory_space<vmem>>, vector<2x32xf32>
      tpu.vector_store %arg8[%c0_32, %c0_33], %54 {strides = array<i32>} : memref<2x32xf32, #tpu.memory_space<vmem>>, vector<2x32xf32>,
      %59 = arith.truncf %56 : vector<2x32xf32> to vector<2x32xbf16>
      %c0_34 = arith.constant 0 : index
      %60 = arith.index_cast %c0_i32_12 : i32 to index
      %c0_35 = arith.constant 0 : index
      %c0_36 = arith.constant 0 : index
      %61 = vector.load %arg6[%c0_34, %60, %c0_35, %c0_36] : memref<1x8x2x32xbf16, #tpu.memory_space<vmem>>, vector<1x1x2x32xbf16>
      %62 = vector.shape_cast %61 : vector<1x1x2x32xbf16> to vector<2x32xbf16>
      %63 = vector.shape_cast %59 : vector<2x32xbf16> to vector<1x1x2x32xbf16>
      tpu.vector_store %arg6[%c0_34, %60, %c0_35, %c0_36], %63 {strides = array<i32>} : memref<1x8x2x32xbf16, #tpu.memory_space<vmem>>, vector<1x1x2x32xbf16>,
      %c1_i32_37 = arith.constant 1 : i32
      %c0_38 = arith.constant 0 : index
      %c0_39 = arith.constant 0 : index
      %64 = vector.load %arg7[%c0_38, %c0_39] : memref<2x32xf32, #tpu.memory_space<vmem>>, vector<2x32xf32>
      %c0_40 = arith.constant 0 : index
      %c0_41 = arith.constant 0 : index
      %65 = vector.load %arg8[%c0_40, %c0_41] : memref<2x32xf32, #tpu.memory_space<vmem>>, vector<2x32xf32>
      %66 = arith.truncf %64 : vector<2x32xf32> to vector<2x32xbf16>
      %cst_42 = arith.constant dense<0.000000e+00> : vector<2x128xf32>
      %67 = tpu.matmul %66, %4, %cst_42 {dimension_numbers = #tpu.dot_dimension_numbers<[1], [0], [0], [1], [0, 0, 1, 1], [], []>} : vector<2x32xbf16>, vector<32x128xbf16>, vector<2x128xf32> -> vector<2x128xf32>
      %68 = vector.broadcast %8 : vector<1x128xf32> to vector<2x128xf32>
      %69 = arith.addf %68, %67 : vector<2x128xf32>
      %c0_43 = arith.constant 0 : index
      %70 = arith.index_cast %c1_i32_37 : i32 to index
      %c0_44 = arith.constant 0 : index
      %c0_45 = arith.constant 0 : index
      %71 = vector.load %arg2[%c0_43, %70, %c0_44, %c0_45] : memref<1x8x2x16xbf16, #tpu.memory_space<vmem>>, vector<1x1x2x16xbf16>
      %72 = vector.shape_cast %71 : vector<1x1x2x16xbf16> to vector<2x16xbf16>
      %cst_46 = arith.constant dense<0.000000e+00> : vector<2x128xf32>
      %73 = tpu.matmul %72, %6, %cst_46 {dimension_numbers = #tpu.dot_dimension_numbers<[1], [0], [0], [1], [0, 0, 1, 1], [], []>} : vector<2x16xbf16>, vector<16x128xbf16>, vector<2x128xf32> -> vector<2x128xf32>
      %74 = arith.addf %69, %73 : vector<2x128xf32>
      %75 = vector.extract_strided_slice %74 {offsets = [0, 0], sizes = [2, 32], strides = [1, 1]} : vector<2x128xf32> to vector<2x32xf32>
      %cst_47 = arith.constant 5.000000e-01 : f32
      %76 = vector.broadcast %cst_47 : f32 to vector<2x32xf32>
      %77 = arith.mulf %76, %75 : vector<2x32xf32>
      %78 = math.tanh %77 : vector<2x32xf32>
      %cst_48 = arith.constant 1.000000e+00 : f32
      %79 = vector.broadcast %cst_48 : f32 to vector<2x32xf32>
      %80 = arith.addf %78, %79 : vector<2x32xf32>
      %cst_49 = arith.constant 5.000000e-01 : f32
      %81 = vector.broadcast %cst_49 : f32 to vector<2x32xf32>
      %82 = arith.mulf %81, %80 : vector<2x32xf32>
      %83 = vector.extract_strided_slice %74 {offsets = [0, 32], sizes = [2, 32], strides = [1, 1]} : vector<2x128xf32> to vector<2x32xf32>
      %cst_50 = arith.constant 5.000000e-01 : f32
      %84 = vector.broadcast %cst_50 : f32 to vector<2x32xf32>
      %85 = arith.mulf %84, %83 : vector<2x32xf32>
      %86 = math.tanh %85 : vector<2x32xf32>
      %cst_51 = arith.constant 1.000000e+00 : f32
      %87 = vector.broadcast %cst_51 : f32 to vector<2x32xf32>
      %88 = arith.addf %86, %87 : vector<2x32xf32>
      %cst_52 = arith.constant 5.000000e-01 : f32
      %89 = vector.broadcast %cst_52 : f32 to vector<2x32xf32>
      %90 = arith.mulf %89, %88 : vector<2x32xf32>
      %91 = vector.extract_strided_slice %74 {offsets = [0, 64], sizes = [2, 32], strides = [1, 1]} : vector<2x128xf32> to vector<2x32xf32>
      %92 = math.tanh %91 : vector<2x32xf32>
      %93 = vector.extract_strided_slice %74 {offsets = [0, 96], sizes = [2, 32], strides = [1, 1]} : vector<2x128xf32> to vector<2x32xf32>
      %cst_53 = arith.constant 5.000000e-01 : f32
      %94 = vector.broadcast %cst_53 : f32 to vector<2x32xf32>
      %95 = arith.mulf %94, %93 : vector<2x32xf32>
      %96 = math.tanh %95 : vector<2x32xf32>
      %cst_54 = arith.constant 1.000000e+00 : f32
      %97 = vector.broadcast %cst_54 : f32 to vector<2x32xf32>
      %98 = arith.addf %96, %97 : vector<2x32xf32>
      %cst_55 = arith.constant 5.000000e-01 : f32
      %99 = vector.broadcast %cst_55 : f32 to vector<2x32xf32>
      %100 = arith.mulf %99, %98 : vector<2x32xf32>
      %101 = arith.mulf %90, %65 : vector<2x32xf32>
      %102 = arith.mulf %82, %92 : vector<2x32xf32>
      %103 = arith.addf %101, %102 : vector<2x32xf32>
      %104 = math.tanh %103 : vector<2x32xf32>
      %105 = arith.mulf %100, %104 : vector<2x32xf32>
      %c0_56 = arith.constant 0 : index
      %c0_57 = arith.constant 0 : index
      %106 = vector.load %arg7[%c0_56, %c0_57] : memref<2x32xf32, #tpu.memory_space<vmem>>, vector<2x32xf32>
      tpu.vector_store %arg7[%c0_56, %c0_57], %105 {strides = array<i32>} : memref<2x32xf32, #tpu.memory_space<vmem>>, vector<2x32xf32>,
      %c0_58 = arith.constant 0 : index
      %c0_59 = arith.constant 0 : index
      %107 = vector.load %arg8[%c0_58, %c0_59] : memref<2x32xf32, #tpu.memory_space<vmem>>, vector<2x32xf32>
      tpu.vector_store %arg8[%c0_58, %c0_59], %103 {strides = array<i32>} : memref<2x32xf32, #tpu.memory_space<vmem>>, vector<2x32xf32>,
      %108 = arith.truncf %105 : vector<2x32xf32> to vector<2x32xbf16>
      %c0_60 = arith.constant 0 : index
      %109 = arith.index_cast %c1_i32_37 : i32 to index
      %c0_61 = arith.constant 0 : index
      %c0_62 = arith.constant 0 : index
      %110 = vector.load %arg6[%c0_60, %109, %c0_61, %c0_62] : memref<1x8x2x32xbf16, #tpu.memory_space<vmem>>, vector<1x1x2x32xbf16>
      %111 = vector.shape_cast %110 : vector<1x1x2x32xbf16> to vector<2x32xbf16>
      %112 = vector.shape_cast %108 : vector<2x32xbf16> to vector<1x1x2x32xbf16>
      tpu.vector_store %arg6[%c0_60, %109, %c0_61, %c0_62], %112 {strides = array<i32>} : memref<1x8x2x32xbf16, #tpu.memory_space<vmem>>, vector<1x1x2x32xbf16>,
      %c2_i32 = arith.constant 2 : i32
      %c0_63 = arith.constant 0 : index
      %c0_64 = arith.constant 0 : index
      %113 = vector.load %arg7[%c0_63, %c0_64] : memref<2x32xf32, #tpu.memory_space<vmem>>, vector<2x32xf32>
      %c0_65 = arith.constant 0 : index
      %c0_66 = arith.constant 0 : index
      %114 = vector.load %arg8[%c0_65, %c0_66] : memref<2x32xf32, #tpu.memory_space<vmem>>, vector<2x32xf32>
      %115 = arith.truncf %113 : vector<2x32xf32> to vector<2x32xbf16>
      %cst_67 = arith.constant dense<0.000000e+00> : vector<2x128xf32>
      %116 = tpu.matmul %115, %4, %cst_67 {dimension_numbers = #tpu.dot_dimension_numbers<[1], [0], [0], [1], [0, 0, 1, 1], [], []>} : vector<2x32xbf16>, vector<32x128xbf16>, vector<2x128xf32> -> vector<2x128xf32>
      %117 = vector.broadcast %8 : vector<1x128xf32> to vector<2x128xf32>
      %118 = arith.addf %117, %116 : vector<2x128xf32>
      %c0_68 = arith.constant 0 : index
      %119 = arith.index_cast %c2_i32 : i32 to index
      %c0_69 = arith.constant 0 : index
      %c0_70 = arith.constant 0 : index
      %120 = vector.load %arg2[%c0_68, %119, %c0_69, %c0_70] : memref<1x8x2x16xbf16, #tpu.memory_space<vmem>>, vector<1x1x2x16xbf16>
      %121 = vector.shape_cast %120 : vector<1x1x2x16xbf16> to vector<2x16xbf16>
      %cst_71 = arith.constant dense<0.000000e+00> : vector<2x128xf32>
      %122 = tpu.matmul %121, %6, %cst_71 {dimension_numbers = #tpu.dot_dimension_numbers<[1], [0], [0], [1], [0, 0, 1, 1], [], []>} : vector<2x16xbf16>, vector<16x128xbf16>, vector<2x128xf32> -> vector<2x128xf32>
      %123 = arith.addf %118, %122 : vector<2x128xf32>
      %124 = vector.extract_strided_slice %123 {offsets = [0, 0], sizes = [2, 32], strides = [1, 1]} : vector<2x128xf32> to vector<2x32xf32>
      %cst_72 = arith.constant 5.000000e-01 : f32
      %125 = vector.broadcast %cst_72 : f32 to vector<2x32xf32>
      %126 = arith.mulf %125, %124 : vector<2x32xf32>
      %127 = math.tanh %126 : vector<2x32xf32>
      %cst_73 = arith.constant 1.000000e+00 : f32
      %128 = vector.broadcast %cst_73 : f32 to vector<2x32xf32>
      %129 = arith.addf %127, %128 : vector<2x32xf32>
      %cst_74 = arith.constant 5.000000e-01 : f32
      %130 = vector.broadcast %cst_74 : f32 to vector<2x32xf32>
      %131 = arith.mulf %130, %129 : vector<2x32xf32>
      %132 = vector.extract_strided_slice %123 {offsets = [0, 32], sizes = [2, 32], strides = [1, 1]} : vector<2x128xf32> to vector<2x32xf32>
      %cst_75 = arith.constant 5.000000e-01 : f32
      %133 = vector.broadcast %cst_75 : f32 to vector<2x32xf32>
      %134 = arith.mulf %133, %132 : vector<2x32xf32>
      %135 = math.tanh %134 : vector<2x32xf32>
      %cst_76 = arith.constant 1.000000e+00 : f32
      %136 = vector.broadcast %cst_76 : f32 to vector<2x32xf32>
      %137 = arith.addf %135, %136 : vector<2x32xf32>
      %cst_77 = arith.constant 5.000000e-01 : f32
      %138 = vector.broadcast %cst_77 : f32 to vector<2x32xf32>
      %139 = arith.mulf %138, %137 : vector<2x32xf32>
      %140 = vector.extract_strided_slice %123 {offsets = [0, 64], sizes = [2, 32], strides = [1, 1]} : vector<2x128xf32> to vector<2x32xf32>
      %141 = math.tanh %140 : vector<2x32xf32>
      %142 = vector.extract_strided_slice %123 {offsets = [0, 96], sizes = [2, 32], strides = [1, 1]} : vector<2x128xf32> to vector<2x32xf32>
      %cst_78 = arith.constant 5.000000e-01 : f32
      %143 = vector.broadcast %cst_78 : f32 to vector<2x32xf32>
      %144 = arith.mulf %143, %142 : vector<2x32xf32>
      %145 = math.tanh %144 : vector<2x32xf32>
      %cst_79 = arith.constant 1.000000e+00 : f32
      %146 = vector.broadcast %cst_79 : f32 to vector<2x32xf32>
      %147 = arith.addf %145, %146 : vector<2x32xf32>
      %cst_80 = arith.constant 5.000000e-01 : f32
      %148 = vector.broadcast %cst_80 : f32 to vector<2x32xf32>
      %149 = arith.mulf %148, %147 : vector<2x32xf32>
      %150 = arith.mulf %139, %114 : vector<2x32xf32>
      %151 = arith.mulf %131, %141 : vector<2x32xf32>
      %152 = arith.addf %150, %151 : vector<2x32xf32>
      %153 = math.tanh %152 : vector<2x32xf32>
      %154 = arith.mulf %149, %153 : vector<2x32xf32>
      %c0_81 = arith.constant 0 : index
      %c0_82 = arith.constant 0 : index
      %155 = vector.load %arg7[%c0_81, %c0_82] : memref<2x32xf32, #tpu.memory_space<vmem>>, vector<2x32xf32>
      tpu.vector_store %arg7[%c0_81, %c0_82], %154 {strides = array<i32>} : memref<2x32xf32, #tpu.memory_space<vmem>>, vector<2x32xf32>,
      %c0_83 = arith.constant 0 : index
      %c0_84 = arith.constant 0 : index
      %156 = vector.load %arg8[%c0_83, %c0_84] : memref<2x32xf32, #tpu.memory_space<vmem>>, vector<2x32xf32>
      tpu.vector_store %arg8[%c0_83, %c0_84], %152 {strides = array<i32>} : memref<2x32xf32, #tpu.memory_space<vmem>>, vector<2x32xf32>,
      %157 = arith.truncf %154 : vector<2x32xf32> to vector<2x32xbf16>
      %c0_85 = arith.constant 0 : index
      %158 = arith.index_cast %c2_i32 : i32 to index
      %c0_86 = arith.constant 0 : index
      %c0_87 = arith.constant 0 : index
      %159 = vector.load %arg6[%c0_85, %158, %c0_86, %c0_87] : memref<1x8x2x32xbf16, #tpu.memory_space<vmem>>, vector<1x1x2x32xbf16>
      %160 = vector.shape_cast %159 : vector<1x1x2x32xbf16> to vector<2x32xbf16>
      %161 = vector.shape_cast %157 : vector<2x32xbf16> to vector<1x1x2x32xbf16>
      tpu.vector_store %arg6[%c0_85, %158, %c0_86, %c0_87], %161 {strides = array<i32>} : memref<1x8x2x32xbf16, #tpu.memory_space<vmem>>, vector<1x1x2x32xbf16>,
      %c3_i32 = arith.constant 3 : i32
      %c0_88 = arith.constant 0 : index
      %c0_89 = arith.constant 0 : index
      %162 = vector.load %arg7[%c0_88, %c0_89] : memref<2x32xf32, #tpu.memory_space<vmem>>, vector<2x32xf32>
      %c0_90 = arith.constant 0 : index
      %c0_91 = arith.constant 0 : index
      %163 = vector.load %arg8[%c0_90, %c0_91] : memref<2x32xf32, #tpu.memory_space<vmem>>, vector<2x32xf32>
      %164 = arith.truncf %162 : vector<2x32xf32> to vector<2x32xbf16>
      %cst_92 = arith.constant dense<0.000000e+00> : vector<2x128xf32>
      %165 = tpu.matmul %164, %4, %cst_92 {dimension_numbers = #tpu.dot_dimension_numbers<[1], [0], [0], [1], [0, 0, 1, 1], [], []>} : vector<2x32xbf16>, vector<32x128xbf16>, vector<2x128xf32> -> vector<2x128xf32>
      %166 = vector.broadcast %8 : vector<1x128xf32> to vector<2x128xf32>
      %167 = arith.addf %166, %165 : vector<2x128xf32>
      %c0_93 = arith.constant 0 : index
      %168 = arith.index_cast %c3_i32 : i32 to index
      %c0_94 = arith.constant 0 : index
      %c0_95 = arith.constant 0 : index
      %169 = vector.load %arg2[%c0_93, %168, %c0_94, %c0_95] : memref<1x8x2x16xbf16, #tpu.memory_space<vmem>>, vector<1x1x2x16xbf16>
      %170 = vector.shape_cast %169 : vector<1x1x2x16xbf16> to vector<2x16xbf16>
      %cst_96 = arith.constant dense<0.000000e+00> : vector<2x128xf32>
      %171 = tpu.matmul %170, %6, %cst_96 {dimension_numbers = #tpu.dot_dimension_numbers<[1], [0], [0], [1], [0, 0, 1, 1], [], []>} : vector<2x16xbf16>, vector<16x128xbf16>, vector<2x128xf32> -> vector<2x128xf32>
      %172 = arith.addf %167, %171 : vector<2x128xf32>
      %173 = vector.extract_strided_slice %172 {offsets = [0, 0], sizes = [2, 32], strides = [1, 1]} : vector<2x128xf32> to vector<2x32xf32>
      %cst_97 = arith.constant 5.000000e-01 : f32
      %174 = vector.broadcast %cst_97 : f32 to vector<2x32xf32>
      %175 = arith.mulf %174, %173 : vector<2x32xf32>
      %176 = math.tanh %175 : vector<2x32xf32>
      %cst_98 = arith.constant 1.000000e+00 : f32
      %177 = vector.broadcast %cst_98 : f32 to vector<2x32xf32>
      %178 = arith.addf %176, %177 : vector<2x32xf32>
      %cst_99 = arith.constant 5.000000e-01 : f32
      %179 = vector.broadcast %cst_99 : f32 to vector<2x32xf32>
      %180 = arith.mulf %179, %178 : vector<2x32xf32>
      %181 = vector.extract_strided_slice %172 {offsets = [0, 32], sizes = [2, 32], strides = [1, 1]} : vector<2x128xf32> to vector<2x32xf32>
      %cst_100 = arith.constant 5.000000e-01 : f32
      %182 = vector.broadcast %cst_100 : f32 to vector<2x32xf32>
      %183 = arith.mulf %182, %181 : vector<2x32xf32>
      %184 = math.tanh %183 : vector<2x32xf32>
      %cst_101 = arith.constant 1.000000e+00 : f32
      %185 = vector.broadcast %cst_101 : f32 to vector<2x32xf32>
      %186 = arith.addf %184, %185 : vector<2x32xf32>
      %cst_102 = arith.constant 5.000000e-01 : f32
      %187 = vector.broadcast %cst_102 : f32 to vector<2x32xf32>
      %188 = arith.mulf %187, %186 : vector<2x32xf32>
      %189 = vector.extract_strided_slice %172 {offsets = [0, 64], sizes = [2, 32], strides = [1, 1]} : vector<2x128xf32> to vector<2x32xf32>
      %190 = math.tanh %189 : vector<2x32xf32>
      %191 = vector.extract_strided_slice %172 {offsets = [0, 96], sizes = [2, 32], strides = [1, 1]} : vector<2x128xf32> to vector<2x32xf32>
      %cst_103 = arith.constant 5.000000e-01 : f32
      %192 = vector.broadcast %cst_103 : f32 to vector<2x32xf32>
      %193 = arith.mulf %192, %191 : vector<2x32xf32>
      %194 = math.tanh %193 : vector<2x32xf32>
      %cst_104 = arith.constant 1.000000e+00 : f32
      %195 = vector.broadcast %cst_104 : f32 to vector<2x32xf32>
      %196 = arith.addf %194, %195 : vector<2x32xf32>
      %cst_105 = arith.constant 5.000000e-01 : f32
      %197 = vector.broadcast %cst_105 : f32 to vector<2x32xf32>
      %198 = arith.mulf %197, %196 : vector<2x32xf32>
      %199 = arith.mulf %188, %163 : vector<2x32xf32>
      %200 = arith.mulf %180, %190 : vector<2x32xf32>
      %201 = arith.addf %199, %200 : vector<2x32xf32>
      %202 = math.tanh %201 : vector<2x32xf32>
      %203 = arith.mulf %198, %202 : vector<2x32xf32>
      %c0_106 = arith.constant 0 : index
      %c0_107 = arith.constant 0 : index
      %204 = vector.load %arg7[%c0_106, %c0_107] : memref<2x32xf32, #tpu.memory_space<vmem>>, vector<2x32xf32>
      tpu.vector_store %arg7[%c0_106, %c0_107], %203 {strides = array<i32>} : memref<2x32xf32, #tpu.memory_space<vmem>>, vector<2x32xf32>,
      %c0_108 = arith.constant 0 : index
      %c0_109 = arith.constant 0 : index
      %205 = vector.load %arg8[%c0_108, %c0_109] : memref<2x32xf32, #tpu.memory_space<vmem>>, vector<2x32xf32>
      tpu.vector_store %arg8[%c0_108, %c0_109], %201 {strides = array<i32>} : memref<2x32xf32, #tpu.memory_space<vmem>>, vector<2x32xf32>,
      %206 = arith.truncf %203 : vector<2x32xf32> to vector<2x32xbf16>
      %c0_110 = arith.constant 0 : index
      %207 = arith.index_cast %c3_i32 : i32 to index
      %c0_111 = arith.constant 0 : index
      %c0_112 = arith.constant 0 : index
      %208 = vector.load %arg6[%c0_110, %207, %c0_111, %c0_112] : memref<1x8x2x32xbf16, #tpu.memory_space<vmem>>, vector<1x1x2x32xbf16>
      %209 = vector.shape_cast %208 : vector<1x1x2x32xbf16> to vector<2x32xbf16>
      %210 = vector.shape_cast %206 : vector<2x32xbf16> to vector<1x1x2x32xbf16>
      tpu.vector_store %arg6[%c0_110, %207, %c0_111, %c0_112], %210 {strides = array<i32>} : memref<1x8x2x32xbf16, #tpu.memory_space<vmem>>, vector<1x1x2x32xbf16>,
      %c4_i32 = arith.constant 4 : i32
      %c0_113 = arith.constant 0 : index
      %c0_114 = arith.constant 0 : index
      %211 = vector.load %arg7[%c0_113, %c0_114] : memref<2x32xf32, #tpu.memory_space<vmem>>, vector<2x32xf32>
      %c0_115 = arith.constant 0 : index
      %c0_116 = arith.constant 0 : index
      %212 = vector.load %arg8[%c0_115, %c0_116] : memref<2x32xf32, #tpu.memory_space<vmem>>, vector<2x32xf32>
      %213 = arith.truncf %211 : vector<2x32xf32> to vector<2x32xbf16>
      %cst_117 = arith.constant dense<0.000000e+00> : vector<2x128xf32>
      %214 = tpu.matmul %213, %4, %cst_117 {dimension_numbers = #tpu.dot_dimension_numbers<[1], [0], [0], [1], [0, 0, 1, 1], [], []>} : vector<2x32xbf16>, vector<32x128xbf16>, vector<2x128xf32> -> vector<2x128xf32>
      %215 = vector.broadcast %8 : vector<1x128xf32> to vector<2x128xf32>
      %216 = arith.addf %215, %214 : vector<2x128xf32>
      %c0_118 = arith.constant 0 : index
      %217 = arith.index_cast %c4_i32 : i32 to index
      %c0_119 = arith.constant 0 : index
      %c0_120 = arith.constant 0 : index
      %218 = vector.load %arg2[%c0_118, %217, %c0_119, %c0_120] : memref<1x8x2x16xbf16, #tpu.memory_space<vmem>>, vector<1x1x2x16xbf16>
      %219 = vector.shape_cast %218 : vector<1x1x2x16xbf16> to vector<2x16xbf16>
      %cst_121 = arith.constant dense<0.000000e+00> : vector<2x128xf32>
      %220 = tpu.matmul %219, %6, %cst_121 {dimension_numbers = #tpu.dot_dimension_numbers<[1], [0], [0], [1], [0, 0, 1, 1], [], []>} : vector<2x16xbf16>, vector<16x128xbf16>, vector<2x128xf32> -> vector<2x128xf32>
      %221 = arith.addf %216, %220 : vector<2x128xf32>
      %222 = vector.extract_strided_slice %221 {offsets = [0, 0], sizes = [2, 32], strides = [1, 1]} : vector<2x128xf32> to vector<2x32xf32>
      %cst_122 = arith.constant 5.000000e-01 : f32
      %223 = vector.broadcast %cst_122 : f32 to vector<2x32xf32>
      %224 = arith.mulf %223, %222 : vector<2x32xf32>
      %225 = math.tanh %224 : vector<2x32xf32>
      %cst_123 = arith.constant 1.000000e+00 : f32
      %226 = vector.broadcast %cst_123 : f32 to vector<2x32xf32>
      %227 = arith.addf %225, %226 : vector<2x32xf32>
      %cst_124 = arith.constant 5.000000e-01 : f32
      %228 = vector.broadcast %cst_124 : f32 to vector<2x32xf32>
      %229 = arith.mulf %228, %227 : vector<2x32xf32>
      %230 = vector.extract_strided_slice %221 {offsets = [0, 32], sizes = [2, 32], strides = [1, 1]} : vector<2x128xf32> to vector<2x32xf32>
      %cst_125 = arith.constant 5.000000e-01 : f32
      %231 = vector.broadcast %cst_125 : f32 to vector<2x32xf32>
      %232 = arith.mulf %231, %230 : vector<2x32xf32>
      %233 = math.tanh %232 : vector<2x32xf32>
      %cst_126 = arith.constant 1.000000e+00 : f32
      %234 = vector.broadcast %cst_126 : f32 to vector<2x32xf32>
      %235 = arith.addf %233, %234 : vector<2x32xf32>
      %cst_127 = arith.constant 5.000000e-01 : f32
      %236 = vector.broadcast %cst_127 : f32 to vector<2x32xf32>
      %237 = arith.mulf %236, %235 : vector<2x32xf32>
      %238 = vector.extract_strided_slice %221 {offsets = [0, 64], sizes = [2, 32], strides = [1, 1]} : vector<2x128xf32> to vector<2x32xf32>
      %239 = math.tanh %238 : vector<2x32xf32>
      %240 = vector.extract_strided_slice %221 {offsets = [0, 96], sizes = [2, 32], strides = [1, 1]} : vector<2x128xf32> to vector<2x32xf32>
      %cst_128 = arith.constant 5.000000e-01 : f32
      %241 = vector.broadcast %cst_128 : f32 to vector<2x32xf32>
      %242 = arith.mulf %241, %240 : vector<2x32xf32>
      %243 = math.tanh %242 : vector<2x32xf32>
      %cst_129 = arith.constant 1.000000e+00 : f32
      %244 = vector.broadcast %cst_129 : f32 to vector<2x32xf32>
      %245 = arith.addf %243, %244 : vector<2x32xf32>
      %cst_130 = arith.constant 5.000000e-01 : f32
      %246 = vector.broadcast %cst_130 : f32 to vector<2x32xf32>
      %247 = arith.mulf %246, %245 : vector<2x32xf32>
      %248 = arith.mulf %237, %212 : vector<2x32xf32>
      %249 = arith.mulf %229, %239 : vector<2x32xf32>
      %250 = arith.addf %248, %249 : vector<2x32xf32>
      %251 = math.tanh %250 : vector<2x32xf32>
      %252 = arith.mulf %247, %251 : vector<2x32xf32>
      %c0_131 = arith.constant 0 : index
      %c0_132 = arith.constant 0 : index
      %253 = vector.load %arg7[%c0_131, %c0_132] : memref<2x32xf32, #tpu.memory_space<vmem>>, vector<2x32xf32>
      tpu.vector_store %arg7[%c0_131, %c0_132], %252 {strides = array<i32>} : memref<2x32xf32, #tpu.memory_space<vmem>>, vector<2x32xf32>,
      %c0_133 = arith.constant 0 : index
      %c0_134 = arith.constant 0 : index
      %254 = vector.load %arg8[%c0_133, %c0_134] : memref<2x32xf32, #tpu.memory_space<vmem>>, vector<2x32xf32>
      tpu.vector_store %arg8[%c0_133, %c0_134], %250 {strides = array<i32>} : memref<2x32xf32, #tpu.memory_space<vmem>>, vector<2x32xf32>,
      %255 = arith.truncf %252 : vector<2x32xf32> to vector<2x32xbf16>
      %c0_135 = arith.constant 0 : index
      %256 = arith.index_cast %c4_i32 : i32 to index
      %c0_136 = arith.constant 0 : index
      %c0_137 = arith.constant 0 : index
      %257 = vector.load %arg6[%c0_135, %256, %c0_136, %c0_137] : memref<1x8x2x32xbf16, #tpu.memory_space<vmem>>, vector<1x1x2x32xbf16>
      %258 = vector.shape_cast %257 : vector<1x1x2x32xbf16> to vector<2x32xbf16>
      %259 = vector.shape_cast %255 : vector<2x32xbf16> to vector<1x1x2x32xbf16>
      tpu.vector_store %arg6[%c0_135, %256, %c0_136, %c0_137], %259 {strides = array<i32>} : memref<1x8x2x32xbf16, #tpu.memory_space<vmem>>, vector<1x1x2x32xbf16>,
      %c5_i32 = arith.constant 5 : i32
      %c0_138 = arith.constant 0 : index
      %c0_139 = arith.constant 0 : index
      %260 = vector.load %arg7[%c0_138, %c0_139] : memref<2x32xf32, #tpu.memory_space<vmem>>, vector<2x32xf32>
      %c0_140 = arith.constant 0 : index
      %c0_141 = arith.constant 0 : index
      %261 = vector.load %arg8[%c0_140, %c0_141] : memref<2x32xf32, #tpu.memory_space<vmem>>, vector<2x32xf32>
      %262 = arith.truncf %260 : vector<2x32xf32> to vector<2x32xbf16>
      %cst_142 = arith.constant dense<0.000000e+00> : vector<2x128xf32>
      %263 = tpu.matmul %262, %4, %cst_142 {dimension_numbers = #tpu.dot_dimension_numbers<[1], [0], [0], [1], [0, 0, 1, 1], [], []>} : vector<2x32xbf16>, vector<32x128xbf16>, vector<2x128xf32> -> vector<2x128xf32>
      %264 = vector.broadcast %8 : vector<1x128xf32> to vector<2x128xf32>
      %265 = arith.addf %264, %263 : vector<2x128xf32>
      %c0_143 = arith.constant 0 : index
      %266 = arith.index_cast %c5_i32 : i32 to index
      %c0_144 = arith.constant 0 : index
      %c0_145 = arith.constant 0 : index
      %267 = vector.load %arg2[%c0_143, %266, %c0_144, %c0_145] : memref<1x8x2x16xbf16, #tpu.memory_space<vmem>>, vector<1x1x2x16xbf16>
      %268 = vector.shape_cast %267 : vector<1x1x2x16xbf16> to vector<2x16xbf16>
      %cst_146 = arith.constant dense<0.000000e+00> : vector<2x128xf32>
      %269 = tpu.matmul %268, %6, %cst_146 {dimension_numbers = #tpu.dot_dimension_numbers<[1], [0], [0], [1], [0, 0, 1, 1], [], []>} : vector<2x16xbf16>, vector<16x128xbf16>, vector<2x128xf32> -> vector<2x128xf32>
      %270 = arith.addf %265, %269 : vector<2x128xf32>
      %271 = vector.extract_strided_slice %270 {offsets = [0, 0], sizes = [2, 32], strides = [1, 1]} : vector<2x128xf32> to vector<2x32xf32>
      %cst_147 = arith.constant 5.000000e-01 : f32
      %272 = vector.broadcast %cst_147 : f32 to vector<2x32xf32>
      %273 = arith.mulf %272, %271 : vector<2x32xf32>
      %274 = math.tanh %273 : vector<2x32xf32>
      %cst_148 = arith.constant 1.000000e+00 : f32
      %275 = vector.broadcast %cst_148 : f32 to vector<2x32xf32>
      %276 = arith.addf %274, %275 : vector<2x32xf32>
      %cst_149 = arith.constant 5.000000e-01 : f32
      %277 = vector.broadcast %cst_149 : f32 to vector<2x32xf32>
      %278 = arith.mulf %277, %276 : vector<2x32xf32>
      %279 = vector.extract_strided_slice %270 {offsets = [0, 32], sizes = [2, 32], strides = [1, 1]} : vector<2x128xf32> to vector<2x32xf32>
      %cst_150 = arith.constant 5.000000e-01 : f32
      %280 = vector.broadcast %cst_150 : f32 to vector<2x32xf32>
      %281 = arith.mulf %280, %279 : vector<2x32xf32>
      %282 = math.tanh %281 : vector<2x32xf32>
      %cst_151 = arith.constant 1.000000e+00 : f32
      %283 = vector.broadcast %cst_151 : f32 to vector<2x32xf32>
      %284 = arith.addf %282, %283 : vector<2x32xf32>
      %cst_152 = arith.constant 5.000000e-01 : f32
      %285 = vector.broadcast %cst_152 : f32 to vector<2x32xf32>
      %286 = arith.mulf %285, %284 : vector<2x32xf32>
      %287 = vector.extract_strided_slice %270 {offsets = [0, 64], sizes = [2, 32], strides = [1, 1]} : vector<2x128xf32> to vector<2x32xf32>
      %288 = math.tanh %287 : vector<2x32xf32>
      %289 = vector.extract_strided_slice %270 {offsets = [0, 96], sizes = [2, 32], strides = [1, 1]} : vector<2x128xf32> to vector<2x32xf32>
      %cst_153 = arith.constant 5.000000e-01 : f32
      %290 = vector.broadcast %cst_153 : f32 to vector<2x32xf32>
      %291 = arith.mulf %290, %289 : vector<2x32xf32>
      %292 = math.tanh %291 : vector<2x32xf32>
      %cst_154 = arith.constant 1.000000e+00 : f32
      %293 = vector.broadcast %cst_154 : f32 to vector<2x32xf32>
      %294 = arith.addf %292, %293 : vector<2x32xf32>
      %cst_155 = arith.constant 5.000000e-01 : f32
      %295 = vector.broadcast %cst_155 : f32 to vector<2x32xf32>
      %296 = arith.mulf %295, %294 : vector<2x32xf32>
      %297 = arith.mulf %286, %261 : vector<2x32xf32>
      %298 = arith.mulf %278, %288 : vector<2x32xf32>
      %299 = arith.addf %297, %298 : vector<2x32xf32>
      %300 = math.tanh %299 : vector<2x32xf32>
      %301 = arith.mulf %296, %300 : vector<2x32xf32>
      %c0_156 = arith.constant 0 : index
      %c0_157 = arith.constant 0 : index
      %302 = vector.load %arg7[%c0_156, %c0_157] : memref<2x32xf32, #tpu.memory_space<vmem>>, vector<2x32xf32>
      tpu.vector_store %arg7[%c0_156, %c0_157], %301 {strides = array<i32>} : memref<2x32xf32, #tpu.memory_space<vmem>>, vector<2x32xf32>,
      %c0_158 = arith.constant 0 : index
      %c0_159 = arith.constant 0 : index
      %303 = vector.load %arg8[%c0_158, %c0_159] : memref<2x32xf32, #tpu.memory_space<vmem>>, vector<2x32xf32>
      tpu.vector_store %arg8[%c0_158, %c0_159], %299 {strides = array<i32>} : memref<2x32xf32, #tpu.memory_space<vmem>>, vector<2x32xf32>,
      %304 = arith.truncf %301 : vector<2x32xf32> to vector<2x32xbf16>
      %c0_160 = arith.constant 0 : index
      %305 = arith.index_cast %c5_i32 : i32 to index
      %c0_161 = arith.constant 0 : index
      %c0_162 = arith.constant 0 : index
      %306 = vector.load %arg6[%c0_160, %305, %c0_161, %c0_162] : memref<1x8x2x32xbf16, #tpu.memory_space<vmem>>, vector<1x1x2x32xbf16>
      %307 = vector.shape_cast %306 : vector<1x1x2x32xbf16> to vector<2x32xbf16>
      %308 = vector.shape_cast %304 : vector<2x32xbf16> to vector<1x1x2x32xbf16>
      tpu.vector_store %arg6[%c0_160, %305, %c0_161, %c0_162], %308 {strides = array<i32>} : memref<1x8x2x32xbf16, #tpu.memory_space<vmem>>, vector<1x1x2x32xbf16>,
      %c6_i32 = arith.constant 6 : i32
      %c0_163 = arith.constant 0 : index
      %c0_164 = arith.constant 0 : index
      %309 = vector.load %arg7[%c0_163, %c0_164] : memref<2x32xf32, #tpu.memory_space<vmem>>, vector<2x32xf32>
      %c0_165 = arith.constant 0 : index
      %c0_166 = arith.constant 0 : index
      %310 = vector.load %arg8[%c0_165, %c0_166] : memref<2x32xf32, #tpu.memory_space<vmem>>, vector<2x32xf32>
      %311 = arith.truncf %309 : vector<2x32xf32> to vector<2x32xbf16>
      %cst_167 = arith.constant dense<0.000000e+00> : vector<2x128xf32>
      %312 = tpu.matmul %311, %4, %cst_167 {dimension_numbers = #tpu.dot_dimension_numbers<[1], [0], [0], [1], [0, 0, 1, 1], [], []>} : vector<2x32xbf16>, vector<32x128xbf16>, vector<2x128xf32> -> vector<2x128xf32>
      %313 = vector.broadcast %8 : vector<1x128xf32> to vector<2x128xf32>
      %314 = arith.addf %313, %312 : vector<2x128xf32>
      %c0_168 = arith.constant 0 : index
      %315 = arith.index_cast %c6_i32 : i32 to index
      %c0_169 = arith.constant 0 : index
      %c0_170 = arith.constant 0 : index
      %316 = vector.load %arg2[%c0_168, %315, %c0_169, %c0_170] : memref<1x8x2x16xbf16, #tpu.memory_space<vmem>>, vector<1x1x2x16xbf16>
      %317 = vector.shape_cast %316 : vector<1x1x2x16xbf16> to vector<2x16xbf16>
      %cst_171 = arith.constant dense<0.000000e+00> : vector<2x128xf32>
      %318 = tpu.matmul %317, %6, %cst_171 {dimension_numbers = #tpu.dot_dimension_numbers<[1], [0], [0], [1], [0, 0, 1, 1], [], []>} : vector<2x16xbf16>, vector<16x128xbf16>, vector<2x128xf32> -> vector<2x128xf32>
      %319 = arith.addf %314, %318 : vector<2x128xf32>
      %320 = vector.extract_strided_slice %319 {offsets = [0, 0], sizes = [2, 32], strides = [1, 1]} : vector<2x128xf32> to vector<2x32xf32>
      %cst_172 = arith.constant 5.000000e-01 : f32
      %321 = vector.broadcast %cst_172 : f32 to vector<2x32xf32>
      %322 = arith.mulf %321, %320 : vector<2x32xf32>
      %323 = math.tanh %322 : vector<2x32xf32>
      %cst_173 = arith.constant 1.000000e+00 : f32
      %324 = vector.broadcast %cst_173 : f32 to vector<2x32xf32>
      %325 = arith.addf %323, %324 : vector<2x32xf32>
      %cst_174 = arith.constant 5.000000e-01 : f32
      %326 = vector.broadcast %cst_174 : f32 to vector<2x32xf32>
      %327 = arith.mulf %326, %325 : vector<2x32xf32>
      %328 = vector.extract_strided_slice %319 {offsets = [0, 32], sizes = [2, 32], strides = [1, 1]} : vector<2x128xf32> to vector<2x32xf32>
      %cst_175 = arith.constant 5.000000e-01 : f32
      %329 = vector.broadcast %cst_175 : f32 to vector<2x32xf32>
      %330 = arith.mulf %329, %328 : vector<2x32xf32>
      %331 = math.tanh %330 : vector<2x32xf32>
      %cst_176 = arith.constant 1.000000e+00 : f32
      %332 = vector.broadcast %cst_176 : f32 to vector<2x32xf32>
      %333 = arith.addf %331, %332 : vector<2x32xf32>
      %cst_177 = arith.constant 5.000000e-01 : f32
      %334 = vector.broadcast %cst_177 : f32 to vector<2x32xf32>
      %335 = arith.mulf %334, %333 : vector<2x32xf32>
      %336 = vector.extract_strided_slice %319 {offsets = [0, 64], sizes = [2, 32], strides = [1, 1]} : vector<2x128xf32> to vector<2x32xf32>
      %337 = math.tanh %336 : vector<2x32xf32>
      %338 = vector.extract_strided_slice %319 {offsets = [0, 96], sizes = [2, 32], strides = [1, 1]} : vector<2x128xf32> to vector<2x32xf32>
      %cst_178 = arith.constant 5.000000e-01 : f32
      %339 = vector.broadcast %cst_178 : f32 to vector<2x32xf32>
      %340 = arith.mulf %339, %338 : vector<2x32xf32>
      %341 = math.tanh %340 : vector<2x32xf32>
      %cst_179 = arith.constant 1.000000e+00 : f32
      %342 = vector.broadcast %cst_179 : f32 to vector<2x32xf32>
      %343 = arith.addf %341, %342 : vector<2x32xf32>
      %cst_180 = arith.constant 5.000000e-01 : f32
      %344 = vector.broadcast %cst_180 : f32 to vector<2x32xf32>
      %345 = arith.mulf %344, %343 : vector<2x32xf32>
      %346 = arith.mulf %335, %310 : vector<2x32xf32>
      %347 = arith.mulf %327, %337 : vector<2x32xf32>
      %348 = arith.addf %346, %347 : vector<2x32xf32>
      %349 = math.tanh %348 : vector<2x32xf32>
      %350 = arith.mulf %345, %349 : vector<2x32xf32>
      %c0_181 = arith.constant 0 : index
      %c0_182 = arith.constant 0 : index
      %351 = vector.load %arg7[%c0_181, %c0_182] : memref<2x32xf32, #tpu.memory_space<vmem>>, vector<2x32xf32>
      tpu.vector_store %arg7[%c0_181, %c0_182], %350 {strides = array<i32>} : memref<2x32xf32, #tpu.memory_space<vmem>>, vector<2x32xf32>,
      %c0_183 = arith.constant 0 : index
      %c0_184 = arith.constant 0 : index
      %352 = vector.load %arg8[%c0_183, %c0_184] : memref<2x32xf32, #tpu.memory_space<vmem>>, vector<2x32xf32>
      tpu.vector_store %arg8[%c0_183, %c0_184], %348 {strides = array<i32>} : memref<2x32xf32, #tpu.memory_space<vmem>>, vector<2x32xf32>,
      %353 = arith.truncf %350 : vector<2x32xf32> to vector<2x32xbf16>
      %c0_185 = arith.constant 0 : index
      %354 = arith.index_cast %c6_i32 : i32 to index
      %c0_186 = arith.constant 0 : index
      %c0_187 = arith.constant 0 : index
      %355 = vector.load %arg6[%c0_185, %354, %c0_186, %c0_187] : memref<1x8x2x32xbf16, #tpu.memory_space<vmem>>, vector<1x1x2x32xbf16>
      %356 = vector.shape_cast %355 : vector<1x1x2x32xbf16> to vector<2x32xbf16>
      %357 = vector.shape_cast %353 : vector<2x32xbf16> to vector<1x1x2x32xbf16>
      tpu.vector_store %arg6[%c0_185, %354, %c0_186, %c0_187], %357 {strides = array<i32>} : memref<1x8x2x32xbf16, #tpu.memory_space<vmem>>, vector<1x1x2x32xbf16>,
      %c7_i32 = arith.constant 7 : i32
      %c0_188 = arith.constant 0 : index
      %c0_189 = arith.constant 0 : index
      %358 = vector.load %arg7[%c0_188, %c0_189] : memref<2x32xf32, #tpu.memory_space<vmem>>, vector<2x32xf32>
      %c0_190 = arith.constant 0 : index
      %c0_191 = arith.constant 0 : index
      %359 = vector.load %arg8[%c0_190, %c0_191] : memref<2x32xf32, #tpu.memory_space<vmem>>, vector<2x32xf32>
      %360 = arith.truncf %358 : vector<2x32xf32> to vector<2x32xbf16>
      %cst_192 = arith.constant dense<0.000000e+00> : vector<2x128xf32>
      %361 = tpu.matmul %360, %4, %cst_192 {dimension_numbers = #tpu.dot_dimension_numbers<[1], [0], [0], [1], [0, 0, 1, 1], [], []>} : vector<2x32xbf16>, vector<32x128xbf16>, vector<2x128xf32> -> vector<2x128xf32>
      %362 = vector.broadcast %8 : vector<1x128xf32> to vector<2x128xf32>
      %363 = arith.addf %362, %361 : vector<2x128xf32>
      %c0_193 = arith.constant 0 : index
      %364 = arith.index_cast %c7_i32 : i32 to index
      %c0_194 = arith.constant 0 : index
      %c0_195 = arith.constant 0 : index
      %365 = vector.load %arg2[%c0_193, %364, %c0_194, %c0_195] : memref<1x8x2x16xbf16, #tpu.memory_space<vmem>>, vector<1x1x2x16xbf16>
      %366 = vector.shape_cast %365 : vector<1x1x2x16xbf16> to vector<2x16xbf16>
      %cst_196 = arith.constant dense<0.000000e+00> : vector<2x128xf32>
      %367 = tpu.matmul %366, %6, %cst_196 {dimension_numbers = #tpu.dot_dimension_numbers<[1], [0], [0], [1], [0, 0, 1, 1], [], []>} : vector<2x16xbf16>, vector<16x128xbf16>, vector<2x128xf32> -> vector<2x128xf32>
      %368 = arith.addf %363, %367 : vector<2x128xf32>
      %369 = vector.extract_strided_slice %368 {offsets = [0, 0], sizes = [2, 32], strides = [1, 1]} : vector<2x128xf32> to vector<2x32xf32>
      %cst_197 = arith.constant 5.000000e-01 : f32
      %370 = vector.broadcast %cst_197 : f32 to vector<2x32xf32>
      %371 = arith.mulf %370, %369 : vector<2x32xf32>
      %372 = math.tanh %371 : vector<2x32xf32>
      %cst_198 = arith.constant 1.000000e+00 : f32
      %373 = vector.broadcast %cst_198 : f32 to vector<2x32xf32>
      %374 = arith.addf %372, %373 : vector<2x32xf32>
      %cst_199 = arith.constant 5.000000e-01 : f32
      %375 = vector.broadcast %cst_199 : f32 to vector<2x32xf32>
      %376 = arith.mulf %375, %374 : vector<2x32xf32>
      %377 = vector.extract_strided_slice %368 {offsets = [0, 32], sizes = [2, 32], strides = [1, 1]} : vector<2x128xf32> to vector<2x32xf32>
      %cst_200 = arith.constant 5.000000e-01 : f32
      %378 = vector.broadcast %cst_200 : f32 to vector<2x32xf32>
      %379 = arith.mulf %378, %377 : vector<2x32xf32>
      %380 = math.tanh %379 : vector<2x32xf32>
      %cst_201 = arith.constant 1.000000e+00 : f32
      %381 = vector.broadcast %cst_201 : f32 to vector<2x32xf32>
      %382 = arith.addf %380, %381 : vector<2x32xf32>
      %cst_202 = arith.constant 5.000000e-01 : f32
      %383 = vector.broadcast %cst_202 : f32 to vector<2x32xf32>
      %384 = arith.mulf %383, %382 : vector<2x32xf32>
      %385 = vector.extract_strided_slice %368 {offsets = [0, 64], sizes = [2, 32], strides = [1, 1]} : vector<2x128xf32> to vector<2x32xf32>
      %386 = math.tanh %385 : vector<2x32xf32>
      %387 = vector.extract_strided_slice %368 {offsets = [0, 96], sizes = [2, 32], strides = [1, 1]} : vector<2x128xf32> to vector<2x32xf32>
      %cst_203 = arith.constant 5.000000e-01 : f32
      %388 = vector.broadcast %cst_203 : f32 to vector<2x32xf32>
      %389 = arith.mulf %388, %387 : vector<2x32xf32>
      %390 = math.tanh %389 : vector<2x32xf32>
      %cst_204 = arith.constant 1.000000e+00 : f32
      %391 = vector.broadcast %cst_204 : f32 to vector<2x32xf32>
      %392 = arith.addf %390, %391 : vector<2x32xf32>
      %cst_205 = arith.constant 5.000000e-01 : f32
      %393 = vector.broadcast %cst_205 : f32 to vector<2x32xf32>
      %394 = arith.mulf %393, %392 : vector<2x32xf32>
      %395 = arith.mulf %384, %359 : vector<2x32xf32>
      %396 = arith.mulf %376, %386 : vector<2x32xf32>
      %397 = arith.addf %395, %396 : vector<2x32xf32>
      %398 = math.tanh %397 : vector<2x32xf32>
      %399 = arith.mulf %394, %398 : vector<2x32xf32>
      %c0_206 = arith.constant 0 : index
      %c0_207 = arith.constant 0 : index
      %400 = vector.load %arg7[%c0_206, %c0_207] : memref<2x32xf32, #tpu.memory_space<vmem>>, vector<2x32xf32>
      tpu.vector_store %arg7[%c0_206, %c0_207], %399 {strides = array<i32>} : memref<2x32xf32, #tpu.memory_space<vmem>>, vector<2x32xf32>,
      %c0_208 = arith.constant 0 : index
      %c0_209 = arith.constant 0 : index
      %401 = vector.load %arg8[%c0_208, %c0_209] : memref<2x32xf32, #tpu.memory_space<vmem>>, vector<2x32xf32>
      tpu.vector_store %arg8[%c0_208, %c0_209], %397 {strides = array<i32>} : memref<2x32xf32, #tpu.memory_space<vmem>>, vector<2x32xf32>,
      %402 = arith.truncf %399 : vector<2x32xf32> to vector<2x32xbf16>
      %c0_210 = arith.constant 0 : index
      %403 = arith.index_cast %c7_i32 : i32 to index
      %c0_211 = arith.constant 0 : index
      %c0_212 = arith.constant 0 : index
      %404 = vector.load %arg6[%c0_210, %403, %c0_211, %c0_212] : memref<1x8x2x32xbf16, #tpu.memory_space<vmem>>, vector<1x1x2x32xbf16>
      %405 = vector.shape_cast %404 : vector<1x1x2x32xbf16> to vector<2x32xbf16>
      %406 = vector.shape_cast %402 : vector<2x32xbf16> to vector<1x1x2x32xbf16>
      tpu.vector_store %arg6[%c0_210, %403, %c0_211, %c0_212], %406 {strides = array<i32>} : memref<1x8x2x32xbf16, #tpu.memory_space<vmem>>, vector<1x1x2x32xbf16>,
      %c8_i32 = arith.constant 8 : i32
    } else {
    }
    %c1_i32 = arith.constant 1 : i32
    %12 = arith.cmpi eq, %arg0, %c1_i32 : i32
    %13 = arith.extui %12 : i1 to i32
    %c0_i32_11 = arith.constant 0 : i32
    %14 = arith.cmpi ne, %13, %c0_i32_11 : i32
    scf.if %14 {
      %c0_i32_12 = arith.constant 0 : i32
      %c7_i32 = arith.constant 7 : i32
      %15 = arith.subi %c7_i32, %c0_i32_12 : i32
      %c0_13 = arith.constant 0 : index
      %c0_14 = arith.constant 0 : index
      %16 = vector.load %arg7[%c0_13, %c0_14] : memref<2x32xf32, #tpu.memory_space<vmem>>, vector<2x32xf32>
      %c0_15 = arith.constant 0 : index
      %c0_16 = arith.constant 0 : index
      %17 = vector.load %arg8[%c0_15, %c0_16] : memref<2x32xf32, #tpu.memory_space<vmem>>, vector<2x32xf32>
      %18 = arith.truncf %16 : vector<2x32xf32> to vector<2x32xbf16>
      %cst = arith.constant dense<0.000000e+00> : vector<2x128xf32>
      %19 = tpu.matmul %18, %4, %cst {dimension_numbers = #tpu.dot_dimension_numbers<[1], [0], [0], [1], [0, 0, 1, 1], [], []>} : vector<2x32xbf16>, vector<32x128xbf16>, vector<2x128xf32> -> vector<2x128xf32>
      %20 = vector.broadcast %8 : vector<1x128xf32> to vector<2x128xf32>
      %21 = arith.addf %20, %19 : vector<2x128xf32>
      %c0_17 = arith.constant 0 : index
      %22 = arith.index_cast %15 : i32 to index
      %c0_18 = arith.constant 0 : index
      %c0_19 = arith.constant 0 : index
      %23 = vector.load %arg2[%c0_17, %22, %c0_18, %c0_19] : memref<1x8x2x16xbf16, #tpu.memory_space<vmem>>, vector<1x1x2x16xbf16>
      %24 = vector.shape_cast %23 : vector<1x1x2x16xbf16> to vector<2x16xbf16>
      %cst_20 = arith.constant dense<0.000000e+00> : vector<2x128xf32>
      %25 = tpu.matmul %24, %6, %cst_20 {dimension_numbers = #tpu.dot_dimension_numbers<[1], [0], [0], [1], [0, 0, 1, 1], [], []>} : vector<2x16xbf16>, vector<16x128xbf16>, vector<2x128xf32> -> vector<2x128xf32>
      %26 = arith.addf %21, %25 : vector<2x128xf32>
      %27 = vector.extract_strided_slice %26 {offsets = [0, 0], sizes = [2, 32], strides = [1, 1]} : vector<2x128xf32> to vector<2x32xf32>
      %cst_21 = arith.constant 5.000000e-01 : f32
      %28 = vector.broadcast %cst_21 : f32 to vector<2x32xf32>
      %29 = arith.mulf %28, %27 : vector<2x32xf32>
      %30 = math.tanh %29 : vector<2x32xf32>
      %cst_22 = arith.constant 1.000000e+00 : f32
      %31 = vector.broadcast %cst_22 : f32 to vector<2x32xf32>
      %32 = arith.addf %30, %31 : vector<2x32xf32>
      %cst_23 = arith.constant 5.000000e-01 : f32
      %33 = vector.broadcast %cst_23 : f32 to vector<2x32xf32>
      %34 = arith.mulf %33, %32 : vector<2x32xf32>
      %35 = vector.extract_strided_slice %26 {offsets = [0, 32], sizes = [2, 32], strides = [1, 1]} : vector<2x128xf32> to vector<2x32xf32>
      %cst_24 = arith.constant 5.000000e-01 : f32
      %36 = vector.broadcast %cst_24 : f32 to vector<2x32xf32>
      %37 = arith.mulf %36, %35 : vector<2x32xf32>
      %38 = math.tanh %37 : vector<2x32xf32>
      %cst_25 = arith.constant 1.000000e+00 : f32
      %39 = vector.broadcast %cst_25 : f32 to vector<2x32xf32>
      %40 = arith.addf %38, %39 : vector<2x32xf32>
      %cst_26 = arith.constant 5.000000e-01 : f32
      %41 = vector.broadcast %cst_26 : f32 to vector<2x32xf32>
      %42 = arith.mulf %41, %40 : vector<2x32xf32>
      %43 = vector.extract_strided_slice %26 {offsets = [0, 64], sizes = [2, 32], strides = [1, 1]} : vector<2x128xf32> to vector<2x32xf32>
      %44 = math.tanh %43 : vector<2x32xf32>
      %45 = vector.extract_strided_slice %26 {offsets = [0, 96], sizes = [2, 32], strides = [1, 1]} : vector<2x128xf32> to vector<2x32xf32>
      %cst_27 = arith.constant 5.000000e-01 : f32
      %46 = vector.broadcast %cst_27 : f32 to vector<2x32xf32>
      %47 = arith.mulf %46, %45 : vector<2x32xf32>
      %48 = math.tanh %47 : vector<2x32xf32>
      %cst_28 = arith.constant 1.000000e+00 : f32
      %49 = vector.broadcast %cst_28 : f32 to vector<2x32xf32>
      %50 = arith.addf %48, %49 : vector<2x32xf32>
      %cst_29 = arith.constant 5.000000e-01 : f32
      %51 = vector.broadcast %cst_29 : f32 to vector<2x32xf32>
      %52 = arith.mulf %51, %50 : vector<2x32xf32>
      %53 = arith.mulf %42, %17 : vector<2x32xf32>
      %54 = arith.mulf %34, %44 : vector<2x32xf32>
      %55 = arith.addf %53, %54 : vector<2x32xf32>
      %56 = math.tanh %55 : vector<2x32xf32>
      %57 = arith.mulf %52, %56 : vector<2x32xf32>
      %c0_30 = arith.constant 0 : index
      %c0_31 = arith.constant 0 : index
      %58 = vector.load %arg7[%c0_30, %c0_31] : memref<2x32xf32, #tpu.memory_space<vmem>>, vector<2x32xf32>
      tpu.vector_store %arg7[%c0_30, %c0_31], %57 {strides = array<i32>} : memref<2x32xf32, #tpu.memory_space<vmem>>, vector<2x32xf32>,
      %c0_32 = arith.constant 0 : index
      %c0_33 = arith.constant 0 : index
      %59 = vector.load %arg8[%c0_32, %c0_33] : memref<2x32xf32, #tpu.memory_space<vmem>>, vector<2x32xf32>
      tpu.vector_store %arg8[%c0_32, %c0_33], %55 {strides = array<i32>} : memref<2x32xf32, #tpu.memory_space<vmem>>, vector<2x32xf32>,
      %60 = arith.truncf %57 : vector<2x32xf32> to vector<2x32xbf16>
      %c0_34 = arith.constant 0 : index
      %61 = arith.index_cast %15 : i32 to index
      %c0_35 = arith.constant 0 : index
      %c0_36 = arith.constant 0 : index
      %62 = vector.load %arg6[%c0_34, %61, %c0_35, %c0_36] : memref<1x8x2x32xbf16, #tpu.memory_space<vmem>>, vector<1x1x2x32xbf16>
      %63 = vector.shape_cast %62 : vector<1x1x2x32xbf16> to vector<2x32xbf16>
      %64 = vector.shape_cast %60 : vector<2x32xbf16> to vector<1x1x2x32xbf16>
      tpu.vector_store %arg6[%c0_34, %61, %c0_35, %c0_36], %64 {strides = array<i32>} : memref<1x8x2x32xbf16, #tpu.memory_space<vmem>>, vector<1x1x2x32xbf16>,
      %c1_i32_37 = arith.constant 1 : i32
      %c7_i32_38 = arith.constant 7 : i32
      %65 = arith.subi %c7_i32_38, %c1_i32_37 : i32
      %c0_39 = arith.constant 0 : index
      %c0_40 = arith.constant 0 : index
      %66 = vector.load %arg7[%c0_39, %c0_40] : memref<2x32xf32, #tpu.memory_space<vmem>>, vector<2x32xf32>
      %c0_41 = arith.constant 0 : index
      %c0_42 = arith.constant 0 : index
      %67 = vector.load %arg8[%c0_41, %c0_42] : memref<2x32xf32, #tpu.memory_space<vmem>>, vector<2x32xf32>
      %68 = arith.truncf %66 : vector<2x32xf32> to vector<2x32xbf16>
      %cst_43 = arith.constant dense<0.000000e+00> : vector<2x128xf32>
      %69 = tpu.matmul %68, %4, %cst_43 {dimension_numbers = #tpu.dot_dimension_numbers<[1], [0], [0], [1], [0, 0, 1, 1], [], []>} : vector<2x32xbf16>, vector<32x128xbf16>, vector<2x128xf32> -> vector<2x128xf32>
      %70 = vector.broadcast %8 : vector<1x128xf32> to vector<2x128xf32>
      %71 = arith.addf %70, %69 : vector<2x128xf32>
      %c0_44 = arith.constant 0 : index
      %72 = arith.index_cast %65 : i32 to index
      %c0_45 = arith.constant 0 : index
      %c0_46 = arith.constant 0 : index
      %73 = vector.load %arg2[%c0_44, %72, %c0_45, %c0_46] : memref<1x8x2x16xbf16, #tpu.memory_space<vmem>>, vector<1x1x2x16xbf16>
      %74 = vector.shape_cast %73 : vector<1x1x2x16xbf16> to vector<2x16xbf16>
      %cst_47 = arith.constant dense<0.000000e+00> : vector<2x128xf32>
      %75 = tpu.matmul %74, %6, %cst_47 {dimension_numbers = #tpu.dot_dimension_numbers<[1], [0], [0], [1], [0, 0, 1, 1], [], []>} : vector<2x16xbf16>, vector<16x128xbf16>, vector<2x128xf32> -> vector<2x128xf32>
      %76 = arith.addf %71, %75 : vector<2x128xf32>
      %77 = vector.extract_strided_slice %76 {offsets = [0, 0], sizes = [2, 32], strides = [1, 1]} : vector<2x128xf32> to vector<2x32xf32>
      %cst_48 = arith.constant 5.000000e-01 : f32
      %78 = vector.broadcast %cst_48 : f32 to vector<2x32xf32>
      %79 = arith.mulf %78, %77 : vector<2x32xf32>
      %80 = math.tanh %79 : vector<2x32xf32>
      %cst_49 = arith.constant 1.000000e+00 : f32
      %81 = vector.broadcast %cst_49 : f32 to vector<2x32xf32>
      %82 = arith.addf %80, %81 : vector<2x32xf32>
      %cst_50 = arith.constant 5.000000e-01 : f32
      %83 = vector.broadcast %cst_50 : f32 to vector<2x32xf32>
      %84 = arith.mulf %83, %82 : vector<2x32xf32>
      %85 = vector.extract_strided_slice %76 {offsets = [0, 32], sizes = [2, 32], strides = [1, 1]} : vector<2x128xf32> to vector<2x32xf32>
      %cst_51 = arith.constant 5.000000e-01 : f32
      %86 = vector.broadcast %cst_51 : f32 to vector<2x32xf32>
      %87 = arith.mulf %86, %85 : vector<2x32xf32>
      %88 = math.tanh %87 : vector<2x32xf32>
      %cst_52 = arith.constant 1.000000e+00 : f32
      %89 = vector.broadcast %cst_52 : f32 to vector<2x32xf32>
      %90 = arith.addf %88, %89 : vector<2x32xf32>
      %cst_53 = arith.constant 5.000000e-01 : f32
      %91 = vector.broadcast %cst_53 : f32 to vector<2x32xf32>
      %92 = arith.mulf %91, %90 : vector<2x32xf32>
      %93 = vector.extract_strided_slice %76 {offsets = [0, 64], sizes = [2, 32], strides = [1, 1]} : vector<2x128xf32> to vector<2x32xf32>
      %94 = math.tanh %93 : vector<2x32xf32>
      %95 = vector.extract_strided_slice %76 {offsets = [0, 96], sizes = [2, 32], strides = [1, 1]} : vector<2x128xf32> to vector<2x32xf32>
      %cst_54 = arith.constant 5.000000e-01 : f32
      %96 = vector.broadcast %cst_54 : f32 to vector<2x32xf32>
      %97 = arith.mulf %96, %95 : vector<2x32xf32>
      %98 = math.tanh %97 : vector<2x32xf32>
      %cst_55 = arith.constant 1.000000e+00 : f32
      %99 = vector.broadcast %cst_55 : f32 to vector<2x32xf32>
      %100 = arith.addf %98, %99 : vector<2x32xf32>
      %cst_56 = arith.constant 5.000000e-01 : f32
      %101 = vector.broadcast %cst_56 : f32 to vector<2x32xf32>
      %102 = arith.mulf %101, %100 : vector<2x32xf32>
      %103 = arith.mulf %92, %67 : vector<2x32xf32>
      %104 = arith.mulf %84, %94 : vector<2x32xf32>
      %105 = arith.addf %103, %104 : vector<2x32xf32>
      %106 = math.tanh %105 : vector<2x32xf32>
      %107 = arith.mulf %102, %106 : vector<2x32xf32>
      %c0_57 = arith.constant 0 : index
      %c0_58 = arith.constant 0 : index
      %108 = vector.load %arg7[%c0_57, %c0_58] : memref<2x32xf32, #tpu.memory_space<vmem>>, vector<2x32xf32>
      tpu.vector_store %arg7[%c0_57, %c0_58], %107 {strides = array<i32>} : memref<2x32xf32, #tpu.memory_space<vmem>>, vector<2x32xf32>,
      %c0_59 = arith.constant 0 : index
      %c0_60 = arith.constant 0 : index
      %109 = vector.load %arg8[%c0_59, %c0_60] : memref<2x32xf32, #tpu.memory_space<vmem>>, vector<2x32xf32>
      tpu.vector_store %arg8[%c0_59, %c0_60], %105 {strides = array<i32>} : memref<2x32xf32, #tpu.memory_space<vmem>>, vector<2x32xf32>,
      %110 = arith.truncf %107 : vector<2x32xf32> to vector<2x32xbf16>
      %c0_61 = arith.constant 0 : index
      %111 = arith.index_cast %65 : i32 to index
      %c0_62 = arith.constant 0 : index
      %c0_63 = arith.constant 0 : index
      %112 = vector.load %arg6[%c0_61, %111, %c0_62, %c0_63] : memref<1x8x2x32xbf16, #tpu.memory_space<vmem>>, vector<1x1x2x32xbf16>
      %113 = vector.shape_cast %112 : vector<1x1x2x32xbf16> to vector<2x32xbf16>
      %114 = vector.shape_cast %110 : vector<2x32xbf16> to vector<1x1x2x32xbf16>
      tpu.vector_store %arg6[%c0_61, %111, %c0_62, %c0_63], %114 {strides = array<i32>} : memref<1x8x2x32xbf16, #tpu.memory_space<vmem>>, vector<1x1x2x32xbf16>,
      %c2_i32 = arith.constant 2 : i32
      %c7_i32_64 = arith.constant 7 : i32
      %115 = arith.subi %c7_i32_64, %c2_i32 : i32
      %c0_65 = arith.constant 0 : index
      %c0_66 = arith.constant 0 : index
      %116 = vector.load %arg7[%c0_65, %c0_66] : memref<2x32xf32, #tpu.memory_space<vmem>>, vector<2x32xf32>
      %c0_67 = arith.constant 0 : index
      %c0_68 = arith.constant 0 : index
      %117 = vector.load %arg8[%c0_67, %c0_68] : memref<2x32xf32, #tpu.memory_space<vmem>>, vector<2x32xf32>
      %118 = arith.truncf %116 : vector<2x32xf32> to vector<2x32xbf16>
      %cst_69 = arith.constant dense<0.000000e+00> : vector<2x128xf32>
      %119 = tpu.matmul %118, %4, %cst_69 {dimension_numbers = #tpu.dot_dimension_numbers<[1], [0], [0], [1], [0, 0, 1, 1], [], []>} : vector<2x32xbf16>, vector<32x128xbf16>, vector<2x128xf32> -> vector<2x128xf32>
      %120 = vector.broadcast %8 : vector<1x128xf32> to vector<2x128xf32>
      %121 = arith.addf %120, %119 : vector<2x128xf32>
      %c0_70 = arith.constant 0 : index
      %122 = arith.index_cast %115 : i32 to index
      %c0_71 = arith.constant 0 : index
      %c0_72 = arith.constant 0 : index
      %123 = vector.load %arg2[%c0_70, %122, %c0_71, %c0_72] : memref<1x8x2x16xbf16, #tpu.memory_space<vmem>>, vector<1x1x2x16xbf16>
      %124 = vector.shape_cast %123 : vector<1x1x2x16xbf16> to vector<2x16xbf16>
      %cst_73 = arith.constant dense<0.000000e+00> : vector<2x128xf32>
      %125 = tpu.matmul %124, %6, %cst_73 {dimension_numbers = #tpu.dot_dimension_numbers<[1], [0], [0], [1], [0, 0, 1, 1], [], []>} : vector<2x16xbf16>, vector<16x128xbf16>, vector<2x128xf32> -> vector<2x128xf32>
      %126 = arith.addf %121, %125 : vector<2x128xf32>
      %127 = vector.extract_strided_slice %126 {offsets = [0, 0], sizes = [2, 32], strides = [1, 1]} : vector<2x128xf32> to vector<2x32xf32>
      %cst_74 = arith.constant 5.000000e-01 : f32
      %128 = vector.broadcast %cst_74 : f32 to vector<2x32xf32>
      %129 = arith.mulf %128, %127 : vector<2x32xf32>
      %130 = math.tanh %129 : vector<2x32xf32>
      %cst_75 = arith.constant 1.000000e+00 : f32
      %131 = vector.broadcast %cst_75 : f32 to vector<2x32xf32>
      %132 = arith.addf %130, %131 : vector<2x32xf32>
      %cst_76 = arith.constant 5.000000e-01 : f32
      %133 = vector.broadcast %cst_76 : f32 to vector<2x32xf32>
      %134 = arith.mulf %133, %132 : vector<2x32xf32>
      %135 = vector.extract_strided_slice %126 {offsets = [0, 32], sizes = [2, 32], strides = [1, 1]} : vector<2x128xf32> to vector<2x32xf32>
      %cst_77 = arith.constant 5.000000e-01 : f32
      %136 = vector.broadcast %cst_77 : f32 to vector<2x32xf32>
      %137 = arith.mulf %136, %135 : vector<2x32xf32>
      %138 = math.tanh %137 : vector<2x32xf32>
      %cst_78 = arith.constant 1.000000e+00 : f32
      %139 = vector.broadcast %cst_78 : f32 to vector<2x32xf32>
      %140 = arith.addf %138, %139 : vector<2x32xf32>
      %cst_79 = arith.constant 5.000000e-01 : f32
      %141 = vector.broadcast %cst_79 : f32 to vector<2x32xf32>
      %142 = arith.mulf %141, %140 : vector<2x32xf32>
      %143 = vector.extract_strided_slice %126 {offsets = [0, 64], sizes = [2, 32], strides = [1, 1]} : vector<2x128xf32> to vector<2x32xf32>
      %144 = math.tanh %143 : vector<2x32xf32>
      %145 = vector.extract_strided_slice %126 {offsets = [0, 96], sizes = [2, 32], strides = [1, 1]} : vector<2x128xf32> to vector<2x32xf32>
      %cst_80 = arith.constant 5.000000e-01 : f32
      %146 = vector.broadcast %cst_80 : f32 to vector<2x32xf32>
      %147 = arith.mulf %146, %145 : vector<2x32xf32>
      %148 = math.tanh %147 : vector<2x32xf32>
      %cst_81 = arith.constant 1.000000e+00 : f32
      %149 = vector.broadcast %cst_81 : f32 to vector<2x32xf32>
      %150 = arith.addf %148, %149 : vector<2x32xf32>
      %cst_82 = arith.constant 5.000000e-01 : f32
      %151 = vector.broadcast %cst_82 : f32 to vector<2x32xf32>
      %152 = arith.mulf %151, %150 : vector<2x32xf32>
      %153 = arith.mulf %142, %117 : vector<2x32xf32>
      %154 = arith.mulf %134, %144 : vector<2x32xf32>
      %155 = arith.addf %153, %154 : vector<2x32xf32>
      %156 = math.tanh %155 : vector<2x32xf32>
      %157 = arith.mulf %152, %156 : vector<2x32xf32>
      %c0_83 = arith.constant 0 : index
      %c0_84 = arith.constant 0 : index
      %158 = vector.load %arg7[%c0_83, %c0_84] : memref<2x32xf32, #tpu.memory_space<vmem>>, vector<2x32xf32>
      tpu.vector_store %arg7[%c0_83, %c0_84], %157 {strides = array<i32>} : memref<2x32xf32, #tpu.memory_space<vmem>>, vector<2x32xf32>,
      %c0_85 = arith.constant 0 : index
      %c0_86 = arith.constant 0 : index
      %159 = vector.load %arg8[%c0_85, %c0_86] : memref<2x32xf32, #tpu.memory_space<vmem>>, vector<2x32xf32>
      tpu.vector_store %arg8[%c0_85, %c0_86], %155 {strides = array<i32>} : memref<2x32xf32, #tpu.memory_space<vmem>>, vector<2x32xf32>,
      %160 = arith.truncf %157 : vector<2x32xf32> to vector<2x32xbf16>
      %c0_87 = arith.constant 0 : index
      %161 = arith.index_cast %115 : i32 to index
      %c0_88 = arith.constant 0 : index
      %c0_89 = arith.constant 0 : index
      %162 = vector.load %arg6[%c0_87, %161, %c0_88, %c0_89] : memref<1x8x2x32xbf16, #tpu.memory_space<vmem>>, vector<1x1x2x32xbf16>
      %163 = vector.shape_cast %162 : vector<1x1x2x32xbf16> to vector<2x32xbf16>
      %164 = vector.shape_cast %160 : vector<2x32xbf16> to vector<1x1x2x32xbf16>
      tpu.vector_store %arg6[%c0_87, %161, %c0_88, %c0_89], %164 {strides = array<i32>} : memref<1x8x2x32xbf16, #tpu.memory_space<vmem>>, vector<1x1x2x32xbf16>,
      %c3_i32 = arith.constant 3 : i32
      %c7_i32_90 = arith.constant 7 : i32
      %165 = arith.subi %c7_i32_90, %c3_i32 : i32
      %c0_91 = arith.constant 0 : index
      %c0_92 = arith.constant 0 : index
      %166 = vector.load %arg7[%c0_91, %c0_92] : memref<2x32xf32, #tpu.memory_space<vmem>>, vector<2x32xf32>
      %c0_93 = arith.constant 0 : index
      %c0_94 = arith.constant 0 : index
      %167 = vector.load %arg8[%c0_93, %c0_94] : memref<2x32xf32, #tpu.memory_space<vmem>>, vector<2x32xf32>
      %168 = arith.truncf %166 : vector<2x32xf32> to vector<2x32xbf16>
      %cst_95 = arith.constant dense<0.000000e+00> : vector<2x128xf32>
      %169 = tpu.matmul %168, %4, %cst_95 {dimension_numbers = #tpu.dot_dimension_numbers<[1], [0], [0], [1], [0, 0, 1, 1], [], []>} : vector<2x32xbf16>, vector<32x128xbf16>, vector<2x128xf32> -> vector<2x128xf32>
      %170 = vector.broadcast %8 : vector<1x128xf32> to vector<2x128xf32>
      %171 = arith.addf %170, %169 : vector<2x128xf32>
      %c0_96 = arith.constant 0 : index
      %172 = arith.index_cast %165 : i32 to index
      %c0_97 = arith.constant 0 : index
      %c0_98 = arith.constant 0 : index
      %173 = vector.load %arg2[%c0_96, %172, %c0_97, %c0_98] : memref<1x8x2x16xbf16, #tpu.memory_space<vmem>>, vector<1x1x2x16xbf16>
      %174 = vector.shape_cast %173 : vector<1x1x2x16xbf16> to vector<2x16xbf16>
      %cst_99 = arith.constant dense<0.000000e+00> : vector<2x128xf32>
      %175 = tpu.matmul %174, %6, %cst_99 {dimension_numbers = #tpu.dot_dimension_numbers<[1], [0], [0], [1], [0, 0, 1, 1], [], []>} : vector<2x16xbf16>, vector<16x128xbf16>, vector<2x128xf32> -> vector<2x128xf32>
      %176 = arith.addf %171, %175 : vector<2x128xf32>
      %177 = vector.extract_strided_slice %176 {offsets = [0, 0], sizes = [2, 32], strides = [1, 1]} : vector<2x128xf32> to vector<2x32xf32>
      %cst_100 = arith.constant 5.000000e-01 : f32
      %178 = vector.broadcast %cst_100 : f32 to vector<2x32xf32>
      %179 = arith.mulf %178, %177 : vector<2x32xf32>
      %180 = math.tanh %179 : vector<2x32xf32>
      %cst_101 = arith.constant 1.000000e+00 : f32
      %181 = vector.broadcast %cst_101 : f32 to vector<2x32xf32>
      %182 = arith.addf %180, %181 : vector<2x32xf32>
      %cst_102 = arith.constant 5.000000e-01 : f32
      %183 = vector.broadcast %cst_102 : f32 to vector<2x32xf32>
      %184 = arith.mulf %183, %182 : vector<2x32xf32>
      %185 = vector.extract_strided_slice %176 {offsets = [0, 32], sizes = [2, 32], strides = [1, 1]} : vector<2x128xf32> to vector<2x32xf32>
      %cst_103 = arith.constant 5.000000e-01 : f32
      %186 = vector.broadcast %cst_103 : f32 to vector<2x32xf32>
      %187 = arith.mulf %186, %185 : vector<2x32xf32>
      %188 = math.tanh %187 : vector<2x32xf32>
      %cst_104 = arith.constant 1.000000e+00 : f32
      %189 = vector.broadcast %cst_104 : f32 to vector<2x32xf32>
      %190 = arith.addf %188, %189 : vector<2x32xf32>
      %cst_105 = arith.constant 5.000000e-01 : f32
      %191 = vector.broadcast %cst_105 : f32 to vector<2x32xf32>
      %192 = arith.mulf %191, %190 : vector<2x32xf32>
      %193 = vector.extract_strided_slice %176 {offsets = [0, 64], sizes = [2, 32], strides = [1, 1]} : vector<2x128xf32> to vector<2x32xf32>
      %194 = math.tanh %193 : vector<2x32xf32>
      %195 = vector.extract_strided_slice %176 {offsets = [0, 96], sizes = [2, 32], strides = [1, 1]} : vector<2x128xf32> to vector<2x32xf32>
      %cst_106 = arith.constant 5.000000e-01 : f32
      %196 = vector.broadcast %cst_106 : f32 to vector<2x32xf32>
      %197 = arith.mulf %196, %195 : vector<2x32xf32>
      %198 = math.tanh %197 : vector<2x32xf32>
      %cst_107 = arith.constant 1.000000e+00 : f32
      %199 = vector.broadcast %cst_107 : f32 to vector<2x32xf32>
      %200 = arith.addf %198, %199 : vector<2x32xf32>
      %cst_108 = arith.constant 5.000000e-01 : f32
      %201 = vector.broadcast %cst_108 : f32 to vector<2x32xf32>
      %202 = arith.mulf %201, %200 : vector<2x32xf32>
      %203 = arith.mulf %192, %167 : vector<2x32xf32>
      %204 = arith.mulf %184, %194 : vector<2x32xf32>
      %205 = arith.addf %203, %204 : vector<2x32xf32>
      %206 = math.tanh %205 : vector<2x32xf32>
      %207 = arith.mulf %202, %206 : vector<2x32xf32>
      %c0_109 = arith.constant 0 : index
      %c0_110 = arith.constant 0 : index
      %208 = vector.load %arg7[%c0_109, %c0_110] : memref<2x32xf32, #tpu.memory_space<vmem>>, vector<2x32xf32>
      tpu.vector_store %arg7[%c0_109, %c0_110], %207 {strides = array<i32>} : memref<2x32xf32, #tpu.memory_space<vmem>>, vector<2x32xf32>,
      %c0_111 = arith.constant 0 : index
      %c0_112 = arith.constant 0 : index
      %209 = vector.load %arg8[%c0_111, %c0_112] : memref<2x32xf32, #tpu.memory_space<vmem>>, vector<2x32xf32>
      tpu.vector_store %arg8[%c0_111, %c0_112], %205 {strides = array<i32>} : memref<2x32xf32, #tpu.memory_space<vmem>>, vector<2x32xf32>,
      %210 = arith.truncf %207 : vector<2x32xf32> to vector<2x32xbf16>
      %c0_113 = arith.constant 0 : index
      %211 = arith.index_cast %165 : i32 to index
      %c0_114 = arith.constant 0 : index
      %c0_115 = arith.constant 0 : index
      %212 = vector.load %arg6[%c0_113, %211, %c0_114, %c0_115] : memref<1x8x2x32xbf16, #tpu.memory_space<vmem>>, vector<1x1x2x32xbf16>
      %213 = vector.shape_cast %212 : vector<1x1x2x32xbf16> to vector<2x32xbf16>
      %214 = vector.shape_cast %210 : vector<2x32xbf16> to vector<1x1x2x32xbf16>
      tpu.vector_store %arg6[%c0_113, %211, %c0_114, %c0_115], %214 {strides = array<i32>} : memref<1x8x2x32xbf16, #tpu.memory_space<vmem>>, vector<1x1x2x32xbf16>,
      %c4_i32 = arith.constant 4 : i32
      %c7_i32_116 = arith.constant 7 : i32
      %215 = arith.subi %c7_i32_116, %c4_i32 : i32
      %c0_117 = arith.constant 0 : index
      %c0_118 = arith.constant 0 : index
      %216 = vector.load %arg7[%c0_117, %c0_118] : memref<2x32xf32, #tpu.memory_space<vmem>>, vector<2x32xf32>
      %c0_119 = arith.constant 0 : index
      %c0_120 = arith.constant 0 : index
      %217 = vector.load %arg8[%c0_119, %c0_120] : memref<2x32xf32, #tpu.memory_space<vmem>>, vector<2x32xf32>
      %218 = arith.truncf %216 : vector<2x32xf32> to vector<2x32xbf16>
      %cst_121 = arith.constant dense<0.000000e+00> : vector<2x128xf32>
      %219 = tpu.matmul %218, %4, %cst_121 {dimension_numbers = #tpu.dot_dimension_numbers<[1], [0], [0], [1], [0, 0, 1, 1], [], []>} : vector<2x32xbf16>, vector<32x128xbf16>, vector<2x128xf32> -> vector<2x128xf32>
      %220 = vector.broadcast %8 : vector<1x128xf32> to vector<2x128xf32>
      %221 = arith.addf %220, %219 : vector<2x128xf32>
      %c0_122 = arith.constant 0 : index
      %222 = arith.index_cast %215 : i32 to index
      %c0_123 = arith.constant 0 : index
      %c0_124 = arith.constant 0 : index
      %223 = vector.load %arg2[%c0_122, %222, %c0_123, %c0_124] : memref<1x8x2x16xbf16, #tpu.memory_space<vmem>>, vector<1x1x2x16xbf16>
      %224 = vector.shape_cast %223 : vector<1x1x2x16xbf16> to vector<2x16xbf16>
      %cst_125 = arith.constant dense<0.000000e+00> : vector<2x128xf32>
      %225 = tpu.matmul %224, %6, %cst_125 {dimension_numbers = #tpu.dot_dimension_numbers<[1], [0], [0], [1], [0, 0, 1, 1], [], []>} : vector<2x16xbf16>, vector<16x128xbf16>, vector<2x128xf32> -> vector<2x128xf32>
      %226 = arith.addf %221, %225 : vector<2x128xf32>
      %227 = vector.extract_strided_slice %226 {offsets = [0, 0], sizes = [2, 32], strides = [1, 1]} : vector<2x128xf32> to vector<2x32xf32>
      %cst_126 = arith.constant 5.000000e-01 : f32
      %228 = vector.broadcast %cst_126 : f32 to vector<2x32xf32>
      %229 = arith.mulf %228, %227 : vector<2x32xf32>
      %230 = math.tanh %229 : vector<2x32xf32>
      %cst_127 = arith.constant 1.000000e+00 : f32
      %231 = vector.broadcast %cst_127 : f32 to vector<2x32xf32>
      %232 = arith.addf %230, %231 : vector<2x32xf32>
      %cst_128 = arith.constant 5.000000e-01 : f32
      %233 = vector.broadcast %cst_128 : f32 to vector<2x32xf32>
      %234 = arith.mulf %233, %232 : vector<2x32xf32>
      %235 = vector.extract_strided_slice %226 {offsets = [0, 32], sizes = [2, 32], strides = [1, 1]} : vector<2x128xf32> to vector<2x32xf32>
      %cst_129 = arith.constant 5.000000e-01 : f32
      %236 = vector.broadcast %cst_129 : f32 to vector<2x32xf32>
      %237 = arith.mulf %236, %235 : vector<2x32xf32>
      %238 = math.tanh %237 : vector<2x32xf32>
      %cst_130 = arith.constant 1.000000e+00 : f32
      %239 = vector.broadcast %cst_130 : f32 to vector<2x32xf32>
      %240 = arith.addf %238, %239 : vector<2x32xf32>
      %cst_131 = arith.constant 5.000000e-01 : f32
      %241 = vector.broadcast %cst_131 : f32 to vector<2x32xf32>
      %242 = arith.mulf %241, %240 : vector<2x32xf32>
      %243 = vector.extract_strided_slice %226 {offsets = [0, 64], sizes = [2, 32], strides = [1, 1]} : vector<2x128xf32> to vector<2x32xf32>
      %244 = math.tanh %243 : vector<2x32xf32>
      %245 = vector.extract_strided_slice %226 {offsets = [0, 96], sizes = [2, 32], strides = [1, 1]} : vector<2x128xf32> to vector<2x32xf32>
      %cst_132 = arith.constant 5.000000e-01 : f32
      %246 = vector.broadcast %cst_132 : f32 to vector<2x32xf32>
      %247 = arith.mulf %246, %245 : vector<2x32xf32>
      %248 = math.tanh %247 : vector<2x32xf32>
      %cst_133 = arith.constant 1.000000e+00 : f32
      %249 = vector.broadcast %cst_133 : f32 to vector<2x32xf32>
      %250 = arith.addf %248, %249 : vector<2x32xf32>
      %cst_134 = arith.constant 5.000000e-01 : f32
      %251 = vector.broadcast %cst_134 : f32 to vector<2x32xf32>
      %252 = arith.mulf %251, %250 : vector<2x32xf32>
      %253 = arith.mulf %242, %217 : vector<2x32xf32>
      %254 = arith.mulf %234, %244 : vector<2x32xf32>
      %255 = arith.addf %253, %254 : vector<2x32xf32>
      %256 = math.tanh %255 : vector<2x32xf32>
      %257 = arith.mulf %252, %256 : vector<2x32xf32>
      %c0_135 = arith.constant 0 : index
      %c0_136 = arith.constant 0 : index
      %258 = vector.load %arg7[%c0_135, %c0_136] : memref<2x32xf32, #tpu.memory_space<vmem>>, vector<2x32xf32>
      tpu.vector_store %arg7[%c0_135, %c0_136], %257 {strides = array<i32>} : memref<2x32xf32, #tpu.memory_space<vmem>>, vector<2x32xf32>,
      %c0_137 = arith.constant 0 : index
      %c0_138 = arith.constant 0 : index
      %259 = vector.load %arg8[%c0_137, %c0_138] : memref<2x32xf32, #tpu.memory_space<vmem>>, vector<2x32xf32>
      tpu.vector_store %arg8[%c0_137, %c0_138], %255 {strides = array<i32>} : memref<2x32xf32, #tpu.memory_space<vmem>>, vector<2x32xf32>,
      %260 = arith.truncf %257 : vector<2x32xf32> to vector<2x32xbf16>
      %c0_139 = arith.constant 0 : index
      %261 = arith.index_cast %215 : i32 to index
      %c0_140 = arith.constant 0 : index
      %c0_141 = arith.constant 0 : index
      %262 = vector.load %arg6[%c0_139, %261, %c0_140, %c0_141] : memref<1x8x2x32xbf16, #tpu.memory_space<vmem>>, vector<1x1x2x32xbf16>
      %263 = vector.shape_cast %262 : vector<1x1x2x32xbf16> to vector<2x32xbf16>
      %264 = vector.shape_cast %260 : vector<2x32xbf16> to vector<1x1x2x32xbf16>
      tpu.vector_store %arg6[%c0_139, %261, %c0_140, %c0_141], %264 {strides = array<i32>} : memref<1x8x2x32xbf16, #tpu.memory_space<vmem>>, vector<1x1x2x32xbf16>,
      %c5_i32 = arith.constant 5 : i32
      %c7_i32_142 = arith.constant 7 : i32
      %265 = arith.subi %c7_i32_142, %c5_i32 : i32
      %c0_143 = arith.constant 0 : index
      %c0_144 = arith.constant 0 : index
      %266 = vector.load %arg7[%c0_143, %c0_144] : memref<2x32xf32, #tpu.memory_space<vmem>>, vector<2x32xf32>
      %c0_145 = arith.constant 0 : index
      %c0_146 = arith.constant 0 : index
      %267 = vector.load %arg8[%c0_145, %c0_146] : memref<2x32xf32, #tpu.memory_space<vmem>>, vector<2x32xf32>
      %268 = arith.truncf %266 : vector<2x32xf32> to vector<2x32xbf16>
      %cst_147 = arith.constant dense<0.000000e+00> : vector<2x128xf32>
      %269 = tpu.matmul %268, %4, %cst_147 {dimension_numbers = #tpu.dot_dimension_numbers<[1], [0], [0], [1], [0, 0, 1, 1], [], []>} : vector<2x32xbf16>, vector<32x128xbf16>, vector<2x128xf32> -> vector<2x128xf32>
      %270 = vector.broadcast %8 : vector<1x128xf32> to vector<2x128xf32>
      %271 = arith.addf %270, %269 : vector<2x128xf32>
      %c0_148 = arith.constant 0 : index
      %272 = arith.index_cast %265 : i32 to index
      %c0_149 = arith.constant 0 : index
      %c0_150 = arith.constant 0 : index
      %273 = vector.load %arg2[%c0_148, %272, %c0_149, %c0_150] : memref<1x8x2x16xbf16, #tpu.memory_space<vmem>>, vector<1x1x2x16xbf16>
      %274 = vector.shape_cast %273 : vector<1x1x2x16xbf16> to vector<2x16xbf16>
      %cst_151 = arith.constant dense<0.000000e+00> : vector<2x128xf32>
      %275 = tpu.matmul %274, %6, %cst_151 {dimension_numbers = #tpu.dot_dimension_numbers<[1], [0], [0], [1], [0, 0, 1, 1], [], []>} : vector<2x16xbf16>, vector<16x128xbf16>, vector<2x128xf32> -> vector<2x128xf32>
      %276 = arith.addf %271, %275 : vector<2x128xf32>
      %277 = vector.extract_strided_slice %276 {offsets = [0, 0], sizes = [2, 32], strides = [1, 1]} : vector<2x128xf32> to vector<2x32xf32>
      %cst_152 = arith.constant 5.000000e-01 : f32
      %278 = vector.broadcast %cst_152 : f32 to vector<2x32xf32>
      %279 = arith.mulf %278, %277 : vector<2x32xf32>
      %280 = math.tanh %279 : vector<2x32xf32>
      %cst_153 = arith.constant 1.000000e+00 : f32
      %281 = vector.broadcast %cst_153 : f32 to vector<2x32xf32>
      %282 = arith.addf %280, %281 : vector<2x32xf32>
      %cst_154 = arith.constant 5.000000e-01 : f32
      %283 = vector.broadcast %cst_154 : f32 to vector<2x32xf32>
      %284 = arith.mulf %283, %282 : vector<2x32xf32>
      %285 = vector.extract_strided_slice %276 {offsets = [0, 32], sizes = [2, 32], strides = [1, 1]} : vector<2x128xf32> to vector<2x32xf32>
      %cst_155 = arith.constant 5.000000e-01 : f32
      %286 = vector.broadcast %cst_155 : f32 to vector<2x32xf32>
      %287 = arith.mulf %286, %285 : vector<2x32xf32>
      %288 = math.tanh %287 : vector<2x32xf32>
      %cst_156 = arith.constant 1.000000e+00 : f32
      %289 = vector.broadcast %cst_156 : f32 to vector<2x32xf32>
      %290 = arith.addf %288, %289 : vector<2x32xf32>
      %cst_157 = arith.constant 5.000000e-01 : f32
      %291 = vector.broadcast %cst_157 : f32 to vector<2x32xf32>
      %292 = arith.mulf %291, %290 : vector<2x32xf32>
      %293 = vector.extract_strided_slice %276 {offsets = [0, 64], sizes = [2, 32], strides = [1, 1]} : vector<2x128xf32> to vector<2x32xf32>
      %294 = math.tanh %293 : vector<2x32xf32>
      %295 = vector.extract_strided_slice %276 {offsets = [0, 96], sizes = [2, 32], strides = [1, 1]} : vector<2x128xf32> to vector<2x32xf32>
      %cst_158 = arith.constant 5.000000e-01 : f32
      %296 = vector.broadcast %cst_158 : f32 to vector<2x32xf32>
      %297 = arith.mulf %296, %295 : vector<2x32xf32>
      %298 = math.tanh %297 : vector<2x32xf32>
      %cst_159 = arith.constant 1.000000e+00 : f32
      %299 = vector.broadcast %cst_159 : f32 to vector<2x32xf32>
      %300 = arith.addf %298, %299 : vector<2x32xf32>
      %cst_160 = arith.constant 5.000000e-01 : f32
      %301 = vector.broadcast %cst_160 : f32 to vector<2x32xf32>
      %302 = arith.mulf %301, %300 : vector<2x32xf32>
      %303 = arith.mulf %292, %267 : vector<2x32xf32>
      %304 = arith.mulf %284, %294 : vector<2x32xf32>
      %305 = arith.addf %303, %304 : vector<2x32xf32>
      %306 = math.tanh %305 : vector<2x32xf32>
      %307 = arith.mulf %302, %306 : vector<2x32xf32>
      %c0_161 = arith.constant 0 : index
      %c0_162 = arith.constant 0 : index
      %308 = vector.load %arg7[%c0_161, %c0_162] : memref<2x32xf32, #tpu.memory_space<vmem>>, vector<2x32xf32>
      tpu.vector_store %arg7[%c0_161, %c0_162], %307 {strides = array<i32>} : memref<2x32xf32, #tpu.memory_space<vmem>>, vector<2x32xf32>,
      %c0_163 = arith.constant 0 : index
      %c0_164 = arith.constant 0 : index
      %309 = vector.load %arg8[%c0_163, %c0_164] : memref<2x32xf32, #tpu.memory_space<vmem>>, vector<2x32xf32>
      tpu.vector_store %arg8[%c0_163, %c0_164], %305 {strides = array<i32>} : memref<2x32xf32, #tpu.memory_space<vmem>>, vector<2x32xf32>,
      %310 = arith.truncf %307 : vector<2x32xf32> to vector<2x32xbf16>
      %c0_165 = arith.constant 0 : index
      %311 = arith.index_cast %265 : i32 to index
      %c0_166 = arith.constant 0 : index
      %c0_167 = arith.constant 0 : index
      %312 = vector.load %arg6[%c0_165, %311, %c0_166, %c0_167] : memref<1x8x2x32xbf16, #tpu.memory_space<vmem>>, vector<1x1x2x32xbf16>
      %313 = vector.shape_cast %312 : vector<1x1x2x32xbf16> to vector<2x32xbf16>
      %314 = vector.shape_cast %310 : vector<2x32xbf16> to vector<1x1x2x32xbf16>
      tpu.vector_store %arg6[%c0_165, %311, %c0_166, %c0_167], %314 {strides = array<i32>} : memref<1x8x2x32xbf16, #tpu.memory_space<vmem>>, vector<1x1x2x32xbf16>,
      %c6_i32 = arith.constant 6 : i32
      %c7_i32_168 = arith.constant 7 : i32
      %315 = arith.subi %c7_i32_168, %c6_i32 : i32
      %c0_169 = arith.constant 0 : index
      %c0_170 = arith.constant 0 : index
      %316 = vector.load %arg7[%c0_169, %c0_170] : memref<2x32xf32, #tpu.memory_space<vmem>>, vector<2x32xf32>
      %c0_171 = arith.constant 0 : index
      %c0_172 = arith.constant 0 : index
      %317 = vector.load %arg8[%c0_171, %c0_172] : memref<2x32xf32, #tpu.memory_space<vmem>>, vector<2x32xf32>
      %318 = arith.truncf %316 : vector<2x32xf32> to vector<2x32xbf16>
      %cst_173 = arith.constant dense<0.000000e+00> : vector<2x128xf32>
      %319 = tpu.matmul %318, %4, %cst_173 {dimension_numbers = #tpu.dot_dimension_numbers<[1], [0], [0], [1], [0, 0, 1, 1], [], []>} : vector<2x32xbf16>, vector<32x128xbf16>, vector<2x128xf32> -> vector<2x128xf32>
      %320 = vector.broadcast %8 : vector<1x128xf32> to vector<2x128xf32>
      %321 = arith.addf %320, %319 : vector<2x128xf32>
      %c0_174 = arith.constant 0 : index
      %322 = arith.index_cast %315 : i32 to index
      %c0_175 = arith.constant 0 : index
      %c0_176 = arith.constant 0 : index
      %323 = vector.load %arg2[%c0_174, %322, %c0_175, %c0_176] : memref<1x8x2x16xbf16, #tpu.memory_space<vmem>>, vector<1x1x2x16xbf16>
      %324 = vector.shape_cast %323 : vector<1x1x2x16xbf16> to vector<2x16xbf16>
      %cst_177 = arith.constant dense<0.000000e+00> : vector<2x128xf32>
      %325 = tpu.matmul %324, %6, %cst_177 {dimension_numbers = #tpu.dot_dimension_numbers<[1], [0], [0], [1], [0, 0, 1, 1], [], []>} : vector<2x16xbf16>, vector<16x128xbf16>, vector<2x128xf32> -> vector<2x128xf32>
      %326 = arith.addf %321, %325 : vector<2x128xf32>
      %327 = vector.extract_strided_slice %326 {offsets = [0, 0], sizes = [2, 32], strides = [1, 1]} : vector<2x128xf32> to vector<2x32xf32>
      %cst_178 = arith.constant 5.000000e-01 : f32
      %328 = vector.broadcast %cst_178 : f32 to vector<2x32xf32>
      %329 = arith.mulf %328, %327 : vector<2x32xf32>
      %330 = math.tanh %329 : vector<2x32xf32>
      %cst_179 = arith.constant 1.000000e+00 : f32
      %331 = vector.broadcast %cst_179 : f32 to vector<2x32xf32>
      %332 = arith.addf %330, %331 : vector<2x32xf32>
      %cst_180 = arith.constant 5.000000e-01 : f32
      %333 = vector.broadcast %cst_180 : f32 to vector<2x32xf32>
      %334 = arith.mulf %333, %332 : vector<2x32xf32>
      %335 = vector.extract_strided_slice %326 {offsets = [0, 32], sizes = [2, 32], strides = [1, 1]} : vector<2x128xf32> to vector<2x32xf32>
      %cst_181 = arith.constant 5.000000e-01 : f32
      %336 = vector.broadcast %cst_181 : f32 to vector<2x32xf32>
      %337 = arith.mulf %336, %335 : vector<2x32xf32>
      %338 = math.tanh %337 : vector<2x32xf32>
      %cst_182 = arith.constant 1.000000e+00 : f32
      %339 = vector.broadcast %cst_182 : f32 to vector<2x32xf32>
      %340 = arith.addf %338, %339 : vector<2x32xf32>
      %cst_183 = arith.constant 5.000000e-01 : f32
      %341 = vector.broadcast %cst_183 : f32 to vector<2x32xf32>
      %342 = arith.mulf %341, %340 : vector<2x32xf32>
      %343 = vector.extract_strided_slice %326 {offsets = [0, 64], sizes = [2, 32], strides = [1, 1]} : vector<2x128xf32> to vector<2x32xf32>
      %344 = math.tanh %343 : vector<2x32xf32>
      %345 = vector.extract_strided_slice %326 {offsets = [0, 96], sizes = [2, 32], strides = [1, 1]} : vector<2x128xf32> to vector<2x32xf32>
      %cst_184 = arith.constant 5.000000e-01 : f32
      %346 = vector.broadcast %cst_184 : f32 to vector<2x32xf32>
      %347 = arith.mulf %346, %345 : vector<2x32xf32>
      %348 = math.tanh %347 : vector<2x32xf32>
      %cst_185 = arith.constant 1.000000e+00 : f32
      %349 = vector.broadcast %cst_185 : f32 to vector<2x32xf32>
      %350 = arith.addf %348, %349 : vector<2x32xf32>
      %cst_186 = arith.constant 5.000000e-01 : f32
      %351 = vector.broadcast %cst_186 : f32 to vector<2x32xf32>
      %352 = arith.mulf %351, %350 : vector<2x32xf32>
      %353 = arith.mulf %342, %317 : vector<2x32xf32>
      %354 = arith.mulf %334, %344 : vector<2x32xf32>
      %355 = arith.addf %353, %354 : vector<2x32xf32>
      %356 = math.tanh %355 : vector<2x32xf32>
      %357 = arith.mulf %352, %356 : vector<2x32xf32>
      %c0_187 = arith.constant 0 : index
      %c0_188 = arith.constant 0 : index
      %358 = vector.load %arg7[%c0_187, %c0_188] : memref<2x32xf32, #tpu.memory_space<vmem>>, vector<2x32xf32>
      tpu.vector_store %arg7[%c0_187, %c0_188], %357 {strides = array<i32>} : memref<2x32xf32, #tpu.memory_space<vmem>>, vector<2x32xf32>,
      %c0_189 = arith.constant 0 : index
      %c0_190 = arith.constant 0 : index
      %359 = vector.load %arg8[%c0_189, %c0_190] : memref<2x32xf32, #tpu.memory_space<vmem>>, vector<2x32xf32>
      tpu.vector_store %arg8[%c0_189, %c0_190], %355 {strides = array<i32>} : memref<2x32xf32, #tpu.memory_space<vmem>>, vector<2x32xf32>,
      %360 = arith.truncf %357 : vector<2x32xf32> to vector<2x32xbf16>
      %c0_191 = arith.constant 0 : index
      %361 = arith.index_cast %315 : i32 to index
      %c0_192 = arith.constant 0 : index
      %c0_193 = arith.constant 0 : index
      %362 = vector.load %arg6[%c0_191, %361, %c0_192, %c0_193] : memref<1x8x2x32xbf16, #tpu.memory_space<vmem>>, vector<1x1x2x32xbf16>
      %363 = vector.shape_cast %362 : vector<1x1x2x32xbf16> to vector<2x32xbf16>
      %364 = vector.shape_cast %360 : vector<2x32xbf16> to vector<1x1x2x32xbf16>
      tpu.vector_store %arg6[%c0_191, %361, %c0_192, %c0_193], %364 {strides = array<i32>} : memref<1x8x2x32xbf16, #tpu.memory_space<vmem>>, vector<1x1x2x32xbf16>,
      %c7_i32_194 = arith.constant 7 : i32
      %c7_i32_195 = arith.constant 7 : i32
      %365 = arith.subi %c7_i32_195, %c7_i32_194 : i32
      %c0_196 = arith.constant 0 : index
      %c0_197 = arith.constant 0 : index
      %366 = vector.load %arg7[%c0_196, %c0_197] : memref<2x32xf32, #tpu.memory_space<vmem>>, vector<2x32xf32>
      %c0_198 = arith.constant 0 : index
      %c0_199 = arith.constant 0 : index
      %367 = vector.load %arg8[%c0_198, %c0_199] : memref<2x32xf32, #tpu.memory_space<vmem>>, vector<2x32xf32>
      %368 = arith.truncf %366 : vector<2x32xf32> to vector<2x32xbf16>
      %cst_200 = arith.constant dense<0.000000e+00> : vector<2x128xf32>
      %369 = tpu.matmul %368, %4, %cst_200 {dimension_numbers = #tpu.dot_dimension_numbers<[1], [0], [0], [1], [0, 0, 1, 1], [], []>} : vector<2x32xbf16>, vector<32x128xbf16>, vector<2x128xf32> -> vector<2x128xf32>
      %370 = vector.broadcast %8 : vector<1x128xf32> to vector<2x128xf32>
      %371 = arith.addf %370, %369 : vector<2x128xf32>
      %c0_201 = arith.constant 0 : index
      %372 = arith.index_cast %365 : i32 to index
      %c0_202 = arith.constant 0 : index
      %c0_203 = arith.constant 0 : index
      %373 = vector.load %arg2[%c0_201, %372, %c0_202, %c0_203] : memref<1x8x2x16xbf16, #tpu.memory_space<vmem>>, vector<1x1x2x16xbf16>
      %374 = vector.shape_cast %373 : vector<1x1x2x16xbf16> to vector<2x16xbf16>
      %cst_204 = arith.constant dense<0.000000e+00> : vector<2x128xf32>
      %375 = tpu.matmul %374, %6, %cst_204 {dimension_numbers = #tpu.dot_dimension_numbers<[1], [0], [0], [1], [0, 0, 1, 1], [], []>} : vector<2x16xbf16>, vector<16x128xbf16>, vector<2x128xf32> -> vector<2x128xf32>
      %376 = arith.addf %371, %375 : vector<2x128xf32>
      %377 = vector.extract_strided_slice %376 {offsets = [0, 0], sizes = [2, 32], strides = [1, 1]} : vector<2x128xf32> to vector<2x32xf32>
      %cst_205 = arith.constant 5.000000e-01 : f32
      %378 = vector.broadcast %cst_205 : f32 to vector<2x32xf32>
      %379 = arith.mulf %378, %377 : vector<2x32xf32>
      %380 = math.tanh %379 : vector<2x32xf32>
      %cst_206 = arith.constant 1.000000e+00 : f32
      %381 = vector.broadcast %cst_206 : f32 to vector<2x32xf32>
      %382 = arith.addf %380, %381 : vector<2x32xf32>
      %cst_207 = arith.constant 5.000000e-01 : f32
      %383 = vector.broadcast %cst_207 : f32 to vector<2x32xf32>
      %384 = arith.mulf %383, %382 : vector<2x32xf32>
      %385 = vector.extract_strided_slice %376 {offsets = [0, 32], sizes = [2, 32], strides = [1, 1]} : vector<2x128xf32> to vector<2x32xf32>
      %cst_208 = arith.constant 5.000000e-01 : f32
      %386 = vector.broadcast %cst_208 : f32 to vector<2x32xf32>
      %387 = arith.mulf %386, %385 : vector<2x32xf32>
      %388 = math.tanh %387 : vector<2x32xf32>
      %cst_209 = arith.constant 1.000000e+00 : f32
      %389 = vector.broadcast %cst_209 : f32 to vector<2x32xf32>
      %390 = arith.addf %388, %389 : vector<2x32xf32>
      %cst_210 = arith.constant 5.000000e-01 : f32
      %391 = vector.broadcast %cst_210 : f32 to vector<2x32xf32>
      %392 = arith.mulf %391, %390 : vector<2x32xf32>
      %393 = vector.extract_strided_slice %376 {offsets = [0, 64], sizes = [2, 32], strides = [1, 1]} : vector<2x128xf32> to vector<2x32xf32>
      %394 = math.tanh %393 : vector<2x32xf32>
      %395 = vector.extract_strided_slice %376 {offsets = [0, 96], sizes = [2, 32], strides = [1, 1]} : vector<2x128xf32> to vector<2x32xf32>
      %cst_211 = arith.constant 5.000000e-01 : f32
      %396 = vector.broadcast %cst_211 : f32 to vector<2x32xf32>
      %397 = arith.mulf %396, %395 : vector<2x32xf32>
      %398 = math.tanh %397 : vector<2x32xf32>
      %cst_212 = arith.constant 1.000000e+00 : f32
      %399 = vector.broadcast %cst_212 : f32 to vector<2x32xf32>
      %400 = arith.addf %398, %399 : vector<2x32xf32>
      %cst_213 = arith.constant 5.000000e-01 : f32
      %401 = vector.broadcast %cst_213 : f32 to vector<2x32xf32>
      %402 = arith.mulf %401, %400 : vector<2x32xf32>
      %403 = arith.mulf %392, %367 : vector<2x32xf32>
      %404 = arith.mulf %384, %394 : vector<2x32xf32>
      %405 = arith.addf %403, %404 : vector<2x32xf32>
      %406 = math.tanh %405 : vector<2x32xf32>
      %407 = arith.mulf %402, %406 : vector<2x32xf32>
      %c0_214 = arith.constant 0 : index
      %c0_215 = arith.constant 0 : index
      %408 = vector.load %arg7[%c0_214, %c0_215] : memref<2x32xf32, #tpu.memory_space<vmem>>, vector<2x32xf32>
      tpu.vector_store %arg7[%c0_214, %c0_215], %407 {strides = array<i32>} : memref<2x32xf32, #tpu.memory_space<vmem>>, vector<2x32xf32>,
      %c0_216 = arith.constant 0 : index
      %c0_217 = arith.constant 0 : index
      %409 = vector.load %arg8[%c0_216, %c0_217] : memref<2x32xf32, #tpu.memory_space<vmem>>, vector<2x32xf32>
      tpu.vector_store %arg8[%c0_216, %c0_217], %405 {strides = array<i32>} : memref<2x32xf32, #tpu.memory_space<vmem>>, vector<2x32xf32>,
      %410 = arith.truncf %407 : vector<2x32xf32> to vector<2x32xbf16>
      %c0_218 = arith.constant 0 : index
      %411 = arith.index_cast %365 : i32 to index
      %c0_219 = arith.constant 0 : index
      %c0_220 = arith.constant 0 : index
      %412 = vector.load %arg6[%c0_218, %411, %c0_219, %c0_220] : memref<1x8x2x32xbf16, #tpu.memory_space<vmem>>, vector<1x1x2x32xbf16>
      %413 = vector.shape_cast %412 : vector<1x1x2x32xbf16> to vector<2x32xbf16>
      %414 = vector.shape_cast %410 : vector<2x32xbf16> to vector<1x1x2x32xbf16>
      tpu.vector_store %arg6[%c0_218, %411, %c0_219, %c0_220], %414 {strides = array<i32>} : memref<1x8x2x32xbf16, #tpu.memory_space<vmem>>, vector<1x1x2x32xbf16>,
      %c8_i32 = arith.constant 8 : i32
    } else {
    }
    return
  }
  func.func @transform_0(%arg0: i32, %arg1: i32) -> (i32, i32, i32, i32) {
    %c1_i32 = arith.constant 1 : i32
    %0 = arith.subi %c1_i32, %arg0 : i32
    %1 = arith.muli %arg1, %0 : i32
    %c0_i32 = arith.constant 0 : i32
    %2 = arith.subi %c0_i32, %arg1 : i32
    %3 = arith.muli %2, %arg0 : i32
    %4 = arith.addi %1, %3 : i32
    %c0_i32_0 = arith.constant 0 : i32
    %c0_i32_1 = arith.constant 0 : i32
    %c0_i32_2 = arith.constant 0 : i32
    %c0_i32_3 = arith.constant 0 : i32
    return %c0_i32_0, %4, %c0_i32_1, %c0_i32_2 : i32, i32, i32, i32
  }
  func.func @transform_1(%arg0: i32, %arg1: i32) -> (i32, i32, i32) {
    %c0_i32 = arith.constant 0 : i32
    %c0_i32_0 = arith.constant 0 : i32
    %c0_i32_1 = arith.constant 0 : i32
    return %arg0, %c0_i32, %c0_i32_0 : i32, i32, i32
  }
  func.func @transform_2(%arg0: i32, %arg1: i32) -> (i32, i32, i32) {
    %c0_i32 = arith.constant 0 : i32
    %c0_i32_0 = arith.constant 0 : i32
    %c0_i32_1 = arith.constant 0 : i32
    return %arg0, %c0_i32, %c0_i32_0 : i32, i32, i32
  }
  func.func @transform_3(%arg0: i32, %arg1: i32) -> (i32, i32, i32) {
    %c0_i32 = arith.constant 0 : i32
    %c0_i32_0 = arith.constant 0 : i32
    %c0_i32_1 = arith.constant 0 : i32
    return %arg0, %c0_i32, %c0_i32_0 : i32, i32, i32
  }
  func.func @transform_4(%arg0: i32, %arg1: i32) -> (i32, i32, i32, i32) {
    %c1_i32 = arith.constant 1 : i32
    %0 = arith.subi %c1_i32, %arg0 : i32
    %1 = arith.muli %arg1, %0 : i32
    %c0_i32 = arith.constant 0 : i32
    %2 = arith.subi %c0_i32, %arg1 : i32
    %3 = arith.muli %2, %arg0 : i32
    %4 = arith.addi %1, %3 : i32
    %c0_i32_0 = arith.constant 0 : i32
    %c0_i32_1 = arith.constant 0 : i32
    %c0_i32_2 = arith.constant 0 : i32
    return %arg0, %4, %c0_i32_0, %c0_i32_1 : i32, i32, i32, i32
  }
}

module attributes {stable_mosaic.version = 11 : i64} {
  func.func @kernel(%arg0: i32, %arg1: i32, %arg2: memref<1x8x2x32xbf16, #tpu.memory_space<vmem>>, %arg3: memref<1x8x2x32xbf16, #tpu.memory_space<vmem>>, %arg4: memref<1x32x128xbf16, #tpu.memory_space<vmem>>, %arg5: memref<1x32x128xbf16, #tpu.memory_space<vmem>>, %arg6: memref<1x32x128xbf16, #tpu.memory_space<vmem>>, %arg7: memref<1x1x128xf32, #tpu.memory_space<vmem>>, %arg8: memref<1x8x2x32xbf16, #tpu.memory_space<vmem>>, %arg9: memref<2x32xf32, #tpu.memory_space<vmem>>, %arg10: memref<2x32xf32, #tpu.memory_space<vmem>>) attributes {dimension_semantics = [#tpu.dimension_semantics<parallel>, #tpu.dimension_semantics<arbitrary>], iteration_bounds = array<i64: 2, 1>, scalar_prefetch = 0 : i64, scratch_operands = 2 : i64, tpu.core_type = #tpu.core_type<tc>, window_params = [{transform_indices = @transform_0, window_bounds = array<i64: 1, 8, 2, 32>}, {transform_indices = @transform_1, window_bounds = array<i64: 1, 8, 2, 32>}, {transform_indices = @transform_2, window_bounds = array<i64: 1, 32, 128>}, {transform_indices = @transform_3, window_bounds = array<i64: 1, 32, 128>}, {transform_indices = @transform_4, window_bounds = array<i64: 1, 32, 128>}, {transform_indices = @transform_5, window_bounds = array<i64: 1, 1, 128>}, {transform_indices = @transform_6, window_bounds = array<i64: 1, 8, 2, 32>}]} {
    %c0_i32 = arith.constant 0 : i32
    %0 = arith.cmpi eq, %arg1, %c0_i32 : i32
    %1 = arith.extui %0 : i1 to i32
    %c0_i32_0 = arith.constant 0 : i32
    %2 = arith.cmpi ne, %1, %c0_i32_0 : i32
    scf.if %2 {
      %cst = arith.constant 0.000000e+00 : f32
      %17 = vector.broadcast %cst : f32 to vector<2x32xf32>
      %c0_15 = arith.constant 0 : index
      %c0_16 = arith.constant 0 : index
      %18 = vector.load %arg9[%c0_15, %c0_16] : memref<2x32xf32, #tpu.memory_space<vmem>>, vector<2x32xf32>
      tpu.vector_store %arg9[%c0_15, %c0_16], %17 {strides = array<i32>} : memref<2x32xf32, #tpu.memory_space<vmem>>, vector<2x32xf32>,
      %cst_17 = arith.constant 0.000000e+00 : f32
      %19 = vector.broadcast %cst_17 : f32 to vector<2x32xf32>
      %c0_18 = arith.constant 0 : index
      %c0_19 = arith.constant 0 : index
      %20 = vector.load %arg10[%c0_18, %c0_19] : memref<2x32xf32, #tpu.memory_space<vmem>>, vector<2x32xf32>
      tpu.vector_store %arg10[%c0_18, %c0_19], %19 {strides = array<i32>} : memref<2x32xf32, #tpu.memory_space<vmem>>, vector<2x32xf32>,
    } else {
    }
    %c0 = arith.constant 0 : index
    %c0_1 = arith.constant 0 : index
    %c0_2 = arith.constant 0 : index
    %3 = vector.load %arg6[%c0, %c0_1, %c0_2] : memref<1x32x128xbf16, #tpu.memory_space<vmem>>, vector<1x32x128xbf16>
    %4 = vector.shape_cast %3 : vector<1x32x128xbf16> to vector<32x128xbf16>
    %c0_3 = arith.constant 0 : index
    %c0_4 = arith.constant 0 : index
    %c0_5 = arith.constant 0 : index
    %5 = vector.load %arg4[%c0_3, %c0_4, %c0_5] : memref<1x32x128xbf16, #tpu.memory_space<vmem>>, vector<1x32x128xbf16>
    %6 = vector.shape_cast %5 : vector<1x32x128xbf16> to vector<32x128xbf16>
    %c0_6 = arith.constant 0 : index
    %c0_7 = arith.constant 0 : index
    %c0_8 = arith.constant 0 : index
    %7 = vector.load %arg5[%c0_6, %c0_7, %c0_8] : memref<1x32x128xbf16, #tpu.memory_space<vmem>>, vector<1x32x128xbf16>
    %8 = vector.shape_cast %7 : vector<1x32x128xbf16> to vector<32x128xbf16>
    %c0_9 = arith.constant 0 : index
    %c0_10 = arith.constant 0 : index
    %c0_11 = arith.constant 0 : index
    %9 = vector.load %arg7[%c0_9, %c0_10, %c0_11] : memref<1x1x128xf32, #tpu.memory_space<vmem>>, vector<1x1x128xf32>
    %10 = vector.shape_cast %9 : vector<1x1x128xf32> to vector<1x128xf32>
    %c0_i32_12 = arith.constant 0 : i32
    %11 = arith.cmpi eq, %arg0, %c0_i32_12 : i32
    %12 = arith.extui %11 : i1 to i32
    %c0_i32_13 = arith.constant 0 : i32
    %13 = arith.cmpi ne, %12, %c0_i32_13 : i32
    scf.if %13 {
      %c0_i32_15 = arith.constant 0 : i32
      %c0_16 = arith.constant 0 : index
      %c0_17 = arith.constant 0 : index
      %17 = vector.load %arg9[%c0_16, %c0_17] : memref<2x32xf32, #tpu.memory_space<vmem>>, vector<2x32xf32>
      %c0_18 = arith.constant 0 : index
      %c0_19 = arith.constant 0 : index
      %18 = vector.load %arg10[%c0_18, %c0_19] : memref<2x32xf32, #tpu.memory_space<vmem>>, vector<2x32xf32>
      %19 = arith.truncf %17 : vector<2x32xf32> to vector<2x32xbf16>
      %cst = arith.constant dense<0.000000e+00> : vector<2x128xf32>
      %20 = tpu.matmul %19, %4, %cst {dimension_numbers = #tpu.dot_dimension_numbers<[1], [0], [0], [1], [0, 0, 1, 1], [], []>} : vector<2x32xbf16>, vector<32x128xbf16>, vector<2x128xf32> -> vector<2x128xf32>
      %21 = vector.broadcast %10 : vector<1x128xf32> to vector<2x128xf32>
      %22 = arith.addf %21, %20 : vector<2x128xf32>
      %c0_20 = arith.constant 0 : index
      %23 = arith.index_cast %c0_i32_15 : i32 to index
      %c0_21 = arith.constant 0 : index
      %c0_22 = arith.constant 0 : index
      %24 = vector.load %arg2[%c0_20, %23, %c0_21, %c0_22] : memref<1x8x2x32xbf16, #tpu.memory_space<vmem>>, vector<1x1x2x32xbf16>
      %25 = vector.shape_cast %24 : vector<1x1x2x32xbf16> to vector<2x32xbf16>
      %cst_23 = arith.constant dense<0.000000e+00> : vector<2x128xf32>
      %26 = tpu.matmul %25, %6, %cst_23 {dimension_numbers = #tpu.dot_dimension_numbers<[1], [0], [0], [1], [0, 0, 1, 1], [], []>} : vector<2x32xbf16>, vector<32x128xbf16>, vector<2x128xf32> -> vector<2x128xf32>
      %27 = arith.addf %22, %26 : vector<2x128xf32>
      %c0_24 = arith.constant 0 : index
      %28 = arith.index_cast %c0_i32_15 : i32 to index
      %c0_25 = arith.constant 0 : index
      %c0_26 = arith.constant 0 : index
      %29 = vector.load %arg3[%c0_24, %28, %c0_25, %c0_26] : memref<1x8x2x32xbf16, #tpu.memory_space<vmem>>, vector<1x1x2x32xbf16>
      %30 = vector.shape_cast %29 : vector<1x1x2x32xbf16> to vector<2x32xbf16>
      %cst_27 = arith.constant dense<0.000000e+00> : vector<2x128xf32>
      %31 = tpu.matmul %30, %8, %cst_27 {dimension_numbers = #tpu.dot_dimension_numbers<[1], [0], [0], [1], [0, 0, 1, 1], [], []>} : vector<2x32xbf16>, vector<32x128xbf16>, vector<2x128xf32> -> vector<2x128xf32>
      %32 = arith.addf %27, %31 : vector<2x128xf32>
      %33 = vector.extract_strided_slice %32 {offsets = [0, 0], sizes = [2, 32], strides = [1, 1]} : vector<2x128xf32> to vector<2x32xf32>
      %cst_28 = arith.constant 5.000000e-01 : f32
      %34 = vector.broadcast %cst_28 : f32 to vector<2x32xf32>
      %35 = arith.mulf %34, %33 : vector<2x32xf32>
      %36 = math.tanh %35 : vector<2x32xf32>
      %cst_29 = arith.constant 1.000000e+00 : f32
      %37 = vector.broadcast %cst_29 : f32 to vector<2x32xf32>
      %38 = arith.addf %36, %37 : vector<2x32xf32>
      %cst_30 = arith.constant 5.000000e-01 : f32
      %39 = vector.broadcast %cst_30 : f32 to vector<2x32xf32>
      %40 = arith.mulf %39, %38 : vector<2x32xf32>
      %41 = vector.extract_strided_slice %32 {offsets = [0, 32], sizes = [2, 32], strides = [1, 1]} : vector<2x128xf32> to vector<2x32xf32>
      %cst_31 = arith.constant 5.000000e-01 : f32
      %42 = vector.broadcast %cst_31 : f32 to vector<2x32xf32>
      %43 = arith.mulf %42, %41 : vector<2x32xf32>
      %44 = math.tanh %43 : vector<2x32xf32>
      %cst_32 = arith.constant 1.000000e+00 : f32
      %45 = vector.broadcast %cst_32 : f32 to vector<2x32xf32>
      %46 = arith.addf %44, %45 : vector<2x32xf32>
      %cst_33 = arith.constant 5.000000e-01 : f32
      %47 = vector.broadcast %cst_33 : f32 to vector<2x32xf32>
      %48 = arith.mulf %47, %46 : vector<2x32xf32>
      %49 = vector.extract_strided_slice %32 {offsets = [0, 64], sizes = [2, 32], strides = [1, 1]} : vector<2x128xf32> to vector<2x32xf32>
      %50 = math.tanh %49 : vector<2x32xf32>
      %51 = vector.extract_strided_slice %32 {offsets = [0, 96], sizes = [2, 32], strides = [1, 1]} : vector<2x128xf32> to vector<2x32xf32>
      %cst_34 = arith.constant 5.000000e-01 : f32
      %52 = vector.broadcast %cst_34 : f32 to vector<2x32xf32>
      %53 = arith.mulf %52, %51 : vector<2x32xf32>
      %54 = math.tanh %53 : vector<2x32xf32>
      %cst_35 = arith.constant 1.000000e+00 : f32
      %55 = vector.broadcast %cst_35 : f32 to vector<2x32xf32>
      %56 = arith.addf %54, %55 : vector<2x32xf32>
      %cst_36 = arith.constant 5.000000e-01 : f32
      %57 = vector.broadcast %cst_36 : f32 to vector<2x32xf32>
      %58 = arith.mulf %57, %56 : vector<2x32xf32>
      %59 = arith.mulf %48, %18 : vector<2x32xf32>
      %60 = arith.mulf %40, %50 : vector<2x32xf32>
      %61 = arith.addf %59, %60 : vector<2x32xf32>
      %62 = math.tanh %61 : vector<2x32xf32>
      %63 = arith.mulf %58, %62 : vector<2x32xf32>
      %c0_37 = arith.constant 0 : index
      %c0_38 = arith.constant 0 : index
      %64 = vector.load %arg9[%c0_37, %c0_38] : memref<2x32xf32, #tpu.memory_space<vmem>>, vector<2x32xf32>
      tpu.vector_store %arg9[%c0_37, %c0_38], %63 {strides = array<i32>} : memref<2x32xf32, #tpu.memory_space<vmem>>, vector<2x32xf32>,
      %c0_39 = arith.constant 0 : index
      %c0_40 = arith.constant 0 : index
      %65 = vector.load %arg10[%c0_39, %c0_40] : memref<2x32xf32, #tpu.memory_space<vmem>>, vector<2x32xf32>
      tpu.vector_store %arg10[%c0_39, %c0_40], %61 {strides = array<i32>} : memref<2x32xf32, #tpu.memory_space<vmem>>, vector<2x32xf32>,
      %66 = arith.truncf %63 : vector<2x32xf32> to vector<2x32xbf16>
      %c0_41 = arith.constant 0 : index
      %67 = arith.index_cast %c0_i32_15 : i32 to index
      %c0_42 = arith.constant 0 : index
      %c0_43 = arith.constant 0 : index
      %68 = vector.load %arg8[%c0_41, %67, %c0_42, %c0_43] : memref<1x8x2x32xbf16, #tpu.memory_space<vmem>>, vector<1x1x2x32xbf16>
      %69 = vector.shape_cast %68 : vector<1x1x2x32xbf16> to vector<2x32xbf16>
      %70 = vector.shape_cast %66 : vector<2x32xbf16> to vector<1x1x2x32xbf16>
      tpu.vector_store %arg8[%c0_41, %67, %c0_42, %c0_43], %70 {strides = array<i32>} : memref<1x8x2x32xbf16, #tpu.memory_space<vmem>>, vector<1x1x2x32xbf16>,
      %c1_i32_44 = arith.constant 1 : i32
      %c0_45 = arith.constant 0 : index
      %c0_46 = arith.constant 0 : index
      %71 = vector.load %arg9[%c0_45, %c0_46] : memref<2x32xf32, #tpu.memory_space<vmem>>, vector<2x32xf32>
      %c0_47 = arith.constant 0 : index
      %c0_48 = arith.constant 0 : index
      %72 = vector.load %arg10[%c0_47, %c0_48] : memref<2x32xf32, #tpu.memory_space<vmem>>, vector<2x32xf32>
      %73 = arith.truncf %71 : vector<2x32xf32> to vector<2x32xbf16>
      %cst_49 = arith.constant dense<0.000000e+00> : vector<2x128xf32>
      %74 = tpu.matmul %73, %4, %cst_49 {dimension_numbers = #tpu.dot_dimension_numbers<[1], [0], [0], [1], [0, 0, 1, 1], [], []>} : vector<2x32xbf16>, vector<32x128xbf16>, vector<2x128xf32> -> vector<2x128xf32>
      %75 = vector.broadcast %10 : vector<1x128xf32> to vector<2x128xf32>
      %76 = arith.addf %75, %74 : vector<2x128xf32>
      %c0_50 = arith.constant 0 : index
      %77 = arith.index_cast %c1_i32_44 : i32 to index
      %c0_51 = arith.constant 0 : index
      %c0_52 = arith.constant 0 : index
      %78 = vector.load %arg2[%c0_50, %77, %c0_51, %c0_52] : memref<1x8x2x32xbf16, #tpu.memory_space<vmem>>, vector<1x1x2x32xbf16>
      %79 = vector.shape_cast %78 : vector<1x1x2x32xbf16> to vector<2x32xbf16>
      %cst_53 = arith.constant dense<0.000000e+00> : vector<2x128xf32>
      %80 = tpu.matmul %79, %6, %cst_53 {dimension_numbers = #tpu.dot_dimension_numbers<[1], [0], [0], [1], [0, 0, 1, 1], [], []>} : vector<2x32xbf16>, vector<32x128xbf16>, vector<2x128xf32> -> vector<2x128xf32>
      %81 = arith.addf %76, %80 : vector<2x128xf32>
      %c0_54 = arith.constant 0 : index
      %82 = arith.index_cast %c1_i32_44 : i32 to index
      %c0_55 = arith.constant 0 : index
      %c0_56 = arith.constant 0 : index
      %83 = vector.load %arg3[%c0_54, %82, %c0_55, %c0_56] : memref<1x8x2x32xbf16, #tpu.memory_space<vmem>>, vector<1x1x2x32xbf16>
      %84 = vector.shape_cast %83 : vector<1x1x2x32xbf16> to vector<2x32xbf16>
      %cst_57 = arith.constant dense<0.000000e+00> : vector<2x128xf32>
      %85 = tpu.matmul %84, %8, %cst_57 {dimension_numbers = #tpu.dot_dimension_numbers<[1], [0], [0], [1], [0, 0, 1, 1], [], []>} : vector<2x32xbf16>, vector<32x128xbf16>, vector<2x128xf32> -> vector<2x128xf32>
      %86 = arith.addf %81, %85 : vector<2x128xf32>
      %87 = vector.extract_strided_slice %86 {offsets = [0, 0], sizes = [2, 32], strides = [1, 1]} : vector<2x128xf32> to vector<2x32xf32>
      %cst_58 = arith.constant 5.000000e-01 : f32
      %88 = vector.broadcast %cst_58 : f32 to vector<2x32xf32>
      %89 = arith.mulf %88, %87 : vector<2x32xf32>
      %90 = math.tanh %89 : vector<2x32xf32>
      %cst_59 = arith.constant 1.000000e+00 : f32
      %91 = vector.broadcast %cst_59 : f32 to vector<2x32xf32>
      %92 = arith.addf %90, %91 : vector<2x32xf32>
      %cst_60 = arith.constant 5.000000e-01 : f32
      %93 = vector.broadcast %cst_60 : f32 to vector<2x32xf32>
      %94 = arith.mulf %93, %92 : vector<2x32xf32>
      %95 = vector.extract_strided_slice %86 {offsets = [0, 32], sizes = [2, 32], strides = [1, 1]} : vector<2x128xf32> to vector<2x32xf32>
      %cst_61 = arith.constant 5.000000e-01 : f32
      %96 = vector.broadcast %cst_61 : f32 to vector<2x32xf32>
      %97 = arith.mulf %96, %95 : vector<2x32xf32>
      %98 = math.tanh %97 : vector<2x32xf32>
      %cst_62 = arith.constant 1.000000e+00 : f32
      %99 = vector.broadcast %cst_62 : f32 to vector<2x32xf32>
      %100 = arith.addf %98, %99 : vector<2x32xf32>
      %cst_63 = arith.constant 5.000000e-01 : f32
      %101 = vector.broadcast %cst_63 : f32 to vector<2x32xf32>
      %102 = arith.mulf %101, %100 : vector<2x32xf32>
      %103 = vector.extract_strided_slice %86 {offsets = [0, 64], sizes = [2, 32], strides = [1, 1]} : vector<2x128xf32> to vector<2x32xf32>
      %104 = math.tanh %103 : vector<2x32xf32>
      %105 = vector.extract_strided_slice %86 {offsets = [0, 96], sizes = [2, 32], strides = [1, 1]} : vector<2x128xf32> to vector<2x32xf32>
      %cst_64 = arith.constant 5.000000e-01 : f32
      %106 = vector.broadcast %cst_64 : f32 to vector<2x32xf32>
      %107 = arith.mulf %106, %105 : vector<2x32xf32>
      %108 = math.tanh %107 : vector<2x32xf32>
      %cst_65 = arith.constant 1.000000e+00 : f32
      %109 = vector.broadcast %cst_65 : f32 to vector<2x32xf32>
      %110 = arith.addf %108, %109 : vector<2x32xf32>
      %cst_66 = arith.constant 5.000000e-01 : f32
      %111 = vector.broadcast %cst_66 : f32 to vector<2x32xf32>
      %112 = arith.mulf %111, %110 : vector<2x32xf32>
      %113 = arith.mulf %102, %72 : vector<2x32xf32>
      %114 = arith.mulf %94, %104 : vector<2x32xf32>
      %115 = arith.addf %113, %114 : vector<2x32xf32>
      %116 = math.tanh %115 : vector<2x32xf32>
      %117 = arith.mulf %112, %116 : vector<2x32xf32>
      %c0_67 = arith.constant 0 : index
      %c0_68 = arith.constant 0 : index
      %118 = vector.load %arg9[%c0_67, %c0_68] : memref<2x32xf32, #tpu.memory_space<vmem>>, vector<2x32xf32>
      tpu.vector_store %arg9[%c0_67, %c0_68], %117 {strides = array<i32>} : memref<2x32xf32, #tpu.memory_space<vmem>>, vector<2x32xf32>,
      %c0_69 = arith.constant 0 : index
      %c0_70 = arith.constant 0 : index
      %119 = vector.load %arg10[%c0_69, %c0_70] : memref<2x32xf32, #tpu.memory_space<vmem>>, vector<2x32xf32>
      tpu.vector_store %arg10[%c0_69, %c0_70], %115 {strides = array<i32>} : memref<2x32xf32, #tpu.memory_space<vmem>>, vector<2x32xf32>,
      %120 = arith.truncf %117 : vector<2x32xf32> to vector<2x32xbf16>
      %c0_71 = arith.constant 0 : index
      %121 = arith.index_cast %c1_i32_44 : i32 to index
      %c0_72 = arith.constant 0 : index
      %c0_73 = arith.constant 0 : index
      %122 = vector.load %arg8[%c0_71, %121, %c0_72, %c0_73] : memref<1x8x2x32xbf16, #tpu.memory_space<vmem>>, vector<1x1x2x32xbf16>
      %123 = vector.shape_cast %122 : vector<1x1x2x32xbf16> to vector<2x32xbf16>
      %124 = vector.shape_cast %120 : vector<2x32xbf16> to vector<1x1x2x32xbf16>
      tpu.vector_store %arg8[%c0_71, %121, %c0_72, %c0_73], %124 {strides = array<i32>} : memref<1x8x2x32xbf16, #tpu.memory_space<vmem>>, vector<1x1x2x32xbf16>,
      %c2_i32 = arith.constant 2 : i32
      %c0_74 = arith.constant 0 : index
      %c0_75 = arith.constant 0 : index
      %125 = vector.load %arg9[%c0_74, %c0_75] : memref<2x32xf32, #tpu.memory_space<vmem>>, vector<2x32xf32>
      %c0_76 = arith.constant 0 : index
      %c0_77 = arith.constant 0 : index
      %126 = vector.load %arg10[%c0_76, %c0_77] : memref<2x32xf32, #tpu.memory_space<vmem>>, vector<2x32xf32>
      %127 = arith.truncf %125 : vector<2x32xf32> to vector<2x32xbf16>
      %cst_78 = arith.constant dense<0.000000e+00> : vector<2x128xf32>
      %128 = tpu.matmul %127, %4, %cst_78 {dimension_numbers = #tpu.dot_dimension_numbers<[1], [0], [0], [1], [0, 0, 1, 1], [], []>} : vector<2x32xbf16>, vector<32x128xbf16>, vector<2x128xf32> -> vector<2x128xf32>
      %129 = vector.broadcast %10 : vector<1x128xf32> to vector<2x128xf32>
      %130 = arith.addf %129, %128 : vector<2x128xf32>
      %c0_79 = arith.constant 0 : index
      %131 = arith.index_cast %c2_i32 : i32 to index
      %c0_80 = arith.constant 0 : index
      %c0_81 = arith.constant 0 : index
      %132 = vector.load %arg2[%c0_79, %131, %c0_80, %c0_81] : memref<1x8x2x32xbf16, #tpu.memory_space<vmem>>, vector<1x1x2x32xbf16>
      %133 = vector.shape_cast %132 : vector<1x1x2x32xbf16> to vector<2x32xbf16>
      %cst_82 = arith.constant dense<0.000000e+00> : vector<2x128xf32>
      %134 = tpu.matmul %133, %6, %cst_82 {dimension_numbers = #tpu.dot_dimension_numbers<[1], [0], [0], [1], [0, 0, 1, 1], [], []>} : vector<2x32xbf16>, vector<32x128xbf16>, vector<2x128xf32> -> vector<2x128xf32>
      %135 = arith.addf %130, %134 : vector<2x128xf32>
      %c0_83 = arith.constant 0 : index
      %136 = arith.index_cast %c2_i32 : i32 to index
      %c0_84 = arith.constant 0 : index
      %c0_85 = arith.constant 0 : index
      %137 = vector.load %arg3[%c0_83, %136, %c0_84, %c0_85] : memref<1x8x2x32xbf16, #tpu.memory_space<vmem>>, vector<1x1x2x32xbf16>
      %138 = vector.shape_cast %137 : vector<1x1x2x32xbf16> to vector<2x32xbf16>
      %cst_86 = arith.constant dense<0.000000e+00> : vector<2x128xf32>
      %139 = tpu.matmul %138, %8, %cst_86 {dimension_numbers = #tpu.dot_dimension_numbers<[1], [0], [0], [1], [0, 0, 1, 1], [], []>} : vector<2x32xbf16>, vector<32x128xbf16>, vector<2x128xf32> -> vector<2x128xf32>
      %140 = arith.addf %135, %139 : vector<2x128xf32>
      %141 = vector.extract_strided_slice %140 {offsets = [0, 0], sizes = [2, 32], strides = [1, 1]} : vector<2x128xf32> to vector<2x32xf32>
      %cst_87 = arith.constant 5.000000e-01 : f32
      %142 = vector.broadcast %cst_87 : f32 to vector<2x32xf32>
      %143 = arith.mulf %142, %141 : vector<2x32xf32>
      %144 = math.tanh %143 : vector<2x32xf32>
      %cst_88 = arith.constant 1.000000e+00 : f32
      %145 = vector.broadcast %cst_88 : f32 to vector<2x32xf32>
      %146 = arith.addf %144, %145 : vector<2x32xf32>
      %cst_89 = arith.constant 5.000000e-01 : f32
      %147 = vector.broadcast %cst_89 : f32 to vector<2x32xf32>
      %148 = arith.mulf %147, %146 : vector<2x32xf32>
      %149 = vector.extract_strided_slice %140 {offsets = [0, 32], sizes = [2, 32], strides = [1, 1]} : vector<2x128xf32> to vector<2x32xf32>
      %cst_90 = arith.constant 5.000000e-01 : f32
      %150 = vector.broadcast %cst_90 : f32 to vector<2x32xf32>
      %151 = arith.mulf %150, %149 : vector<2x32xf32>
      %152 = math.tanh %151 : vector<2x32xf32>
      %cst_91 = arith.constant 1.000000e+00 : f32
      %153 = vector.broadcast %cst_91 : f32 to vector<2x32xf32>
      %154 = arith.addf %152, %153 : vector<2x32xf32>
      %cst_92 = arith.constant 5.000000e-01 : f32
      %155 = vector.broadcast %cst_92 : f32 to vector<2x32xf32>
      %156 = arith.mulf %155, %154 : vector<2x32xf32>
      %157 = vector.extract_strided_slice %140 {offsets = [0, 64], sizes = [2, 32], strides = [1, 1]} : vector<2x128xf32> to vector<2x32xf32>
      %158 = math.tanh %157 : vector<2x32xf32>
      %159 = vector.extract_strided_slice %140 {offsets = [0, 96], sizes = [2, 32], strides = [1, 1]} : vector<2x128xf32> to vector<2x32xf32>
      %cst_93 = arith.constant 5.000000e-01 : f32
      %160 = vector.broadcast %cst_93 : f32 to vector<2x32xf32>
      %161 = arith.mulf %160, %159 : vector<2x32xf32>
      %162 = math.tanh %161 : vector<2x32xf32>
      %cst_94 = arith.constant 1.000000e+00 : f32
      %163 = vector.broadcast %cst_94 : f32 to vector<2x32xf32>
      %164 = arith.addf %162, %163 : vector<2x32xf32>
      %cst_95 = arith.constant 5.000000e-01 : f32
      %165 = vector.broadcast %cst_95 : f32 to vector<2x32xf32>
      %166 = arith.mulf %165, %164 : vector<2x32xf32>
      %167 = arith.mulf %156, %126 : vector<2x32xf32>
      %168 = arith.mulf %148, %158 : vector<2x32xf32>
      %169 = arith.addf %167, %168 : vector<2x32xf32>
      %170 = math.tanh %169 : vector<2x32xf32>
      %171 = arith.mulf %166, %170 : vector<2x32xf32>
      %c0_96 = arith.constant 0 : index
      %c0_97 = arith.constant 0 : index
      %172 = vector.load %arg9[%c0_96, %c0_97] : memref<2x32xf32, #tpu.memory_space<vmem>>, vector<2x32xf32>
      tpu.vector_store %arg9[%c0_96, %c0_97], %171 {strides = array<i32>} : memref<2x32xf32, #tpu.memory_space<vmem>>, vector<2x32xf32>,
      %c0_98 = arith.constant 0 : index
      %c0_99 = arith.constant 0 : index
      %173 = vector.load %arg10[%c0_98, %c0_99] : memref<2x32xf32, #tpu.memory_space<vmem>>, vector<2x32xf32>
      tpu.vector_store %arg10[%c0_98, %c0_99], %169 {strides = array<i32>} : memref<2x32xf32, #tpu.memory_space<vmem>>, vector<2x32xf32>,
      %174 = arith.truncf %171 : vector<2x32xf32> to vector<2x32xbf16>
      %c0_100 = arith.constant 0 : index
      %175 = arith.index_cast %c2_i32 : i32 to index
      %c0_101 = arith.constant 0 : index
      %c0_102 = arith.constant 0 : index
      %176 = vector.load %arg8[%c0_100, %175, %c0_101, %c0_102] : memref<1x8x2x32xbf16, #tpu.memory_space<vmem>>, vector<1x1x2x32xbf16>
      %177 = vector.shape_cast %176 : vector<1x1x2x32xbf16> to vector<2x32xbf16>
      %178 = vector.shape_cast %174 : vector<2x32xbf16> to vector<1x1x2x32xbf16>
      tpu.vector_store %arg8[%c0_100, %175, %c0_101, %c0_102], %178 {strides = array<i32>} : memref<1x8x2x32xbf16, #tpu.memory_space<vmem>>, vector<1x1x2x32xbf16>,
      %c3_i32 = arith.constant 3 : i32
      %c0_103 = arith.constant 0 : index
      %c0_104 = arith.constant 0 : index
      %179 = vector.load %arg9[%c0_103, %c0_104] : memref<2x32xf32, #tpu.memory_space<vmem>>, vector<2x32xf32>
      %c0_105 = arith.constant 0 : index
      %c0_106 = arith.constant 0 : index
      %180 = vector.load %arg10[%c0_105, %c0_106] : memref<2x32xf32, #tpu.memory_space<vmem>>, vector<2x32xf32>
      %181 = arith.truncf %179 : vector<2x32xf32> to vector<2x32xbf16>
      %cst_107 = arith.constant dense<0.000000e+00> : vector<2x128xf32>
      %182 = tpu.matmul %181, %4, %cst_107 {dimension_numbers = #tpu.dot_dimension_numbers<[1], [0], [0], [1], [0, 0, 1, 1], [], []>} : vector<2x32xbf16>, vector<32x128xbf16>, vector<2x128xf32> -> vector<2x128xf32>
      %183 = vector.broadcast %10 : vector<1x128xf32> to vector<2x128xf32>
      %184 = arith.addf %183, %182 : vector<2x128xf32>
      %c0_108 = arith.constant 0 : index
      %185 = arith.index_cast %c3_i32 : i32 to index
      %c0_109 = arith.constant 0 : index
      %c0_110 = arith.constant 0 : index
      %186 = vector.load %arg2[%c0_108, %185, %c0_109, %c0_110] : memref<1x8x2x32xbf16, #tpu.memory_space<vmem>>, vector<1x1x2x32xbf16>
      %187 = vector.shape_cast %186 : vector<1x1x2x32xbf16> to vector<2x32xbf16>
      %cst_111 = arith.constant dense<0.000000e+00> : vector<2x128xf32>
      %188 = tpu.matmul %187, %6, %cst_111 {dimension_numbers = #tpu.dot_dimension_numbers<[1], [0], [0], [1], [0, 0, 1, 1], [], []>} : vector<2x32xbf16>, vector<32x128xbf16>, vector<2x128xf32> -> vector<2x128xf32>
      %189 = arith.addf %184, %188 : vector<2x128xf32>
      %c0_112 = arith.constant 0 : index
      %190 = arith.index_cast %c3_i32 : i32 to index
      %c0_113 = arith.constant 0 : index
      %c0_114 = arith.constant 0 : index
      %191 = vector.load %arg3[%c0_112, %190, %c0_113, %c0_114] : memref<1x8x2x32xbf16, #tpu.memory_space<vmem>>, vector<1x1x2x32xbf16>
      %192 = vector.shape_cast %191 : vector<1x1x2x32xbf16> to vector<2x32xbf16>
      %cst_115 = arith.constant dense<0.000000e+00> : vector<2x128xf32>
      %193 = tpu.matmul %192, %8, %cst_115 {dimension_numbers = #tpu.dot_dimension_numbers<[1], [0], [0], [1], [0, 0, 1, 1], [], []>} : vector<2x32xbf16>, vector<32x128xbf16>, vector<2x128xf32> -> vector<2x128xf32>
      %194 = arith.addf %189, %193 : vector<2x128xf32>
      %195 = vector.extract_strided_slice %194 {offsets = [0, 0], sizes = [2, 32], strides = [1, 1]} : vector<2x128xf32> to vector<2x32xf32>
      %cst_116 = arith.constant 5.000000e-01 : f32
      %196 = vector.broadcast %cst_116 : f32 to vector<2x32xf32>
      %197 = arith.mulf %196, %195 : vector<2x32xf32>
      %198 = math.tanh %197 : vector<2x32xf32>
      %cst_117 = arith.constant 1.000000e+00 : f32
      %199 = vector.broadcast %cst_117 : f32 to vector<2x32xf32>
      %200 = arith.addf %198, %199 : vector<2x32xf32>
      %cst_118 = arith.constant 5.000000e-01 : f32
      %201 = vector.broadcast %cst_118 : f32 to vector<2x32xf32>
      %202 = arith.mulf %201, %200 : vector<2x32xf32>
      %203 = vector.extract_strided_slice %194 {offsets = [0, 32], sizes = [2, 32], strides = [1, 1]} : vector<2x128xf32> to vector<2x32xf32>
      %cst_119 = arith.constant 5.000000e-01 : f32
      %204 = vector.broadcast %cst_119 : f32 to vector<2x32xf32>
      %205 = arith.mulf %204, %203 : vector<2x32xf32>
      %206 = math.tanh %205 : vector<2x32xf32>
      %cst_120 = arith.constant 1.000000e+00 : f32
      %207 = vector.broadcast %cst_120 : f32 to vector<2x32xf32>
      %208 = arith.addf %206, %207 : vector<2x32xf32>
      %cst_121 = arith.constant 5.000000e-01 : f32
      %209 = vector.broadcast %cst_121 : f32 to vector<2x32xf32>
      %210 = arith.mulf %209, %208 : vector<2x32xf32>
      %211 = vector.extract_strided_slice %194 {offsets = [0, 64], sizes = [2, 32], strides = [1, 1]} : vector<2x128xf32> to vector<2x32xf32>
      %212 = math.tanh %211 : vector<2x32xf32>
      %213 = vector.extract_strided_slice %194 {offsets = [0, 96], sizes = [2, 32], strides = [1, 1]} : vector<2x128xf32> to vector<2x32xf32>
      %cst_122 = arith.constant 5.000000e-01 : f32
      %214 = vector.broadcast %cst_122 : f32 to vector<2x32xf32>
      %215 = arith.mulf %214, %213 : vector<2x32xf32>
      %216 = math.tanh %215 : vector<2x32xf32>
      %cst_123 = arith.constant 1.000000e+00 : f32
      %217 = vector.broadcast %cst_123 : f32 to vector<2x32xf32>
      %218 = arith.addf %216, %217 : vector<2x32xf32>
      %cst_124 = arith.constant 5.000000e-01 : f32
      %219 = vector.broadcast %cst_124 : f32 to vector<2x32xf32>
      %220 = arith.mulf %219, %218 : vector<2x32xf32>
      %221 = arith.mulf %210, %180 : vector<2x32xf32>
      %222 = arith.mulf %202, %212 : vector<2x32xf32>
      %223 = arith.addf %221, %222 : vector<2x32xf32>
      %224 = math.tanh %223 : vector<2x32xf32>
      %225 = arith.mulf %220, %224 : vector<2x32xf32>
      %c0_125 = arith.constant 0 : index
      %c0_126 = arith.constant 0 : index
      %226 = vector.load %arg9[%c0_125, %c0_126] : memref<2x32xf32, #tpu.memory_space<vmem>>, vector<2x32xf32>
      tpu.vector_store %arg9[%c0_125, %c0_126], %225 {strides = array<i32>} : memref<2x32xf32, #tpu.memory_space<vmem>>, vector<2x32xf32>,
      %c0_127 = arith.constant 0 : index
      %c0_128 = arith.constant 0 : index
      %227 = vector.load %arg10[%c0_127, %c0_128] : memref<2x32xf32, #tpu.memory_space<vmem>>, vector<2x32xf32>
      tpu.vector_store %arg10[%c0_127, %c0_128], %223 {strides = array<i32>} : memref<2x32xf32, #tpu.memory_space<vmem>>, vector<2x32xf32>,
      %228 = arith.truncf %225 : vector<2x32xf32> to vector<2x32xbf16>
      %c0_129 = arith.constant 0 : index
      %229 = arith.index_cast %c3_i32 : i32 to index
      %c0_130 = arith.constant 0 : index
      %c0_131 = arith.constant 0 : index
      %230 = vector.load %arg8[%c0_129, %229, %c0_130, %c0_131] : memref<1x8x2x32xbf16, #tpu.memory_space<vmem>>, vector<1x1x2x32xbf16>
      %231 = vector.shape_cast %230 : vector<1x1x2x32xbf16> to vector<2x32xbf16>
      %232 = vector.shape_cast %228 : vector<2x32xbf16> to vector<1x1x2x32xbf16>
      tpu.vector_store %arg8[%c0_129, %229, %c0_130, %c0_131], %232 {strides = array<i32>} : memref<1x8x2x32xbf16, #tpu.memory_space<vmem>>, vector<1x1x2x32xbf16>,
      %c4_i32 = arith.constant 4 : i32
      %c0_132 = arith.constant 0 : index
      %c0_133 = arith.constant 0 : index
      %233 = vector.load %arg9[%c0_132, %c0_133] : memref<2x32xf32, #tpu.memory_space<vmem>>, vector<2x32xf32>
      %c0_134 = arith.constant 0 : index
      %c0_135 = arith.constant 0 : index
      %234 = vector.load %arg10[%c0_134, %c0_135] : memref<2x32xf32, #tpu.memory_space<vmem>>, vector<2x32xf32>
      %235 = arith.truncf %233 : vector<2x32xf32> to vector<2x32xbf16>
      %cst_136 = arith.constant dense<0.000000e+00> : vector<2x128xf32>
      %236 = tpu.matmul %235, %4, %cst_136 {dimension_numbers = #tpu.dot_dimension_numbers<[1], [0], [0], [1], [0, 0, 1, 1], [], []>} : vector<2x32xbf16>, vector<32x128xbf16>, vector<2x128xf32> -> vector<2x128xf32>
      %237 = vector.broadcast %10 : vector<1x128xf32> to vector<2x128xf32>
      %238 = arith.addf %237, %236 : vector<2x128xf32>
      %c0_137 = arith.constant 0 : index
      %239 = arith.index_cast %c4_i32 : i32 to index
      %c0_138 = arith.constant 0 : index
      %c0_139 = arith.constant 0 : index
      %240 = vector.load %arg2[%c0_137, %239, %c0_138, %c0_139] : memref<1x8x2x32xbf16, #tpu.memory_space<vmem>>, vector<1x1x2x32xbf16>
      %241 = vector.shape_cast %240 : vector<1x1x2x32xbf16> to vector<2x32xbf16>
      %cst_140 = arith.constant dense<0.000000e+00> : vector<2x128xf32>
      %242 = tpu.matmul %241, %6, %cst_140 {dimension_numbers = #tpu.dot_dimension_numbers<[1], [0], [0], [1], [0, 0, 1, 1], [], []>} : vector<2x32xbf16>, vector<32x128xbf16>, vector<2x128xf32> -> vector<2x128xf32>
      %243 = arith.addf %238, %242 : vector<2x128xf32>
      %c0_141 = arith.constant 0 : index
      %244 = arith.index_cast %c4_i32 : i32 to index
      %c0_142 = arith.constant 0 : index
      %c0_143 = arith.constant 0 : index
      %245 = vector.load %arg3[%c0_141, %244, %c0_142, %c0_143] : memref<1x8x2x32xbf16, #tpu.memory_space<vmem>>, vector<1x1x2x32xbf16>
      %246 = vector.shape_cast %245 : vector<1x1x2x32xbf16> to vector<2x32xbf16>
      %cst_144 = arith.constant dense<0.000000e+00> : vector<2x128xf32>
      %247 = tpu.matmul %246, %8, %cst_144 {dimension_numbers = #tpu.dot_dimension_numbers<[1], [0], [0], [1], [0, 0, 1, 1], [], []>} : vector<2x32xbf16>, vector<32x128xbf16>, vector<2x128xf32> -> vector<2x128xf32>
      %248 = arith.addf %243, %247 : vector<2x128xf32>
      %249 = vector.extract_strided_slice %248 {offsets = [0, 0], sizes = [2, 32], strides = [1, 1]} : vector<2x128xf32> to vector<2x32xf32>
      %cst_145 = arith.constant 5.000000e-01 : f32
      %250 = vector.broadcast %cst_145 : f32 to vector<2x32xf32>
      %251 = arith.mulf %250, %249 : vector<2x32xf32>
      %252 = math.tanh %251 : vector<2x32xf32>
      %cst_146 = arith.constant 1.000000e+00 : f32
      %253 = vector.broadcast %cst_146 : f32 to vector<2x32xf32>
      %254 = arith.addf %252, %253 : vector<2x32xf32>
      %cst_147 = arith.constant 5.000000e-01 : f32
      %255 = vector.broadcast %cst_147 : f32 to vector<2x32xf32>
      %256 = arith.mulf %255, %254 : vector<2x32xf32>
      %257 = vector.extract_strided_slice %248 {offsets = [0, 32], sizes = [2, 32], strides = [1, 1]} : vector<2x128xf32> to vector<2x32xf32>
      %cst_148 = arith.constant 5.000000e-01 : f32
      %258 = vector.broadcast %cst_148 : f32 to vector<2x32xf32>
      %259 = arith.mulf %258, %257 : vector<2x32xf32>
      %260 = math.tanh %259 : vector<2x32xf32>
      %cst_149 = arith.constant 1.000000e+00 : f32
      %261 = vector.broadcast %cst_149 : f32 to vector<2x32xf32>
      %262 = arith.addf %260, %261 : vector<2x32xf32>
      %cst_150 = arith.constant 5.000000e-01 : f32
      %263 = vector.broadcast %cst_150 : f32 to vector<2x32xf32>
      %264 = arith.mulf %263, %262 : vector<2x32xf32>
      %265 = vector.extract_strided_slice %248 {offsets = [0, 64], sizes = [2, 32], strides = [1, 1]} : vector<2x128xf32> to vector<2x32xf32>
      %266 = math.tanh %265 : vector<2x32xf32>
      %267 = vector.extract_strided_slice %248 {offsets = [0, 96], sizes = [2, 32], strides = [1, 1]} : vector<2x128xf32> to vector<2x32xf32>
      %cst_151 = arith.constant 5.000000e-01 : f32
      %268 = vector.broadcast %cst_151 : f32 to vector<2x32xf32>
      %269 = arith.mulf %268, %267 : vector<2x32xf32>
      %270 = math.tanh %269 : vector<2x32xf32>
      %cst_152 = arith.constant 1.000000e+00 : f32
      %271 = vector.broadcast %cst_152 : f32 to vector<2x32xf32>
      %272 = arith.addf %270, %271 : vector<2x32xf32>
      %cst_153 = arith.constant 5.000000e-01 : f32
      %273 = vector.broadcast %cst_153 : f32 to vector<2x32xf32>
      %274 = arith.mulf %273, %272 : vector<2x32xf32>
      %275 = arith.mulf %264, %234 : vector<2x32xf32>
      %276 = arith.mulf %256, %266 : vector<2x32xf32>
      %277 = arith.addf %275, %276 : vector<2x32xf32>
      %278 = math.tanh %277 : vector<2x32xf32>
      %279 = arith.mulf %274, %278 : vector<2x32xf32>
      %c0_154 = arith.constant 0 : index
      %c0_155 = arith.constant 0 : index
      %280 = vector.load %arg9[%c0_154, %c0_155] : memref<2x32xf32, #tpu.memory_space<vmem>>, vector<2x32xf32>
      tpu.vector_store %arg9[%c0_154, %c0_155], %279 {strides = array<i32>} : memref<2x32xf32, #tpu.memory_space<vmem>>, vector<2x32xf32>,
      %c0_156 = arith.constant 0 : index
      %c0_157 = arith.constant 0 : index
      %281 = vector.load %arg10[%c0_156, %c0_157] : memref<2x32xf32, #tpu.memory_space<vmem>>, vector<2x32xf32>
      tpu.vector_store %arg10[%c0_156, %c0_157], %277 {strides = array<i32>} : memref<2x32xf32, #tpu.memory_space<vmem>>, vector<2x32xf32>,
      %282 = arith.truncf %279 : vector<2x32xf32> to vector<2x32xbf16>
      %c0_158 = arith.constant 0 : index
      %283 = arith.index_cast %c4_i32 : i32 to index
      %c0_159 = arith.constant 0 : index
      %c0_160 = arith.constant 0 : index
      %284 = vector.load %arg8[%c0_158, %283, %c0_159, %c0_160] : memref<1x8x2x32xbf16, #tpu.memory_space<vmem>>, vector<1x1x2x32xbf16>
      %285 = vector.shape_cast %284 : vector<1x1x2x32xbf16> to vector<2x32xbf16>
      %286 = vector.shape_cast %282 : vector<2x32xbf16> to vector<1x1x2x32xbf16>
      tpu.vector_store %arg8[%c0_158, %283, %c0_159, %c0_160], %286 {strides = array<i32>} : memref<1x8x2x32xbf16, #tpu.memory_space<vmem>>, vector<1x1x2x32xbf16>,
      %c5_i32 = arith.constant 5 : i32
      %c0_161 = arith.constant 0 : index
      %c0_162 = arith.constant 0 : index
      %287 = vector.load %arg9[%c0_161, %c0_162] : memref<2x32xf32, #tpu.memory_space<vmem>>, vector<2x32xf32>
      %c0_163 = arith.constant 0 : index
      %c0_164 = arith.constant 0 : index
      %288 = vector.load %arg10[%c0_163, %c0_164] : memref<2x32xf32, #tpu.memory_space<vmem>>, vector<2x32xf32>
      %289 = arith.truncf %287 : vector<2x32xf32> to vector<2x32xbf16>
      %cst_165 = arith.constant dense<0.000000e+00> : vector<2x128xf32>
      %290 = tpu.matmul %289, %4, %cst_165 {dimension_numbers = #tpu.dot_dimension_numbers<[1], [0], [0], [1], [0, 0, 1, 1], [], []>} : vector<2x32xbf16>, vector<32x128xbf16>, vector<2x128xf32> -> vector<2x128xf32>
      %291 = vector.broadcast %10 : vector<1x128xf32> to vector<2x128xf32>
      %292 = arith.addf %291, %290 : vector<2x128xf32>
      %c0_166 = arith.constant 0 : index
      %293 = arith.index_cast %c5_i32 : i32 to index
      %c0_167 = arith.constant 0 : index
      %c0_168 = arith.constant 0 : index
      %294 = vector.load %arg2[%c0_166, %293, %c0_167, %c0_168] : memref<1x8x2x32xbf16, #tpu.memory_space<vmem>>, vector<1x1x2x32xbf16>
      %295 = vector.shape_cast %294 : vector<1x1x2x32xbf16> to vector<2x32xbf16>
      %cst_169 = arith.constant dense<0.000000e+00> : vector<2x128xf32>
      %296 = tpu.matmul %295, %6, %cst_169 {dimension_numbers = #tpu.dot_dimension_numbers<[1], [0], [0], [1], [0, 0, 1, 1], [], []>} : vector<2x32xbf16>, vector<32x128xbf16>, vector<2x128xf32> -> vector<2x128xf32>
      %297 = arith.addf %292, %296 : vector<2x128xf32>
      %c0_170 = arith.constant 0 : index
      %298 = arith.index_cast %c5_i32 : i32 to index
      %c0_171 = arith.constant 0 : index
      %c0_172 = arith.constant 0 : index
      %299 = vector.load %arg3[%c0_170, %298, %c0_171, %c0_172] : memref<1x8x2x32xbf16, #tpu.memory_space<vmem>>, vector<1x1x2x32xbf16>
      %300 = vector.shape_cast %299 : vector<1x1x2x32xbf16> to vector<2x32xbf16>
      %cst_173 = arith.constant dense<0.000000e+00> : vector<2x128xf32>
      %301 = tpu.matmul %300, %8, %cst_173 {dimension_numbers = #tpu.dot_dimension_numbers<[1], [0], [0], [1], [0, 0, 1, 1], [], []>} : vector<2x32xbf16>, vector<32x128xbf16>, vector<2x128xf32> -> vector<2x128xf32>
      %302 = arith.addf %297, %301 : vector<2x128xf32>
      %303 = vector.extract_strided_slice %302 {offsets = [0, 0], sizes = [2, 32], strides = [1, 1]} : vector<2x128xf32> to vector<2x32xf32>
      %cst_174 = arith.constant 5.000000e-01 : f32
      %304 = vector.broadcast %cst_174 : f32 to vector<2x32xf32>
      %305 = arith.mulf %304, %303 : vector<2x32xf32>
      %306 = math.tanh %305 : vector<2x32xf32>
      %cst_175 = arith.constant 1.000000e+00 : f32
      %307 = vector.broadcast %cst_175 : f32 to vector<2x32xf32>
      %308 = arith.addf %306, %307 : vector<2x32xf32>
      %cst_176 = arith.constant 5.000000e-01 : f32
      %309 = vector.broadcast %cst_176 : f32 to vector<2x32xf32>
      %310 = arith.mulf %309, %308 : vector<2x32xf32>
      %311 = vector.extract_strided_slice %302 {offsets = [0, 32], sizes = [2, 32], strides = [1, 1]} : vector<2x128xf32> to vector<2x32xf32>
      %cst_177 = arith.constant 5.000000e-01 : f32
      %312 = vector.broadcast %cst_177 : f32 to vector<2x32xf32>
      %313 = arith.mulf %312, %311 : vector<2x32xf32>
      %314 = math.tanh %313 : vector<2x32xf32>
      %cst_178 = arith.constant 1.000000e+00 : f32
      %315 = vector.broadcast %cst_178 : f32 to vector<2x32xf32>
      %316 = arith.addf %314, %315 : vector<2x32xf32>
      %cst_179 = arith.constant 5.000000e-01 : f32
      %317 = vector.broadcast %cst_179 : f32 to vector<2x32xf32>
      %318 = arith.mulf %317, %316 : vector<2x32xf32>
      %319 = vector.extract_strided_slice %302 {offsets = [0, 64], sizes = [2, 32], strides = [1, 1]} : vector<2x128xf32> to vector<2x32xf32>
      %320 = math.tanh %319 : vector<2x32xf32>
      %321 = vector.extract_strided_slice %302 {offsets = [0, 96], sizes = [2, 32], strides = [1, 1]} : vector<2x128xf32> to vector<2x32xf32>
      %cst_180 = arith.constant 5.000000e-01 : f32
      %322 = vector.broadcast %cst_180 : f32 to vector<2x32xf32>
      %323 = arith.mulf %322, %321 : vector<2x32xf32>
      %324 = math.tanh %323 : vector<2x32xf32>
      %cst_181 = arith.constant 1.000000e+00 : f32
      %325 = vector.broadcast %cst_181 : f32 to vector<2x32xf32>
      %326 = arith.addf %324, %325 : vector<2x32xf32>
      %cst_182 = arith.constant 5.000000e-01 : f32
      %327 = vector.broadcast %cst_182 : f32 to vector<2x32xf32>
      %328 = arith.mulf %327, %326 : vector<2x32xf32>
      %329 = arith.mulf %318, %288 : vector<2x32xf32>
      %330 = arith.mulf %310, %320 : vector<2x32xf32>
      %331 = arith.addf %329, %330 : vector<2x32xf32>
      %332 = math.tanh %331 : vector<2x32xf32>
      %333 = arith.mulf %328, %332 : vector<2x32xf32>
      %c0_183 = arith.constant 0 : index
      %c0_184 = arith.constant 0 : index
      %334 = vector.load %arg9[%c0_183, %c0_184] : memref<2x32xf32, #tpu.memory_space<vmem>>, vector<2x32xf32>
      tpu.vector_store %arg9[%c0_183, %c0_184], %333 {strides = array<i32>} : memref<2x32xf32, #tpu.memory_space<vmem>>, vector<2x32xf32>,
      %c0_185 = arith.constant 0 : index
      %c0_186 = arith.constant 0 : index
      %335 = vector.load %arg10[%c0_185, %c0_186] : memref<2x32xf32, #tpu.memory_space<vmem>>, vector<2x32xf32>
      tpu.vector_store %arg10[%c0_185, %c0_186], %331 {strides = array<i32>} : memref<2x32xf32, #tpu.memory_space<vmem>>, vector<2x32xf32>,
      %336 = arith.truncf %333 : vector<2x32xf32> to vector<2x32xbf16>
      %c0_187 = arith.constant 0 : index
      %337 = arith.index_cast %c5_i32 : i32 to index
      %c0_188 = arith.constant 0 : index
      %c0_189 = arith.constant 0 : index
      %338 = vector.load %arg8[%c0_187, %337, %c0_188, %c0_189] : memref<1x8x2x32xbf16, #tpu.memory_space<vmem>>, vector<1x1x2x32xbf16>
      %339 = vector.shape_cast %338 : vector<1x1x2x32xbf16> to vector<2x32xbf16>
      %340 = vector.shape_cast %336 : vector<2x32xbf16> to vector<1x1x2x32xbf16>
      tpu.vector_store %arg8[%c0_187, %337, %c0_188, %c0_189], %340 {strides = array<i32>} : memref<1x8x2x32xbf16, #tpu.memory_space<vmem>>, vector<1x1x2x32xbf16>,
      %c6_i32 = arith.constant 6 : i32
      %c0_190 = arith.constant 0 : index
      %c0_191 = arith.constant 0 : index
      %341 = vector.load %arg9[%c0_190, %c0_191] : memref<2x32xf32, #tpu.memory_space<vmem>>, vector<2x32xf32>
      %c0_192 = arith.constant 0 : index
      %c0_193 = arith.constant 0 : index
      %342 = vector.load %arg10[%c0_192, %c0_193] : memref<2x32xf32, #tpu.memory_space<vmem>>, vector<2x32xf32>
      %343 = arith.truncf %341 : vector<2x32xf32> to vector<2x32xbf16>
      %cst_194 = arith.constant dense<0.000000e+00> : vector<2x128xf32>
      %344 = tpu.matmul %343, %4, %cst_194 {dimension_numbers = #tpu.dot_dimension_numbers<[1], [0], [0], [1], [0, 0, 1, 1], [], []>} : vector<2x32xbf16>, vector<32x128xbf16>, vector<2x128xf32> -> vector<2x128xf32>
      %345 = vector.broadcast %10 : vector<1x128xf32> to vector<2x128xf32>
      %346 = arith.addf %345, %344 : vector<2x128xf32>
      %c0_195 = arith.constant 0 : index
      %347 = arith.index_cast %c6_i32 : i32 to index
      %c0_196 = arith.constant 0 : index
      %c0_197 = arith.constant 0 : index
      %348 = vector.load %arg2[%c0_195, %347, %c0_196, %c0_197] : memref<1x8x2x32xbf16, #tpu.memory_space<vmem>>, vector<1x1x2x32xbf16>
      %349 = vector.shape_cast %348 : vector<1x1x2x32xbf16> to vector<2x32xbf16>
      %cst_198 = arith.constant dense<0.000000e+00> : vector<2x128xf32>
      %350 = tpu.matmul %349, %6, %cst_198 {dimension_numbers = #tpu.dot_dimension_numbers<[1], [0], [0], [1], [0, 0, 1, 1], [], []>} : vector<2x32xbf16>, vector<32x128xbf16>, vector<2x128xf32> -> vector<2x128xf32>
      %351 = arith.addf %346, %350 : vector<2x128xf32>
      %c0_199 = arith.constant 0 : index
      %352 = arith.index_cast %c6_i32 : i32 to index
      %c0_200 = arith.constant 0 : index
      %c0_201 = arith.constant 0 : index
      %353 = vector.load %arg3[%c0_199, %352, %c0_200, %c0_201] : memref<1x8x2x32xbf16, #tpu.memory_space<vmem>>, vector<1x1x2x32xbf16>
      %354 = vector.shape_cast %353 : vector<1x1x2x32xbf16> to vector<2x32xbf16>
      %cst_202 = arith.constant dense<0.000000e+00> : vector<2x128xf32>
      %355 = tpu.matmul %354, %8, %cst_202 {dimension_numbers = #tpu.dot_dimension_numbers<[1], [0], [0], [1], [0, 0, 1, 1], [], []>} : vector<2x32xbf16>, vector<32x128xbf16>, vector<2x128xf32> -> vector<2x128xf32>
      %356 = arith.addf %351, %355 : vector<2x128xf32>
      %357 = vector.extract_strided_slice %356 {offsets = [0, 0], sizes = [2, 32], strides = [1, 1]} : vector<2x128xf32> to vector<2x32xf32>
      %cst_203 = arith.constant 5.000000e-01 : f32
      %358 = vector.broadcast %cst_203 : f32 to vector<2x32xf32>
      %359 = arith.mulf %358, %357 : vector<2x32xf32>
      %360 = math.tanh %359 : vector<2x32xf32>
      %cst_204 = arith.constant 1.000000e+00 : f32
      %361 = vector.broadcast %cst_204 : f32 to vector<2x32xf32>
      %362 = arith.addf %360, %361 : vector<2x32xf32>
      %cst_205 = arith.constant 5.000000e-01 : f32
      %363 = vector.broadcast %cst_205 : f32 to vector<2x32xf32>
      %364 = arith.mulf %363, %362 : vector<2x32xf32>
      %365 = vector.extract_strided_slice %356 {offsets = [0, 32], sizes = [2, 32], strides = [1, 1]} : vector<2x128xf32> to vector<2x32xf32>
      %cst_206 = arith.constant 5.000000e-01 : f32
      %366 = vector.broadcast %cst_206 : f32 to vector<2x32xf32>
      %367 = arith.mulf %366, %365 : vector<2x32xf32>
      %368 = math.tanh %367 : vector<2x32xf32>
      %cst_207 = arith.constant 1.000000e+00 : f32
      %369 = vector.broadcast %cst_207 : f32 to vector<2x32xf32>
      %370 = arith.addf %368, %369 : vector<2x32xf32>
      %cst_208 = arith.constant 5.000000e-01 : f32
      %371 = vector.broadcast %cst_208 : f32 to vector<2x32xf32>
      %372 = arith.mulf %371, %370 : vector<2x32xf32>
      %373 = vector.extract_strided_slice %356 {offsets = [0, 64], sizes = [2, 32], strides = [1, 1]} : vector<2x128xf32> to vector<2x32xf32>
      %374 = math.tanh %373 : vector<2x32xf32>
      %375 = vector.extract_strided_slice %356 {offsets = [0, 96], sizes = [2, 32], strides = [1, 1]} : vector<2x128xf32> to vector<2x32xf32>
      %cst_209 = arith.constant 5.000000e-01 : f32
      %376 = vector.broadcast %cst_209 : f32 to vector<2x32xf32>
      %377 = arith.mulf %376, %375 : vector<2x32xf32>
      %378 = math.tanh %377 : vector<2x32xf32>
      %cst_210 = arith.constant 1.000000e+00 : f32
      %379 = vector.broadcast %cst_210 : f32 to vector<2x32xf32>
      %380 = arith.addf %378, %379 : vector<2x32xf32>
      %cst_211 = arith.constant 5.000000e-01 : f32
      %381 = vector.broadcast %cst_211 : f32 to vector<2x32xf32>
      %382 = arith.mulf %381, %380 : vector<2x32xf32>
      %383 = arith.mulf %372, %342 : vector<2x32xf32>
      %384 = arith.mulf %364, %374 : vector<2x32xf32>
      %385 = arith.addf %383, %384 : vector<2x32xf32>
      %386 = math.tanh %385 : vector<2x32xf32>
      %387 = arith.mulf %382, %386 : vector<2x32xf32>
      %c0_212 = arith.constant 0 : index
      %c0_213 = arith.constant 0 : index
      %388 = vector.load %arg9[%c0_212, %c0_213] : memref<2x32xf32, #tpu.memory_space<vmem>>, vector<2x32xf32>
      tpu.vector_store %arg9[%c0_212, %c0_213], %387 {strides = array<i32>} : memref<2x32xf32, #tpu.memory_space<vmem>>, vector<2x32xf32>,
      %c0_214 = arith.constant 0 : index
      %c0_215 = arith.constant 0 : index
      %389 = vector.load %arg10[%c0_214, %c0_215] : memref<2x32xf32, #tpu.memory_space<vmem>>, vector<2x32xf32>
      tpu.vector_store %arg10[%c0_214, %c0_215], %385 {strides = array<i32>} : memref<2x32xf32, #tpu.memory_space<vmem>>, vector<2x32xf32>,
      %390 = arith.truncf %387 : vector<2x32xf32> to vector<2x32xbf16>
      %c0_216 = arith.constant 0 : index
      %391 = arith.index_cast %c6_i32 : i32 to index
      %c0_217 = arith.constant 0 : index
      %c0_218 = arith.constant 0 : index
      %392 = vector.load %arg8[%c0_216, %391, %c0_217, %c0_218] : memref<1x8x2x32xbf16, #tpu.memory_space<vmem>>, vector<1x1x2x32xbf16>
      %393 = vector.shape_cast %392 : vector<1x1x2x32xbf16> to vector<2x32xbf16>
      %394 = vector.shape_cast %390 : vector<2x32xbf16> to vector<1x1x2x32xbf16>
      tpu.vector_store %arg8[%c0_216, %391, %c0_217, %c0_218], %394 {strides = array<i32>} : memref<1x8x2x32xbf16, #tpu.memory_space<vmem>>, vector<1x1x2x32xbf16>,
      %c7_i32 = arith.constant 7 : i32
      %c0_219 = arith.constant 0 : index
      %c0_220 = arith.constant 0 : index
      %395 = vector.load %arg9[%c0_219, %c0_220] : memref<2x32xf32, #tpu.memory_space<vmem>>, vector<2x32xf32>
      %c0_221 = arith.constant 0 : index
      %c0_222 = arith.constant 0 : index
      %396 = vector.load %arg10[%c0_221, %c0_222] : memref<2x32xf32, #tpu.memory_space<vmem>>, vector<2x32xf32>
      %397 = arith.truncf %395 : vector<2x32xf32> to vector<2x32xbf16>
      %cst_223 = arith.constant dense<0.000000e+00> : vector<2x128xf32>
      %398 = tpu.matmul %397, %4, %cst_223 {dimension_numbers = #tpu.dot_dimension_numbers<[1], [0], [0], [1], [0, 0, 1, 1], [], []>} : vector<2x32xbf16>, vector<32x128xbf16>, vector<2x128xf32> -> vector<2x128xf32>
      %399 = vector.broadcast %10 : vector<1x128xf32> to vector<2x128xf32>
      %400 = arith.addf %399, %398 : vector<2x128xf32>
      %c0_224 = arith.constant 0 : index
      %401 = arith.index_cast %c7_i32 : i32 to index
      %c0_225 = arith.constant 0 : index
      %c0_226 = arith.constant 0 : index
      %402 = vector.load %arg2[%c0_224, %401, %c0_225, %c0_226] : memref<1x8x2x32xbf16, #tpu.memory_space<vmem>>, vector<1x1x2x32xbf16>
      %403 = vector.shape_cast %402 : vector<1x1x2x32xbf16> to vector<2x32xbf16>
      %cst_227 = arith.constant dense<0.000000e+00> : vector<2x128xf32>
      %404 = tpu.matmul %403, %6, %cst_227 {dimension_numbers = #tpu.dot_dimension_numbers<[1], [0], [0], [1], [0, 0, 1, 1], [], []>} : vector<2x32xbf16>, vector<32x128xbf16>, vector<2x128xf32> -> vector<2x128xf32>
      %405 = arith.addf %400, %404 : vector<2x128xf32>
      %c0_228 = arith.constant 0 : index
      %406 = arith.index_cast %c7_i32 : i32 to index
      %c0_229 = arith.constant 0 : index
      %c0_230 = arith.constant 0 : index
      %407 = vector.load %arg3[%c0_228, %406, %c0_229, %c0_230] : memref<1x8x2x32xbf16, #tpu.memory_space<vmem>>, vector<1x1x2x32xbf16>
      %408 = vector.shape_cast %407 : vector<1x1x2x32xbf16> to vector<2x32xbf16>
      %cst_231 = arith.constant dense<0.000000e+00> : vector<2x128xf32>
      %409 = tpu.matmul %408, %8, %cst_231 {dimension_numbers = #tpu.dot_dimension_numbers<[1], [0], [0], [1], [0, 0, 1, 1], [], []>} : vector<2x32xbf16>, vector<32x128xbf16>, vector<2x128xf32> -> vector<2x128xf32>
      %410 = arith.addf %405, %409 : vector<2x128xf32>
      %411 = vector.extract_strided_slice %410 {offsets = [0, 0], sizes = [2, 32], strides = [1, 1]} : vector<2x128xf32> to vector<2x32xf32>
      %cst_232 = arith.constant 5.000000e-01 : f32
      %412 = vector.broadcast %cst_232 : f32 to vector<2x32xf32>
      %413 = arith.mulf %412, %411 : vector<2x32xf32>
      %414 = math.tanh %413 : vector<2x32xf32>
      %cst_233 = arith.constant 1.000000e+00 : f32
      %415 = vector.broadcast %cst_233 : f32 to vector<2x32xf32>
      %416 = arith.addf %414, %415 : vector<2x32xf32>
      %cst_234 = arith.constant 5.000000e-01 : f32
      %417 = vector.broadcast %cst_234 : f32 to vector<2x32xf32>
      %418 = arith.mulf %417, %416 : vector<2x32xf32>
      %419 = vector.extract_strided_slice %410 {offsets = [0, 32], sizes = [2, 32], strides = [1, 1]} : vector<2x128xf32> to vector<2x32xf32>
      %cst_235 = arith.constant 5.000000e-01 : f32
      %420 = vector.broadcast %cst_235 : f32 to vector<2x32xf32>
      %421 = arith.mulf %420, %419 : vector<2x32xf32>
      %422 = math.tanh %421 : vector<2x32xf32>
      %cst_236 = arith.constant 1.000000e+00 : f32
      %423 = vector.broadcast %cst_236 : f32 to vector<2x32xf32>
      %424 = arith.addf %422, %423 : vector<2x32xf32>
      %cst_237 = arith.constant 5.000000e-01 : f32
      %425 = vector.broadcast %cst_237 : f32 to vector<2x32xf32>
      %426 = arith.mulf %425, %424 : vector<2x32xf32>
      %427 = vector.extract_strided_slice %410 {offsets = [0, 64], sizes = [2, 32], strides = [1, 1]} : vector<2x128xf32> to vector<2x32xf32>
      %428 = math.tanh %427 : vector<2x32xf32>
      %429 = vector.extract_strided_slice %410 {offsets = [0, 96], sizes = [2, 32], strides = [1, 1]} : vector<2x128xf32> to vector<2x32xf32>
      %cst_238 = arith.constant 5.000000e-01 : f32
      %430 = vector.broadcast %cst_238 : f32 to vector<2x32xf32>
      %431 = arith.mulf %430, %429 : vector<2x32xf32>
      %432 = math.tanh %431 : vector<2x32xf32>
      %cst_239 = arith.constant 1.000000e+00 : f32
      %433 = vector.broadcast %cst_239 : f32 to vector<2x32xf32>
      %434 = arith.addf %432, %433 : vector<2x32xf32>
      %cst_240 = arith.constant 5.000000e-01 : f32
      %435 = vector.broadcast %cst_240 : f32 to vector<2x32xf32>
      %436 = arith.mulf %435, %434 : vector<2x32xf32>
      %437 = arith.mulf %426, %396 : vector<2x32xf32>
      %438 = arith.mulf %418, %428 : vector<2x32xf32>
      %439 = arith.addf %437, %438 : vector<2x32xf32>
      %440 = math.tanh %439 : vector<2x32xf32>
      %441 = arith.mulf %436, %440 : vector<2x32xf32>
      %c0_241 = arith.constant 0 : index
      %c0_242 = arith.constant 0 : index
      %442 = vector.load %arg9[%c0_241, %c0_242] : memref<2x32xf32, #tpu.memory_space<vmem>>, vector<2x32xf32>
      tpu.vector_store %arg9[%c0_241, %c0_242], %441 {strides = array<i32>} : memref<2x32xf32, #tpu.memory_space<vmem>>, vector<2x32xf32>,
      %c0_243 = arith.constant 0 : index
      %c0_244 = arith.constant 0 : index
      %443 = vector.load %arg10[%c0_243, %c0_244] : memref<2x32xf32, #tpu.memory_space<vmem>>, vector<2x32xf32>
      tpu.vector_store %arg10[%c0_243, %c0_244], %439 {strides = array<i32>} : memref<2x32xf32, #tpu.memory_space<vmem>>, vector<2x32xf32>,
      %444 = arith.truncf %441 : vector<2x32xf32> to vector<2x32xbf16>
      %c0_245 = arith.constant 0 : index
      %445 = arith.index_cast %c7_i32 : i32 to index
      %c0_246 = arith.constant 0 : index
      %c0_247 = arith.constant 0 : index
      %446 = vector.load %arg8[%c0_245, %445, %c0_246, %c0_247] : memref<1x8x2x32xbf16, #tpu.memory_space<vmem>>, vector<1x1x2x32xbf16>
      %447 = vector.shape_cast %446 : vector<1x1x2x32xbf16> to vector<2x32xbf16>
      %448 = vector.shape_cast %444 : vector<2x32xbf16> to vector<1x1x2x32xbf16>
      tpu.vector_store %arg8[%c0_245, %445, %c0_246, %c0_247], %448 {strides = array<i32>} : memref<1x8x2x32xbf16, #tpu.memory_space<vmem>>, vector<1x1x2x32xbf16>,
      %c8_i32 = arith.constant 8 : i32
    } else {
    }
    %c1_i32 = arith.constant 1 : i32
    %14 = arith.cmpi eq, %arg0, %c1_i32 : i32
    %15 = arith.extui %14 : i1 to i32
    %c0_i32_14 = arith.constant 0 : i32
    %16 = arith.cmpi ne, %15, %c0_i32_14 : i32
    scf.if %16 {
      %c0_i32_15 = arith.constant 0 : i32
      %c7_i32 = arith.constant 7 : i32
      %17 = arith.subi %c7_i32, %c0_i32_15 : i32
      %c0_16 = arith.constant 0 : index
      %c0_17 = arith.constant 0 : index
      %18 = vector.load %arg9[%c0_16, %c0_17] : memref<2x32xf32, #tpu.memory_space<vmem>>, vector<2x32xf32>
      %c0_18 = arith.constant 0 : index
      %c0_19 = arith.constant 0 : index
      %19 = vector.load %arg10[%c0_18, %c0_19] : memref<2x32xf32, #tpu.memory_space<vmem>>, vector<2x32xf32>
      %20 = arith.truncf %18 : vector<2x32xf32> to vector<2x32xbf16>
      %cst = arith.constant dense<0.000000e+00> : vector<2x128xf32>
      %21 = tpu.matmul %20, %4, %cst {dimension_numbers = #tpu.dot_dimension_numbers<[1], [0], [0], [1], [0, 0, 1, 1], [], []>} : vector<2x32xbf16>, vector<32x128xbf16>, vector<2x128xf32> -> vector<2x128xf32>
      %22 = vector.broadcast %10 : vector<1x128xf32> to vector<2x128xf32>
      %23 = arith.addf %22, %21 : vector<2x128xf32>
      %c0_20 = arith.constant 0 : index
      %24 = arith.index_cast %17 : i32 to index
      %c0_21 = arith.constant 0 : index
      %c0_22 = arith.constant 0 : index
      %25 = vector.load %arg2[%c0_20, %24, %c0_21, %c0_22] : memref<1x8x2x32xbf16, #tpu.memory_space<vmem>>, vector<1x1x2x32xbf16>
      %26 = vector.shape_cast %25 : vector<1x1x2x32xbf16> to vector<2x32xbf16>
      %cst_23 = arith.constant dense<0.000000e+00> : vector<2x128xf32>
      %27 = tpu.matmul %26, %6, %cst_23 {dimension_numbers = #tpu.dot_dimension_numbers<[1], [0], [0], [1], [0, 0, 1, 1], [], []>} : vector<2x32xbf16>, vector<32x128xbf16>, vector<2x128xf32> -> vector<2x128xf32>
      %28 = arith.addf %23, %27 : vector<2x128xf32>
      %c0_24 = arith.constant 0 : index
      %29 = arith.index_cast %17 : i32 to index
      %c0_25 = arith.constant 0 : index
      %c0_26 = arith.constant 0 : index
      %30 = vector.load %arg3[%c0_24, %29, %c0_25, %c0_26] : memref<1x8x2x32xbf16, #tpu.memory_space<vmem>>, vector<1x1x2x32xbf16>
      %31 = vector.shape_cast %30 : vector<1x1x2x32xbf16> to vector<2x32xbf16>
      %cst_27 = arith.constant dense<0.000000e+00> : vector<2x128xf32>
      %32 = tpu.matmul %31, %8, %cst_27 {dimension_numbers = #tpu.dot_dimension_numbers<[1], [0], [0], [1], [0, 0, 1, 1], [], []>} : vector<2x32xbf16>, vector<32x128xbf16>, vector<2x128xf32> -> vector<2x128xf32>
      %33 = arith.addf %28, %32 : vector<2x128xf32>
      %34 = vector.extract_strided_slice %33 {offsets = [0, 0], sizes = [2, 32], strides = [1, 1]} : vector<2x128xf32> to vector<2x32xf32>
      %cst_28 = arith.constant 5.000000e-01 : f32
      %35 = vector.broadcast %cst_28 : f32 to vector<2x32xf32>
      %36 = arith.mulf %35, %34 : vector<2x32xf32>
      %37 = math.tanh %36 : vector<2x32xf32>
      %cst_29 = arith.constant 1.000000e+00 : f32
      %38 = vector.broadcast %cst_29 : f32 to vector<2x32xf32>
      %39 = arith.addf %37, %38 : vector<2x32xf32>
      %cst_30 = arith.constant 5.000000e-01 : f32
      %40 = vector.broadcast %cst_30 : f32 to vector<2x32xf32>
      %41 = arith.mulf %40, %39 : vector<2x32xf32>
      %42 = vector.extract_strided_slice %33 {offsets = [0, 32], sizes = [2, 32], strides = [1, 1]} : vector<2x128xf32> to vector<2x32xf32>
      %cst_31 = arith.constant 5.000000e-01 : f32
      %43 = vector.broadcast %cst_31 : f32 to vector<2x32xf32>
      %44 = arith.mulf %43, %42 : vector<2x32xf32>
      %45 = math.tanh %44 : vector<2x32xf32>
      %cst_32 = arith.constant 1.000000e+00 : f32
      %46 = vector.broadcast %cst_32 : f32 to vector<2x32xf32>
      %47 = arith.addf %45, %46 : vector<2x32xf32>
      %cst_33 = arith.constant 5.000000e-01 : f32
      %48 = vector.broadcast %cst_33 : f32 to vector<2x32xf32>
      %49 = arith.mulf %48, %47 : vector<2x32xf32>
      %50 = vector.extract_strided_slice %33 {offsets = [0, 64], sizes = [2, 32], strides = [1, 1]} : vector<2x128xf32> to vector<2x32xf32>
      %51 = math.tanh %50 : vector<2x32xf32>
      %52 = vector.extract_strided_slice %33 {offsets = [0, 96], sizes = [2, 32], strides = [1, 1]} : vector<2x128xf32> to vector<2x32xf32>
      %cst_34 = arith.constant 5.000000e-01 : f32
      %53 = vector.broadcast %cst_34 : f32 to vector<2x32xf32>
      %54 = arith.mulf %53, %52 : vector<2x32xf32>
      %55 = math.tanh %54 : vector<2x32xf32>
      %cst_35 = arith.constant 1.000000e+00 : f32
      %56 = vector.broadcast %cst_35 : f32 to vector<2x32xf32>
      %57 = arith.addf %55, %56 : vector<2x32xf32>
      %cst_36 = arith.constant 5.000000e-01 : f32
      %58 = vector.broadcast %cst_36 : f32 to vector<2x32xf32>
      %59 = arith.mulf %58, %57 : vector<2x32xf32>
      %60 = arith.mulf %49, %19 : vector<2x32xf32>
      %61 = arith.mulf %41, %51 : vector<2x32xf32>
      %62 = arith.addf %60, %61 : vector<2x32xf32>
      %63 = math.tanh %62 : vector<2x32xf32>
      %64 = arith.mulf %59, %63 : vector<2x32xf32>
      %c0_37 = arith.constant 0 : index
      %c0_38 = arith.constant 0 : index
      %65 = vector.load %arg9[%c0_37, %c0_38] : memref<2x32xf32, #tpu.memory_space<vmem>>, vector<2x32xf32>
      tpu.vector_store %arg9[%c0_37, %c0_38], %64 {strides = array<i32>} : memref<2x32xf32, #tpu.memory_space<vmem>>, vector<2x32xf32>,
      %c0_39 = arith.constant 0 : index
      %c0_40 = arith.constant 0 : index
      %66 = vector.load %arg10[%c0_39, %c0_40] : memref<2x32xf32, #tpu.memory_space<vmem>>, vector<2x32xf32>
      tpu.vector_store %arg10[%c0_39, %c0_40], %62 {strides = array<i32>} : memref<2x32xf32, #tpu.memory_space<vmem>>, vector<2x32xf32>,
      %67 = arith.truncf %64 : vector<2x32xf32> to vector<2x32xbf16>
      %c0_41 = arith.constant 0 : index
      %68 = arith.index_cast %17 : i32 to index
      %c0_42 = arith.constant 0 : index
      %c0_43 = arith.constant 0 : index
      %69 = vector.load %arg8[%c0_41, %68, %c0_42, %c0_43] : memref<1x8x2x32xbf16, #tpu.memory_space<vmem>>, vector<1x1x2x32xbf16>
      %70 = vector.shape_cast %69 : vector<1x1x2x32xbf16> to vector<2x32xbf16>
      %71 = vector.shape_cast %67 : vector<2x32xbf16> to vector<1x1x2x32xbf16>
      tpu.vector_store %arg8[%c0_41, %68, %c0_42, %c0_43], %71 {strides = array<i32>} : memref<1x8x2x32xbf16, #tpu.memory_space<vmem>>, vector<1x1x2x32xbf16>,
      %c1_i32_44 = arith.constant 1 : i32
      %c7_i32_45 = arith.constant 7 : i32
      %72 = arith.subi %c7_i32_45, %c1_i32_44 : i32
      %c0_46 = arith.constant 0 : index
      %c0_47 = arith.constant 0 : index
      %73 = vector.load %arg9[%c0_46, %c0_47] : memref<2x32xf32, #tpu.memory_space<vmem>>, vector<2x32xf32>
      %c0_48 = arith.constant 0 : index
      %c0_49 = arith.constant 0 : index
      %74 = vector.load %arg10[%c0_48, %c0_49] : memref<2x32xf32, #tpu.memory_space<vmem>>, vector<2x32xf32>
      %75 = arith.truncf %73 : vector<2x32xf32> to vector<2x32xbf16>
      %cst_50 = arith.constant dense<0.000000e+00> : vector<2x128xf32>
      %76 = tpu.matmul %75, %4, %cst_50 {dimension_numbers = #tpu.dot_dimension_numbers<[1], [0], [0], [1], [0, 0, 1, 1], [], []>} : vector<2x32xbf16>, vector<32x128xbf16>, vector<2x128xf32> -> vector<2x128xf32>
      %77 = vector.broadcast %10 : vector<1x128xf32> to vector<2x128xf32>
      %78 = arith.addf %77, %76 : vector<2x128xf32>
      %c0_51 = arith.constant 0 : index
      %79 = arith.index_cast %72 : i32 to index
      %c0_52 = arith.constant 0 : index
      %c0_53 = arith.constant 0 : index
      %80 = vector.load %arg2[%c0_51, %79, %c0_52, %c0_53] : memref<1x8x2x32xbf16, #tpu.memory_space<vmem>>, vector<1x1x2x32xbf16>
      %81 = vector.shape_cast %80 : vector<1x1x2x32xbf16> to vector<2x32xbf16>
      %cst_54 = arith.constant dense<0.000000e+00> : vector<2x128xf32>
      %82 = tpu.matmul %81, %6, %cst_54 {dimension_numbers = #tpu.dot_dimension_numbers<[1], [0], [0], [1], [0, 0, 1, 1], [], []>} : vector<2x32xbf16>, vector<32x128xbf16>, vector<2x128xf32> -> vector<2x128xf32>
      %83 = arith.addf %78, %82 : vector<2x128xf32>
      %c0_55 = arith.constant 0 : index
      %84 = arith.index_cast %72 : i32 to index
      %c0_56 = arith.constant 0 : index
      %c0_57 = arith.constant 0 : index
      %85 = vector.load %arg3[%c0_55, %84, %c0_56, %c0_57] : memref<1x8x2x32xbf16, #tpu.memory_space<vmem>>, vector<1x1x2x32xbf16>
      %86 = vector.shape_cast %85 : vector<1x1x2x32xbf16> to vector<2x32xbf16>
      %cst_58 = arith.constant dense<0.000000e+00> : vector<2x128xf32>
      %87 = tpu.matmul %86, %8, %cst_58 {dimension_numbers = #tpu.dot_dimension_numbers<[1], [0], [0], [1], [0, 0, 1, 1], [], []>} : vector<2x32xbf16>, vector<32x128xbf16>, vector<2x128xf32> -> vector<2x128xf32>
      %88 = arith.addf %83, %87 : vector<2x128xf32>
      %89 = vector.extract_strided_slice %88 {offsets = [0, 0], sizes = [2, 32], strides = [1, 1]} : vector<2x128xf32> to vector<2x32xf32>
      %cst_59 = arith.constant 5.000000e-01 : f32
      %90 = vector.broadcast %cst_59 : f32 to vector<2x32xf32>
      %91 = arith.mulf %90, %89 : vector<2x32xf32>
      %92 = math.tanh %91 : vector<2x32xf32>
      %cst_60 = arith.constant 1.000000e+00 : f32
      %93 = vector.broadcast %cst_60 : f32 to vector<2x32xf32>
      %94 = arith.addf %92, %93 : vector<2x32xf32>
      %cst_61 = arith.constant 5.000000e-01 : f32
      %95 = vector.broadcast %cst_61 : f32 to vector<2x32xf32>
      %96 = arith.mulf %95, %94 : vector<2x32xf32>
      %97 = vector.extract_strided_slice %88 {offsets = [0, 32], sizes = [2, 32], strides = [1, 1]} : vector<2x128xf32> to vector<2x32xf32>
      %cst_62 = arith.constant 5.000000e-01 : f32
      %98 = vector.broadcast %cst_62 : f32 to vector<2x32xf32>
      %99 = arith.mulf %98, %97 : vector<2x32xf32>
      %100 = math.tanh %99 : vector<2x32xf32>
      %cst_63 = arith.constant 1.000000e+00 : f32
      %101 = vector.broadcast %cst_63 : f32 to vector<2x32xf32>
      %102 = arith.addf %100, %101 : vector<2x32xf32>
      %cst_64 = arith.constant 5.000000e-01 : f32
      %103 = vector.broadcast %cst_64 : f32 to vector<2x32xf32>
      %104 = arith.mulf %103, %102 : vector<2x32xf32>
      %105 = vector.extract_strided_slice %88 {offsets = [0, 64], sizes = [2, 32], strides = [1, 1]} : vector<2x128xf32> to vector<2x32xf32>
      %106 = math.tanh %105 : vector<2x32xf32>
      %107 = vector.extract_strided_slice %88 {offsets = [0, 96], sizes = [2, 32], strides = [1, 1]} : vector<2x128xf32> to vector<2x32xf32>
      %cst_65 = arith.constant 5.000000e-01 : f32
      %108 = vector.broadcast %cst_65 : f32 to vector<2x32xf32>
      %109 = arith.mulf %108, %107 : vector<2x32xf32>
      %110 = math.tanh %109 : vector<2x32xf32>
      %cst_66 = arith.constant 1.000000e+00 : f32
      %111 = vector.broadcast %cst_66 : f32 to vector<2x32xf32>
      %112 = arith.addf %110, %111 : vector<2x32xf32>
      %cst_67 = arith.constant 5.000000e-01 : f32
      %113 = vector.broadcast %cst_67 : f32 to vector<2x32xf32>
      %114 = arith.mulf %113, %112 : vector<2x32xf32>
      %115 = arith.mulf %104, %74 : vector<2x32xf32>
      %116 = arith.mulf %96, %106 : vector<2x32xf32>
      %117 = arith.addf %115, %116 : vector<2x32xf32>
      %118 = math.tanh %117 : vector<2x32xf32>
      %119 = arith.mulf %114, %118 : vector<2x32xf32>
      %c0_68 = arith.constant 0 : index
      %c0_69 = arith.constant 0 : index
      %120 = vector.load %arg9[%c0_68, %c0_69] : memref<2x32xf32, #tpu.memory_space<vmem>>, vector<2x32xf32>
      tpu.vector_store %arg9[%c0_68, %c0_69], %119 {strides = array<i32>} : memref<2x32xf32, #tpu.memory_space<vmem>>, vector<2x32xf32>,
      %c0_70 = arith.constant 0 : index
      %c0_71 = arith.constant 0 : index
      %121 = vector.load %arg10[%c0_70, %c0_71] : memref<2x32xf32, #tpu.memory_space<vmem>>, vector<2x32xf32>
      tpu.vector_store %arg10[%c0_70, %c0_71], %117 {strides = array<i32>} : memref<2x32xf32, #tpu.memory_space<vmem>>, vector<2x32xf32>,
      %122 = arith.truncf %119 : vector<2x32xf32> to vector<2x32xbf16>
      %c0_72 = arith.constant 0 : index
      %123 = arith.index_cast %72 : i32 to index
      %c0_73 = arith.constant 0 : index
      %c0_74 = arith.constant 0 : index
      %124 = vector.load %arg8[%c0_72, %123, %c0_73, %c0_74] : memref<1x8x2x32xbf16, #tpu.memory_space<vmem>>, vector<1x1x2x32xbf16>
      %125 = vector.shape_cast %124 : vector<1x1x2x32xbf16> to vector<2x32xbf16>
      %126 = vector.shape_cast %122 : vector<2x32xbf16> to vector<1x1x2x32xbf16>
      tpu.vector_store %arg8[%c0_72, %123, %c0_73, %c0_74], %126 {strides = array<i32>} : memref<1x8x2x32xbf16, #tpu.memory_space<vmem>>, vector<1x1x2x32xbf16>,
      %c2_i32 = arith.constant 2 : i32
      %c7_i32_75 = arith.constant 7 : i32
      %127 = arith.subi %c7_i32_75, %c2_i32 : i32
      %c0_76 = arith.constant 0 : index
      %c0_77 = arith.constant 0 : index
      %128 = vector.load %arg9[%c0_76, %c0_77] : memref<2x32xf32, #tpu.memory_space<vmem>>, vector<2x32xf32>
      %c0_78 = arith.constant 0 : index
      %c0_79 = arith.constant 0 : index
      %129 = vector.load %arg10[%c0_78, %c0_79] : memref<2x32xf32, #tpu.memory_space<vmem>>, vector<2x32xf32>
      %130 = arith.truncf %128 : vector<2x32xf32> to vector<2x32xbf16>
      %cst_80 = arith.constant dense<0.000000e+00> : vector<2x128xf32>
      %131 = tpu.matmul %130, %4, %cst_80 {dimension_numbers = #tpu.dot_dimension_numbers<[1], [0], [0], [1], [0, 0, 1, 1], [], []>} : vector<2x32xbf16>, vector<32x128xbf16>, vector<2x128xf32> -> vector<2x128xf32>
      %132 = vector.broadcast %10 : vector<1x128xf32> to vector<2x128xf32>
      %133 = arith.addf %132, %131 : vector<2x128xf32>
      %c0_81 = arith.constant 0 : index
      %134 = arith.index_cast %127 : i32 to index
      %c0_82 = arith.constant 0 : index
      %c0_83 = arith.constant 0 : index
      %135 = vector.load %arg2[%c0_81, %134, %c0_82, %c0_83] : memref<1x8x2x32xbf16, #tpu.memory_space<vmem>>, vector<1x1x2x32xbf16>
      %136 = vector.shape_cast %135 : vector<1x1x2x32xbf16> to vector<2x32xbf16>
      %cst_84 = arith.constant dense<0.000000e+00> : vector<2x128xf32>
      %137 = tpu.matmul %136, %6, %cst_84 {dimension_numbers = #tpu.dot_dimension_numbers<[1], [0], [0], [1], [0, 0, 1, 1], [], []>} : vector<2x32xbf16>, vector<32x128xbf16>, vector<2x128xf32> -> vector<2x128xf32>
      %138 = arith.addf %133, %137 : vector<2x128xf32>
      %c0_85 = arith.constant 0 : index
      %139 = arith.index_cast %127 : i32 to index
      %c0_86 = arith.constant 0 : index
      %c0_87 = arith.constant 0 : index
      %140 = vector.load %arg3[%c0_85, %139, %c0_86, %c0_87] : memref<1x8x2x32xbf16, #tpu.memory_space<vmem>>, vector<1x1x2x32xbf16>
      %141 = vector.shape_cast %140 : vector<1x1x2x32xbf16> to vector<2x32xbf16>
      %cst_88 = arith.constant dense<0.000000e+00> : vector<2x128xf32>
      %142 = tpu.matmul %141, %8, %cst_88 {dimension_numbers = #tpu.dot_dimension_numbers<[1], [0], [0], [1], [0, 0, 1, 1], [], []>} : vector<2x32xbf16>, vector<32x128xbf16>, vector<2x128xf32> -> vector<2x128xf32>
      %143 = arith.addf %138, %142 : vector<2x128xf32>
      %144 = vector.extract_strided_slice %143 {offsets = [0, 0], sizes = [2, 32], strides = [1, 1]} : vector<2x128xf32> to vector<2x32xf32>
      %cst_89 = arith.constant 5.000000e-01 : f32
      %145 = vector.broadcast %cst_89 : f32 to vector<2x32xf32>
      %146 = arith.mulf %145, %144 : vector<2x32xf32>
      %147 = math.tanh %146 : vector<2x32xf32>
      %cst_90 = arith.constant 1.000000e+00 : f32
      %148 = vector.broadcast %cst_90 : f32 to vector<2x32xf32>
      %149 = arith.addf %147, %148 : vector<2x32xf32>
      %cst_91 = arith.constant 5.000000e-01 : f32
      %150 = vector.broadcast %cst_91 : f32 to vector<2x32xf32>
      %151 = arith.mulf %150, %149 : vector<2x32xf32>
      %152 = vector.extract_strided_slice %143 {offsets = [0, 32], sizes = [2, 32], strides = [1, 1]} : vector<2x128xf32> to vector<2x32xf32>
      %cst_92 = arith.constant 5.000000e-01 : f32
      %153 = vector.broadcast %cst_92 : f32 to vector<2x32xf32>
      %154 = arith.mulf %153, %152 : vector<2x32xf32>
      %155 = math.tanh %154 : vector<2x32xf32>
      %cst_93 = arith.constant 1.000000e+00 : f32
      %156 = vector.broadcast %cst_93 : f32 to vector<2x32xf32>
      %157 = arith.addf %155, %156 : vector<2x32xf32>
      %cst_94 = arith.constant 5.000000e-01 : f32
      %158 = vector.broadcast %cst_94 : f32 to vector<2x32xf32>
      %159 = arith.mulf %158, %157 : vector<2x32xf32>
      %160 = vector.extract_strided_slice %143 {offsets = [0, 64], sizes = [2, 32], strides = [1, 1]} : vector<2x128xf32> to vector<2x32xf32>
      %161 = math.tanh %160 : vector<2x32xf32>
      %162 = vector.extract_strided_slice %143 {offsets = [0, 96], sizes = [2, 32], strides = [1, 1]} : vector<2x128xf32> to vector<2x32xf32>
      %cst_95 = arith.constant 5.000000e-01 : f32
      %163 = vector.broadcast %cst_95 : f32 to vector<2x32xf32>
      %164 = arith.mulf %163, %162 : vector<2x32xf32>
      %165 = math.tanh %164 : vector<2x32xf32>
      %cst_96 = arith.constant 1.000000e+00 : f32
      %166 = vector.broadcast %cst_96 : f32 to vector<2x32xf32>
      %167 = arith.addf %165, %166 : vector<2x32xf32>
      %cst_97 = arith.constant 5.000000e-01 : f32
      %168 = vector.broadcast %cst_97 : f32 to vector<2x32xf32>
      %169 = arith.mulf %168, %167 : vector<2x32xf32>
      %170 = arith.mulf %159, %129 : vector<2x32xf32>
      %171 = arith.mulf %151, %161 : vector<2x32xf32>
      %172 = arith.addf %170, %171 : vector<2x32xf32>
      %173 = math.tanh %172 : vector<2x32xf32>
      %174 = arith.mulf %169, %173 : vector<2x32xf32>
      %c0_98 = arith.constant 0 : index
      %c0_99 = arith.constant 0 : index
      %175 = vector.load %arg9[%c0_98, %c0_99] : memref<2x32xf32, #tpu.memory_space<vmem>>, vector<2x32xf32>
      tpu.vector_store %arg9[%c0_98, %c0_99], %174 {strides = array<i32>} : memref<2x32xf32, #tpu.memory_space<vmem>>, vector<2x32xf32>,
      %c0_100 = arith.constant 0 : index
      %c0_101 = arith.constant 0 : index
      %176 = vector.load %arg10[%c0_100, %c0_101] : memref<2x32xf32, #tpu.memory_space<vmem>>, vector<2x32xf32>
      tpu.vector_store %arg10[%c0_100, %c0_101], %172 {strides = array<i32>} : memref<2x32xf32, #tpu.memory_space<vmem>>, vector<2x32xf32>,
      %177 = arith.truncf %174 : vector<2x32xf32> to vector<2x32xbf16>
      %c0_102 = arith.constant 0 : index
      %178 = arith.index_cast %127 : i32 to index
      %c0_103 = arith.constant 0 : index
      %c0_104 = arith.constant 0 : index
      %179 = vector.load %arg8[%c0_102, %178, %c0_103, %c0_104] : memref<1x8x2x32xbf16, #tpu.memory_space<vmem>>, vector<1x1x2x32xbf16>
      %180 = vector.shape_cast %179 : vector<1x1x2x32xbf16> to vector<2x32xbf16>
      %181 = vector.shape_cast %177 : vector<2x32xbf16> to vector<1x1x2x32xbf16>
      tpu.vector_store %arg8[%c0_102, %178, %c0_103, %c0_104], %181 {strides = array<i32>} : memref<1x8x2x32xbf16, #tpu.memory_space<vmem>>, vector<1x1x2x32xbf16>,
      %c3_i32 = arith.constant 3 : i32
      %c7_i32_105 = arith.constant 7 : i32
      %182 = arith.subi %c7_i32_105, %c3_i32 : i32
      %c0_106 = arith.constant 0 : index
      %c0_107 = arith.constant 0 : index
      %183 = vector.load %arg9[%c0_106, %c0_107] : memref<2x32xf32, #tpu.memory_space<vmem>>, vector<2x32xf32>
      %c0_108 = arith.constant 0 : index
      %c0_109 = arith.constant 0 : index
      %184 = vector.load %arg10[%c0_108, %c0_109] : memref<2x32xf32, #tpu.memory_space<vmem>>, vector<2x32xf32>
      %185 = arith.truncf %183 : vector<2x32xf32> to vector<2x32xbf16>
      %cst_110 = arith.constant dense<0.000000e+00> : vector<2x128xf32>
      %186 = tpu.matmul %185, %4, %cst_110 {dimension_numbers = #tpu.dot_dimension_numbers<[1], [0], [0], [1], [0, 0, 1, 1], [], []>} : vector<2x32xbf16>, vector<32x128xbf16>, vector<2x128xf32> -> vector<2x128xf32>
      %187 = vector.broadcast %10 : vector<1x128xf32> to vector<2x128xf32>
      %188 = arith.addf %187, %186 : vector<2x128xf32>
      %c0_111 = arith.constant 0 : index
      %189 = arith.index_cast %182 : i32 to index
      %c0_112 = arith.constant 0 : index
      %c0_113 = arith.constant 0 : index
      %190 = vector.load %arg2[%c0_111, %189, %c0_112, %c0_113] : memref<1x8x2x32xbf16, #tpu.memory_space<vmem>>, vector<1x1x2x32xbf16>
      %191 = vector.shape_cast %190 : vector<1x1x2x32xbf16> to vector<2x32xbf16>
      %cst_114 = arith.constant dense<0.000000e+00> : vector<2x128xf32>
      %192 = tpu.matmul %191, %6, %cst_114 {dimension_numbers = #tpu.dot_dimension_numbers<[1], [0], [0], [1], [0, 0, 1, 1], [], []>} : vector<2x32xbf16>, vector<32x128xbf16>, vector<2x128xf32> -> vector<2x128xf32>
      %193 = arith.addf %188, %192 : vector<2x128xf32>
      %c0_115 = arith.constant 0 : index
      %194 = arith.index_cast %182 : i32 to index
      %c0_116 = arith.constant 0 : index
      %c0_117 = arith.constant 0 : index
      %195 = vector.load %arg3[%c0_115, %194, %c0_116, %c0_117] : memref<1x8x2x32xbf16, #tpu.memory_space<vmem>>, vector<1x1x2x32xbf16>
      %196 = vector.shape_cast %195 : vector<1x1x2x32xbf16> to vector<2x32xbf16>
      %cst_118 = arith.constant dense<0.000000e+00> : vector<2x128xf32>
      %197 = tpu.matmul %196, %8, %cst_118 {dimension_numbers = #tpu.dot_dimension_numbers<[1], [0], [0], [1], [0, 0, 1, 1], [], []>} : vector<2x32xbf16>, vector<32x128xbf16>, vector<2x128xf32> -> vector<2x128xf32>
      %198 = arith.addf %193, %197 : vector<2x128xf32>
      %199 = vector.extract_strided_slice %198 {offsets = [0, 0], sizes = [2, 32], strides = [1, 1]} : vector<2x128xf32> to vector<2x32xf32>
      %cst_119 = arith.constant 5.000000e-01 : f32
      %200 = vector.broadcast %cst_119 : f32 to vector<2x32xf32>
      %201 = arith.mulf %200, %199 : vector<2x32xf32>
      %202 = math.tanh %201 : vector<2x32xf32>
      %cst_120 = arith.constant 1.000000e+00 : f32
      %203 = vector.broadcast %cst_120 : f32 to vector<2x32xf32>
      %204 = arith.addf %202, %203 : vector<2x32xf32>
      %cst_121 = arith.constant 5.000000e-01 : f32
      %205 = vector.broadcast %cst_121 : f32 to vector<2x32xf32>
      %206 = arith.mulf %205, %204 : vector<2x32xf32>
      %207 = vector.extract_strided_slice %198 {offsets = [0, 32], sizes = [2, 32], strides = [1, 1]} : vector<2x128xf32> to vector<2x32xf32>
      %cst_122 = arith.constant 5.000000e-01 : f32
      %208 = vector.broadcast %cst_122 : f32 to vector<2x32xf32>
      %209 = arith.mulf %208, %207 : vector<2x32xf32>
      %210 = math.tanh %209 : vector<2x32xf32>
      %cst_123 = arith.constant 1.000000e+00 : f32
      %211 = vector.broadcast %cst_123 : f32 to vector<2x32xf32>
      %212 = arith.addf %210, %211 : vector<2x32xf32>
      %cst_124 = arith.constant 5.000000e-01 : f32
      %213 = vector.broadcast %cst_124 : f32 to vector<2x32xf32>
      %214 = arith.mulf %213, %212 : vector<2x32xf32>
      %215 = vector.extract_strided_slice %198 {offsets = [0, 64], sizes = [2, 32], strides = [1, 1]} : vector<2x128xf32> to vector<2x32xf32>
      %216 = math.tanh %215 : vector<2x32xf32>
      %217 = vector.extract_strided_slice %198 {offsets = [0, 96], sizes = [2, 32], strides = [1, 1]} : vector<2x128xf32> to vector<2x32xf32>
      %cst_125 = arith.constant 5.000000e-01 : f32
      %218 = vector.broadcast %cst_125 : f32 to vector<2x32xf32>
      %219 = arith.mulf %218, %217 : vector<2x32xf32>
      %220 = math.tanh %219 : vector<2x32xf32>
      %cst_126 = arith.constant 1.000000e+00 : f32
      %221 = vector.broadcast %cst_126 : f32 to vector<2x32xf32>
      %222 = arith.addf %220, %221 : vector<2x32xf32>
      %cst_127 = arith.constant 5.000000e-01 : f32
      %223 = vector.broadcast %cst_127 : f32 to vector<2x32xf32>
      %224 = arith.mulf %223, %222 : vector<2x32xf32>
      %225 = arith.mulf %214, %184 : vector<2x32xf32>
      %226 = arith.mulf %206, %216 : vector<2x32xf32>
      %227 = arith.addf %225, %226 : vector<2x32xf32>
      %228 = math.tanh %227 : vector<2x32xf32>
      %229 = arith.mulf %224, %228 : vector<2x32xf32>
      %c0_128 = arith.constant 0 : index
      %c0_129 = arith.constant 0 : index
      %230 = vector.load %arg9[%c0_128, %c0_129] : memref<2x32xf32, #tpu.memory_space<vmem>>, vector<2x32xf32>
      tpu.vector_store %arg9[%c0_128, %c0_129], %229 {strides = array<i32>} : memref<2x32xf32, #tpu.memory_space<vmem>>, vector<2x32xf32>,
      %c0_130 = arith.constant 0 : index
      %c0_131 = arith.constant 0 : index
      %231 = vector.load %arg10[%c0_130, %c0_131] : memref<2x32xf32, #tpu.memory_space<vmem>>, vector<2x32xf32>
      tpu.vector_store %arg10[%c0_130, %c0_131], %227 {strides = array<i32>} : memref<2x32xf32, #tpu.memory_space<vmem>>, vector<2x32xf32>,
      %232 = arith.truncf %229 : vector<2x32xf32> to vector<2x32xbf16>
      %c0_132 = arith.constant 0 : index
      %233 = arith.index_cast %182 : i32 to index
      %c0_133 = arith.constant 0 : index
      %c0_134 = arith.constant 0 : index
      %234 = vector.load %arg8[%c0_132, %233, %c0_133, %c0_134] : memref<1x8x2x32xbf16, #tpu.memory_space<vmem>>, vector<1x1x2x32xbf16>
      %235 = vector.shape_cast %234 : vector<1x1x2x32xbf16> to vector<2x32xbf16>
      %236 = vector.shape_cast %232 : vector<2x32xbf16> to vector<1x1x2x32xbf16>
      tpu.vector_store %arg8[%c0_132, %233, %c0_133, %c0_134], %236 {strides = array<i32>} : memref<1x8x2x32xbf16, #tpu.memory_space<vmem>>, vector<1x1x2x32xbf16>,
      %c4_i32 = arith.constant 4 : i32
      %c7_i32_135 = arith.constant 7 : i32
      %237 = arith.subi %c7_i32_135, %c4_i32 : i32
      %c0_136 = arith.constant 0 : index
      %c0_137 = arith.constant 0 : index
      %238 = vector.load %arg9[%c0_136, %c0_137] : memref<2x32xf32, #tpu.memory_space<vmem>>, vector<2x32xf32>
      %c0_138 = arith.constant 0 : index
      %c0_139 = arith.constant 0 : index
      %239 = vector.load %arg10[%c0_138, %c0_139] : memref<2x32xf32, #tpu.memory_space<vmem>>, vector<2x32xf32>
      %240 = arith.truncf %238 : vector<2x32xf32> to vector<2x32xbf16>
      %cst_140 = arith.constant dense<0.000000e+00> : vector<2x128xf32>
      %241 = tpu.matmul %240, %4, %cst_140 {dimension_numbers = #tpu.dot_dimension_numbers<[1], [0], [0], [1], [0, 0, 1, 1], [], []>} : vector<2x32xbf16>, vector<32x128xbf16>, vector<2x128xf32> -> vector<2x128xf32>
      %242 = vector.broadcast %10 : vector<1x128xf32> to vector<2x128xf32>
      %243 = arith.addf %242, %241 : vector<2x128xf32>
      %c0_141 = arith.constant 0 : index
      %244 = arith.index_cast %237 : i32 to index
      %c0_142 = arith.constant 0 : index
      %c0_143 = arith.constant 0 : index
      %245 = vector.load %arg2[%c0_141, %244, %c0_142, %c0_143] : memref<1x8x2x32xbf16, #tpu.memory_space<vmem>>, vector<1x1x2x32xbf16>
      %246 = vector.shape_cast %245 : vector<1x1x2x32xbf16> to vector<2x32xbf16>
      %cst_144 = arith.constant dense<0.000000e+00> : vector<2x128xf32>
      %247 = tpu.matmul %246, %6, %cst_144 {dimension_numbers = #tpu.dot_dimension_numbers<[1], [0], [0], [1], [0, 0, 1, 1], [], []>} : vector<2x32xbf16>, vector<32x128xbf16>, vector<2x128xf32> -> vector<2x128xf32>
      %248 = arith.addf %243, %247 : vector<2x128xf32>
      %c0_145 = arith.constant 0 : index
      %249 = arith.index_cast %237 : i32 to index
      %c0_146 = arith.constant 0 : index
      %c0_147 = arith.constant 0 : index
      %250 = vector.load %arg3[%c0_145, %249, %c0_146, %c0_147] : memref<1x8x2x32xbf16, #tpu.memory_space<vmem>>, vector<1x1x2x32xbf16>
      %251 = vector.shape_cast %250 : vector<1x1x2x32xbf16> to vector<2x32xbf16>
      %cst_148 = arith.constant dense<0.000000e+00> : vector<2x128xf32>
      %252 = tpu.matmul %251, %8, %cst_148 {dimension_numbers = #tpu.dot_dimension_numbers<[1], [0], [0], [1], [0, 0, 1, 1], [], []>} : vector<2x32xbf16>, vector<32x128xbf16>, vector<2x128xf32> -> vector<2x128xf32>
      %253 = arith.addf %248, %252 : vector<2x128xf32>
      %254 = vector.extract_strided_slice %253 {offsets = [0, 0], sizes = [2, 32], strides = [1, 1]} : vector<2x128xf32> to vector<2x32xf32>
      %cst_149 = arith.constant 5.000000e-01 : f32
      %255 = vector.broadcast %cst_149 : f32 to vector<2x32xf32>
      %256 = arith.mulf %255, %254 : vector<2x32xf32>
      %257 = math.tanh %256 : vector<2x32xf32>
      %cst_150 = arith.constant 1.000000e+00 : f32
      %258 = vector.broadcast %cst_150 : f32 to vector<2x32xf32>
      %259 = arith.addf %257, %258 : vector<2x32xf32>
      %cst_151 = arith.constant 5.000000e-01 : f32
      %260 = vector.broadcast %cst_151 : f32 to vector<2x32xf32>
      %261 = arith.mulf %260, %259 : vector<2x32xf32>
      %262 = vector.extract_strided_slice %253 {offsets = [0, 32], sizes = [2, 32], strides = [1, 1]} : vector<2x128xf32> to vector<2x32xf32>
      %cst_152 = arith.constant 5.000000e-01 : f32
      %263 = vector.broadcast %cst_152 : f32 to vector<2x32xf32>
      %264 = arith.mulf %263, %262 : vector<2x32xf32>
      %265 = math.tanh %264 : vector<2x32xf32>
      %cst_153 = arith.constant 1.000000e+00 : f32
      %266 = vector.broadcast %cst_153 : f32 to vector<2x32xf32>
      %267 = arith.addf %265, %266 : vector<2x32xf32>
      %cst_154 = arith.constant 5.000000e-01 : f32
      %268 = vector.broadcast %cst_154 : f32 to vector<2x32xf32>
      %269 = arith.mulf %268, %267 : vector<2x32xf32>
      %270 = vector.extract_strided_slice %253 {offsets = [0, 64], sizes = [2, 32], strides = [1, 1]} : vector<2x128xf32> to vector<2x32xf32>
      %271 = math.tanh %270 : vector<2x32xf32>
      %272 = vector.extract_strided_slice %253 {offsets = [0, 96], sizes = [2, 32], strides = [1, 1]} : vector<2x128xf32> to vector<2x32xf32>
      %cst_155 = arith.constant 5.000000e-01 : f32
      %273 = vector.broadcast %cst_155 : f32 to vector<2x32xf32>
      %274 = arith.mulf %273, %272 : vector<2x32xf32>
      %275 = math.tanh %274 : vector<2x32xf32>
      %cst_156 = arith.constant 1.000000e+00 : f32
      %276 = vector.broadcast %cst_156 : f32 to vector<2x32xf32>
      %277 = arith.addf %275, %276 : vector<2x32xf32>
      %cst_157 = arith.constant 5.000000e-01 : f32
      %278 = vector.broadcast %cst_157 : f32 to vector<2x32xf32>
      %279 = arith.mulf %278, %277 : vector<2x32xf32>
      %280 = arith.mulf %269, %239 : vector<2x32xf32>
      %281 = arith.mulf %261, %271 : vector<2x32xf32>
      %282 = arith.addf %280, %281 : vector<2x32xf32>
      %283 = math.tanh %282 : vector<2x32xf32>
      %284 = arith.mulf %279, %283 : vector<2x32xf32>
      %c0_158 = arith.constant 0 : index
      %c0_159 = arith.constant 0 : index
      %285 = vector.load %arg9[%c0_158, %c0_159] : memref<2x32xf32, #tpu.memory_space<vmem>>, vector<2x32xf32>
      tpu.vector_store %arg9[%c0_158, %c0_159], %284 {strides = array<i32>} : memref<2x32xf32, #tpu.memory_space<vmem>>, vector<2x32xf32>,
      %c0_160 = arith.constant 0 : index
      %c0_161 = arith.constant 0 : index
      %286 = vector.load %arg10[%c0_160, %c0_161] : memref<2x32xf32, #tpu.memory_space<vmem>>, vector<2x32xf32>
      tpu.vector_store %arg10[%c0_160, %c0_161], %282 {strides = array<i32>} : memref<2x32xf32, #tpu.memory_space<vmem>>, vector<2x32xf32>,
      %287 = arith.truncf %284 : vector<2x32xf32> to vector<2x32xbf16>
      %c0_162 = arith.constant 0 : index
      %288 = arith.index_cast %237 : i32 to index
      %c0_163 = arith.constant 0 : index
      %c0_164 = arith.constant 0 : index
      %289 = vector.load %arg8[%c0_162, %288, %c0_163, %c0_164] : memref<1x8x2x32xbf16, #tpu.memory_space<vmem>>, vector<1x1x2x32xbf16>
      %290 = vector.shape_cast %289 : vector<1x1x2x32xbf16> to vector<2x32xbf16>
      %291 = vector.shape_cast %287 : vector<2x32xbf16> to vector<1x1x2x32xbf16>
      tpu.vector_store %arg8[%c0_162, %288, %c0_163, %c0_164], %291 {strides = array<i32>} : memref<1x8x2x32xbf16, #tpu.memory_space<vmem>>, vector<1x1x2x32xbf16>,
      %c5_i32 = arith.constant 5 : i32
      %c7_i32_165 = arith.constant 7 : i32
      %292 = arith.subi %c7_i32_165, %c5_i32 : i32
      %c0_166 = arith.constant 0 : index
      %c0_167 = arith.constant 0 : index
      %293 = vector.load %arg9[%c0_166, %c0_167] : memref<2x32xf32, #tpu.memory_space<vmem>>, vector<2x32xf32>
      %c0_168 = arith.constant 0 : index
      %c0_169 = arith.constant 0 : index
      %294 = vector.load %arg10[%c0_168, %c0_169] : memref<2x32xf32, #tpu.memory_space<vmem>>, vector<2x32xf32>
      %295 = arith.truncf %293 : vector<2x32xf32> to vector<2x32xbf16>
      %cst_170 = arith.constant dense<0.000000e+00> : vector<2x128xf32>
      %296 = tpu.matmul %295, %4, %cst_170 {dimension_numbers = #tpu.dot_dimension_numbers<[1], [0], [0], [1], [0, 0, 1, 1], [], []>} : vector<2x32xbf16>, vector<32x128xbf16>, vector<2x128xf32> -> vector<2x128xf32>
      %297 = vector.broadcast %10 : vector<1x128xf32> to vector<2x128xf32>
      %298 = arith.addf %297, %296 : vector<2x128xf32>
      %c0_171 = arith.constant 0 : index
      %299 = arith.index_cast %292 : i32 to index
      %c0_172 = arith.constant 0 : index
      %c0_173 = arith.constant 0 : index
      %300 = vector.load %arg2[%c0_171, %299, %c0_172, %c0_173] : memref<1x8x2x32xbf16, #tpu.memory_space<vmem>>, vector<1x1x2x32xbf16>
      %301 = vector.shape_cast %300 : vector<1x1x2x32xbf16> to vector<2x32xbf16>
      %cst_174 = arith.constant dense<0.000000e+00> : vector<2x128xf32>
      %302 = tpu.matmul %301, %6, %cst_174 {dimension_numbers = #tpu.dot_dimension_numbers<[1], [0], [0], [1], [0, 0, 1, 1], [], []>} : vector<2x32xbf16>, vector<32x128xbf16>, vector<2x128xf32> -> vector<2x128xf32>
      %303 = arith.addf %298, %302 : vector<2x128xf32>
      %c0_175 = arith.constant 0 : index
      %304 = arith.index_cast %292 : i32 to index
      %c0_176 = arith.constant 0 : index
      %c0_177 = arith.constant 0 : index
      %305 = vector.load %arg3[%c0_175, %304, %c0_176, %c0_177] : memref<1x8x2x32xbf16, #tpu.memory_space<vmem>>, vector<1x1x2x32xbf16>
      %306 = vector.shape_cast %305 : vector<1x1x2x32xbf16> to vector<2x32xbf16>
      %cst_178 = arith.constant dense<0.000000e+00> : vector<2x128xf32>
      %307 = tpu.matmul %306, %8, %cst_178 {dimension_numbers = #tpu.dot_dimension_numbers<[1], [0], [0], [1], [0, 0, 1, 1], [], []>} : vector<2x32xbf16>, vector<32x128xbf16>, vector<2x128xf32> -> vector<2x128xf32>
      %308 = arith.addf %303, %307 : vector<2x128xf32>
      %309 = vector.extract_strided_slice %308 {offsets = [0, 0], sizes = [2, 32], strides = [1, 1]} : vector<2x128xf32> to vector<2x32xf32>
      %cst_179 = arith.constant 5.000000e-01 : f32
      %310 = vector.broadcast %cst_179 : f32 to vector<2x32xf32>
      %311 = arith.mulf %310, %309 : vector<2x32xf32>
      %312 = math.tanh %311 : vector<2x32xf32>
      %cst_180 = arith.constant 1.000000e+00 : f32
      %313 = vector.broadcast %cst_180 : f32 to vector<2x32xf32>
      %314 = arith.addf %312, %313 : vector<2x32xf32>
      %cst_181 = arith.constant 5.000000e-01 : f32
      %315 = vector.broadcast %cst_181 : f32 to vector<2x32xf32>
      %316 = arith.mulf %315, %314 : vector<2x32xf32>
      %317 = vector.extract_strided_slice %308 {offsets = [0, 32], sizes = [2, 32], strides = [1, 1]} : vector<2x128xf32> to vector<2x32xf32>
      %cst_182 = arith.constant 5.000000e-01 : f32
      %318 = vector.broadcast %cst_182 : f32 to vector<2x32xf32>
      %319 = arith.mulf %318, %317 : vector<2x32xf32>
      %320 = math.tanh %319 : vector<2x32xf32>
      %cst_183 = arith.constant 1.000000e+00 : f32
      %321 = vector.broadcast %cst_183 : f32 to vector<2x32xf32>
      %322 = arith.addf %320, %321 : vector<2x32xf32>
      %cst_184 = arith.constant 5.000000e-01 : f32
      %323 = vector.broadcast %cst_184 : f32 to vector<2x32xf32>
      %324 = arith.mulf %323, %322 : vector<2x32xf32>
      %325 = vector.extract_strided_slice %308 {offsets = [0, 64], sizes = [2, 32], strides = [1, 1]} : vector<2x128xf32> to vector<2x32xf32>
      %326 = math.tanh %325 : vector<2x32xf32>
      %327 = vector.extract_strided_slice %308 {offsets = [0, 96], sizes = [2, 32], strides = [1, 1]} : vector<2x128xf32> to vector<2x32xf32>
      %cst_185 = arith.constant 5.000000e-01 : f32
      %328 = vector.broadcast %cst_185 : f32 to vector<2x32xf32>
      %329 = arith.mulf %328, %327 : vector<2x32xf32>
      %330 = math.tanh %329 : vector<2x32xf32>
      %cst_186 = arith.constant 1.000000e+00 : f32
      %331 = vector.broadcast %cst_186 : f32 to vector<2x32xf32>
      %332 = arith.addf %330, %331 : vector<2x32xf32>
      %cst_187 = arith.constant 5.000000e-01 : f32
      %333 = vector.broadcast %cst_187 : f32 to vector<2x32xf32>
      %334 = arith.mulf %333, %332 : vector<2x32xf32>
      %335 = arith.mulf %324, %294 : vector<2x32xf32>
      %336 = arith.mulf %316, %326 : vector<2x32xf32>
      %337 = arith.addf %335, %336 : vector<2x32xf32>
      %338 = math.tanh %337 : vector<2x32xf32>
      %339 = arith.mulf %334, %338 : vector<2x32xf32>
      %c0_188 = arith.constant 0 : index
      %c0_189 = arith.constant 0 : index
      %340 = vector.load %arg9[%c0_188, %c0_189] : memref<2x32xf32, #tpu.memory_space<vmem>>, vector<2x32xf32>
      tpu.vector_store %arg9[%c0_188, %c0_189], %339 {strides = array<i32>} : memref<2x32xf32, #tpu.memory_space<vmem>>, vector<2x32xf32>,
      %c0_190 = arith.constant 0 : index
      %c0_191 = arith.constant 0 : index
      %341 = vector.load %arg10[%c0_190, %c0_191] : memref<2x32xf32, #tpu.memory_space<vmem>>, vector<2x32xf32>
      tpu.vector_store %arg10[%c0_190, %c0_191], %337 {strides = array<i32>} : memref<2x32xf32, #tpu.memory_space<vmem>>, vector<2x32xf32>,
      %342 = arith.truncf %339 : vector<2x32xf32> to vector<2x32xbf16>
      %c0_192 = arith.constant 0 : index
      %343 = arith.index_cast %292 : i32 to index
      %c0_193 = arith.constant 0 : index
      %c0_194 = arith.constant 0 : index
      %344 = vector.load %arg8[%c0_192, %343, %c0_193, %c0_194] : memref<1x8x2x32xbf16, #tpu.memory_space<vmem>>, vector<1x1x2x32xbf16>
      %345 = vector.shape_cast %344 : vector<1x1x2x32xbf16> to vector<2x32xbf16>
      %346 = vector.shape_cast %342 : vector<2x32xbf16> to vector<1x1x2x32xbf16>
      tpu.vector_store %arg8[%c0_192, %343, %c0_193, %c0_194], %346 {strides = array<i32>} : memref<1x8x2x32xbf16, #tpu.memory_space<vmem>>, vector<1x1x2x32xbf16>,
      %c6_i32 = arith.constant 6 : i32
      %c7_i32_195 = arith.constant 7 : i32
      %347 = arith.subi %c7_i32_195, %c6_i32 : i32
      %c0_196 = arith.constant 0 : index
      %c0_197 = arith.constant 0 : index
      %348 = vector.load %arg9[%c0_196, %c0_197] : memref<2x32xf32, #tpu.memory_space<vmem>>, vector<2x32xf32>
      %c0_198 = arith.constant 0 : index
      %c0_199 = arith.constant 0 : index
      %349 = vector.load %arg10[%c0_198, %c0_199] : memref<2x32xf32, #tpu.memory_space<vmem>>, vector<2x32xf32>
      %350 = arith.truncf %348 : vector<2x32xf32> to vector<2x32xbf16>
      %cst_200 = arith.constant dense<0.000000e+00> : vector<2x128xf32>
      %351 = tpu.matmul %350, %4, %cst_200 {dimension_numbers = #tpu.dot_dimension_numbers<[1], [0], [0], [1], [0, 0, 1, 1], [], []>} : vector<2x32xbf16>, vector<32x128xbf16>, vector<2x128xf32> -> vector<2x128xf32>
      %352 = vector.broadcast %10 : vector<1x128xf32> to vector<2x128xf32>
      %353 = arith.addf %352, %351 : vector<2x128xf32>
      %c0_201 = arith.constant 0 : index
      %354 = arith.index_cast %347 : i32 to index
      %c0_202 = arith.constant 0 : index
      %c0_203 = arith.constant 0 : index
      %355 = vector.load %arg2[%c0_201, %354, %c0_202, %c0_203] : memref<1x8x2x32xbf16, #tpu.memory_space<vmem>>, vector<1x1x2x32xbf16>
      %356 = vector.shape_cast %355 : vector<1x1x2x32xbf16> to vector<2x32xbf16>
      %cst_204 = arith.constant dense<0.000000e+00> : vector<2x128xf32>
      %357 = tpu.matmul %356, %6, %cst_204 {dimension_numbers = #tpu.dot_dimension_numbers<[1], [0], [0], [1], [0, 0, 1, 1], [], []>} : vector<2x32xbf16>, vector<32x128xbf16>, vector<2x128xf32> -> vector<2x128xf32>
      %358 = arith.addf %353, %357 : vector<2x128xf32>
      %c0_205 = arith.constant 0 : index
      %359 = arith.index_cast %347 : i32 to index
      %c0_206 = arith.constant 0 : index
      %c0_207 = arith.constant 0 : index
      %360 = vector.load %arg3[%c0_205, %359, %c0_206, %c0_207] : memref<1x8x2x32xbf16, #tpu.memory_space<vmem>>, vector<1x1x2x32xbf16>
      %361 = vector.shape_cast %360 : vector<1x1x2x32xbf16> to vector<2x32xbf16>
      %cst_208 = arith.constant dense<0.000000e+00> : vector<2x128xf32>
      %362 = tpu.matmul %361, %8, %cst_208 {dimension_numbers = #tpu.dot_dimension_numbers<[1], [0], [0], [1], [0, 0, 1, 1], [], []>} : vector<2x32xbf16>, vector<32x128xbf16>, vector<2x128xf32> -> vector<2x128xf32>
      %363 = arith.addf %358, %362 : vector<2x128xf32>
      %364 = vector.extract_strided_slice %363 {offsets = [0, 0], sizes = [2, 32], strides = [1, 1]} : vector<2x128xf32> to vector<2x32xf32>
      %cst_209 = arith.constant 5.000000e-01 : f32
      %365 = vector.broadcast %cst_209 : f32 to vector<2x32xf32>
      %366 = arith.mulf %365, %364 : vector<2x32xf32>
      %367 = math.tanh %366 : vector<2x32xf32>
      %cst_210 = arith.constant 1.000000e+00 : f32
      %368 = vector.broadcast %cst_210 : f32 to vector<2x32xf32>
      %369 = arith.addf %367, %368 : vector<2x32xf32>
      %cst_211 = arith.constant 5.000000e-01 : f32
      %370 = vector.broadcast %cst_211 : f32 to vector<2x32xf32>
      %371 = arith.mulf %370, %369 : vector<2x32xf32>
      %372 = vector.extract_strided_slice %363 {offsets = [0, 32], sizes = [2, 32], strides = [1, 1]} : vector<2x128xf32> to vector<2x32xf32>
      %cst_212 = arith.constant 5.000000e-01 : f32
      %373 = vector.broadcast %cst_212 : f32 to vector<2x32xf32>
      %374 = arith.mulf %373, %372 : vector<2x32xf32>
      %375 = math.tanh %374 : vector<2x32xf32>
      %cst_213 = arith.constant 1.000000e+00 : f32
      %376 = vector.broadcast %cst_213 : f32 to vector<2x32xf32>
      %377 = arith.addf %375, %376 : vector<2x32xf32>
      %cst_214 = arith.constant 5.000000e-01 : f32
      %378 = vector.broadcast %cst_214 : f32 to vector<2x32xf32>
      %379 = arith.mulf %378, %377 : vector<2x32xf32>
      %380 = vector.extract_strided_slice %363 {offsets = [0, 64], sizes = [2, 32], strides = [1, 1]} : vector<2x128xf32> to vector<2x32xf32>
      %381 = math.tanh %380 : vector<2x32xf32>
      %382 = vector.extract_strided_slice %363 {offsets = [0, 96], sizes = [2, 32], strides = [1, 1]} : vector<2x128xf32> to vector<2x32xf32>
      %cst_215 = arith.constant 5.000000e-01 : f32
      %383 = vector.broadcast %cst_215 : f32 to vector<2x32xf32>
      %384 = arith.mulf %383, %382 : vector<2x32xf32>
      %385 = math.tanh %384 : vector<2x32xf32>
      %cst_216 = arith.constant 1.000000e+00 : f32
      %386 = vector.broadcast %cst_216 : f32 to vector<2x32xf32>
      %387 = arith.addf %385, %386 : vector<2x32xf32>
      %cst_217 = arith.constant 5.000000e-01 : f32
      %388 = vector.broadcast %cst_217 : f32 to vector<2x32xf32>
      %389 = arith.mulf %388, %387 : vector<2x32xf32>
      %390 = arith.mulf %379, %349 : vector<2x32xf32>
      %391 = arith.mulf %371, %381 : vector<2x32xf32>
      %392 = arith.addf %390, %391 : vector<2x32xf32>
      %393 = math.tanh %392 : vector<2x32xf32>
      %394 = arith.mulf %389, %393 : vector<2x32xf32>
      %c0_218 = arith.constant 0 : index
      %c0_219 = arith.constant 0 : index
      %395 = vector.load %arg9[%c0_218, %c0_219] : memref<2x32xf32, #tpu.memory_space<vmem>>, vector<2x32xf32>
      tpu.vector_store %arg9[%c0_218, %c0_219], %394 {strides = array<i32>} : memref<2x32xf32, #tpu.memory_space<vmem>>, vector<2x32xf32>,
      %c0_220 = arith.constant 0 : index
      %c0_221 = arith.constant 0 : index
      %396 = vector.load %arg10[%c0_220, %c0_221] : memref<2x32xf32, #tpu.memory_space<vmem>>, vector<2x32xf32>
      tpu.vector_store %arg10[%c0_220, %c0_221], %392 {strides = array<i32>} : memref<2x32xf32, #tpu.memory_space<vmem>>, vector<2x32xf32>,
      %397 = arith.truncf %394 : vector<2x32xf32> to vector<2x32xbf16>
      %c0_222 = arith.constant 0 : index
      %398 = arith.index_cast %347 : i32 to index
      %c0_223 = arith.constant 0 : index
      %c0_224 = arith.constant 0 : index
      %399 = vector.load %arg8[%c0_222, %398, %c0_223, %c0_224] : memref<1x8x2x32xbf16, #tpu.memory_space<vmem>>, vector<1x1x2x32xbf16>
      %400 = vector.shape_cast %399 : vector<1x1x2x32xbf16> to vector<2x32xbf16>
      %401 = vector.shape_cast %397 : vector<2x32xbf16> to vector<1x1x2x32xbf16>
      tpu.vector_store %arg8[%c0_222, %398, %c0_223, %c0_224], %401 {strides = array<i32>} : memref<1x8x2x32xbf16, #tpu.memory_space<vmem>>, vector<1x1x2x32xbf16>,
      %c7_i32_225 = arith.constant 7 : i32
      %c7_i32_226 = arith.constant 7 : i32
      %402 = arith.subi %c7_i32_226, %c7_i32_225 : i32
      %c0_227 = arith.constant 0 : index
      %c0_228 = arith.constant 0 : index
      %403 = vector.load %arg9[%c0_227, %c0_228] : memref<2x32xf32, #tpu.memory_space<vmem>>, vector<2x32xf32>
      %c0_229 = arith.constant 0 : index
      %c0_230 = arith.constant 0 : index
      %404 = vector.load %arg10[%c0_229, %c0_230] : memref<2x32xf32, #tpu.memory_space<vmem>>, vector<2x32xf32>
      %405 = arith.truncf %403 : vector<2x32xf32> to vector<2x32xbf16>
      %cst_231 = arith.constant dense<0.000000e+00> : vector<2x128xf32>
      %406 = tpu.matmul %405, %4, %cst_231 {dimension_numbers = #tpu.dot_dimension_numbers<[1], [0], [0], [1], [0, 0, 1, 1], [], []>} : vector<2x32xbf16>, vector<32x128xbf16>, vector<2x128xf32> -> vector<2x128xf32>
      %407 = vector.broadcast %10 : vector<1x128xf32> to vector<2x128xf32>
      %408 = arith.addf %407, %406 : vector<2x128xf32>
      %c0_232 = arith.constant 0 : index
      %409 = arith.index_cast %402 : i32 to index
      %c0_233 = arith.constant 0 : index
      %c0_234 = arith.constant 0 : index
      %410 = vector.load %arg2[%c0_232, %409, %c0_233, %c0_234] : memref<1x8x2x32xbf16, #tpu.memory_space<vmem>>, vector<1x1x2x32xbf16>
      %411 = vector.shape_cast %410 : vector<1x1x2x32xbf16> to vector<2x32xbf16>
      %cst_235 = arith.constant dense<0.000000e+00> : vector<2x128xf32>
      %412 = tpu.matmul %411, %6, %cst_235 {dimension_numbers = #tpu.dot_dimension_numbers<[1], [0], [0], [1], [0, 0, 1, 1], [], []>} : vector<2x32xbf16>, vector<32x128xbf16>, vector<2x128xf32> -> vector<2x128xf32>
      %413 = arith.addf %408, %412 : vector<2x128xf32>
      %c0_236 = arith.constant 0 : index
      %414 = arith.index_cast %402 : i32 to index
      %c0_237 = arith.constant 0 : index
      %c0_238 = arith.constant 0 : index
      %415 = vector.load %arg3[%c0_236, %414, %c0_237, %c0_238] : memref<1x8x2x32xbf16, #tpu.memory_space<vmem>>, vector<1x1x2x32xbf16>
      %416 = vector.shape_cast %415 : vector<1x1x2x32xbf16> to vector<2x32xbf16>
      %cst_239 = arith.constant dense<0.000000e+00> : vector<2x128xf32>
      %417 = tpu.matmul %416, %8, %cst_239 {dimension_numbers = #tpu.dot_dimension_numbers<[1], [0], [0], [1], [0, 0, 1, 1], [], []>} : vector<2x32xbf16>, vector<32x128xbf16>, vector<2x128xf32> -> vector<2x128xf32>
      %418 = arith.addf %413, %417 : vector<2x128xf32>
      %419 = vector.extract_strided_slice %418 {offsets = [0, 0], sizes = [2, 32], strides = [1, 1]} : vector<2x128xf32> to vector<2x32xf32>
      %cst_240 = arith.constant 5.000000e-01 : f32
      %420 = vector.broadcast %cst_240 : f32 to vector<2x32xf32>
      %421 = arith.mulf %420, %419 : vector<2x32xf32>
      %422 = math.tanh %421 : vector<2x32xf32>
      %cst_241 = arith.constant 1.000000e+00 : f32
      %423 = vector.broadcast %cst_241 : f32 to vector<2x32xf32>
      %424 = arith.addf %422, %423 : vector<2x32xf32>
      %cst_242 = arith.constant 5.000000e-01 : f32
      %425 = vector.broadcast %cst_242 : f32 to vector<2x32xf32>
      %426 = arith.mulf %425, %424 : vector<2x32xf32>
      %427 = vector.extract_strided_slice %418 {offsets = [0, 32], sizes = [2, 32], strides = [1, 1]} : vector<2x128xf32> to vector<2x32xf32>
      %cst_243 = arith.constant 5.000000e-01 : f32
      %428 = vector.broadcast %cst_243 : f32 to vector<2x32xf32>
      %429 = arith.mulf %428, %427 : vector<2x32xf32>
      %430 = math.tanh %429 : vector<2x32xf32>
      %cst_244 = arith.constant 1.000000e+00 : f32
      %431 = vector.broadcast %cst_244 : f32 to vector<2x32xf32>
      %432 = arith.addf %430, %431 : vector<2x32xf32>
      %cst_245 = arith.constant 5.000000e-01 : f32
      %433 = vector.broadcast %cst_245 : f32 to vector<2x32xf32>
      %434 = arith.mulf %433, %432 : vector<2x32xf32>
      %435 = vector.extract_strided_slice %418 {offsets = [0, 64], sizes = [2, 32], strides = [1, 1]} : vector<2x128xf32> to vector<2x32xf32>
      %436 = math.tanh %435 : vector<2x32xf32>
      %437 = vector.extract_strided_slice %418 {offsets = [0, 96], sizes = [2, 32], strides = [1, 1]} : vector<2x128xf32> to vector<2x32xf32>
      %cst_246 = arith.constant 5.000000e-01 : f32
      %438 = vector.broadcast %cst_246 : f32 to vector<2x32xf32>
      %439 = arith.mulf %438, %437 : vector<2x32xf32>
      %440 = math.tanh %439 : vector<2x32xf32>
      %cst_247 = arith.constant 1.000000e+00 : f32
      %441 = vector.broadcast %cst_247 : f32 to vector<2x32xf32>
      %442 = arith.addf %440, %441 : vector<2x32xf32>
      %cst_248 = arith.constant 5.000000e-01 : f32
      %443 = vector.broadcast %cst_248 : f32 to vector<2x32xf32>
      %444 = arith.mulf %443, %442 : vector<2x32xf32>
      %445 = arith.mulf %434, %404 : vector<2x32xf32>
      %446 = arith.mulf %426, %436 : vector<2x32xf32>
      %447 = arith.addf %445, %446 : vector<2x32xf32>
      %448 = math.tanh %447 : vector<2x32xf32>
      %449 = arith.mulf %444, %448 : vector<2x32xf32>
      %c0_249 = arith.constant 0 : index
      %c0_250 = arith.constant 0 : index
      %450 = vector.load %arg9[%c0_249, %c0_250] : memref<2x32xf32, #tpu.memory_space<vmem>>, vector<2x32xf32>
      tpu.vector_store %arg9[%c0_249, %c0_250], %449 {strides = array<i32>} : memref<2x32xf32, #tpu.memory_space<vmem>>, vector<2x32xf32>,
      %c0_251 = arith.constant 0 : index
      %c0_252 = arith.constant 0 : index
      %451 = vector.load %arg10[%c0_251, %c0_252] : memref<2x32xf32, #tpu.memory_space<vmem>>, vector<2x32xf32>
      tpu.vector_store %arg10[%c0_251, %c0_252], %447 {strides = array<i32>} : memref<2x32xf32, #tpu.memory_space<vmem>>, vector<2x32xf32>,
      %452 = arith.truncf %449 : vector<2x32xf32> to vector<2x32xbf16>
      %c0_253 = arith.constant 0 : index
      %453 = arith.index_cast %402 : i32 to index
      %c0_254 = arith.constant 0 : index
      %c0_255 = arith.constant 0 : index
      %454 = vector.load %arg8[%c0_253, %453, %c0_254, %c0_255] : memref<1x8x2x32xbf16, #tpu.memory_space<vmem>>, vector<1x1x2x32xbf16>
      %455 = vector.shape_cast %454 : vector<1x1x2x32xbf16> to vector<2x32xbf16>
      %456 = vector.shape_cast %452 : vector<2x32xbf16> to vector<1x1x2x32xbf16>
      tpu.vector_store %arg8[%c0_253, %453, %c0_254, %c0_255], %456 {strides = array<i32>} : memref<1x8x2x32xbf16, #tpu.memory_space<vmem>>, vector<1x1x2x32xbf16>,
      %c8_i32 = arith.constant 8 : i32
    } else {
    }
    return
  }
  func.func @transform_0(%arg0: i32, %arg1: i32) -> (i32, i32, i32, i32) {
    %c1_i32 = arith.constant 1 : i32
    %0 = arith.subi %c1_i32, %arg0 : i32
    %1 = arith.muli %arg1, %0 : i32
    %c0_i32 = arith.constant 0 : i32
    %2 = arith.subi %c0_i32, %arg1 : i32
    %3 = arith.muli %2, %arg0 : i32
    %4 = arith.addi %1, %3 : i32
    %c0_i32_0 = arith.constant 0 : i32
    %c0_i32_1 = arith.constant 0 : i32
    %c0_i32_2 = arith.constant 0 : i32
    %c0_i32_3 = arith.constant 0 : i32
    return %c0_i32_0, %4, %c0_i32_1, %c0_i32_2 : i32, i32, i32, i32
  }
  func.func @transform_1(%arg0: i32, %arg1: i32) -> (i32, i32, i32, i32) {
    %c1_i32 = arith.constant 1 : i32
    %0 = arith.subi %c1_i32, %arg0 : i32
    %1 = arith.muli %arg1, %0 : i32
    %c0_i32 = arith.constant 0 : i32
    %2 = arith.subi %c0_i32, %arg1 : i32
    %3 = arith.muli %2, %arg0 : i32
    %4 = arith.addi %1, %3 : i32
    %c1_i32_0 = arith.constant 1 : i32
    %c0_i32_1 = arith.constant 0 : i32
    %c0_i32_2 = arith.constant 0 : i32
    %c0_i32_3 = arith.constant 0 : i32
    return %c1_i32_0, %4, %c0_i32_1, %c0_i32_2 : i32, i32, i32, i32
  }
  func.func @transform_2(%arg0: i32, %arg1: i32) -> (i32, i32, i32) {
    %c0_i32 = arith.constant 0 : i32
    %c0_i32_0 = arith.constant 0 : i32
    %c0_i32_1 = arith.constant 0 : i32
    return %arg0, %c0_i32, %c0_i32_0 : i32, i32, i32
  }
  func.func @transform_3(%arg0: i32, %arg1: i32) -> (i32, i32, i32) {
    %c0_i32 = arith.constant 0 : i32
    %c0_i32_0 = arith.constant 0 : i32
    %c0_i32_1 = arith.constant 0 : i32
    return %arg0, %c0_i32, %c0_i32_0 : i32, i32, i32
  }
  func.func @transform_4(%arg0: i32, %arg1: i32) -> (i32, i32, i32) {
    %c0_i32 = arith.constant 0 : i32
    %c0_i32_0 = arith.constant 0 : i32
    %c0_i32_1 = arith.constant 0 : i32
    return %arg0, %c0_i32, %c0_i32_0 : i32, i32, i32
  }
  func.func @transform_5(%arg0: i32, %arg1: i32) -> (i32, i32, i32) {
    %c0_i32 = arith.constant 0 : i32
    %c0_i32_0 = arith.constant 0 : i32
    %c0_i32_1 = arith.constant 0 : i32
    return %arg0, %c0_i32, %c0_i32_0 : i32, i32, i32
  }
  func.func @transform_6(%arg0: i32, %arg1: i32) -> (i32, i32, i32, i32) {
    %c1_i32 = arith.constant 1 : i32
    %0 = arith.subi %c1_i32, %arg0 : i32
    %1 = arith.muli %arg1, %0 : i32
    %c0_i32 = arith.constant 0 : i32
    %2 = arith.subi %c0_i32, %arg1 : i32
    %3 = arith.muli %2, %arg0 : i32
    %4 = arith.addi %1, %3 : i32
    %c0_i32_0 = arith.constant 0 : i32
    %c0_i32_1 = arith.constant 0 : i32
    %c0_i32_2 = arith.constant 0 : i32
    return %arg0, %4, %c0_i32_0, %c0_i32_1 : i32, i32, i32, i32
  }
}

</mosaic_0001>

<bundles_post_ra>
// kernel: stack_bi_lstm_forward.2
= control target key start
LH: loop header
LB: loop body
LE: loop exit
PB: predicated region body
PF: predicated region fallthrough
CT: control target
= control target key end

     0   :  { %9 = vsyncpa [#allocation5], 0  ;;  %s4520_s0 = inlined_call_operand.vmem [shape: bf16[1,8,2,16], index: 0, kind: input, shape index: {}]   ;;  %s4521_s1 = inlined_call_operand.hbm [shape: bf16[2,16,128], index: 1, kind: input, shape index: {}]   ;;  %s4522_s2 = inlined_call_operand.hbm [shape: bf16[2,32,128], index: 2, kind: input, shape index: {}]   ;;  %s4523_s3 = inlined_call_operand.vmem [shape: f32[2,1,128], index: 3, kind: input, shape index: {}]   ;;  %s4524_s4 = inlined_call_operand.vmem [shape: bf16[2,8,2,32], index: 4, kind: output, shape index: {}]  }
   0x1   :  { %11 = vsyncpa [#allocation5 + $0x1], 0 }
   0x2   :  { %12 = vsyncpa [#allocation7], 0 }
   0x3   :  { %14 = vsyncpa [#allocation7 + $0x1], 0  ;;  %s3789_s15 = smov 0   ;;  %s3791_s16 = smov 0  }
   0x4   :  { %s3793_s17 = smov 0   ;;  %s3795_s18 = smov 0  }
   0x5   :  { %s3797_s19 = smov 0   ;;  %s3799_s20 = smov 0  }
   0x6 LB: > { %s2989_s21 = sadd.s32 4294967295, %s3745_s20   ;;  %s32_s22 = sadd.s32 1, %s3741_s19  ;;  %s3745_s20 = sphi %s3799_s20, %s20_s20   ;;  %s3741_s19 = sphi %s3797_s19, %s4535_s19   ;;  %s3737_s18 = sphi %s3795_s18, %s4534_s18   ;;  %s3733_s17 = sphi %s3793_s17, %s4533_s17   ;;  %s3729_s16 = sphi %s3791_s16, %s4532_s16   ;;  %s3725_s15 = sphi %s3789_s15, %s4531_s15  }
   0x7   : > { %p34_p0 = scmp.ge.s32.totalorder %s32_s22, 2  ;;  %s75_s23 = sadd.s32 1, %s3733_s17 }
   0x8   : > { %p82_p1 = scmp.ne.s32.totalorder %s3733_s17, %s3729_s16  ;;  %p83_p2 = scmp.eq.s32.totalorder %s3745_s20, 0 }
   0x9   : > { %s4537_s22 = smov (%p34_p0, %s32_s22), 0  ;;  %p88_p4 = scmp.ne.s32.totalorder %s3729_s16, %s3725_s15 }
   0xa   : > { %p3825_p3 = por %p83_p2, %p82_p1  ;;  %s72_s25 = ssub.s32 %s3741_s19, %s4537_s22 }
   0xb   : > { %p89_p5 = scmp.eq.s32.totalorder %s2989_s21, 0  ;;  %p73_p6 = scmp.eq.s32.totalorder %s72_s25, 0 }
   0xc   : > { %p3471_p8 = scmp.lt.s32.totalorder %s3745_s20, 2  ;;  %s3841_s28 = sand.u32 1, %s3733_s17  }
   0xd   : > { %p3832_p7 = por %p89_p5, %p88_p4  ;;  %s3074_s29 = sshll.u32 %s3741_s19, 7 }
   0xe   : > { %s3838_s27 = scalar_select %p73_p6, %s3733_s17, %s75_s23  }
   0xf   : > { %s4527_s26 = scalar_select %p3832_p7, 1, 0 }
  0x10   : > { %s2994_s30 = sshll.u32 %s3841_s28, 3  ;;  %s3848_s7 = scalar_lea.hbm %s4521_s1, %s3074_s29 }
  0x11   : > { %s224_s8 = scalar_lea.vmem [#allocation4], %s2994_s30  ;;  %p3852_p9 = pnand %p3471_p8, %p3825_p3 }
  0x12   : > { %s231_s9 = sshll.u32 %s224_s8, 4  ;;  %s221_s11 = scalar_lea.sflag [#allocation5], %s3841_s28  ;;  %s3856_s9 = int_to_ptr.vmem [resolvable:$true] %s231_s9 }
  0x13   : > { %s3631_s12 = scalar_lea.hbm %s3848_s7, 128  ;;  %p3633_p11 = pneg %p3852_p9 }
  0x14   : > { %p3632_p10 = scmp.ne.s32.totalorder %s3848_s7, %s3631_s12  ;;  %s3636_s15 = scalar_lea.hbm %s4521_s1, 256 }
  0x15   : > { %p3637_p0 = scmp.lt.u32.totalorder %s3848_s7, %s4521_s1  ;;  %p3638_p1 = scmp.lt.u32.totalorder %s3636_s15, %s3631_s12 }
  0x16   : > { %p3634_p12 = pnand %p3633_p11, %p3632_p10  ;;  %p3640_p3 = scmp.lt.u32.totalorder %s3631_s12, %s3848_s7 }
  0x17   : > { %p3639_p2 = por %p3638_p1, %p3637_p0 }
  0x18   : > { %p3635_p13 = pneg %p3634_p12 }
  0x19   : > { %p3641_p4 = por %p3640_p3, %p3639_p2 }
  0x1b   : > { %p3642_p5 = pnand %p3641_p4, %p3635_p13 }
  0x1d   : > { %3645 = shalt.err (!%p3642_p5)
}
  0x1e   : > { %s3646_s24 = scalar_lea.vmem %s3856_s9, 128  ;;  %s3747_s25 = smov [#allocation4]  }
  0x1f   : > { %p3647_p6 = scmp.ne.s32.totalorder %s3856_s9, %s3646_s24  ;;  %s3651_s29 = sshll.u32 %s3747_s25, 4  ;;  %s3652_s29 = int_to_ptr.vmem [resolvable:$false] %s3651_s29 }
  0x20   : > { %s3653_s30 = scalar_lea.vmem %s3652_s29, 256  ;;  %p3654_p12 = scmp.lt.s32.totalorder %s3856_s9, %s3652_s29 }
  0x21   : > { %p3649_p8 = pnand %p3647_p6, %p3633_p11  ;;  %p3655_p0 = scmp.lt.s32.totalorder %s3653_s30, %s3646_s24 }
  0x23   : > { %p3650_p10 = pneg %p3649_p8  ;;  %p3656_p1 = por %p3655_p0, %p3654_p12 }
  0x25   : > { %p3657_p2 = pnand %p3656_p1, %p3650_p10 }
  0x27   : > { %3660 = shalt.err (!%p3657_p2)
}
  0x28   : > { %s3748_s5 = smov 64   ;;  %s3749_s6 = smov 4  }
  0x29   : > { %3467 = dma.hbm_to_vmem [thread:$0]  (!%p3852_p9), %s3848_s7, 128, %s3856_s9, %s221_s11, %s3748_s5, %s3748_s5, %s3749_s6  }
  0x2a   : > { %p3000_p13 = scmp.ge.s32.totalorder %s3745_s20, 1  ;;  %p266_p3 = scmp.lt.s32.totalorder %s3745_s20, 3 }
  0x2b   : > { %s2997_s8 = sshll.u32 %s3841_s28, 4  ;;  %s3075_s13 = sshll.u32 %s3741_s19, 8 }
  0x2c   : > { %p3892_p4 = pnand %p3000_p13, %p266_p3  ;;  %s245_s14 = scalar_lea.vmem [#allocation6], %s2997_s8 }
  0x2d   : > { %s252_s15 = sshll.u32 %s245_s14, 4  ;;  %s3900_s24 = scalar_lea.hbm %s4522_s2, %s3075_s13  ;;  %s3902_s15 = int_to_ptr.vmem [resolvable:$true] %s252_s15 }
  0x2e   : > { %s242_s7 = scalar_lea.sflag [#allocation7], %s3841_s28  ;;  %s3661_s9 = scalar_lea.hbm %s3900_s24, 256 }
  0x2f   : > { %p3662_p5 = scmp.ne.s32.totalorder %s3900_s24, %s3661_s9  ;;  %s3666_s29 = scalar_lea.hbm %s4522_s2, 512 }
  0x30   : > { %p3667_p10 = scmp.lt.u32.totalorder %s3900_s24, %s4522_s2  ;;  %p3668_p12 = scmp.lt.u32.totalorder %s3666_s29, %s3661_s9 }
  0x31   : > { %p3664_p6 = pnand %p3662_p5, %p3633_p11  ;;  %p3670_p1 = scmp.lt.u32.totalorder %s3661_s9, %s3900_s24 }
  0x32   : > { %p3669_p0 = por %p3668_p12, %p3667_p10 }
  0x33   : > { %p3665_p8 = pneg %p3664_p6 }
  0x34   : > { %p3671_p2 = por %p3670_p1, %p3669_p0 }
  0x36   : > { %p3672_p13 = pnand %p3671_p2, %p3665_p8 }
  0x38   : > { %3675 = shalt.err (!%p3672_p13)
}
  0x39   : > { %s3676_s13 = scalar_lea.vmem %s3902_s15, 256  ;;  %s3750_s14 = smov [#allocation6]  }
  0x3a   : > { %p3677_p3 = scmp.ne.s32.totalorder %s3902_s15, %s3676_s13  ;;  %s3681_s21 = sshll.u32 %s3750_s14, 4  ;;  %s3682_s21 = int_to_ptr.vmem [resolvable:$false] %s3681_s21 }
  0x3b   : > { %s3683_s23 = scalar_lea.vmem %s3682_s21, 512  ;;  %p3684_p7 = scmp.lt.s32.totalorder %s3902_s15, %s3682_s21 }
  0x3c   : > { %p3679_p5 = pnand %p3677_p3, %p3633_p11  ;;  %p3685_p10 = scmp.lt.s32.totalorder %s3683_s23, %s3676_s13 }
  0x3e   : > { %p3680_p6 = pneg %p3679_p5  ;;  %p3686_p12 = por %p3685_p10, %p3684_p7 }
  0x40   : > { %p3687_p0 = pnand %p3686_p12, %p3680_p6 }
  0x42   : > { %3690 = shalt.err (!%p3687_p0)
}
  0x43   : > { %3470 = dma.hbm_to_vmem [thread:$0]  (!%p3852_p9), %s3900_s24, 256, %s3902_s15, %s242_s7, %s3748_s5, %s3748_s5, %s3749_s6  }
  0x44   : > { %270 = sbr.rel (%p3892_p4) target bundleno = 11680 (0x2da0), region = 36  ;;  %s272_s9 = sand.u32 (!%p3892_p4), 1, %s3729_s16  }
  0x45   : > { %s3001_s11 = sshll.u32 (!%p3892_p4), %s272_s9, 3  ;;  %s273_s25 = scalar_lea.sflag (!%p3892_p4), [#allocation5], %s272_s9 }
  0x46   : > { %s276_s29 = scalar_lea.vmem (!%p3892_p4), [#allocation4], %s3001_s11  ;;  %p4530_p7 = scmp.ne.s32.totalorder (!%p3892_p4), %s4527_s26, 0 }
  0x4b   : > { %3716 = dma.done.wait (%p4530_p7), %s273_s25, 128  }
  0x4c   : > { %3718 = vsyncadd (%p4530_p7), %s273_s25, 4294967168  ;;  %s3002_s10 = sshll.u32 %s272_s9, 4  ;;  %s282_s28 = scalar_lea.sflag [#allocation7], %s272_s9 }
  0x4d   : > { %s285_s30 = scalar_lea.vmem [#allocation6], %s3002_s10 }
  0x4e   : > { %3720 = dma.done.wait (%p4530_p7), %s282_s28, 256  }
  0x4f   : > { %3722 = vsyncadd (%p4530_p7), %s282_s28, 4294967040  ;;  %p350_p9 = scmp.lt.s32.totalorder %s3737_s18, 1  ;;  %vm377_vm0 = vcmask 254976   ;;  %v3751_v0 = vmov 0.0   ;;  %v3956_v1 = vld [vmem:[%s285_s30] sm:$0xf] }
  0x50   : > { %378 = vst.msk [vmem:[#allocation2] sm:$0x3] %vm377_vm0, %v3751_v0  ;;  %379 = vst.msk [vmem:[#allocation3] sm:$0x3] %vm377_vm0, %v3751_v0  ;;  %v3958_v2 = vld [vmem:[%s285_s30 + $0x4] sm:$0xf] }
  0x51   : > { %s351_s5 = scalar_select %p350_p9, %s3737_s18, 1  ;;  %v3960_v3 = vld [vmem:[%s285_s30 + $0x8] sm:$0xf]  ;;  %v3962_v4 = vld [vmem:[%s285_s30 + $0xc] sm:$0xf] }
  0x52   : > { %v3964_v5 = vld [vmem:[%s276_s29] sm:$0xf]  ;;  %v3966_v6 = vld [vmem:[%s276_s29 + $0x4] sm:$0xf]  ;;  %p3004_p11 = scmp.ne.s32.totalorder %s3737_s18, 0 }
  0x53   : > { %s3003_s6 = sshll.u32 %s351_s5, 3  ;;  %s352_s26 = scalar_lea.vmem %s4523_s3, %s351_s5  ;;  %v3973_v8 = vcombine.low (!%p3004_p11), %v3956_v1, %v3958_v2  ;;  %v3752_v9 = vmov (!%p3004_p11), 0.0   ;;  %vm3753_vm1 = vmmov (!%p3004_p11), 0   ;;  %v3981_v10 = vcombine.low (!%p3004_p11), %v3960_v3, %v3962_v4  ;;  %v457_v14 = vld [vmem:[%s4520_s0] sm:$0x1] (!%p3004_p11) }
  0x54   : > { %s3951_s24 = scalar_lea.vmem %s4524_s4, %s3003_s6  ;;  %v3968_v7 = vld [vmem:[%s352_s26] sm:$0x1]  ;;  %390 = sbr.rel (%p3004_p11) target bundleno = 5881 (0x16f9), region = 52  ;;  %3156 = vmatprep.subr.bf16.mxu0 (!%p3004_p11), %v3752_v9  ;;  %3160 = vmatprep.mubr.msk.bf16.mxu0 (!%p3004_p11), %vm3753_vm1, %v3752_v9  ;;  %vm406_vm2 = vcmask (!%p3004_p11), 261120   ;;  %v3992_v13 = vcombine.low (!%p3004_p11), %v3964_v5, %v3966_v6  ;;  %vm464_vm3 = vcmask (!%p3004_p11), 130048   ;;  %v451_v15 = vlaneseq (!%p3004_p11) }
  0x55   : > { %3157 = vmatpush3.bf16.msra.mxu0 (!%p3004_p11), %v3973_v8  ;;  %3170 = vmatprep.subr.bf16.mxu1 (!%p3004_p11), %v3752_v9  ;;  %s3754_s21 = smov (!%p3004_p11), 64   ;;  %s3755_s23 = smov (!%p3004_p11), 32   ;;  %v3011_v44 = vld [vmem:[%s4520_s0 + $0x1] sm:$0x1] (!%p3004_p11)  ;;  %vm565_vm4 = vcmask (!%p3004_p11), 253952  }
  0x56   : > { %3158 = vmatprep.subr.bf16.mxu0 (!%p3004_p11), %v3752_v9  ;;  %3171 = vmatpush3.bf16.msra.mxu1 (!%p3004_p11), %v3973_v8  ;;  %v4012_v16 = vshrl.u32 (!%p3004_p11), %v451_v15, 7  ;;  %s3756_s9 = smov (!%p3004_p11), 96  }
  0x57   : > { %v391_v11 = vld [vmem:[#allocation2] sm:$0x3] (!%p3004_p11)  ;;  %3172 = vmatprep.subr.bf16.mxu1 (!%p3004_p11), %v3752_v9  ;;  %3174 = vmatprep.mubr.msk.bf16.mxu1 (!%p3004_p11), %vm3753_vm1, %v3752_v9  ;;  %v392_v25 = vld [vmem:[#allocation3] sm:$0x3] (!%p3004_p11) }
  0x58   : > { %v393_v12 = vpack.c.bf16 (!%p3004_p11), %v391_v11, %v391_v11  ;;  %v453_v17 = vsub.s32 (!%p3004_p11), 0, %v4012_v16 }
  0x59   : > { %3159 = vmatpush3.bf16.msra.mxu0 (!%p3004_p11), %v3981_v10 }
  0x5a   : > { %3164 = vmatprep.subr.bf16.mxu0 (!%p3004_p11), %v3752_v9  ;;  %3173 = vmatpush3.bf16.msra.mxu1 (!%p3004_p11), %v3981_v10  ;;  %v4016_v18 = vrot.slane (!%p3004_p11), %v3968_v7, %v453_v17  ;;  %v3015_v17 = vld [vmem:[%s4520_s0 + $0x2] sm:$0x1] (!%p3004_p11) }
  0x5b   : > { %3178 = vmatprep.subr.bf16.mxu1 %v3752_v9 }
  0x5c   : > { %3161 = vmatmul.mubr.msk.bf16.vlgmr.msra.gmra.mrb[0].mxu0 %vm406_vm2, %v393_v12 }
  0x5d   : > { %3165 = vmatpush3.bf16.msra.mxu0 %v3992_v13  ;;  %3166 = vmatprep.mubr.msk.bf16.mxu0 %vm3753_vm1, %v3752_v9 }
  0x5e   : > { %3184 = vmatprep.subr.bf16.mxu0 %v3752_v9 }
  0x68   : > { %3167 = vmatmul.mubr.msk.bf16.vlgmr.msra.gmra.mrb[0].mxu0 %vm464_vm3, %v457_v14 }
  0x69   : > { %3185 = vmatpush3.bf16.msra.mxu0 %v3973_v8  ;;  %3188 = vmatprep.mubr.msk.bf16.mxu0 %vm3753_vm1, %v3752_v9 }
  0x6a   : > { %3186 = vmatprep.subr.bf16.mxu0 %v3752_v9 }
  0x6d   : > { %3187 = vmatpush3.bf16.msra.mxu0 %v3981_v10 }
  0x6e   : > { %3192 = vmatprep.subr.bf16.mxu0 %v3752_v9 }
 0x13b   : > { %v502_v19 = vpop.f32.mrb[0].mxu0 }
 0x13c   : > { %v3380_v20 = vadd.f32 %v502_v19, %v4016_v18  ;;  %v3168_v21 = vpop.f32.mrb[1].mxu0 }
 0x13d   : > { %v505_v22 = vpop.f32.mrb[2].mxu0 }
 0x13e   : > { %3535 = vtanh.f32 %v3380_v20  ;;  %v3169_v23 = vpop.f32.mrb[3].mxu0  ;;  %v509_v26 = vmul.f32 0.5, %v3380_v20 }
 0x140   : > { %3537 = vtanh.f32 %v509_v26 }
 0x148   : > { %v3536_v24 = vpop.eup %3535 }
 0x149   : > { %520 = vrot.lane.b32.xlu0 %v3536_v24, %s3754_s21 }
 0x14a   : > { %v3538_v27 = vpop.eup %3537 }
 0x14b   : > { %v511_v28 = vadd.f32 1.0, %v3538_v27 }
 0x14d   : > { %515 = vrot.lane.b32.xlu0 %v392_v25, %s3755_s23  ;;  %v512_v29 = vmul.f32 0.5, %v511_v28 }
 0x1bb   : > { %v521_v30 = vpop.permute.xlu0 %520 }
 0x1bc   : > { %v523_v31 = vmul.f32 %v521_v30, %v512_v29 }
 0x1be   : > { %525 = vrot.lane.b32.xlu1 %v523_v31, %s3755_s23 }
 0x1bf   : > { %v516_v32 = vpop.permute.xlu0 %515 }
 0x1c0   : > { %v518_v33 = vmul.f32 %v516_v32, %v512_v29 }
 0x230   : > { %v526_v34 = vpop.permute.xlu1 %525 }
 0x231   : > { %v528_v35 = vadd.f32 %v526_v34, %v518_v33 }
 0x233   : > { %3539 = vtanh.f32 %v528_v35 }
 0x23d   : > { %v3540_v36 = vpop.eup %3539 }
 0x23e   : > { %531 = vrot.lane.b32.xlu1 %v3540_v36, %s3754_s21 }
 0x242   : > { %542 = vrot.lane.b32.xlu1 %v528_v35, %s3756_s9 }
 0x2b0   : > { %v532_v37 = vpop.permute.xlu1 %531 }
 0x2b1   : > { %v4024_v38 = vmul.f32 %v532_v37, %v512_v29 }
 0x2b3   : > { %536 = vrot.lane.b32.xlu0 %v4024_v38, %s3755_s23 }
 0x2b4   : > { %v543_v39 = vpop.permute.xlu1 %542 }
 0x2b5   : > { %545 = vst.msk [vmem:[#allocation3] sm:$0x3] %vm377_vm0, %v543_v39 }
 0x2bc   : > { %v568_v40 = vld [vmem:[#allocation3] sm:$0x3] }
 0x2bd   : > { %666 = vrot.lane.b32.xlu1 %v568_v40, %s3755_s23 }
 0x325   : > { %v537_v41 = vpop.permute.xlu0 %536 }
 0x326   : > { %540 = vst.msk [vmem:[#allocation2] sm:$0x3] %vm377_vm0, %v537_v41 }
 0x32d   : > { %v567_v42 = vld [vmem:[#allocation2] sm:$0x3] }
 0x32e   : > { %v569_v43 = vpack.c.bf16 %v567_v42, %v567_v42 }
 0x32f   : > { %v667_v57 = vpop.permute.xlu1 %666 }
 0x330   : > { %3175 = vmatmul.mubr.msk.bf16.vlgmr.msra.gmra.mrb[0].mxu1 %vm406_vm2, %v569_v43 }
 0x331   : > { %3179 = vmatpush3.bf16.msra.mxu1 %v3992_v13  ;;  %3180 = vmatprep.mubr.msk.bf16.mxu1 %vm3753_vm1, %v3752_v9 }
 0x332   : > { %3198 = vmatprep.subr.bf16.mxu1 %v3752_v9 }
 0x33c   : > { %3181 = vmatmul.mubr.msk.bf16.vlgmr.msra.gmra.mrb[0].mxu1 %vm464_vm3, %v3011_v44  ;;  %v3019_v44 = vld [vmem:[%s4520_s0 + $0x3] sm:$0x1] }
 0x33d   : > { %3199 = vmatpush3.bf16.msra.mxu1 %v3973_v8  ;;  %3202 = vmatprep.mubr.msk.bf16.mxu1 %vm3753_vm1, %v3752_v9 }
 0x33e   : > { %3200 = vmatprep.subr.bf16.mxu1 %v3752_v9 }
 0x341   : > { %3201 = vmatpush3.bf16.msra.mxu1 %v3981_v10 }
 0x342   : > { %3206 = vmatprep.subr.bf16.mxu1 %v3752_v9 }
 0x40f   : > { %v653_v45 = vpop.f32.mrb[0].mxu1 }
 0x410   : > { %v3381_v46 = vadd.f32 %v653_v45, %v4016_v18  ;;  %v3182_v47 = vpop.f32.mrb[1].mxu1 }
 0x411   : > { %v656_v48 = vpop.f32.mrb[2].mxu1 }
 0x412   : > { %3541 = vtanh.f32 %v3381_v46  ;;  %v3183_v49 = vpop.f32.mrb[3].mxu1  ;;  %v660_v51 = vmul.f32 0.5, %v3381_v46 }
 0x414   : > { %3543 = vtanh.f32 %v660_v51 }
 0x41c   : > { %v3542_v50 = vpop.eup %3541 }
 0x41d   : > { %671 = vrot.lane.b32.xlu0 %v3542_v50, %s3754_s21 }
 0x41e   : > { %v3544_v52 = vpop.eup %3543 }
 0x41f   : > { %v662_v53 = vadd.f32 1.0, %v3544_v52 }
 0x421   : > { %v663_v54 = vmul.f32 0.5, %v662_v53 }
 0x423   : > { %v669_v58 = vmul.f32 %v667_v57, %v663_v54 }
 0x48f   : > { %v672_v55 = vpop.permute.xlu0 %671 }
 0x490   : > { %v674_v56 = vmul.f32 %v672_v55, %v663_v54 }
 0x492   : > { %676 = vrot.lane.b32.xlu0 %v674_v56, %s3755_s23 }
 0x504   : > { %v677_v59 = vpop.permute.xlu0 %676 }
 0x505   : > { %v679_v60 = vadd.f32 %v677_v59, %v669_v58 }
 0x507   : > { %3545 = vtanh.f32 %v679_v60 }
 0x511   : > { %v3546_v61 = vpop.eup %3545 }
 0x512   : > { %682 = vrot.lane.b32.xlu1 %v3546_v61, %s3754_s21 }
 0x516   : > { %692 = vrot.lane.b32.xlu1 %v679_v60, %s3756_s9 }
 0x584   : > { %v683_v62 = vpop.permute.xlu1 %682 }
 0x585   : > { %v4051_v63 = vmul.f32 %v683_v62, %v663_v54 }
 0x587   : > { %687 = vrot.lane.b32.xlu0 %v4051_v63, %s3755_s23 }
 0x588   : > { %v693_v0 = vpop.permute.xlu1 %692 }
 0x589   : > { %695 = vst.msk [vmem:[#allocation3] sm:$0x3] %vm377_vm0, %v693_v0 }
 0x590   : > { %v718_v11 = vld [vmem:[#allocation3] sm:$0x3] }
 0x591   : > { %816 = vrot.lane.b32.xlu1 %v718_v11, %s3755_s23 }
 0x5f9   : > { %v688_v12 = vpop.permute.xlu0 %687 }
 0x5fa   : > { %690 = vst.msk [vmem:[#allocation2] sm:$0x3] %vm377_vm0, %v688_v12 }
 0x601   : > { %v717_v14 = vld [vmem:[#allocation2] sm:$0x3] }
 0x602   : > { %v719_v15 = vpack.c.bf16 %v717_v14, %v717_v14 }
 0x603   : > { %v817_v31 = vpop.permute.xlu1 %816 }
 0x604   : > { %3189 = vmatmul.mubr.msk.bf16.vlgmr.msra.gmra.mrb[4].mxu0 %vm406_vm2, %v719_v15 }
 0x605   : > { %3193 = vmatpush3.bf16.msra.mxu0 %v3992_v13  ;;  %3194 = vmatprep.mubr.msk.bf16.mxu0 %vm3753_vm1, %v3752_v9 }
 0x606   : > { %3212 = vmatprep.subr.bf16.mxu0 %v3752_v9 }
 0x610   : > { %3195 = vmatmul.mubr.msk.bf16.vlgmr.msra.gmra.mrb[4].mxu0 %vm464_vm3, %v3015_v17 }
 0x611   : > { %3213 = vmatpush3.bf16.msra.mxu0 %v3973_v8  ;;  %3216 = vmatprep.mubr.msk.bf16.mxu0 %vm3753_vm1, %v3752_v9 }
 0x612   : > { %3214 = vmatprep.subr.bf16.mxu0 %v3752_v9 }
 0x615   : > { %3215 = vmatpush3.bf16.msra.mxu0 %v3981_v10 }
 0x616   : > { %3220 = vmatprep.subr.bf16.mxu0 %v3752_v9 }
 0x6e3   : > { %v803_v19 = vpop.f32.mrb[4].mxu0 }
 0x6e4   : > { %v3382_v20 = vadd.f32 %v803_v19, %v4016_v18  ;;  %v3196_v21 = vpop.f32.mrb[5].mxu0  ;;  %v3023_v19 = vld [vmem:[%s4520_s0 + $0x4] sm:$0x1] }
 0x6e5   : > { %v806_v22 = vpop.f32.mrb[6].mxu0 }
 0x6e6   : > { %3547 = vtanh.f32 %v3382_v20  ;;  %v3197_v23 = vpop.f32.mrb[7].mxu0  ;;  %v810_v25 = vmul.f32 0.5, %v3382_v20 }
 0x6e8   : > { %3549 = vtanh.f32 %v810_v25 }
 0x6f0   : > { %v3548_v24 = vpop.eup %3547 }
 0x6f1   : > { %821 = vrot.lane.b32.xlu0 %v3548_v24, %s3754_s21 }
 0x6f2   : > { %v3550_v26 = vpop.eup %3549 }
 0x6f3   : > { %v812_v27 = vadd.f32 1.0, %v3550_v26 }
 0x6f5   : > { %v813_v28 = vmul.f32 0.5, %v812_v27 }
 0x6f7   : > { %v819_v32 = vmul.f32 %v817_v31, %v813_v28 }
 0x763   : > { %v822_v29 = vpop.permute.xlu0 %821 }
 0x764   : > { %v824_v30 = vmul.f32 %v822_v29, %v813_v28 }
 0x766   : > { %826 = vrot.lane.b32.xlu0 %v824_v30, %s3755_s23 }
 0x7d8   : > { %v827_v33 = vpop.permute.xlu0 %826 }
 0x7d9   : > { %v829_v34 = vadd.f32 %v827_v33, %v819_v32 }
 0x7db   : > { %3551 = vtanh.f32 %v829_v34 }
 0x7e5   : > { %v3552_v35 = vpop.eup %3551 }
 0x7e6   : > { %832 = vrot.lane.b32.xlu1 %v3552_v35, %s3754_s21 }
 0x7ea   : > { %842 = vrot.lane.b32.xlu1 %v829_v34, %s3756_s9 }
 0x858   : > { %v833_v36 = vpop.permute.xlu1 %832 }
 0x859   : > { %v4078_v37 = vmul.f32 %v833_v36, %v813_v28 }
 0x85b   : > { %837 = vrot.lane.b32.xlu0 %v4078_v37, %s3755_s23 }
 0x85c   : > { %v843_v39 = vpop.permute.xlu1 %842 }
 0x85d   : > { %845 = vst.msk [vmem:[#allocation3] sm:$0x3] %vm377_vm0, %v843_v39 }
 0x864   : > { %v868_v40 = vld [vmem:[#allocation3] sm:$0x3] }
 0x865   : > { %966 = vrot.lane.b32.xlu1 %v868_v40, %s3755_s23 }
 0x8cd   : > { %v838_v41 = vpop.permute.xlu0 %837 }
 0x8ce   : > { %840 = vst.msk [vmem:[#allocation2] sm:$0x3] %vm377_vm0, %v838_v41 }
 0x8d5   : > { %v867_v42 = vld [vmem:[#allocation2] sm:$0x3] }
 0x8d6   : > { %v869_v43 = vpack.c.bf16 %v867_v42, %v867_v42 }
 0x8d7   : > { %v967_v57 = vpop.permute.xlu1 %966 }
 0x8d8   : > { %3203 = vmatmul.mubr.msk.bf16.vlgmr.msra.gmra.mrb[4].mxu1 %vm406_vm2, %v869_v43 }
 0x8d9   : > { %3207 = vmatpush3.bf16.msra.mxu1 %v3992_v13  ;;  %3208 = vmatprep.mubr.msk.bf16.mxu1 %vm3753_vm1, %v3752_v9 }
 0x8da   : > { %3226 = vmatprep.subr.bf16.mxu1 %v3752_v9 }
 0x8e4   : > { %3209 = vmatmul.mubr.msk.bf16.vlgmr.msra.gmra.mrb[4].mxu1 %vm464_vm3, %v3019_v44 }
 0x8e5   : > { %3227 = vmatpush3.bf16.msra.mxu1 %v3973_v8  ;;  %3230 = vmatprep.mubr.msk.bf16.mxu1 %vm3753_vm1, %v3752_v9 }
 0x8e6   : > { %3228 = vmatprep.subr.bf16.mxu1 %v3752_v9 }
 0x8e9   : > { %3229 = vmatpush3.bf16.msra.mxu1 %v3981_v10 }
 0x8ea   : > { %3234 = vmatprep.subr.bf16.mxu1 %v3752_v9 }
 0x9b7   : > { %v953_v45 = vpop.f32.mrb[4].mxu1 }
 0x9b8   : > { %v3383_v46 = vadd.f32 %v953_v45, %v4016_v18  ;;  %v3210_v47 = vpop.f32.mrb[5].mxu1 }
 0x9b9   : > { %v956_v48 = vpop.f32.mrb[6].mxu1 }
 0x9ba   : > { %3553 = vtanh.f32 %v3383_v46  ;;  %v3211_v49 = vpop.f32.mrb[7].mxu1  ;;  %v960_v51 = vmul.f32 0.5, %v3383_v46  ;;  %v3027_v46 = vld [vmem:[%s4520_s0 + $0x5] sm:$0x1] }
 0x9bc   : > { %3555 = vtanh.f32 %v960_v51 }
 0x9c4   : > { %v3554_v50 = vpop.eup %3553 }
 0x9c5   : > { %971 = vrot.lane.b32.xlu0 %v3554_v50, %s3754_s21 }
 0x9c6   : > { %v3556_v52 = vpop.eup %3555 }
 0x9c7   : > { %v962_v53 = vadd.f32 1.0, %v3556_v52 }
 0x9c9   : > { %v963_v54 = vmul.f32 0.5, %v962_v53 }
 0x9cb   : > { %v969_v58 = vmul.f32 %v967_v57, %v963_v54 }
 0xa37   : > { %v972_v55 = vpop.permute.xlu0 %971 }
 0xa38   : > { %v974_v56 = vmul.f32 %v972_v55, %v963_v54 }
 0xa3a   : > { %976 = vrot.lane.b32.xlu0 %v974_v56, %s3755_s23 }
 0xaac   : > { %v977_v59 = vpop.permute.xlu0 %976 }
 0xaad   : > { %v979_v60 = vadd.f32 %v977_v59, %v969_v58 }
 0xaaf   : > { %3557 = vtanh.f32 %v979_v60 }
 0xab9   : > { %v3558_v61 = vpop.eup %3557 }
 0xaba   : > { %982 = vrot.lane.b32.xlu1 %v3558_v61, %s3754_s21 }
 0xabe   : > { %992 = vrot.lane.b32.xlu1 %v979_v60, %s3756_s9 }
 0xb2c   : > { %v983_v62 = vpop.permute.xlu1 %982 }
 0xb2d   : > { %v4105_v0 = vmul.f32 %v983_v62, %v963_v54 }
 0xb2f   : > { %987 = vrot.lane.b32.xlu0 %v4105_v0, %s3755_s23 }
 0xb30   : > { %v993_v11 = vpop.permute.xlu1 %992 }
 0xb31   : > { %995 = vst.msk [vmem:[#allocation3] sm:$0x3] %vm377_vm0, %v993_v11 }
 0xb38   : > { %v1018_v12 = vld [vmem:[#allocation3] sm:$0x3] }
 0xb39   : > { %1116 = vrot.lane.b32.xlu1 %v1018_v12, %s3755_s23 }
 0xba1   : > { %v988_v14 = vpop.permute.xlu0 %987 }
 0xba2   : > { %990 = vst.msk [vmem:[#allocation2] sm:$0x3] %vm377_vm0, %v988_v14 }
 0xba9   : > { %v1017_v15 = vld [vmem:[#allocation2] sm:$0x3] }
 0xbaa   : > { %v1019_v17 = vpack.c.bf16 %v1017_v15, %v1017_v15 }
 0xbab   : > { %v1117_v32 = vpop.permute.xlu1 %1116 }
 0xbac   : > { %3217 = vmatmul.mubr.msk.bf16.vlgmr.msra.gmra.mrb[8].mxu0 %vm406_vm2, %v1019_v17 }
 0xbad   : > { %3221 = vmatpush3.bf16.msra.mxu0 %v3992_v13  ;;  %3222 = vmatprep.mubr.msk.bf16.mxu0 %vm3753_vm1, %v3752_v9 }
 0xbae   : > { %3240 = vmatprep.subr.bf16.mxu0 %v3752_v9 }
 0xbb8   : > { %3223 = vmatmul.mubr.msk.bf16.vlgmr.msra.gmra.mrb[8].mxu0 %vm464_vm3, %v3023_v19 }
 0xbb9   : > { %3241 = vmatpush3.bf16.msra.mxu0 %v3973_v8  ;;  %3244 = vmatprep.mubr.msk.bf16.mxu0 %vm3753_vm1, %v3752_v9 }
 0xbba   : > { %3242 = vmatprep.subr.bf16.mxu0 %v3752_v9 }
 0xbbd   : > { %3243 = vmatpush3.bf16.msra.mxu0 %v3981_v10 }
 0xbbe   : > { %3248 = vmatprep.subr.bf16.mxu0 %v3752_v9 }
 0xc8b   : > { %v1103_v20 = vpop.f32.mrb[8].mxu0 }
 0xc8c   : > { %v3384_v21 = vadd.f32 %v1103_v20, %v4016_v18  ;;  %v3224_v22 = vpop.f32.mrb[9].mxu0  ;;  %v3031_v20 = vld [vmem:[%s4520_s0 + $0x6] sm:$0x1] }
 0xc8d   : > { %v1106_v23 = vpop.f32.mrb[10].mxu0 }
 0xc8e   : > { %3559 = vtanh.f32 %v3384_v21  ;;  %v3225_v24 = vpop.f32.mrb[11].mxu0  ;;  %v1110_v26 = vmul.f32 0.5, %v3384_v21 }
 0xc90   : > { %3561 = vtanh.f32 %v1110_v26 }
 0xc98   : > { %v3560_v25 = vpop.eup %3559 }
 0xc99   : > { %1121 = vrot.lane.b32.xlu0 %v3560_v25, %s3754_s21 }
 0xc9a   : > { %v3562_v27 = vpop.eup %3561 }
 0xc9b   : > { %v1112_v28 = vadd.f32 1.0, %v3562_v27 }
 0xc9d   : > { %v1113_v29 = vmul.f32 0.5, %v1112_v28 }
 0xc9f   : > { %v1119_v33 = vmul.f32 %v1117_v32, %v1113_v29 }
 0xd0b   : > { %v1122_v30 = vpop.permute.xlu0 %1121 }
 0xd0c   : > { %v1124_v31 = vmul.f32 %v1122_v30, %v1113_v29 }
 0xd0e   : > { %1126 = vrot.lane.b32.xlu0 %v1124_v31, %s3755_s23 }
 0xd80   : > { %v1127_v34 = vpop.permute.xlu0 %1126 }
 0xd81   : > { %v1129_v35 = vadd.f32 %v1127_v34, %v1119_v33 }
 0xd83   : > { %3563 = vtanh.f32 %v1129_v35 }
 0xd8d   : > { %v3564_v36 = vpop.eup %3563 }
 0xd8e   : > { %1132 = vrot.lane.b32.xlu1 %v3564_v36, %s3754_s21 }
 0xd92   : > { %1142 = vrot.lane.b32.xlu1 %v1129_v35, %s3756_s9 }
 0xe00   : > { %v1133_v39 = vpop.permute.xlu1 %1132 }
 0xe01   : > { %v4132_v40 = vmul.f32 %v1133_v39, %v1113_v29 }
 0xe03   : > { %1137 = vrot.lane.b32.xlu0 %v4132_v40, %s3755_s23 }
 0xe04   : > { %v1143_v41 = vpop.permute.xlu1 %1142 }
 0xe05   : > { %1145 = vst.msk [vmem:[#allocation3] sm:$0x3] %vm377_vm0, %v1143_v41 }
 0xe0c   : > { %v1168_v42 = vld [vmem:[#allocation3] sm:$0x3] }
 0xe0d   : > { %1266 = vrot.lane.b32.xlu1 %v1168_v42, %s3755_s23 }
 0xe75   : > { %v1138_v43 = vpop.permute.xlu0 %1137 }
 0xe76   : > { %1140 = vst.msk [vmem:[#allocation2] sm:$0x3] %vm377_vm0, %v1138_v43 }
 0xe7d   : > { %v1167_v44 = vld [vmem:[#allocation2] sm:$0x3] }
 0xe7e   : > { %v1169_v45 = vpack.c.bf16 %v1167_v44, %v1167_v44 }
 0xe80   : > { %3231 = vmatmul.mubr.msk.bf16.vlgmr.msra.gmra.mrb[8].mxu1 %vm406_vm2, %v1169_v45 }
 0xe81   : > { %3235 = vmatpush3.bf16.msra.mxu1 %v3992_v13  ;;  %3236 = vmatprep.mubr.msk.bf16.mxu1 %vm3753_vm1, %v3752_v9 }
 0xe82   : > { %3254 = vmatprep.subr.bf16.mxu1 %v3752_v9 }
 0xe8c   : > { %3237 = vmatmul.mubr.msk.bf16.vlgmr.msra.gmra.mrb[8].mxu1 %vm464_vm3, %v3027_v46 }
 0xe8d   : > { %3255 = vmatpush3.bf16.msra.mxu1 %v3973_v8  ;;  %3258 = vmatprep.mubr.msk.bf16.mxu1 %vm3753_vm1, %v3752_v9 }
 0xe8e   : > { %3256 = vmatprep.subr.bf16.mxu1 %v3752_v9 }
 0xe91   : > { %3257 = vmatpush3.bf16.msra.mxu1 %v3981_v10  ;;  %v1267_v10 = vpop.permute.xlu1 %1266 }
 0xe92   : > { %3262 = vmatprep.subr.bf16.mxu1 %v3752_v9 }
 0xf5f   : > { %v1253_v47 = vpop.f32.mrb[8].mxu1 }
 0xf60   : > { %v3385_v48 = vadd.f32 %v1253_v47, %v4016_v18  ;;  %v3238_v49 = vpop.f32.mrb[9].mxu1 }
 0xf61   : > { %v1256_v50 = vpop.f32.mrb[10].mxu1 }
 0xf62   : > { %3565 = vtanh.f32 %v3385_v48  ;;  %v3239_v51 = vpop.f32.mrb[11].mxu1  ;;  %v1260_v8 = vmul.f32 0.5, %v3385_v48  ;;  %v3035_v48 = vld [vmem:[%s4520_s0 + $0x7] sm:$0x1] }
 0xf64   : > { %3567 = vtanh.f32 %v1260_v8 }
 0xf6c   : > { %v3566_v52 = vpop.eup %3565 }
 0xf6d   : > { %1271 = vrot.lane.b32.xlu0 %v3566_v52, %s3754_s21 }
 0xf6e   : > { %v3568_v53 = vpop.eup %3567 }
 0xf6f   : > { %v1262_v54 = vadd.f32 1.0, %v3568_v53 }
 0xf71   : > { %v1263_v55 = vmul.f32 0.5, %v1262_v54  ;;  %v3757_v54 = vmov 1966171168  }
 0xf73   : > { %v1269_v58 = vmul.f32 %v1267_v10, %v1263_v55 }
 0xfdf   : > { %v1272_v56 = vpop.permute.xlu0 %1271 }
 0xfe0   : > { %v1274_v57 = vmul.f32 %v1272_v56, %v1263_v55 }
 0xfe2   : > { %1276 = vrot.lane.b32.xlu0 %v1274_v57, %s3755_s23 }
0x1054   : > { %v1277_v59 = vpop.permute.xlu0 %1276 }
0x1055   : > { %v1279_v60 = vadd.f32 %v1277_v59, %v1269_v58  ;;  %v546_v58 = vpack.c.bf16 %v4024_v38, %v4024_v38 }
0x1057   : > { %3569 = vtanh.f32 %v1279_v60 }
0x1061   : > { %v3570_v61 = vpop.eup %3569 }
0x1062   : > { %1282 = vrot.lane.b32.xlu1 %v3570_v61, %s3754_s21  ;;  %v846_v61 = vpack.c.bf16 %v4078_v37, %v4078_v37 }
0x1066   : > { %1292 = vrot.lane.b32.xlu1 %v1279_v60, %s3756_s9 }
0x10d4   : > { %v1283_v62 = vpop.permute.xlu1 %1282 }
0x10d5   : > { %v4159_v11 = vmul.f32 %v1283_v62, %v1263_v55 }
0x10d7   : > { %1287 = vrot.lane.b32.xlu0 %v4159_v11, %s3755_s23 }
0x10d8   : > { %v1293_v12 = vpop.permute.xlu1 %1292 }
0x10d9   : > { %1295 = vst.msk [vmem:[#allocation3] sm:$0x3] %vm377_vm0, %v1293_v12 }
0x10e0   : > { %v1318_v14 = vld [vmem:[#allocation3] sm:$0x3] }
0x10e1   : > { %1416 = vrot.lane.b32.xlu1 %v1318_v14, %s3755_s23  ;;  %v1146_v14 = vpack.c.bf16 %v4132_v40, %v4132_v40 }
0x1149   : > { %v1288_v15 = vpop.permute.xlu0 %1287 }
0x114a   : > { %1290 = vst.msk [vmem:[#allocation2] sm:$0x3] %vm377_vm0, %v1288_v15 }
0x1151   : > { %v1317_v17 = vld [vmem:[#allocation2] sm:$0x3] }
0x1152   : > { %v1319_v19 = vpack.c.bf16 %v1317_v17, %v1317_v17 }
0x1153   : > { %v1417_v33 = vpop.permute.xlu1 %1416 }
0x1154   : > { %3245 = vmatmul.mubr.msk.bf16.vlgmr.msra.gmra.mrb[12].mxu0 %vm406_vm2, %v1319_v19 }
0x1155   : > { %3249 = vmatpush3.bf16.msra.mxu0 %v3992_v13  ;;  %3250 = vmatprep.mubr.msk.bf16.mxu0 %vm3753_vm1, %v3752_v9 }
0x1160   : > { %3251 = vmatmul.mubr.msk.bf16.vlgmr.msra.gmra.mrb[12].mxu0 %vm464_vm3, %v3031_v20 }
0x1233   : > { %v1403_v21 = vpop.f32.mrb[12].mxu0 }
0x1234   : > { %v3386_v22 = vadd.f32 %v1403_v21, %v4016_v18  ;;  %v3252_v23 = vpop.f32.mrb[13].mxu0 }
0x1235   : > { %v1406_v24 = vpop.f32.mrb[14].mxu0 }
0x1236   : > { %3571 = vtanh.f32 %v3386_v22  ;;  %v3253_v25 = vpop.f32.mrb[15].mxu0  ;;  %v1410_v27 = vmul.f32 0.5, %v3386_v22 }
0x1237   : > { %v696_v25 = vpack.c.bf16 %v4051_v63, %v4051_v63 }
0x1238   : > { %3573 = vtanh.f32 %v1410_v27 }
0x1240   : > { %v3572_v26 = vpop.eup %3571 }
0x1241   : > { %1421 = vrot.lane.b32.xlu0 %v3572_v26, %s3754_s21 }
0x1242   : > { %v3574_v28 = vpop.eup %3573 }
0x1243   : > { %v1412_v29 = vadd.f32 1.0, %v3574_v28  ;;  %v996_v28 = vpack.c.bf16 %v4105_v0, %v4105_v0 }
0x1245   : > { %v1413_v30 = vmul.f32 0.5, %v1412_v29 }
0x1247   : > { %v1419_v34 = vmul.f32 %v1417_v33, %v1413_v30 }
0x12b3   : > { %v1422_v31 = vpop.permute.xlu0 %1421 }
0x12b4   : > { %v1424_v32 = vmul.f32 %v1422_v31, %v1413_v30 }
0x12b6   : > { %1426 = vrot.lane.b32.xlu0 %v1424_v32, %s3755_s23  ;;  %v1296_v32 = vpack.c.bf16 %v4159_v11, %v4159_v11 }
0x1328   : > { %v1427_v35 = vpop.permute.xlu0 %1426 }
0x1329   : > { %v1429_v36 = vadd.f32 %v1427_v35, %v1419_v34 }
0x132b   : > { %3575 = vtanh.f32 %v1429_v36 }
0x1335   : > { %v3576_v39 = vpop.eup %3575 }
0x1336   : > { %1432 = vrot.lane.b32.xlu1 %v3576_v39, %s3754_s21 }
0x133a   : > { %1442 = vrot.lane.b32.xlu1 %v1429_v36, %s3756_s9 }
0x13a8   : > { %v1433_v41 = vpop.permute.xlu1 %1432 }
0x13a9   : > { %v1435_v42 = vmul.f32 %v1433_v41, %v1413_v30 }
0x13ab   : > { %1437 = vrot.lane.b32.xlu0 %v1435_v42, %s3755_s23  ;;  %v1446_v17 = vpack.c.bf16 %v1435_v42, %v1435_v42 }
0x13ac   : > { %v1443_v43 = vpop.permute.xlu1 %1442 }
0x13ad   : > { %1445 = vst.msk [vmem:[#allocation3] sm:$0x3] %vm377_vm0, %v1443_v43 }
0x13b4   : > { %v1468_v44 = vld [vmem:[#allocation3] sm:$0x3] }
0x13b5   : > { %1566 = vrot.lane.b32.xlu1 %v1468_v44, %s3755_s23 }
0x141d   : > { %v1438_v45 = vpop.permute.xlu0 %1437 }
0x141e   : > { %1440 = vst.msk [vmem:[#allocation2] sm:$0x3] %vm377_vm0, %v1438_v45 }
0x1425   : > { %v1467_v46 = vld [vmem:[#allocation2] sm:$0x3] }
0x1426   : > { %v1469_v47 = vpack.c.bf16 %v1467_v46, %v1467_v46 }
0x1427   : > { %v1567_v21 = vpop.permute.xlu1 %1566 }
0x1428   : > { %3259 = vmatmul.mubr.msk.bf16.vlgmr.msra.gmra.mrb[12].mxu1 %vm406_vm2, %v1469_v47 }
0x1429   : > { %3263 = vmatpush3.bf16.msra.mxu1 %v3992_v13  ;;  %3264 = vmatprep.mubr.msk.bf16.mxu1 %vm3753_vm1, %v3752_v9  ;;  %v549_v9 = vunpack.c.l.s4 %v3757_v54 }
0x142b   : > { %v550_v56 = vunpack.c.0.s8 %v549_v9 }
0x142d   : > { %v553_v10 = vsub.s32 %v550_v56, %v4012_v16 }
0x142f   : > { %v554_v60 = vrot.slane %v546_v58, %v553_v10  ;;  %v854_v12 = vrot.slane %v846_v61, %v553_v10  ;;  %v1154_v16 = vrot.slane %v1146_v14, %v553_v10  ;;  %v1454_v19 = vrot.slane %v1446_v17, %v553_v10 }
0x1430   : > { %v704_v27 = vrot.slane %v696_v25, %v553_v10  ;;  %v1004_v31 = vrot.slane %v996_v28, %v553_v10  ;;  %v1304_v63 = vrot.slane %v1296_v32, %v553_v10 }
0x1431   : > { %v561_v15 = vrot.slane %v554_v60, %v553_v10  ;;  %v861_v38 = vrot.slane %v854_v12, %v553_v10  ;;  %v1161_v20 = vrot.slane %v1154_v16, %v553_v10  ;;  %v1461_v37 = vrot.slane %v1454_v19, %v553_v10 }
0x1432   : > { %v711_v34 = vrot.slane %v704_v27, %v553_v10  ;;  %v1011_v0 = vrot.slane %v1004_v31, %v553_v10  ;;  %v1311_v35 = vrot.slane %v1304_v63, %v553_v10 }
0x1434   : > { %3265 = vmatmul.mubr.msk.bf16.vlgmr.msra.gmra.mrb[12].mxu1 %vm464_vm3, %v3035_v48 }
0x1507   : > { %v1553_v49 = vpop.f32.mrb[12].mxu1 }
0x1508   : > { %v3387_v50 = vadd.f32 %v1553_v49, %v4016_v18  ;;  %v3266_v51 = vpop.f32.mrb[13].mxu1 }
0x1509   : > { %v1556_v52 = vpop.f32.mrb[14].mxu1 }
0x150a   : > { %3577 = vtanh.f32 %v3387_v50  ;;  %v3267_v8 = vpop.f32.mrb[15].mxu1  ;;  %v1560_v13 = vmul.f32 0.5, %v3387_v50 }
0x150c   : > { %3579 = vtanh.f32 %v1560_v13 }
0x1514   : > { %v3578_v53 = vpop.eup %3577 }
0x1515   : > { %1571 = vrot.lane.b32.xlu0 %v3578_v53, %s3754_s21 }
0x1516   : > { %v3580_v55 = vpop.eup %3579 }
0x1517   : > { %v1562_v57 = vadd.f32 1.0, %v3580_v55 }
0x1519   : > { %v1563_v18 = vmul.f32 0.5, %v1562_v57 }
0x151b   : > { %v1569_v40 = vmul.f32 %v1567_v21, %v1563_v18 }
0x1587   : > { %v1572_v59 = vpop.permute.xlu0 %1571 }
0x1588   : > { %v1574_v62 = vmul.f32 %v1572_v59, %v1563_v18 }
0x158a   : > { %1576 = vrot.lane.b32.xlu0 %v1574_v62, %s3755_s23 }
0x158e   : > { %562 = vrot.lane.b32.xlu0 %v561_v15, %s3755_s23 }
0x1592   : > { %862 = vrot.lane.b32.xlu0 %v861_v38, %s3755_s23 }
0x1596   : > { %1162 = vrot.lane.b32.xlu0 %v1161_v20, %s3755_s23 }
0x159a   : > { %1462 = vrot.lane.b32.xlu0 %v1461_v37, %s3755_s23 }
0x15fc   : > { %v1577_v22 = vpop.permute.xlu0 %1576 }
0x15fd   : > { %v1579_v23 = vadd.f32 %v1577_v22, %v1569_v40 }
0x15ff   : > { %3581 = vtanh.f32 %v1579_v23  ;;  %1592 = vrot.lane.b32.xlu0 %v1579_v23, %s3756_s9 }
0x1600   : > { %v563_v24 = vpop.permute.xlu0 %562 }
0x1601   : > { %566 = vst.msk [vmem:[%s3951_s24] sm:$0x1] %vm565_vm4, %v563_v24 }
0x1604   : > { %v863_v26 = vpop.permute.xlu0 %862 }
0x1605   : > { %3017 = vst.msk [vmem:[%s3951_s24 + $0x2] sm:$0x1] %vm565_vm4, %v863_v26 }
0x1608   : > { %v1163_v29 = vpop.permute.xlu0 %1162 }
0x1609   : > { %v3582_v30 = vpop.eup %3581  ;;  %3025 = vst.msk [vmem:[%s3951_s24 + $0x4] sm:$0x1] %vm565_vm4, %v1163_v29 }
0x160a   : > { %1582 = vrot.lane.b32.xlu1 %v3582_v30, %s3754_s21 }
0x160c   : > { %v1463_v33 = vpop.permute.xlu0 %1462 }
0x160d   : > { %3033 = vst.msk [vmem:[%s3951_s24 + $0x6] sm:$0x1] %vm565_vm4, %v1463_v33 }
0x160e   : > { %712 = vrot.lane.b32.xlu1 %v711_v34, %s3755_s23 }
0x1612   : > { %1012 = vrot.lane.b32.xlu1 %v1011_v0, %s3755_s23 }
0x1616   : > { %1312 = vrot.lane.b32.xlu1 %v1311_v35, %s3755_s23 }
0x1671   : > { %v1593_v36 = vpop.permute.xlu0 %1592 }
0x1672   : > { %1595 = vst.msk [vmem:[#allocation3] sm:$0x3] %vm377_vm0, %v1593_v36 }
0x167c   : > { %v1583_v11 = vpop.permute.xlu1 %1582 }
0x167d   : > { %v1585_v39 = vmul.f32 %v1583_v11, %v1563_v18 }
0x167f   : > { %v1596_v41 = vpack.c.bf16 %v1585_v39, %v1585_v39  ;;  %1587 = vrot.lane.b32.xlu1 %v1585_v39, %s3755_s23 }
0x1680   : > { %v713_v42 = vpop.permute.xlu1 %712 }
0x1681   : > { %v1604_v43 = vrot.slane %v1596_v41, %v553_v10  ;;  %3013 = vst.msk [vmem:[%s3951_s24 + $0x1] sm:$0x1] %vm565_vm4, %v713_v42 }
0x1683   : > { %v1611_v44 = vrot.slane %v1604_v43, %v553_v10 }
0x1684   : > { %v1013_v45 = vpop.permute.xlu1 %1012 }
0x1685   : > { %3021 = vst.msk [vmem:[%s3951_s24 + $0x3] sm:$0x1] %vm565_vm4, %v1013_v45  ;;  %1612 = vrot.lane.b32.xlu1 %v1611_v44, %s3755_s23 }
0x1688   : > { %v1313_v46 = vpop.permute.xlu1 %1312 }
0x1689   : > { %3029 = vst.msk [vmem:[%s3951_s24 + $0x5] sm:$0x1] %vm565_vm4, %v1313_v46 }
0x16f1   : > { %v1588_v47 = vpop.permute.xlu1 %1587 }
0x16f2   : > { %1590 = vst.msk [vmem:[#allocation2] sm:$0x3] %vm377_vm0, %v1588_v47 }
0x16f7   : > { %v1613_v48 = vpop.permute.xlu1 %1612 }
0x16f8   : > { %3037 = vst.msk [vmem:[%s3951_s24 + $0x7] sm:$0x1] %vm565_vm4, %v1613_v48 }
0x16f9 PF: > { %p3038_p4 = scmp.ne.s32.totalorder %s3737_s18, 1 }
0x16fa   : > { %v4239_v49 = vcombine.low (!%p3038_p4), %v3956_v1, %v3958_v2  ;;  %v3758_v50 = vmov (!%p3038_p4), 0.0   ;;  %vm3759_vm5 = vmmov (!%p3038_p4), 0   ;;  %v4247_v51 = vcombine.low (!%p3038_p4), %v3960_v3, %v3962_v4  ;;  %v1621_v52 = vld [vmem:[#allocation2] sm:$0x3] (!%p3038_p4)  ;;  %v3042_v3 = vld [vmem:[%s4520_s0 + $0x7] sm:$0x1] (!%p3038_p4) }
0x16fb   : > { %1620 = sbr.rel (%p3038_p4) target bundleno = 11680 (0x2da0), region = 56  ;;  %3268 = vmatprep.subr.bf16.mxu0 (!%p3038_p4), %v3758_v50  ;;  %3272 = vmatprep.mubr.msk.bf16.mxu0 (!%p3038_p4), %vm3759_vm5, %v3758_v50  ;;  %v1623_v1 = vpack.c.bf16 (!%p3038_p4), %v1621_v52, %v1621_v52  ;;  %vm1636_vm6 = vcmask (!%p3038_p4), 261120   ;;  %v4258_v2 = vcombine.low (!%p3038_p4), %v3964_v5, %v3966_v6  ;;  %vm1695_vm7 = vcmask (!%p3038_p4), 130048   ;;  %s3760_s21 = smov (!%p3038_p4), 64   ;;  %v1622_v57 = vld [vmem:[#allocation3] sm:$0x3] (!%p3038_p4) }
0x16fc   : > { %3269 = vmatpush3.bf16.msra.mxu0 (!%p3038_p4), %v4239_v49  ;;  %3282 = vmatprep.subr.bf16.mxu1 (!%p3038_p4), %v3758_v50  ;;  %v1681_v4 = vlaneseq (!%p3038_p4)  ;;  %s3761_s23 = smov (!%p3038_p4), 32   ;;  %s3762_s9 = smov (!%p3038_p4), 96   ;;  %v3047_v40 = vld [vmem:[%s4520_s0 + $0x6] sm:$0x1] (!%p3038_p4)  ;;  %v3051_v46 = vld [vmem:[%s4520_s0 + $0x5] sm:$0x1] (!%p3038_p4) }
0x16fd   : > { %3270 = vmatprep.subr.bf16.mxu0 (!%p3038_p4), %v3758_v50  ;;  %3283 = vmatpush3.bf16.msra.mxu1 (!%p3038_p4), %v4239_v49  ;;  %vm1797_vm8 = vcmask (!%p3038_p4), 253952  }
0x16fe   : > { %3284 = vmatprep.subr.bf16.mxu1 (!%p3038_p4), %v3758_v50  ;;  %3286 = vmatprep.mubr.msk.bf16.mxu1 (!%p3038_p4), %vm3759_vm5, %v3758_v50  ;;  %v4278_v5 = vshrl.u32 (!%p3038_p4), %v1681_v4, 7 }
0x1700   : > { %3271 = vmatpush3.bf16.msra.mxu0 (!%p3038_p4), %v4247_v51  ;;  %v1683_v6 = vsub.s32 (!%p3038_p4), 0, %v4278_v5 }
0x1701   : > { %3276 = vmatprep.subr.bf16.mxu0 (!%p3038_p4), %v3758_v50  ;;  %3285 = vmatpush3.bf16.msra.mxu1 (!%p3038_p4), %v4247_v51 }
0x1702   : > { %3290 = vmatprep.subr.bf16.mxu1 %v3758_v50  ;;  %v4282_v8 = vrot.slane %v3968_v7, %v1683_v6 }
0x1703   : > { %3273 = vmatmul.mubr.msk.bf16.vlgmr.msra.gmra.mrb[0].mxu0 %vm1636_vm6, %v1623_v1 }
0x1704   : > { %3277 = vmatpush3.bf16.msra.mxu0 %v4258_v2  ;;  %3278 = vmatprep.mubr.msk.bf16.mxu0 %vm3759_vm5, %v3758_v50 }
0x1705   : > { %3296 = vmatprep.subr.bf16.mxu0 %v3758_v50 }
0x170f   : > { %3279 = vmatmul.mubr.msk.bf16.vlgmr.msra.gmra.mrb[0].mxu0 %vm1695_vm7, %v3042_v3 }
0x1710   : > { %3297 = vmatpush3.bf16.msra.mxu0 %v4239_v49  ;;  %3300 = vmatprep.mubr.msk.bf16.mxu0 %vm3759_vm5, %v3758_v50 }
0x1711   : > { %3298 = vmatprep.subr.bf16.mxu0 %v3758_v50 }
0x1714   : > { %3299 = vmatpush3.bf16.msra.mxu0 %v4247_v51 }
0x1715   : > { %3304 = vmatprep.subr.bf16.mxu0 %v3758_v50 }
0x17e2   : > { %v1733_v53 = vpop.f32.mrb[0].mxu0 }
0x17e3   : > { %v3420_v13 = vadd.f32 %v1733_v53, %v4282_v8  ;;  %v3280_v54 = vpop.f32.mrb[1].mxu0 }
0x17e4   : > { %v1736_v9 = vpop.f32.mrb[2].mxu0 }
0x17e5   : > { %3583 = vtanh.f32 %v3420_v13  ;;  %v3281_v55 = vpop.f32.mrb[3].mxu0  ;;  %v1740_v10 = vmul.f32 0.5, %v3420_v13 }
0x17e7   : > { %3585 = vtanh.f32 %v1740_v10 }
0x17ef   : > { %v3584_v56 = vpop.eup %3583 }
0x17f0   : > { %1751 = vrot.lane.b32.xlu0 %v3584_v56, %s3760_s21 }
0x17f1   : > { %v3586_v58 = vpop.eup %3585 }
0x17f2   : > { %v1742_v7 = vadd.f32 1.0, %v3586_v58 }
0x17f4   : > { %1746 = vrot.lane.b32.xlu0 %v1622_v57, %s3761_s23  ;;  %v1743_v18 = vmul.f32 0.5, %v1742_v7 }
0x1862   : > { %v1752_v59 = vpop.permute.xlu0 %1751 }
0x1863   : > { %v1754_v60 = vmul.f32 %v1752_v59, %v1743_v18 }
0x1865   : > { %1756 = vrot.lane.b32.xlu1 %v1754_v60, %s3761_s23 }
0x1866   : > { %v1747_v61 = vpop.permute.xlu0 %1746 }
0x1867   : > { %v1749_v62 = vmul.f32 %v1747_v61, %v1743_v18 }
0x18d7   : > { %v1757_v12 = vpop.permute.xlu1 %1756 }
0x18d8   : > { %v1759_v14 = vadd.f32 %v1757_v12, %v1749_v62 }
0x18da   : > { %3587 = vtanh.f32 %v1759_v14 }
0x18e4   : > { %v3588_v15 = vpop.eup %3587 }
0x18e5   : > { %1762 = vrot.lane.b32.xlu1 %v3588_v15, %s3760_s21  ;;  %v3055_v15 = vld [vmem:[%s4520_s0 + $0x4] sm:$0x1] }
0x18e9   : > { %1773 = vrot.lane.b32.xlu1 %v1759_v14, %s3762_s9 }
0x1957   : > { %v1763_v16 = vpop.permute.xlu1 %1762 }
0x1958   : > { %v4290_v17 = vmul.f32 %v1763_v16, %v1743_v18 }
0x195a   : > { %1767 = vrot.lane.b32.xlu0 %v4290_v17, %s3761_s23 }
0x195b   : > { %v1774_v38 = vpop.permute.xlu1 %1773 }
0x195c   : > { %1776 = vst.msk [vmem:[#allocation3] sm:$0x3] %vm377_vm0, %v1774_v38 }
0x1963   : > { %v1800_v19 = vld [vmem:[#allocation3] sm:$0x3] }
0x1964   : > { %1898 = vrot.lane.b32.xlu1 %v1800_v19, %s3761_s23 }
0x19cc   : > { %v1768_v20 = vpop.permute.xlu0 %1767 }
0x19cd   : > { %1771 = vst.msk [vmem:[#allocation2] sm:$0x3] %vm377_vm0, %v1768_v20 }
0x19d4   : > { %v1799_v37 = vld [vmem:[#allocation2] sm:$0x3] }
0x19d5   : > { %v1801_v21 = vpack.c.bf16 %v1799_v37, %v1799_v37 }
0x19d6   : > { %v1899_v34 = vpop.permute.xlu1 %1898 }
0x19d7   : > { %3287 = vmatmul.mubr.msk.bf16.vlgmr.msra.gmra.mrb[0].mxu1 %vm1636_vm6, %v1801_v21 }
0x19d8   : > { %3291 = vmatpush3.bf16.msra.mxu1 %v4258_v2  ;;  %3292 = vmatprep.mubr.msk.bf16.mxu1 %vm3759_vm5, %v3758_v50 }
0x19d9   : > { %3310 = vmatprep.subr.bf16.mxu1 %v3758_v50 }
0x19e3   : > { %3293 = vmatmul.mubr.msk.bf16.vlgmr.msra.gmra.mrb[0].mxu1 %vm1695_vm7, %v3047_v40 }
0x19e4   : > { %3311 = vmatpush3.bf16.msra.mxu1 %v4239_v49  ;;  %3314 = vmatprep.mubr.msk.bf16.mxu1 %vm3759_vm5, %v3758_v50 }
0x19e5   : > { %3312 = vmatprep.subr.bf16.mxu1 %v3758_v50 }
0x19e8   : > { %3313 = vmatpush3.bf16.msra.mxu1 %v4247_v51 }
0x19e9   : > { %3318 = vmatprep.subr.bf16.mxu1 %v3758_v50 }
0x1ab6   : > { %v1885_v22 = vpop.f32.mrb[0].mxu1 }
0x1ab7   : > { %v3421_v23 = vadd.f32 %v1885_v22, %v4282_v8  ;;  %v3294_v24 = vpop.f32.mrb[1].mxu1 }
0x1ab8   : > { %v1888_v25 = vpop.f32.mrb[2].mxu1 }
0x1ab9   : > { %3589 = vtanh.f32 %v3421_v23  ;;  %v3295_v26 = vpop.f32.mrb[3].mxu1  ;;  %v1892_v28 = vmul.f32 0.5, %v3421_v23 }
0x1abb   : > { %3591 = vtanh.f32 %v1892_v28 }
0x1ac3   : > { %v3590_v27 = vpop.eup %3589 }
0x1ac4   : > { %1903 = vrot.lane.b32.xlu0 %v3590_v27, %s3760_s21 }
0x1ac5   : > { %v3592_v29 = vpop.eup %3591 }
0x1ac6   : > { %v1894_v30 = vadd.f32 1.0, %v3592_v29 }
0x1ac8   : > { %v1895_v31 = vmul.f32 0.5, %v1894_v30 }
0x1aca   : > { %v1901_v63 = vmul.f32 %v1899_v34, %v1895_v31 }
0x1b36   : > { %v1904_v32 = vpop.permute.xlu0 %1903 }
0x1b37   : > { %v1906_v33 = vmul.f32 %v1904_v32, %v1895_v31 }
0x1b39   : > { %1908 = vrot.lane.b32.xlu0 %v1906_v33, %s3761_s23 }
0x1bab   : > { %v1909_v0 = vpop.permute.xlu0 %1908 }
0x1bac   : > { %v1911_v35 = vadd.f32 %v1909_v0, %v1901_v63 }
0x1bae   : > { %3593 = vtanh.f32 %v1911_v35 }
0x1bb8   : > { %v3594_v36 = vpop.eup %3593 }
0x1bb9   : > { %1914 = vrot.lane.b32.xlu1 %v3594_v36, %s3760_s21 }
0x1bbd   : > { %1924 = vrot.lane.b32.xlu1 %v1911_v35, %s3762_s9 }
0x1c2b   : > { %v1915_v11 = vpop.permute.xlu1 %1914 }
0x1c2c   : > { %v4317_v39 = vmul.f32 %v1915_v11, %v1895_v31  ;;  %v3059_v11 = vld [vmem:[%s4520_s0 + $0x3] sm:$0x1] }
0x1c2e   : > { %1919 = vrot.lane.b32.xlu0 %v4317_v39, %s3761_s23 }
0x1c2f   : > { %v1925_v41 = vpop.permute.xlu1 %1924 }
0x1c30   : > { %1927 = vst.msk [vmem:[#allocation3] sm:$0x3] %vm377_vm0, %v1925_v41 }
0x1c37   : > { %v1950_v42 = vld [vmem:[#allocation3] sm:$0x3] }
0x1c38   : > { %2048 = vrot.lane.b32.xlu1 %v1950_v42, %s3761_s23 }
0x1ca0   : > { %v1920_v43 = vpop.permute.xlu0 %1919 }
0x1ca1   : > { %1922 = vst.msk [vmem:[#allocation2] sm:$0x3] %vm377_vm0, %v1920_v43 }
0x1ca8   : > { %v1949_v44 = vld [vmem:[#allocation2] sm:$0x3] }
0x1ca9   : > { %v1951_v45 = vpack.c.bf16 %v1949_v44, %v1949_v44 }
0x1caa   : > { %v2049_v56 = vpop.permute.xlu1 %2048 }
0x1cab   : > { %3301 = vmatmul.mubr.msk.bf16.vlgmr.msra.gmra.mrb[4].mxu0 %vm1636_vm6, %v1951_v45 }
0x1cac   : > { %3305 = vmatpush3.bf16.msra.mxu0 %v4258_v2  ;;  %3306 = vmatprep.mubr.msk.bf16.mxu0 %vm3759_vm5, %v3758_v50 }
0x1cad   : > { %3324 = vmatprep.subr.bf16.mxu0 %v3758_v50 }
0x1cb7   : > { %3307 = vmatmul.mubr.msk.bf16.vlgmr.msra.gmra.mrb[4].mxu0 %vm1695_vm7, %v3051_v46 }
0x1cb8   : > { %3325 = vmatpush3.bf16.msra.mxu0 %v4239_v49  ;;  %3328 = vmatprep.mubr.msk.bf16.mxu0 %vm3759_vm5, %v3758_v50 }
0x1cb9   : > { %3326 = vmatprep.subr.bf16.mxu0 %v3758_v50 }
0x1cbc   : > { %3327 = vmatpush3.bf16.msra.mxu0 %v4247_v51 }
0x1cbd   : > { %3332 = vmatprep.subr.bf16.mxu0 %v3758_v50 }
0x1d8a   : > { %v2035_v47 = vpop.f32.mrb[4].mxu0 }
0x1d8b   : > { %v3422_v48 = vadd.f32 %v2035_v47, %v4282_v8  ;;  %v3308_v52 = vpop.f32.mrb[5].mxu0 }
0x1d8c   : > { %v2038_v1 = vpop.f32.mrb[6].mxu0 }
0x1d8d   : > { %3595 = vtanh.f32 %v3422_v48  ;;  %v3309_v3 = vpop.f32.mrb[7].mxu0  ;;  %v2042_v6 = vmul.f32 0.5, %v3422_v48 }
0x1d8f   : > { %3597 = vtanh.f32 %v2042_v6 }
0x1d97   : > { %v3596_v4 = vpop.eup %3595 }
0x1d98   : > { %2053 = vrot.lane.b32.xlu0 %v3596_v4, %s3760_s21 }
0x1d99   : > { %v3598_v53 = vpop.eup %3597 }
0x1d9a   : > { %v2044_v13 = vadd.f32 1.0, %v3598_v53 }
0x1d9c   : > { %v2045_v54 = vmul.f32 0.5, %v2044_v13 }
0x1d9e   : > { %v2051_v57 = vmul.f32 %v2049_v56, %v2045_v54 }
0x1e0a   : > { %v2054_v9 = vpop.permute.xlu0 %2053 }
0x1e0b   : > { %v2056_v55 = vmul.f32 %v2054_v9, %v2045_v54 }
0x1e0d   : > { %2058 = vrot.lane.b32.xlu0 %v2056_v55, %s3761_s23 }
0x1e7f   : > { %v2059_v10 = vpop.permute.xlu0 %2058 }
0x1e80   : > { %v2061_v58 = vadd.f32 %v2059_v10, %v2051_v57 }
0x1e82   : > { %3599 = vtanh.f32 %v2061_v58 }
0x1e8c   : > { %v3600_v7 = vpop.eup %3599 }
0x1e8d   : > { %2064 = vrot.lane.b32.xlu1 %v3600_v7, %s3760_s21 }
0x1e91   : > { %2074 = vrot.lane.b32.xlu1 %v2061_v58, %s3762_s9 }
0x1eff   : > { %v2065_v18 = vpop.permute.xlu1 %2064 }
0x1f00   : > { %v4344_v59 = vmul.f32 %v2065_v18, %v2045_v54 }
0x1f02   : > { %2069 = vrot.lane.b32.xlu0 %v4344_v59, %s3761_s23 }
0x1f03   : > { %v2075_v60 = vpop.permute.xlu1 %2074 }
0x1f04   : > { %2077 = vst.msk [vmem:[#allocation3] sm:$0x3] %vm377_vm0, %v2075_v60  ;;  %v3063_v60 = vld [vmem:[%s4520_s0 + $0x2] sm:$0x1] }
0x1f0b   : > { %v2100_v61 = vld [vmem:[#allocation3] sm:$0x3] }
0x1f0c   : > { %2198 = vrot.lane.b32.xlu1 %v2100_v61, %s3761_s23 }
0x1f74   : > { %v2070_v62 = vpop.permute.xlu0 %2069 }
0x1f75   : > { %2072 = vst.msk [vmem:[#allocation2] sm:$0x3] %vm377_vm0, %v2070_v62 }
0x1f7c   : > { %v2099_v12 = vld [vmem:[#allocation2] sm:$0x3] }
0x1f7d   : > { %v2101_v14 = vpack.c.bf16 %v2099_v12, %v2099_v12 }
0x1f7e   : > { %v2199_v27 = vpop.permute.xlu1 %2198 }
0x1f7f   : > { %3315 = vmatmul.mubr.msk.bf16.vlgmr.msra.gmra.mrb[4].mxu1 %vm1636_vm6, %v2101_v14 }
0x1f80   : > { %3319 = vmatpush3.bf16.msra.mxu1 %v4258_v2  ;;  %3320 = vmatprep.mubr.msk.bf16.mxu1 %vm3759_vm5, %v3758_v50 }
0x1f81   : > { %3338 = vmatprep.subr.bf16.mxu1 %v3758_v50 }
0x1f8b   : > { %3321 = vmatmul.mubr.msk.bf16.vlgmr.msra.gmra.mrb[4].mxu1 %vm1695_vm7, %v3055_v15 }
0x1f8c   : > { %3339 = vmatpush3.bf16.msra.mxu1 %v4239_v49  ;;  %3342 = vmatprep.mubr.msk.bf16.mxu1 %vm3759_vm5, %v3758_v50 }
0x1f8d   : > { %3340 = vmatprep.subr.bf16.mxu1 %v3758_v50 }
0x1f90   : > { %3341 = vmatpush3.bf16.msra.mxu1 %v4247_v51 }
0x1f91   : > { %3346 = vmatprep.subr.bf16.mxu1 %v3758_v50 }
0x205e   : > { %v2185_v16 = vpop.f32.mrb[4].mxu1 }
0x205f   : > { %v3423_v38 = vadd.f32 %v2185_v16, %v4282_v8  ;;  %v3322_v19 = vpop.f32.mrb[5].mxu1 }
0x2060   : > { %v2188_v20 = vpop.f32.mrb[6].mxu1 }
0x2061   : > { %3601 = vtanh.f32 %v3423_v38  ;;  %v3323_v37 = vpop.f32.mrb[7].mxu1  ;;  %v2192_v40 = vmul.f32 0.5, %v3423_v38 }
0x2063   : > { %3603 = vtanh.f32 %v2192_v40 }
0x206b   : > { %v3602_v21 = vpop.eup %3601 }
0x206c   : > { %2203 = vrot.lane.b32.xlu0 %v3602_v21, %s3760_s21 }
0x206d   : > { %v3604_v22 = vpop.eup %3603 }
0x206e   : > { %v2194_v23 = vadd.f32 1.0, %v3604_v22 }
0x2070   : > { %v2195_v24 = vmul.f32 0.5, %v2194_v23 }
0x2072   : > { %v2201_v28 = vmul.f32 %v2199_v27, %v2195_v24 }
0x20de   : > { %v2204_v25 = vpop.permute.xlu0 %2203 }
0x20df   : > { %v2206_v26 = vmul.f32 %v2204_v25, %v2195_v24 }
0x20e1   : > { %2208 = vrot.lane.b32.xlu0 %v2206_v26, %s3761_s23 }
0x2153   : > { %v2209_v29 = vpop.permute.xlu0 %2208 }
0x2154   : > { %v2211_v30 = vadd.f32 %v2209_v29, %v2201_v28 }
0x2156   : > { %3605 = vtanh.f32 %v2211_v30 }
0x2160   : > { %v3606_v31 = vpop.eup %3605 }
0x2161   : > { %2214 = vrot.lane.b32.xlu1 %v3606_v31, %s3760_s21 }
0x2165   : > { %2224 = vrot.lane.b32.xlu1 %v2211_v30, %s3762_s9 }
0x21d3   : > { %v2215_v32 = vpop.permute.xlu1 %2214 }
0x21d4   : > { %v4371_v33 = vmul.f32 %v2215_v32, %v2195_v24  ;;  %v3067_v32 = vld [vmem:[%s4520_s0 + $0x1] sm:$0x1] }
0x21d6   : > { %2219 = vrot.lane.b32.xlu0 %v4371_v33, %s3761_s23 }
0x21d7   : > { %v2225_v34 = vpop.permute.xlu1 %2224 }
0x21d8   : > { %2227 = vst.msk [vmem:[#allocation3] sm:$0x3] %vm377_vm0, %v2225_v34 }
0x21df   : > { %v2250_v63 = vld [vmem:[#allocation3] sm:$0x3] }
0x21e0   : > { %2348 = vrot.lane.b32.xlu1 %v2250_v63, %s3761_s23 }
0x2248   : > { %v2220_v0 = vpop.permute.xlu0 %2219 }
0x2249   : > { %2222 = vst.msk [vmem:[#allocation2] sm:$0x3] %vm377_vm0, %v2220_v0 }
0x2250   : > { %v2249_v35 = vld [vmem:[#allocation2] sm:$0x3] }
0x2251   : > { %v2251_v36 = vpack.c.bf16 %v2249_v35, %v2249_v35 }
0x2252   : > { %v2349_v6 = vpop.permute.xlu1 %2348 }
0x2253   : > { %3329 = vmatmul.mubr.msk.bf16.vlgmr.msra.gmra.mrb[8].mxu0 %vm1636_vm6, %v2251_v36 }
0x2254   : > { %3333 = vmatpush3.bf16.msra.mxu0 %v4258_v2  ;;  %3334 = vmatprep.mubr.msk.bf16.mxu0 %vm3759_vm5, %v3758_v50 }
0x2255   : > { %3352 = vmatprep.subr.bf16.mxu0 %v3758_v50 }
0x225f   : > { %3335 = vmatmul.mubr.msk.bf16.vlgmr.msra.gmra.mrb[8].mxu0 %vm1695_vm7, %v3059_v11 }
0x2260   : > { %3353 = vmatpush3.bf16.msra.mxu0 %v4239_v49  ;;  %3356 = vmatprep.mubr.msk.bf16.mxu0 %vm3759_vm5, %v3758_v50 }
0x2261   : > { %3354 = vmatprep.subr.bf16.mxu0 %v3758_v50 }
0x2264   : > { %3355 = vmatpush3.bf16.msra.mxu0 %v4247_v51 }
0x2265   : > { %3360 = vmatprep.subr.bf16.mxu0 %v3758_v50 }
0x2332   : > { %v2335_v41 = vpop.f32.mrb[8].mxu0 }
0x2333   : > { %v3424_v42 = vadd.f32 %v2335_v41, %v4282_v8  ;;  %v3336_v43 = vpop.f32.mrb[9].mxu0 }
0x2334   : > { %v2338_v44 = vpop.f32.mrb[10].mxu0 }
0x2335   : > { %3607 = vtanh.f32 %v3424_v42  ;;  %v3337_v45 = vpop.f32.mrb[11].mxu0  ;;  %v2342_v47 = vmul.f32 0.5, %v3424_v42 }
0x2337   : > { %3609 = vtanh.f32 %v2342_v47 }
0x233f   : > { %v3608_v46 = vpop.eup %3607 }
0x2340   : > { %2353 = vrot.lane.b32.xlu0 %v3608_v46, %s3760_s21 }
0x2341   : > { %v3610_v48 = vpop.eup %3609 }
0x2342   : > { %v2344_v52 = vadd.f32 1.0, %v3610_v48 }
0x2344   : > { %v2345_v1 = vmul.f32 0.5, %v2344_v52 }
0x2346   : > { %v2351_v53 = vmul.f32 %v2349_v6, %v2345_v1 }
0x23b2   : > { %v2354_v3 = vpop.permute.xlu0 %2353 }
0x23b3   : > { %v2356_v4 = vmul.f32 %v2354_v3, %v2345_v1 }
0x23b5   : > { %2358 = vrot.lane.b32.xlu0 %v2356_v4, %s3761_s23 }
0x2427   : > { %v2359_v13 = vpop.permute.xlu0 %2358 }
0x2428   : > { %v2361_v54 = vadd.f32 %v2359_v13, %v2351_v53 }
0x242a   : > { %3611 = vtanh.f32 %v2361_v54 }
0x2434   : > { %v3612_v9 = vpop.eup %3611 }
0x2435   : > { %2364 = vrot.lane.b32.xlu1 %v3612_v9, %s3760_s21 }
0x2439   : > { %2374 = vrot.lane.b32.xlu1 %v2361_v54, %s3762_s9 }
0x24a7   : > { %v2365_v55 = vpop.permute.xlu1 %2364 }
0x24a8   : > { %v4398_v56 = vmul.f32 %v2365_v55, %v2345_v1 }
0x24aa   : > { %2369 = vrot.lane.b32.xlu0 %v4398_v56, %s3761_s23 }
0x24ab   : > { %v2375_v57 = vpop.permute.xlu1 %2374 }
0x24ac   : > { %2377 = vst.msk [vmem:[#allocation3] sm:$0x3] %vm377_vm0, %v2375_v57  ;;  %v2746_v57 = vld [vmem:[%s4520_s0] sm:$0x1] }
0x24b3   : > { %v2400_v10 = vld [vmem:[#allocation3] sm:$0x3] }
0x24b4   : > { %2498 = vrot.lane.b32.xlu1 %v2400_v10, %s3761_s23 }
0x251c   : > { %v2370_v58 = vpop.permute.xlu0 %2369 }
0x251d   : > { %2372 = vst.msk [vmem:[#allocation2] sm:$0x3] %vm377_vm0, %v2370_v58 }
0x2524   : > { %v2399_v7 = vld [vmem:[#allocation2] sm:$0x3] }
0x2525   : > { %v2401_v18 = vpack.c.bf16 %v2399_v7, %v2399_v7 }
0x2527   : > { %3343 = vmatmul.mubr.msk.bf16.vlgmr.msra.gmra.mrb[8].mxu1 %vm1636_vm6, %v2401_v18 }
0x2528   : > { %3347 = vmatpush3.bf16.msra.mxu1 %v4258_v2  ;;  %3348 = vmatprep.mubr.msk.bf16.mxu1 %vm3759_vm5, %v3758_v50 }
0x2529   : > { %3366 = vmatprep.subr.bf16.mxu1 %v3758_v50 }
0x2533   : > { %3349 = vmatmul.mubr.msk.bf16.vlgmr.msra.gmra.mrb[8].mxu1 %vm1695_vm7, %v3063_v60 }
0x2534   : > { %3367 = vmatpush3.bf16.msra.mxu1 %v4239_v49  ;;  %3370 = vmatprep.mubr.msk.bf16.mxu1 %vm3759_vm5, %v3758_v50 }
0x2535   : > { %3368 = vmatprep.subr.bf16.mxu1 %v3758_v50 }
0x2538   : > { %3369 = vmatpush3.bf16.msra.mxu1 %v4247_v51  ;;  %v2499_v51 = vpop.permute.xlu1 %2498 }
0x2539   : > { %3374 = vmatprep.subr.bf16.mxu1 %v3758_v50 }
0x2606   : > { %v2485_v61 = vpop.f32.mrb[8].mxu1 }
0x2607   : > { %v3425_v62 = vadd.f32 %v2485_v61, %v4282_v8  ;;  %v3350_v12 = vpop.f32.mrb[9].mxu1 }
0x2608   : > { %v2488_v14 = vpop.f32.mrb[10].mxu1 }
0x2609   : > { %3613 = vtanh.f32 %v3425_v62  ;;  %v3351_v15 = vpop.f32.mrb[11].mxu1  ;;  %v2492_v49 = vmul.f32 0.5, %v3425_v62  ;;  %v3763_v62 = vmov 1966171168  }
0x260b   : > { %3615 = vtanh.f32 %v2492_v49  ;;  %v1777_v49 = vpack.c.bf16 %v4290_v17, %v4290_v17 }
0x2613   : > { %v3614_v16 = vpop.eup %3613 }
0x2614   : > { %2503 = vrot.lane.b32.xlu0 %v3614_v16, %s3760_s21 }
0x2615   : > { %v3616_v38 = vpop.eup %3615 }
0x2616   : > { %v2494_v19 = vadd.f32 1.0, %v3616_v38 }
0x2618   : > { %v2495_v20 = vmul.f32 0.5, %v2494_v19 }
0x261a   : > { %v2501_v40 = vmul.f32 %v2499_v51, %v2495_v20  ;;  %v2378_v51 = vpack.c.bf16 %v4398_v56, %v4398_v56 }
0x2686   : > { %v2504_v37 = vpop.permute.xlu0 %2503 }
0x2687   : > { %v2506_v21 = vmul.f32 %v2504_v37, %v2495_v20 }
0x2689   : > { %2508 = vrot.lane.b32.xlu0 %v2506_v21, %s3761_s23 }
0x26fb   : > { %v2509_v22 = vpop.permute.xlu0 %2508 }
0x26fc   : > { %v2511_v23 = vadd.f32 %v2509_v22, %v2501_v40 }
0x26fe   : > { %3617 = vtanh.f32 %v2511_v23 }
0x2708   : > { %v3618_v24 = vpop.eup %3617 }
0x2709   : > { %2514 = vrot.lane.b32.xlu1 %v3618_v24, %s3760_s21 }
0x270d   : > { %2524 = vrot.lane.b32.xlu1 %v2511_v23, %s3762_s9 }
0x277b   : > { %v2515_v25 = vpop.permute.xlu1 %2514 }
0x277c   : > { %v4425_v26 = vmul.f32 %v2515_v25, %v2495_v20  ;;  %v2078_v20 = vpack.c.bf16 %v4344_v59, %v4344_v59 }
0x277e   : > { %2519 = vrot.lane.b32.xlu0 %v4425_v26, %s3761_s23 }
0x277f   : > { %v2525_v27 = vpop.permute.xlu1 %2524 }
0x2780   : > { %2527 = vst.msk [vmem:[#allocation3] sm:$0x3] %vm377_vm0, %v2525_v27 }
0x2787   : > { %v2550_v28 = vld [vmem:[#allocation3] sm:$0x3] }
0x2788   : > { %2648 = vrot.lane.b32.xlu1 %v2550_v28, %s3761_s23 }
0x27f0   : > { %v2520_v29 = vpop.permute.xlu0 %2519 }
0x27f1   : > { %2522 = vst.msk [vmem:[#allocation2] sm:$0x3] %vm377_vm0, %v2520_v29 }
0x27f8   : > { %v2549_v30 = vld [vmem:[#allocation2] sm:$0x3] }
0x27f9   : > { %v2551_v31 = vpack.c.bf16 %v2549_v30, %v2549_v30  ;;  %v1928_v30 = vpack.c.bf16 %v4317_v39, %v4317_v39 }
0x27fa   : > { %v2649_v47 = vpop.permute.xlu1 %2648 }
0x27fb   : > { %3357 = vmatmul.mubr.msk.bf16.vlgmr.msra.gmra.mrb[12].mxu0 %vm1636_vm6, %v2551_v31 }
0x27fc   : > { %3361 = vmatpush3.bf16.msra.mxu0 %v4258_v2  ;;  %3362 = vmatprep.mubr.msk.bf16.mxu0 %vm3759_vm5, %v3758_v50 }
0x2807   : > { %3363 = vmatmul.mubr.msk.bf16.vlgmr.msra.gmra.mrb[12].mxu0 %vm1695_vm7, %v3067_v32 }
0x28da   : > { %v2635_v34 = vpop.f32.mrb[12].mxu0 }
0x28db   : > { %v3426_v63 = vadd.f32 %v2635_v34, %v4282_v8  ;;  %v3364_v0 = vpop.f32.mrb[13].mxu0  ;;  %v2228_v34 = vpack.c.bf16 %v4371_v33, %v4371_v33 }
0x28dc   : > { %v2638_v35 = vpop.f32.mrb[14].mxu0 }
0x28dd   : > { %3619 = vtanh.f32 %v3426_v63  ;;  %v3365_v36 = vpop.f32.mrb[15].mxu0  ;;  %v2642_v41 = vmul.f32 0.5, %v3426_v63 }
0x28de   : > { %v2528_v36 = vpack.c.bf16 %v4425_v26, %v4425_v26 }
0x28df   : > { %3621 = vtanh.f32 %v2642_v41 }
0x28e7   : > { %v3620_v11 = vpop.eup %3619 }
0x28e8   : > { %2653 = vrot.lane.b32.xlu0 %v3620_v11, %s3760_s21 }
0x28e9   : > { %v3622_v42 = vpop.eup %3621 }
0x28ea   : > { %v2644_v43 = vadd.f32 1.0, %v3622_v42 }
0x28ec   : > { %v2645_v44 = vmul.f32 0.5, %v2644_v43 }
0x28ee   : > { %v2651_v48 = vmul.f32 %v2649_v47, %v2645_v44 }
0x295a   : > { %v2654_v45 = vpop.permute.xlu0 %2653 }
0x295b   : > { %v2656_v46 = vmul.f32 %v2654_v45, %v2645_v44 }
0x295d   : > { %2658 = vrot.lane.b32.xlu0 %v2656_v46, %s3761_s23 }
0x29cf   : > { %v2659_v52 = vpop.permute.xlu0 %2658 }
0x29d0   : > { %v2661_v1 = vadd.f32 %v2659_v52, %v2651_v48 }
0x29d2   : > { %3623 = vtanh.f32 %v2661_v1 }
0x29dc   : > { %v3624_v3 = vpop.eup %3623 }
0x29dd   : > { %2664 = vrot.lane.b32.xlu1 %v3624_v3, %s3760_s21 }
0x29e1   : > { %2674 = vrot.lane.b32.xlu1 %v2661_v1, %s3762_s9 }
0x2a4f   : > { %v2665_v4 = vpop.permute.xlu1 %2664 }
0x2a50   : > { %v2667_v6 = vmul.f32 %v2665_v4, %v2645_v44 }
0x2a52   : > { %2669 = vrot.lane.b32.xlu0 %v2667_v6, %s3761_s23  ;;  %v2678_v22 = vpack.c.bf16 %v2667_v6, %v2667_v6 }
0x2a53   : > { %v2675_v53 = vpop.permute.xlu1 %2674 }
0x2a54   : > { %2677 = vst.msk [vmem:[#allocation3] sm:$0x3] %vm377_vm0, %v2675_v53 }
0x2a5b   : > { %v2700_v13 = vld [vmem:[#allocation3] sm:$0x3] }
0x2a5c   : > { %2797 = vrot.lane.b32.xlu1 %v2700_v13, %s3761_s23 }
0x2ac4   : > { %v2670_v54 = vpop.permute.xlu0 %2669 }
0x2ac5   : > { %2672 = vst.msk [vmem:[#allocation2] sm:$0x3] %vm377_vm0, %v2670_v54 }
0x2acc   : > { %v2699_v9 = vld [vmem:[#allocation2] sm:$0x3] }
0x2acd   : > { %v2701_v55 = vpack.c.bf16 %v2699_v9, %v2699_v9 }
0x2ace   : > { %v2798_v25 = vpop.permute.xlu1 %2797 }
0x2acf   : > { %3371 = vmatmul.mubr.msk.bf16.vlgmr.msra.gmra.mrb[12].mxu1 %vm1636_vm6, %v2701_v55 }
0x2ad0   : > { %3375 = vmatpush3.bf16.msra.mxu1 %v4258_v2  ;;  %3376 = vmatprep.mubr.msk.bf16.mxu1 %vm3759_vm5, %v3758_v50  ;;  %v1780_v50 = vunpack.c.l.s4 %v3763_v62 }
0x2ad2   : > { %v1781_v14 = vunpack.c.0.s8 %v1780_v50 }
0x2ad4   : > { %v1784_v16 = vsub.s32 %v1781_v14, %v4278_v5 }
0x2ad6   : > { %v1785_v19 = vrot.slane %v1777_v49, %v1784_v16  ;;  %v2086_v21 = vrot.slane %v2078_v20, %v1784_v16  ;;  %v2386_v5 = vrot.slane %v2378_v51, %v1784_v16  ;;  %v2686_v23 = vrot.slane %v2678_v22, %v1784_v16 }
0x2ad7   : > { %v1936_v32 = vrot.slane %v1928_v30, %v1784_v16  ;;  %v2236_v35 = vrot.slane %v2228_v34, %v1784_v16  ;;  %v2536_v39 = vrot.slane %v2528_v36, %v1784_v16 }
0x2ad8   : > { %v1792_v40 = vrot.slane %v1785_v19, %v1784_v16  ;;  %v2093_v17 = vrot.slane %v2086_v21, %v1784_v16  ;;  %v2393_v24 = vrot.slane %v2386_v5, %v1784_v16  ;;  %v2693_v59 = vrot.slane %v2686_v23, %v1784_v16 }
0x2ad9   : > { %v1943_v41 = vrot.slane %v1936_v32, %v1784_v16  ;;  %v2243_v33 = vrot.slane %v2236_v35, %v1784_v16  ;;  %v2543_v42 = vrot.slane %v2536_v39, %v1784_v16 }
0x2adb   : > { %3377 = vmatmul.mubr.msk.bf16.vlgmr.msra.gmra.mrb[12].mxu1 %vm1695_vm7, %v2746_v57 }
0x2bae   : > { %v2784_v10 = vpop.f32.mrb[12].mxu1 }
0x2baf   : > { %v3427_v58 = vadd.f32 %v2784_v10, %v4282_v8  ;;  %v3378_v7 = vpop.f32.mrb[13].mxu1 }
0x2bb0   : > { %v2787_v18 = vpop.f32.mrb[14].mxu1 }
0x2bb1   : > { %3625 = vtanh.f32 %v3427_v58  ;;  %v3379_v60 = vpop.f32.mrb[15].mxu1  ;;  %v2791_v2 = vmul.f32 0.5, %v3427_v58 }
0x2bb3   : > { %3627 = vtanh.f32 %v2791_v2 }
0x2bbb   : > { %v3626_v61 = vpop.eup %3625 }
0x2bbc   : > { %2802 = vrot.lane.b32.xlu0 %v3626_v61, %s3760_s21 }
0x2bbd   : > { %v3628_v12 = vpop.eup %3627 }
0x2bbe   : > { %v2793_v15 = vadd.f32 1.0, %v3628_v12 }
0x2bc0   : > { %v2794_v8 = vmul.f32 0.5, %v2793_v15 }
0x2bc2   : > { %v2800_v56 = vmul.f32 %v2798_v25, %v2794_v8 }
0x2c2e   : > { %v2803_v38 = vpop.permute.xlu0 %2802 }
0x2c2f   : > { %v2805_v37 = vmul.f32 %v2803_v38, %v2794_v8 }
0x2c31   : > { %2807 = vrot.lane.b32.xlu0 %v2805_v37, %s3761_s23 }
0x2c35   : > { %1793 = vrot.lane.b32.xlu0 %v1792_v40, %s3761_s23 }
0x2c39   : > { %2094 = vrot.lane.b32.xlu0 %v2093_v17, %s3761_s23 }
0x2c3d   : > { %2394 = vrot.lane.b32.xlu0 %v2393_v24, %s3761_s23 }
0x2c41   : > { %2694 = vrot.lane.b32.xlu0 %v2693_v59, %s3761_s23 }
0x2ca3   : > { %v2808_v27 = vpop.permute.xlu0 %2807 }
0x2ca4   : > { %v2810_v28 = vadd.f32 %v2808_v27, %v2800_v56 }
0x2ca6   : > { %3629 = vtanh.f32 %v2810_v28  ;;  %2823 = vrot.lane.b32.xlu0 %v2810_v28, %s3762_s9 }
0x2ca7   : > { %v1794_v29 = vpop.permute.xlu0 %1793 }
0x2ca8   : > { %3045 = vst.msk [vmem:[%s3951_s24 + $0x7] sm:$0x1] %vm1797_vm8, %v1794_v29 }
0x2cab   : > { %v2095_v31 = vpop.permute.xlu0 %2094 }
0x2cac   : > { %3053 = vst.msk [vmem:[%s3951_s24 + $0x5] sm:$0x1] %vm1797_vm8, %v2095_v31 }
0x2caf   : > { %v2395_v63 = vpop.permute.xlu0 %2394 }
0x2cb0   : > { %v3630_v0 = vpop.eup %3629  ;;  %3061 = vst.msk [vmem:[%s3951_s24 + $0x3] sm:$0x1] %vm1797_vm8, %v2395_v63 }
0x2cb1   : > { %2813 = vrot.lane.b32.xlu1 %v3630_v0, %s3760_s21 }
0x2cb3   : > { %v2695_v11 = vpop.permute.xlu0 %2694 }
0x2cb4   : > { %3069 = vst.msk [vmem:[%s3951_s24 + $0x1] sm:$0x1] %vm1797_vm8, %v2695_v11 }
0x2cb5   : > { %1944 = vrot.lane.b32.xlu1 %v1943_v41, %s3761_s23 }
0x2cb9   : > { %2244 = vrot.lane.b32.xlu1 %v2243_v33, %s3761_s23 }
0x2cbd   : > { %2544 = vrot.lane.b32.xlu1 %v2543_v42, %s3761_s23 }
0x2d18   : > { %v2824_v43 = vpop.permute.xlu0 %2823 }
0x2d19   : > { %2826 = vst.msk [vmem:[#allocation3] sm:$0x3] %vm377_vm0, %v2824_v43 }
0x2d23   : > { %v2814_v26 = vpop.permute.xlu1 %2813 }
0x2d24   : > { %v2816_v44 = vmul.f32 %v2814_v26, %v2794_v8 }
0x2d26   : > { %v2827_v45 = vpack.c.bf16 %v2816_v44, %v2816_v44  ;;  %2818 = vrot.lane.b32.xlu1 %v2816_v44, %s3761_s23 }
0x2d27   : > { %v1945_v46 = vpop.permute.xlu1 %1944 }
0x2d28   : > { %v2835_v47 = vrot.slane %v2827_v45, %v1784_v16  ;;  %3049 = vst.msk [vmem:[%s3951_s24 + $0x6] sm:$0x1] %vm1797_vm8, %v1945_v46 }
0x2d2a   : > { %v2842_v48 = vrot.slane %v2835_v47, %v1784_v16 }
0x2d2b   : > { %v2245_v52 = vpop.permute.xlu1 %2244 }
0x2d2c   : > { %3057 = vst.msk [vmem:[%s3951_s24 + $0x4] sm:$0x1] %vm1797_vm8, %v2245_v52  ;;  %2843 = vrot.lane.b32.xlu1 %v2842_v48, %s3761_s23 }
0x2d2f   : > { %v2545_v1 = vpop.permute.xlu1 %2544 }
0x2d30   : > { %3065 = vst.msk [vmem:[%s3951_s24 + $0x2] sm:$0x1] %vm1797_vm8, %v2545_v1 }
0x2d98   : > { %v2819_v3 = vpop.permute.xlu1 %2818 }
0x2d99   : > { %2821 = vst.msk [vmem:[#allocation2] sm:$0x3] %vm377_vm0, %v2819_v3 }
0x2d9e   : > { %v2844_v4 = vpop.permute.xlu1 %2843 }
0x2d9f   : > { %2846 = vst.msk [vmem:[%s3951_s24] sm:$0x1] %vm1797_vm8, %v2844_v4 }
0x2da0 PF: > { %s20_s20 = sadd.s32 1, %s3745_s20   ;;  %s4531_s15 = smov %s3729_s16 }
0x2da1   : > { %p17_p8 = scmp.ge.s32.totalorder %s20_s20, 4   ;;  %s4532_s16 = smov %s3733_s17 }
0x2da2   : > { %s4533_s17 = smov %s3838_s27  ;;  %s4534_s18 = smov %s3741_s19 }
0x2da3   : > { %s4535_s19 = smov %s4537_s22  ;;  %19 = sbr.rel (!%p17_p8) target bundleno = 6 (0x6), region = 135 }
0x2daa   :  { %2890 = vsyncpa [#allocation5], 1 }
0x2dab   :  { %2892 = vsyncpa [#allocation5 + $0x1], 1 }
0x2dac   :  { %2893 = vsyncpa [#allocation7], 1 }
0x2dad   :  { %2895 = vsyncpa [#allocation7 + $0x1], 1 }

// kernel: stack_bi_lstm_forward.3
= control target key start
LH: loop header
LB: loop body
LE: loop exit
PB: predicated region body
PF: predicated region fallthrough
CT: control target
= control target key end

     0   :  { %s4872_s21 = smov 0   ;;  %s4874_s22 = smov 0   ;;  %s5696_s0 = inlined_call_operand.vmem [shape: bf16[2,8,2,32], index: 0, kind: input, shape index: {}, may-alias: {0,1}]   ;;  %s5697_s1 = inlined_call_operand.vmem [shape: bf16[2,8,2,32], index: 1, kind: input, shape index: {}, may-alias: {0,1}]   ;;  %s5698_s2 = inlined_call_operand.vmem [shape: bf16[2,32,128], index: 2, kind: input, shape index: {}]   ;;  %s5699_s3 = inlined_call_operand.vmem [shape: bf16[2,32,128], index: 3, kind: input, shape index: {}]   ;;  %s5700_s4 = inlined_call_operand.vmem [shape: bf16[2,32,128], index: 4, kind: input, shape index: {}]   ;;  %s5701_s5 = inlined_call_operand.vmem [shape: f32[2,1,128], index: 5, kind: input, shape index: {}]   ;;  %s5702_s6 = inlined_call_operand.vmem [shape: bf16[2,8,2,32], index: 6, kind: output, shape index: {}]  }
   0x1   :  { %s4876_s23 = smov 0  }
   0x2 LB: > { %s28_s24 = sadd.s32 1, %s4818_s22  ;;  %p3876_p0 = scmp.ge.s32.totalorder %s4822_s23, 1  ;;  %s4822_s23 = sphi %s4876_s23, %s16_s23   ;;  %s4818_s22 = sphi %s4874_s22, %s5704_s22   ;;  %s4814_s21 = sphi %s4872_s21, %s5703_s21  }
   0x3   : > { %p30_p1 = scmp.ge.s32.totalorder %s28_s24, 2  ;;  %p325_p2 = scmp.lt.s32.totalorder %s4822_s23, 3 }
   0x5   : > { %s5706_s24 = smov (%p30_p1, %s28_s24), 0  ;;  %p326_p3 = pnand %p3876_p0, %p325_p2 }
   0x6   : > { %p426_p4 = scmp.lt.s32.totalorder (!%p326_p3), %s4814_s21, 1  ;;  %vm468_vm0 = vcmask (!%p326_p3), 254976   ;;  %v4824_v0 = vmov (!%p326_p3), 0.0   ;;  %p3884_p5 = scmp.ne.s32.totalorder (!%p326_p3), %s4814_s21, 0 }
   0x7   : > { %329 = sbr.rel (%p326_p3) target bundleno = 11809 (0x2e21), region = 44  ;;  %469 = vst.msk [vmem:[#allocation2] sm:$0x3] (!%p326_p3), %vm468_vm0, %v4824_v0  ;;  %470 = vst.msk [vmem:[#allocation3] sm:$0x3] (!%p326_p3), %vm468_vm0, %v4824_v0 }
   0xe   : > { %s427_s25 = scalar_select %p426_p4, %s4814_s21, 1 }
   0xf   : > { %v4825_v15 = vmov (!%p3884_p5), 0.0   ;;  %vm4826_vm1 = vmmov (!%p3884_p5), 0   ;;  %v488_v17 = vld [vmem:[#allocation2] sm:$0x3] (!%p3884_p5)  ;;  %vm503_vm2 = vcmask (!%p3884_p5), 261120   ;;  %v548_v25 = vlaneseq (!%p3884_p5)  ;;  %s4827_s27 = smov (!%p3884_p5), 64  }
  0x10   : > { %s3992_s26 = sshll.u32 %s427_s25, 4  ;;  %s443_s29 = scalar_lea.vmem %s5701_s5, %s427_s25  ;;  %4139 = vmatprep.subr.bf16.mxu0 (!%p3884_p5), %v4825_v15  ;;  %4143 = vmatprep.mubr.msk.bf16.mxu0 (!%p3884_p5), %vm4826_vm1, %v4825_v15  ;;  %v490_v18 = vpack.c.bf16 (!%p3884_p5), %v488_v17, %v488_v17  ;;  %v554_v21 = vld [vmem:[%s5696_s0] sm:$0x1] (!%p3884_p5)  ;;  %v3891_v24 = vld [vmem:[%s5697_s1 + $0x8] sm:$0x1] (!%p3884_p5)  ;;  %vm724_vm3 = vcmask (!%p3884_p5), 253952  }
  0x11   : > { %s430_s8 = scalar_lea.vmem %s5698_s2, %s3992_s26  ;;  %s435_s11 = scalar_lea.vmem %s5699_s3, %s3992_s26  ;;  %v4905_v1 = vld [vmem:[%s443_s29] sm:$0x1]  ;;  %4163 = vmatprep.subr.bf16.mxu1 (!%p3884_p5), %v4825_v15  ;;  %4167 = vmatprep.mubr.msk.bf16.mxu1 (!%p3884_p5), %vm4826_vm1, %v4825_v15  ;;  %v5005_v26 = vshrl.u32 (!%p3884_p5), %v548_v25, 7  ;;  %v489_v35 = vld [vmem:[#allocation3] sm:$0x3] (!%p3884_p5) }
  0x12   : > { %s440_s14 = scalar_lea.vmem %s5700_s4, %s3992_s26  ;;  %s3883_s15 = sshll.u32 %s427_s25, 3  ;;  %v4910_v2 = vld [vmem:[%s430_s8] sm:$0xf]  ;;  %v4912_v3 = vld [vmem:[%s430_s8 + $0x4] sm:$0xf] }
  0x13   : > { %s4917_s18 = scalar_lea.vmem %s5702_s6, %s3883_s15  ;;  %v4919_v4 = vld [vmem:[%s440_s14] sm:$0xf]  ;;  %v4921_v5 = vld [vmem:[%s440_s14 + $0x4] sm:$0xf]  ;;  %v4923_v6 = vld [vmem:[%s440_s14 + $0x8] sm:$0xf]  ;;  %v4961_v19 = vcombine.low (!%p3884_p5), %v4910_v2, %v4912_v3 }
  0x14   : > { %v4925_v7 = vld [vmem:[%s440_s14 + $0xc] sm:$0xf]  ;;  %v4927_v8 = vld [vmem:[%s430_s8 + $0x8] sm:$0xf]  ;;  %v4931_v10 = vld [vmem:[%s435_s11] sm:$0xf]  ;;  %v4942_v14 = vcombine.low (!%p3884_p5), %v4919_v4, %v4921_v5 }
  0x15   : > { %v4929_v9 = vld [vmem:[%s430_s8 + $0xc] sm:$0xf]  ;;  %v4933_v11 = vld [vmem:[%s435_s11 + $0x4] sm:$0xf]  ;;  %v4935_v12 = vld [vmem:[%s435_s11 + $0x8] sm:$0xf]  ;;  %v4950_v16 = vcombine.low (!%p3884_p5), %v4923_v6, %v4925_v7 }
  0x16   : > { %v4937_v13 = vld [vmem:[%s435_s11 + $0xc] sm:$0xf]  ;;  %487 = sbr.rel (%p3884_p5) target bundleno = 5914 (0x171a), region = 52  ;;  %4140 = vmatpush3.bf16.msra.mxu0 (!%p3884_p5), %v4942_v14  ;;  %4164 = vmatpush3.bf16.msra.mxu1 (!%p3884_p5), %v4942_v14  ;;  %v4970_v20 = vcombine.low (!%p3884_p5), %v4927_v8, %v4929_v9  ;;  %v4982_v22 = vcombine.low (!%p3884_p5), %v4931_v10, %v4933_v11  ;;  %v550_v27 = vsub.s32 (!%p3884_p5), 0, %v5005_v26  ;;  %s4828_s28 = smov (!%p3884_p5), 32  }
  0x17   : > { %4141 = vmatprep.subr.bf16.mxu0 (!%p3884_p5), %v4825_v15  ;;  %4165 = vmatprep.subr.bf16.mxu1 (!%p3884_p5), %v4825_v15  ;;  %v4988_v23 = vcombine.low (!%p3884_p5), %v4935_v12, %v4937_v13  ;;  %s4829_s29 = smov (!%p3884_p5), 96   ;;  %v3896_v54 = vld [vmem:[%s5696_s0 + $0x1] sm:$0x1] (!%p3884_p5)  ;;  %v3898_v55 = vld [vmem:[%s5697_s1 + $0x9] sm:$0x1] (!%p3884_p5) }
  0x18   : > { %v5009_v28 = vrot.slane (!%p3884_p5), %v4905_v1, %v550_v27 }
  0x1a   : > { %4142 = vmatpush3.bf16.msra.mxu0 (!%p3884_p5), %v4950_v16  ;;  %4166 = vmatpush3.bf16.msra.mxu1 (!%p3884_p5), %v4950_v16 }
  0x1b   : > { %4147 = vmatprep.subr.bf16.mxu0 (!%p3884_p5), %v4825_v15  ;;  %4171 = vmatprep.subr.bf16.mxu1 (!%p3884_p5), %v4825_v15 }
  0x1d   : > { %4144 = vmatmul.mubr.msk.bf16.vlgmr.msra.gmra.mrb[0].mxu0 %vm503_vm2, %v490_v18 }
  0x1e   : > { %4148 = vmatpush3.bf16.msra.mxu0 %v4961_v19  ;;  %4151 = vmatprep.mubr.msk.bf16.mxu0 %vm4826_vm1, %v4825_v15 }
  0x1f   : > { %4149 = vmatprep.subr.bf16.mxu0 %v4825_v15 }
  0x22   : > { %4150 = vmatpush3.bf16.msra.mxu0 %v4970_v20 }
  0x23   : > { %4155 = vmatprep.subr.bf16.mxu0 %v4825_v15 }
  0x29   : > { %4152 = vmatmul.mubr.msk.bf16.vlgmr.msra.gmra.mrb[0].mxu0 %vm503_vm2, %v554_v21 }
  0x2a   : > { %4156 = vmatpush3.bf16.msra.mxu0 %v4982_v22  ;;  %4159 = vmatprep.mubr.msk.bf16.mxu0 %vm4826_vm1, %v4825_v15 }
  0x2b   : > { %4157 = vmatprep.subr.bf16.mxu0 %v4825_v15 }
  0x2e   : > { %4158 = vmatpush3.bf16.msra.mxu0 %v4988_v23 }
  0x2f   : > { %4187 = vmatprep.subr.bf16.mxu0 %v4825_v15 }
  0x35   : > { %4160 = vmatmul.mubr.msk.bf16.vlgmr.msra.gmra.mrb[0].mxu0 %vm503_vm2, %v3891_v24 }
  0x36   : > { %4188 = vmatpush3.bf16.msra.mxu0 %v4942_v14  ;;  %4191 = vmatprep.mubr.msk.bf16.mxu0 %vm4826_vm1, %v4825_v15 }
  0x37   : > { %4189 = vmatprep.subr.bf16.mxu0 %v4825_v15 }
  0x3a   : > { %4190 = vmatpush3.bf16.msra.mxu0 %v4950_v16 }
  0x3b   : > { %4195 = vmatprep.subr.bf16.mxu0 %v4825_v15 }
 0x108   : > { %v661_v29 = vpop.f32.mrb[0].mxu0 }
 0x109   : > { %v4523_v30 = vadd.f32 %v661_v29, %v5009_v28  ;;  %v4161_v31 = vpop.f32.mrb[1].mxu0 }
 0x10a   : > { %v664_v32 = vpop.f32.mrb[2].mxu0 }
 0x10b   : > { %4704 = vtanh.f32 %v4523_v30  ;;  %v4162_v33 = vpop.f32.mrb[3].mxu0  ;;  %v668_v36 = vmul.f32 0.5, %v4523_v30 }
 0x10d   : > { %4706 = vtanh.f32 %v668_v36 }
 0x115   : > { %v4705_v34 = vpop.eup %4704 }
 0x116   : > { %679 = vrot.lane.b32.xlu0 %v4705_v34, %s4827_s27 }
 0x117   : > { %v4707_v37 = vpop.eup %4706 }
 0x118   : > { %v670_v38 = vadd.f32 1.0, %v4707_v37 }
 0x11a   : > { %674 = vrot.lane.b32.xlu0 %v489_v35, %s4828_s28  ;;  %v671_v39 = vmul.f32 0.5, %v670_v38  ;;  %v3902_v38 = vld [vmem:[%s5696_s0 + $0x2] sm:$0x1] }
 0x188   : > { %v680_v40 = vpop.permute.xlu0 %679 }
 0x189   : > { %v682_v41 = vmul.f32 %v680_v40, %v671_v39 }
 0x18b   : > { %684 = vrot.lane.b32.xlu1 %v682_v41, %s4828_s28 }
 0x18c   : > { %v675_v42 = vpop.permute.xlu0 %674 }
 0x18d   : > { %v677_v43 = vmul.f32 %v675_v42, %v671_v39 }
 0x1fd   : > { %v685_v44 = vpop.permute.xlu1 %684 }
 0x1fe   : > { %v687_v45 = vadd.f32 %v685_v44, %v677_v43 }
 0x200   : > { %4708 = vtanh.f32 %v687_v45 }
 0x20a   : > { %v4709_v46 = vpop.eup %4708 }
 0x20b   : > { %690 = vrot.lane.b32.xlu1 %v4709_v46, %s4827_s27 }
 0x20f   : > { %701 = vrot.lane.b32.xlu1 %v687_v45, %s4829_s29 }
 0x27d   : > { %v691_v47 = vpop.permute.xlu1 %690 }
 0x27e   : > { %v5017_v48 = vmul.f32 %v691_v47, %v671_v39  ;;  %v3904_v39 = vld [vmem:[%s5697_s1 + $0xa] sm:$0x1] }
 0x280   : > { %695 = vrot.lane.b32.xlu0 %v5017_v48, %s4828_s28 }
 0x281   : > { %v702_v49 = vpop.permute.xlu1 %701 }
 0x282   : > { %704 = vst.msk [vmem:[#allocation3] sm:$0x3] %vm468_vm0, %v702_v49 }
 0x289   : > { %v727_v50 = vld [vmem:[#allocation3] sm:$0x3] }
 0x28a   : > { %871 = vrot.lane.b32.xlu1 %v727_v50, %s4828_s28 }
 0x2f2   : > { %v696_v51 = vpop.permute.xlu0 %695 }
 0x2f3   : > { %699 = vst.msk [vmem:[#allocation2] sm:$0x3] %vm468_vm0, %v696_v51 }
 0x2fa   : > { %v726_v52 = vld [vmem:[#allocation2] sm:$0x3] }
 0x2fb   : > { %v728_v53 = vpack.c.bf16 %v726_v52, %v726_v52 }
 0x2fc   : > { %v872_v24 = vpop.permute.xlu1 %871 }
 0x2fd   : > { %4168 = vmatmul.mubr.msk.bf16.vlgmr.msra.gmra.mrb[0].mxu1 %vm503_vm2, %v728_v53 }
 0x2fe   : > { %4172 = vmatpush3.bf16.msra.mxu1 %v4961_v19  ;;  %4175 = vmatprep.mubr.msk.bf16.mxu1 %vm4826_vm1, %v4825_v15 }
 0x2ff   : > { %4173 = vmatprep.subr.bf16.mxu1 %v4825_v15 }
 0x302   : > { %4174 = vmatpush3.bf16.msra.mxu1 %v4970_v20 }
 0x303   : > { %4179 = vmatprep.subr.bf16.mxu1 %v4825_v15 }
 0x309   : > { %4176 = vmatmul.mubr.msk.bf16.vlgmr.msra.gmra.mrb[0].mxu1 %vm503_vm2, %v3896_v54 }
 0x30a   : > { %4180 = vmatpush3.bf16.msra.mxu1 %v4982_v22  ;;  %4183 = vmatprep.mubr.msk.bf16.mxu1 %vm4826_vm1, %v4825_v15 }
 0x30b   : > { %4181 = vmatprep.subr.bf16.mxu1 %v4825_v15 }
 0x30e   : > { %4182 = vmatpush3.bf16.msra.mxu1 %v4988_v23 }
 0x30f   : > { %4211 = vmatprep.subr.bf16.mxu1 %v4825_v15 }
 0x315   : > { %4184 = vmatmul.mubr.msk.bf16.vlgmr.msra.gmra.mrb[0].mxu1 %vm503_vm2, %v3898_v55 }
 0x316   : > { %4212 = vmatpush3.bf16.msra.mxu1 %v4942_v14  ;;  %4215 = vmatprep.mubr.msk.bf16.mxu1 %vm4826_vm1, %v4825_v15 }
 0x317   : > { %4213 = vmatprep.subr.bf16.mxu1 %v4825_v15 }
 0x31a   : > { %4214 = vmatpush3.bf16.msra.mxu1 %v4950_v16 }
 0x31b   : > { %4219 = vmatprep.subr.bf16.mxu1 %v4825_v15 }
 0x3e8   : > { %v858_v56 = vpop.f32.mrb[0].mxu1 }
 0x3e9   : > { %v4524_v57 = vadd.f32 %v858_v56, %v5009_v28  ;;  %v4185_v58 = vpop.f32.mrb[1].mxu1 }
 0x3ea   : > { %v861_v59 = vpop.f32.mrb[2].mxu1 }
 0x3eb   : > { %4710 = vtanh.f32 %v4524_v57  ;;  %v4186_v60 = vpop.f32.mrb[3].mxu1  ;;  %v865_v62 = vmul.f32 0.5, %v4524_v57 }
 0x3ed   : > { %4712 = vtanh.f32 %v865_v62 }
 0x3f5   : > { %v4711_v61 = vpop.eup %4710 }
 0x3f6   : > { %876 = vrot.lane.b32.xlu0 %v4711_v61, %s4827_s27 }
 0x3f7   : > { %v4713_v63 = vpop.eup %4712 }
 0x3f8   : > { %v867_v0 = vadd.f32 1.0, %v4713_v63 }
 0x3fa   : > { %v868_v17 = vmul.f32 0.5, %v867_v0 }
 0x3fc   : > { %v874_v25 = vmul.f32 %v872_v24, %v868_v17 }
 0x468   : > { %v877_v18 = vpop.permute.xlu0 %876 }
 0x469   : > { %v879_v21 = vmul.f32 %v877_v18, %v868_v17  ;;  %v3910_v18 = vld [vmem:[%s5697_s1 + $0xb] sm:$0x1] }
 0x46b   : > { %881 = vrot.lane.b32.xlu0 %v879_v21, %s4828_s28 }
 0x4dd   : > { %v882_v27 = vpop.permute.xlu0 %881 }
 0x4de   : > { %v884_v29 = vadd.f32 %v882_v27, %v874_v25 }
 0x4e0   : > { %4714 = vtanh.f32 %v884_v29 }
 0x4ea   : > { %v4715_v30 = vpop.eup %4714 }
 0x4eb   : > { %887 = vrot.lane.b32.xlu1 %v4715_v30, %s4827_s27 }
 0x4ef   : > { %897 = vrot.lane.b32.xlu1 %v884_v29, %s4829_s29 }
 0x55d   : > { %v888_v31 = vpop.permute.xlu1 %887 }
 0x55e   : > { %v5056_v32 = vmul.f32 %v888_v31, %v868_v17  ;;  %v3908_v17 = vld [vmem:[%s5696_s0 + $0x3] sm:$0x1] }
 0x560   : > { %892 = vrot.lane.b32.xlu0 %v5056_v32, %s4828_s28 }
 0x561   : > { %v898_v33 = vpop.permute.xlu1 %897 }
 0x562   : > { %900 = vst.msk [vmem:[#allocation3] sm:$0x3] %vm468_vm0, %v898_v33 }
 0x569   : > { %v923_v34 = vld [vmem:[#allocation3] sm:$0x3] }
 0x56a   : > { %1067 = vrot.lane.b32.xlu1 %v923_v34, %s4828_s28 }
 0x5d2   : > { %v893_v35 = vpop.permute.xlu0 %892 }
 0x5d3   : > { %895 = vst.msk [vmem:[#allocation2] sm:$0x3] %vm468_vm0, %v893_v35 }
 0x5da   : > { %v922_v36 = vld [vmem:[#allocation2] sm:$0x3] }
 0x5db   : > { %v924_v37 = vpack.c.bf16 %v922_v36, %v922_v36 }
 0x5dc   : > { %v1068_v53 = vpop.permute.xlu1 %1067 }
 0x5dd   : > { %4192 = vmatmul.mubr.msk.bf16.vlgmr.msra.gmra.mrb[4].mxu0 %vm503_vm2, %v924_v37 }
 0x5de   : > { %4196 = vmatpush3.bf16.msra.mxu0 %v4961_v19  ;;  %4199 = vmatprep.mubr.msk.bf16.mxu0 %vm4826_vm1, %v4825_v15 }
 0x5df   : > { %4197 = vmatprep.subr.bf16.mxu0 %v4825_v15 }
 0x5e2   : > { %4198 = vmatpush3.bf16.msra.mxu0 %v4970_v20 }
 0x5e3   : > { %4203 = vmatprep.subr.bf16.mxu0 %v4825_v15 }
 0x5e9   : > { %4200 = vmatmul.mubr.msk.bf16.vlgmr.msra.gmra.mrb[4].mxu0 %vm503_vm2, %v3902_v38 }
 0x5ea   : > { %4204 = vmatpush3.bf16.msra.mxu0 %v4982_v22  ;;  %4207 = vmatprep.mubr.msk.bf16.mxu0 %vm4826_vm1, %v4825_v15 }
 0x5eb   : > { %4205 = vmatprep.subr.bf16.mxu0 %v4825_v15 }
 0x5ee   : > { %4206 = vmatpush3.bf16.msra.mxu0 %v4988_v23 }
 0x5ef   : > { %4235 = vmatprep.subr.bf16.mxu0 %v4825_v15 }
 0x5f5   : > { %4208 = vmatmul.mubr.msk.bf16.vlgmr.msra.gmra.mrb[4].mxu0 %vm503_vm2, %v3904_v39 }
 0x5f6   : > { %4236 = vmatpush3.bf16.msra.mxu0 %v4942_v14  ;;  %4239 = vmatprep.mubr.msk.bf16.mxu0 %vm4826_vm1, %v4825_v15 }
 0x5f7   : > { %4237 = vmatprep.subr.bf16.mxu0 %v4825_v15 }
 0x5fa   : > { %4238 = vmatpush3.bf16.msra.mxu0 %v4950_v16 }
 0x5fb   : > { %4243 = vmatprep.subr.bf16.mxu0 %v4825_v15 }
 0x6c8   : > { %v1054_v40 = vpop.f32.mrb[4].mxu0 }
 0x6c9   : > { %v4525_v41 = vadd.f32 %v1054_v40, %v5009_v28  ;;  %v4209_v42 = vpop.f32.mrb[5].mxu0 }
 0x6ca   : > { %v1057_v43 = vpop.f32.mrb[6].mxu0 }
 0x6cb   : > { %4716 = vtanh.f32 %v4525_v41  ;;  %v4210_v44 = vpop.f32.mrb[7].mxu0  ;;  %v1061_v46 = vmul.f32 0.5, %v4525_v41 }
 0x6cd   : > { %4718 = vtanh.f32 %v1061_v46 }
 0x6d5   : > { %v4717_v45 = vpop.eup %4716 }
 0x6d6   : > { %1072 = vrot.lane.b32.xlu0 %v4717_v45, %s4827_s27 }
 0x6d7   : > { %v4719_v47 = vpop.eup %4718 }
 0x6d8   : > { %v1063_v49 = vadd.f32 1.0, %v4719_v47 }
 0x6da   : > { %v1064_v50 = vmul.f32 0.5, %v1063_v49 }
 0x6dc   : > { %v1070_v54 = vmul.f32 %v1068_v53, %v1064_v50 }
 0x748   : > { %v1073_v51 = vpop.permute.xlu0 %1072 }
 0x749   : > { %v1075_v52 = vmul.f32 %v1073_v51, %v1064_v50  ;;  %v3914_v51 = vld [vmem:[%s5696_s0 + $0x4] sm:$0x1] }
 0x74b   : > { %1077 = vrot.lane.b32.xlu0 %v1075_v52, %s4828_s28  ;;  %v3916_v52 = vld [vmem:[%s5697_s1 + $0xc] sm:$0x1] }
 0x7bd   : > { %v1078_v55 = vpop.permute.xlu0 %1077 }
 0x7be   : > { %v1080_v56 = vadd.f32 %v1078_v55, %v1070_v54 }
 0x7c0   : > { %4720 = vtanh.f32 %v1080_v56 }
 0x7ca   : > { %v4721_v57 = vpop.eup %4720 }
 0x7cb   : > { %1083 = vrot.lane.b32.xlu1 %v4721_v57, %s4827_s27 }
 0x7cf   : > { %1093 = vrot.lane.b32.xlu1 %v1080_v56, %s4829_s29 }
 0x83d   : > { %v1084_v58 = vpop.permute.xlu1 %1083 }
 0x83e   : > { %v5095_v59 = vmul.f32 %v1084_v58, %v1064_v50 }
 0x840   : > { %1088 = vrot.lane.b32.xlu0 %v5095_v59, %s4828_s28 }
 0x841   : > { %v1094_v60 = vpop.permute.xlu1 %1093 }
 0x842   : > { %1096 = vst.msk [vmem:[#allocation3] sm:$0x3] %vm468_vm0, %v1094_v60 }
 0x849   : > { %v1119_v61 = vld [vmem:[#allocation3] sm:$0x3] }
 0x84a   : > { %1263 = vrot.lane.b32.xlu1 %v1119_v61, %s4828_s28 }
 0x8b2   : > { %v1089_v62 = vpop.permute.xlu0 %1088 }
 0x8b3   : > { %1091 = vst.msk [vmem:[#allocation2] sm:$0x3] %vm468_vm0, %v1089_v62 }
 0x8ba   : > { %v1118_v63 = vld [vmem:[#allocation2] sm:$0x3] }
 0x8bb   : > { %v1120_v0 = vpack.c.bf16 %v1118_v63, %v1118_v63 }
 0x8bc   : > { %v1264_v38 = vpop.permute.xlu1 %1263 }
 0x8bd   : > { %4216 = vmatmul.mubr.msk.bf16.vlgmr.msra.gmra.mrb[4].mxu1 %vm503_vm2, %v1120_v0 }
 0x8be   : > { %4220 = vmatpush3.bf16.msra.mxu1 %v4961_v19  ;;  %4223 = vmatprep.mubr.msk.bf16.mxu1 %vm4826_vm1, %v4825_v15 }
 0x8bf   : > { %4221 = vmatprep.subr.bf16.mxu1 %v4825_v15 }
 0x8c2   : > { %4222 = vmatpush3.bf16.msra.mxu1 %v4970_v20 }
 0x8c3   : > { %4227 = vmatprep.subr.bf16.mxu1 %v4825_v15 }
 0x8c9   : > { %4224 = vmatmul.mubr.msk.bf16.vlgmr.msra.gmra.mrb[4].mxu1 %vm503_vm2, %v3908_v17 }
 0x8ca   : > { %4228 = vmatpush3.bf16.msra.mxu1 %v4982_v22  ;;  %4231 = vmatprep.mubr.msk.bf16.mxu1 %vm4826_vm1, %v4825_v15 }
 0x8cb   : > { %4229 = vmatprep.subr.bf16.mxu1 %v4825_v15 }
 0x8ce   : > { %4230 = vmatpush3.bf16.msra.mxu1 %v4988_v23 }
 0x8cf   : > { %4259 = vmatprep.subr.bf16.mxu1 %v4825_v15 }
 0x8d5   : > { %4232 = vmatmul.mubr.msk.bf16.vlgmr.msra.gmra.mrb[4].mxu1 %vm503_vm2, %v3910_v18 }
 0x8d6   : > { %4260 = vmatpush3.bf16.msra.mxu1 %v4942_v14  ;;  %4263 = vmatprep.mubr.msk.bf16.mxu1 %vm4826_vm1, %v4825_v15 }
 0x8d7   : > { %4261 = vmatprep.subr.bf16.mxu1 %v4825_v15 }
 0x8da   : > { %4262 = vmatpush3.bf16.msra.mxu1 %v4950_v16 }
 0x8db   : > { %4267 = vmatprep.subr.bf16.mxu1 %v4825_v15 }
 0x9a8   : > { %v1250_v21 = vpop.f32.mrb[4].mxu1 }
 0x9a9   : > { %v4526_v24 = vadd.f32 %v1250_v21, %v5009_v28  ;;  %v4233_v25 = vpop.f32.mrb[5].mxu1 }
 0x9aa   : > { %v1253_v27 = vpop.f32.mrb[6].mxu1 }
 0x9ab   : > { %4722 = vtanh.f32 %v4526_v24  ;;  %v4234_v29 = vpop.f32.mrb[7].mxu1  ;;  %v1257_v31 = vmul.f32 0.5, %v4526_v24 }
 0x9ad   : > { %4724 = vtanh.f32 %v1257_v31 }
 0x9b5   : > { %v4723_v30 = vpop.eup %4722 }
 0x9b6   : > { %1268 = vrot.lane.b32.xlu0 %v4723_v30, %s4827_s27 }
 0x9b7   : > { %v4725_v33 = vpop.eup %4724 }
 0x9b8   : > { %v1259_v34 = vadd.f32 1.0, %v4725_v33 }
 0x9ba   : > { %v1260_v35 = vmul.f32 0.5, %v1259_v34 }
 0x9bc   : > { %v1266_v39 = vmul.f32 %v1264_v38, %v1260_v35  ;;  %v3922_v38 = vld [vmem:[%s5697_s1 + $0xd] sm:$0x1] }
 0xa28   : > { %v1269_v36 = vpop.permute.xlu0 %1268 }
 0xa29   : > { %v1271_v37 = vmul.f32 %v1269_v36, %v1260_v35 }
 0xa2b   : > { %1273 = vrot.lane.b32.xlu0 %v1271_v37, %s4828_s28  ;;  %v3920_v37 = vld [vmem:[%s5696_s0 + $0x5] sm:$0x1] }
 0xa9d   : > { %v1274_v40 = vpop.permute.xlu0 %1273 }
 0xa9e   : > { %v1276_v41 = vadd.f32 %v1274_v40, %v1266_v39 }
 0xaa0   : > { %4726 = vtanh.f32 %v1276_v41 }
 0xaaa   : > { %v4727_v42 = vpop.eup %4726 }
 0xaab   : > { %1279 = vrot.lane.b32.xlu1 %v4727_v42, %s4827_s27 }
 0xaaf   : > { %1289 = vrot.lane.b32.xlu1 %v1276_v41, %s4829_s29 }
 0xb1d   : > { %v1280_v43 = vpop.permute.xlu1 %1279 }
 0xb1e   : > { %v5134_v44 = vmul.f32 %v1280_v43, %v1260_v35 }
 0xb20   : > { %1284 = vrot.lane.b32.xlu0 %v5134_v44, %s4828_s28 }
 0xb21   : > { %v1290_v45 = vpop.permute.xlu1 %1289 }
 0xb22   : > { %1292 = vst.msk [vmem:[#allocation3] sm:$0x3] %vm468_vm0, %v1290_v45 }
 0xb29   : > { %v1315_v46 = vld [vmem:[#allocation3] sm:$0x3] }
 0xb2a   : > { %1459 = vrot.lane.b32.xlu1 %v1315_v46, %s4828_s28 }
 0xb92   : > { %v1285_v47 = vpop.permute.xlu0 %1284 }
 0xb93   : > { %1287 = vst.msk [vmem:[#allocation2] sm:$0x3] %vm468_vm0, %v1285_v47 }
 0xb9a   : > { %v1314_v49 = vld [vmem:[#allocation2] sm:$0x3] }
 0xb9b   : > { %v1316_v50 = vpack.c.bf16 %v1314_v49, %v1314_v49 }
 0xb9c   : > { %v1460_v18 = vpop.permute.xlu1 %1459 }
 0xb9d   : > { %4240 = vmatmul.mubr.msk.bf16.vlgmr.msra.gmra.mrb[8].mxu0 %vm503_vm2, %v1316_v50 }
 0xb9e   : > { %4244 = vmatpush3.bf16.msra.mxu0 %v4961_v19  ;;  %4247 = vmatprep.mubr.msk.bf16.mxu0 %vm4826_vm1, %v4825_v15 }
 0xb9f   : > { %4245 = vmatprep.subr.bf16.mxu0 %v4825_v15 }
 0xba2   : > { %4246 = vmatpush3.bf16.msra.mxu0 %v4970_v20 }
 0xba3   : > { %4251 = vmatprep.subr.bf16.mxu0 %v4825_v15 }
 0xba9   : > { %4248 = vmatmul.mubr.msk.bf16.vlgmr.msra.gmra.mrb[8].mxu0 %vm503_vm2, %v3914_v51 }
 0xbaa   : > { %4252 = vmatpush3.bf16.msra.mxu0 %v4982_v22  ;;  %4255 = vmatprep.mubr.msk.bf16.mxu0 %vm4826_vm1, %v4825_v15 }
 0xbab   : > { %4253 = vmatprep.subr.bf16.mxu0 %v4825_v15 }
 0xbae   : > { %4254 = vmatpush3.bf16.msra.mxu0 %v4988_v23 }
 0xbaf   : > { %4283 = vmatprep.subr.bf16.mxu0 %v4825_v15 }
 0xbb5   : > { %4256 = vmatmul.mubr.msk.bf16.vlgmr.msra.gmra.mrb[8].mxu0 %vm503_vm2, %v3916_v52 }
 0xbb6   : > { %4284 = vmatpush3.bf16.msra.mxu0 %v4942_v14  ;;  %4287 = vmatprep.mubr.msk.bf16.mxu0 %vm4826_vm1, %v4825_v15 }
 0xbb7   : > { %4285 = vmatprep.subr.bf16.mxu0 %v4825_v15 }
 0xbba   : > { %4286 = vmatpush3.bf16.msra.mxu0 %v4950_v16 }
 0xbbb   : > { %4291 = vmatprep.subr.bf16.mxu0 %v4825_v15 }
 0xc88   : > { %v1446_v53 = vpop.f32.mrb[8].mxu0 }
 0xc89   : > { %v4527_v54 = vadd.f32 %v1446_v53, %v5009_v28  ;;  %v4257_v55 = vpop.f32.mrb[9].mxu0 }
 0xc8a   : > { %v1449_v56 = vpop.f32.mrb[10].mxu0 }
 0xc8b   : > { %4728 = vtanh.f32 %v4527_v54  ;;  %v4258_v57 = vpop.f32.mrb[11].mxu0  ;;  %v1453_v60 = vmul.f32 0.5, %v4527_v54 }
 0xc8d   : > { %4730 = vtanh.f32 %v1453_v60 }
 0xc95   : > { %v4729_v58 = vpop.eup %4728 }
 0xc96   : > { %1464 = vrot.lane.b32.xlu0 %v4729_v58, %s4827_s27 }
 0xc97   : > { %v4731_v61 = vpop.eup %4730 }
 0xc98   : > { %v1455_v62 = vadd.f32 1.0, %v4731_v61 }
 0xc9a   : > { %v1456_v63 = vmul.f32 0.5, %v1455_v62 }
 0xc9c   : > { %v1462_v21 = vmul.f32 %v1460_v18, %v1456_v63 }
 0xd08   : > { %v1465_v0 = vpop.permute.xlu0 %1464 }
 0xd09   : > { %v1467_v17 = vmul.f32 %v1465_v0, %v1456_v63  ;;  %v3926_v0 = vld [vmem:[%s5696_s0 + $0x6] sm:$0x1] }
 0xd0b   : > { %1469 = vrot.lane.b32.xlu0 %v1467_v17, %s4828_s28  ;;  %v3928_v17 = vld [vmem:[%s5697_s1 + $0xe] sm:$0x1] }
 0xd7d   : > { %v1470_v24 = vpop.permute.xlu0 %1469 }
 0xd7e   : > { %v1472_v25 = vadd.f32 %v1470_v24, %v1462_v21 }
 0xd80   : > { %4732 = vtanh.f32 %v1472_v25 }
 0xd8a   : > { %v4733_v27 = vpop.eup %4732 }
 0xd8b   : > { %1475 = vrot.lane.b32.xlu1 %v4733_v27, %s4827_s27 }
 0xd8f   : > { %1485 = vrot.lane.b32.xlu1 %v1472_v25, %s4829_s29 }
 0xdfd   : > { %v1476_v29 = vpop.permute.xlu1 %1475 }
 0xdfe   : > { %v5173_v30 = vmul.f32 %v1476_v29, %v1456_v63 }
 0xe00   : > { %1480 = vrot.lane.b32.xlu0 %v5173_v30, %s4828_s28 }
 0xe01   : > { %v1486_v31 = vpop.permute.xlu1 %1485 }
 0xe02   : > { %1488 = vst.msk [vmem:[#allocation3] sm:$0x3] %vm468_vm0, %v1486_v31 }
 0xe09   : > { %v1511_v33 = vld [vmem:[#allocation3] sm:$0x3] }
 0xe0a   : > { %1655 = vrot.lane.b32.xlu1 %v1511_v33, %s4828_s28 }
 0xe72   : > { %v1481_v34 = vpop.permute.xlu0 %1480 }
 0xe73   : > { %1483 = vst.msk [vmem:[#allocation2] sm:$0x3] %vm468_vm0, %v1481_v34 }
 0xe7a   : > { %v1510_v35 = vld [vmem:[#allocation2] sm:$0x3] }
 0xe7b   : > { %v1512_v36 = vpack.c.bf16 %v1510_v35, %v1510_v35 }
 0xe7d   : > { %4264 = vmatmul.mubr.msk.bf16.vlgmr.msra.gmra.mrb[8].mxu1 %vm503_vm2, %v1512_v36 }
 0xe7e   : > { %4268 = vmatpush3.bf16.msra.mxu1 %v4961_v19  ;;  %4271 = vmatprep.mubr.msk.bf16.mxu1 %vm4826_vm1, %v4825_v15 }
 0xe7f   : > { %4269 = vmatprep.subr.bf16.mxu1 %v4825_v15 }
 0xe82   : > { %4270 = vmatpush3.bf16.msra.mxu1 %v4970_v20 }
 0xe83   : > { %4275 = vmatprep.subr.bf16.mxu1 %v4825_v15 }
 0xe89   : > { %4272 = vmatmul.mubr.msk.bf16.vlgmr.msra.gmra.mrb[8].mxu1 %vm503_vm2, %v3920_v37 }
 0xe8a   : > { %4276 = vmatpush3.bf16.msra.mxu1 %v4982_v22  ;;  %4279 = vmatprep.mubr.msk.bf16.mxu1 %vm4826_vm1, %v4825_v15 }
 0xe8b   : > { %4277 = vmatprep.subr.bf16.mxu1 %v4825_v15 }
 0xe8e   : > { %4278 = vmatpush3.bf16.msra.mxu1 %v4988_v23 }
 0xe8f   : > { %4307 = vmatprep.subr.bf16.mxu1 %v4825_v15 }
 0xe95   : > { %4280 = vmatmul.mubr.msk.bf16.vlgmr.msra.gmra.mrb[8].mxu1 %vm503_vm2, %v3922_v38 }
 0xe96   : > { %4308 = vmatpush3.bf16.msra.mxu1 %v4942_v14  ;;  %4311 = vmatprep.mubr.msk.bf16.mxu1 %vm4826_vm1, %v4825_v15 }
 0xe97   : > { %4309 = vmatprep.subr.bf16.mxu1 %v4825_v15 }
 0xe9a   : > { %4310 = vmatpush3.bf16.msra.mxu1 %v4950_v16  ;;  %v1656_v16 = vpop.permute.xlu1 %1655 }
 0xe9b   : > { %4315 = vmatprep.subr.bf16.mxu1 %v4825_v15 }
 0xf68   : > { %v1642_v39 = vpop.f32.mrb[8].mxu1 }
 0xf69   : > { %v4528_v40 = vadd.f32 %v1642_v39, %v5009_v28  ;;  %v4281_v41 = vpop.f32.mrb[9].mxu1 }
 0xf6a   : > { %v1645_v42 = vpop.f32.mrb[10].mxu1 }
 0xf6b   : > { %4734 = vtanh.f32 %v4528_v40  ;;  %v4282_v43 = vpop.f32.mrb[11].mxu1  ;;  %v1649_v14 = vmul.f32 0.5, %v4528_v40 }
 0xf6d   : > { %4736 = vtanh.f32 %v1649_v14 }
 0xf75   : > { %v4735_v45 = vpop.eup %4734 }
 0xf76   : > { %1660 = vrot.lane.b32.xlu0 %v4735_v45, %s4827_s27 }
 0xf77   : > { %v4737_v46 = vpop.eup %4736 }
 0xf78   : > { %v1651_v47 = vadd.f32 1.0, %v4737_v46 }
 0xf7a   : > { %v1652_v49 = vmul.f32 0.5, %v1651_v47 }
 0xf7c   : > { %v1658_v52 = vmul.f32 %v1656_v16, %v1652_v49 }
 0xfe8   : > { %v1661_v50 = vpop.permute.xlu0 %1660 }
 0xfe9   : > { %v1663_v51 = vmul.f32 %v1661_v50, %v1652_v49 }
 0xfeb   : > { %1665 = vrot.lane.b32.xlu0 %v1663_v51, %s4828_s28  ;;  %v3932_v51 = vld [vmem:[%s5696_s0 + $0x7] sm:$0x1] }
0x105d   : > { %v1666_v53 = vpop.permute.xlu0 %1665 }
0x105e   : > { %v1668_v54 = vadd.f32 %v1666_v53, %v1658_v52 }
0x1060   : > { %4738 = vtanh.f32 %v1668_v54 }
0x106a   : > { %v4739_v55 = vpop.eup %4738 }
0x106b   : > { %1671 = vrot.lane.b32.xlu1 %v4739_v55, %s4827_s27 }
0x106f   : > { %1681 = vrot.lane.b32.xlu1 %v1668_v54, %s4829_s29 }
0x10dd   : > { %v1672_v56 = vpop.permute.xlu1 %1671 }
0x10de   : > { %v5212_v57 = vmul.f32 %v1672_v56, %v1652_v49 }
0x10e0   : > { %1676 = vrot.lane.b32.xlu0 %v5212_v57, %s4828_s28 }
0x10e1   : > { %v1682_v58 = vpop.permute.xlu1 %1681 }
0x10e2   : > { %1684 = vst.msk [vmem:[#allocation3] sm:$0x3] %vm468_vm0, %v1682_v58 }
0x10e9   : > { %v1707_v60 = vld [vmem:[#allocation3] sm:$0x3] }
0x10ea   : > { %1851 = vrot.lane.b32.xlu1 %v1707_v60, %s4828_s28 }
0x1152   : > { %v1677_v61 = vpop.permute.xlu0 %1676 }
0x1153   : > { %1679 = vst.msk [vmem:[#allocation2] sm:$0x3] %vm468_vm0, %v1677_v61 }
0x115a   : > { %v1706_v62 = vld [vmem:[#allocation2] sm:$0x3] }
0x115b   : > { %v1708_v63 = vpack.c.bf16 %v1706_v62, %v1706_v62  ;;  %v705_v62 = vpack.c.bf16 %v5017_v48, %v5017_v48 }
0x115c   : > { %v1852_v38 = vpop.permute.xlu1 %1851 }
0x115d   : > { %4288 = vmatmul.mubr.msk.bf16.vlgmr.msra.gmra.mrb[12].mxu0 %vm503_vm2, %v1708_v63 }
0x115e   : > { %4292 = vmatpush3.bf16.msra.mxu0 %v4961_v19  ;;  %4295 = vmatprep.mubr.msk.bf16.mxu0 %vm4826_vm1, %v4825_v15 }
0x115f   : > { %4293 = vmatprep.subr.bf16.mxu0 %v4825_v15 }
0x1162   : > { %4294 = vmatpush3.bf16.msra.mxu0 %v4970_v20 }
0x1163   : > { %4299 = vmatprep.subr.bf16.mxu0 %v4825_v15 }
0x1169   : > { %4296 = vmatmul.mubr.msk.bf16.vlgmr.msra.gmra.mrb[12].mxu0 %vm503_vm2, %v3926_v0 }
0x116a   : > { %4300 = vmatpush3.bf16.msra.mxu0 %v4982_v22  ;;  %4303 = vmatprep.mubr.msk.bf16.mxu0 %vm4826_vm1, %v4825_v15 }
0x116b   : > { %4301 = vmatprep.subr.bf16.mxu0 %v4825_v15 }
0x116e   : > { %4302 = vmatpush3.bf16.msra.mxu0 %v4988_v23 }
0x1175   : > { %4304 = vmatmul.mubr.msk.bf16.vlgmr.msra.gmra.mrb[12].mxu0 %vm503_vm2, %v3928_v17  ;;  %v1097_v17 = vpack.c.bf16 %v5095_v59, %v5095_v59 }
0x1248   : > { %v1838_v18 = vpop.f32.mrb[12].mxu0 }
0x1249   : > { %v4529_v21 = vadd.f32 %v1838_v18, %v5009_v28  ;;  %v4305_v24 = vpop.f32.mrb[13].mxu0 }
0x124a   : > { %v1841_v25 = vpop.f32.mrb[14].mxu0  ;;  %v1489_v24 = vpack.c.bf16 %v5173_v30, %v5173_v30 }
0x124b   : > { %4740 = vtanh.f32 %v4529_v21  ;;  %v4306_v27 = vpop.f32.mrb[15].mxu0  ;;  %v1845_v31 = vmul.f32 0.5, %v4529_v21 }
0x124d   : > { %4742 = vtanh.f32 %v1845_v31 }
0x1255   : > { %v4741_v29 = vpop.eup %4740 }
0x1256   : > { %1856 = vrot.lane.b32.xlu0 %v4741_v29, %s4827_s27 }
0x1257   : > { %v4743_v33 = vpop.eup %4742 }
0x1258   : > { %v1847_v34 = vadd.f32 1.0, %v4743_v33 }
0x125a   : > { %v1848_v35 = vmul.f32 0.5, %v1847_v34 }
0x125c   : > { %v1854_v39 = vmul.f32 %v1852_v38, %v1848_v35 }
0x12c8   : > { %v1857_v36 = vpop.permute.xlu0 %1856 }
0x12c9   : > { %v1859_v37 = vmul.f32 %v1857_v36, %v1848_v35 }
0x12cb   : > { %1861 = vrot.lane.b32.xlu0 %v1859_v37, %s4828_s28  ;;  %v901_v37 = vpack.c.bf16 %v5056_v32, %v5056_v32 }
0x133d   : > { %v1862_v40 = vpop.permute.xlu0 %1861 }
0x133e   : > { %v1864_v41 = vadd.f32 %v1862_v40, %v1854_v39  ;;  %v1293_v40 = vpack.c.bf16 %v5134_v44, %v5134_v44 }
0x1340   : > { %4744 = vtanh.f32 %v1864_v41 }
0x134a   : > { %v4745_v42 = vpop.eup %4744 }
0x134b   : > { %1867 = vrot.lane.b32.xlu1 %v4745_v42, %s4827_s27 }
0x134f   : > { %1877 = vrot.lane.b32.xlu1 %v1864_v41, %s4829_s29 }
0x13bd   : > { %v1868_v43 = vpop.permute.xlu1 %1867 }
0x13be   : > { %v1870_v45 = vmul.f32 %v1868_v43, %v1848_v35 }
0x13c0   : > { %1872 = vrot.lane.b32.xlu0 %v1870_v45, %s4828_s28  ;;  %v1881_v27 = vpack.c.bf16 %v1870_v45, %v1870_v45  ;;  %v1685_v45 = vpack.c.bf16 %v5212_v57, %v5212_v57 }
0x13c1   : > { %v1878_v14 = vpop.permute.xlu1 %1877 }
0x13c2   : > { %1880 = vst.msk [vmem:[#allocation3] sm:$0x3] %vm468_vm0, %v1878_v14 }
0x13c9   : > { %v1903_v46 = vld [vmem:[#allocation3] sm:$0x3] }
0x13ca   : > { %2047 = vrot.lane.b32.xlu1 %v1903_v46, %s4828_s28 }
0x1432   : > { %v1873_v47 = vpop.permute.xlu0 %1872 }
0x1433   : > { %1875 = vst.msk [vmem:[#allocation2] sm:$0x3] %vm468_vm0, %v1873_v47 }
0x143a   : > { %v1902_v49 = vld [vmem:[#allocation2] sm:$0x3] }
0x143b   : > { %v1904_v50 = vpack.c.bf16 %v1902_v49, %v1902_v49 }
0x143c   : > { %v2048_v33 = vpop.permute.xlu1 %2047 }
0x143d   : > { %4312 = vmatmul.mubr.msk.bf16.vlgmr.msra.gmra.mrb[12].mxu1 %vm503_vm2, %v1904_v50 }
0x143e   : > { %4316 = vmatpush3.bf16.msra.mxu1 %v4961_v19  ;;  %4319 = vmatprep.mubr.msk.bf16.mxu1 %vm4826_vm1, %v4825_v15  ;;  %v3934_v19 = vld [vmem:[%s5697_s1 + $0xf] sm:$0x1] }
0x143f   : > { %4317 = vmatprep.subr.bf16.mxu1 %v4825_v15 }
0x1442   : > { %4318 = vmatpush3.bf16.msra.mxu1 %v4970_v20 }
0x1443   : > { %4323 = vmatprep.subr.bf16.mxu1 %v4825_v15 }
0x1449   : > { %4320 = vmatmul.mubr.msk.bf16.vlgmr.msra.gmra.mrb[12].mxu1 %vm503_vm2, %v3932_v51 }
0x144a   : > { %4324 = vmatpush3.bf16.msra.mxu1 %v4982_v22  ;;  %4327 = vmatprep.mubr.msk.bf16.mxu1 %vm4826_vm1, %v4825_v15 }
0x144b   : > { %4325 = vmatprep.subr.bf16.mxu1 %v4825_v15  ;;  %v4830_v15 = vmov 1966171168  }
0x144e   : > { %4326 = vmatpush3.bf16.msra.mxu1 %v4988_v23  ;;  %v708_v23 = vunpack.c.l.s4 %v4830_v15 }
0x1450   : > { %v709_v58 = vunpack.c.0.s8 %v708_v23 }
0x1452   : > { %v712_v61 = vsub.s32 %v709_v58, %v5005_v26 }
0x1454   : > { %v713_v0 = vrot.slane %v705_v62, %v712_v61  ;;  %v1105_v21 = vrot.slane %v1097_v17, %v712_v61  ;;  %v1497_v26 = vrot.slane %v1489_v24, %v712_v61  ;;  %v1889_v29 = vrot.slane %v1881_v27, %v712_v61 }
0x1455   : > { %4328 = vmatmul.mubr.msk.bf16.vlgmr.msra.gmra.mrb[12].mxu1 %vm503_vm2, %v3934_v19  ;;  %v909_v39 = vrot.slane %v901_v37, %v712_v61  ;;  %v1301_v43 = vrot.slane %v1293_v40, %v712_v61  ;;  %v1693_v32 = vrot.slane %v1685_v45, %v712_v61 }
0x1456   : > { %v720_v25 = vrot.slane %v713_v0, %v712_v61  ;;  %v1112_v48 = vrot.slane %v1105_v21, %v712_v61  ;;  %v1504_v31 = vrot.slane %v1497_v26, %v712_v61  ;;  %v1896_v59 = vrot.slane %v1889_v29, %v712_v61 }
0x1457   : > { %v916_v46 = vrot.slane %v909_v39, %v712_v61  ;;  %v1308_v44 = vrot.slane %v1301_v43, %v712_v61  ;;  %v1700_v47 = vrot.slane %v1693_v32, %v712_v61 }
0x1528   : > { %v2034_v20 = vpop.f32.mrb[12].mxu1 }
0x1529   : > { %v4530_v16 = vadd.f32 %v2034_v20, %v5009_v28  ;;  %v4329_v52 = vpop.f32.mrb[13].mxu1 }
0x152a   : > { %v2037_v53 = vpop.f32.mrb[14].mxu1 }
0x152b   : > { %4746 = vtanh.f32 %v4530_v16  ;;  %v4330_v22 = vpop.f32.mrb[15].mxu1  ;;  %v2041_v55 = vmul.f32 0.5, %v4530_v16 }
0x152d   : > { %4748 = vtanh.f32 %v2041_v55 }
0x1535   : > { %v4747_v54 = vpop.eup %4746 }
0x1536   : > { %2052 = vrot.lane.b32.xlu0 %v4747_v54, %s4827_s27 }
0x1537   : > { %v4749_v56 = vpop.eup %4748 }
0x1538   : > { %v2043_v60 = vadd.f32 1.0, %v4749_v56 }
0x153a   : > { %v2044_v28 = vmul.f32 0.5, %v2043_v60 }
0x153c   : > { %v2050_v30 = vmul.f32 %v2048_v33, %v2044_v28 }
0x15a8   : > { %v2053_v63 = vpop.permute.xlu0 %2052 }
0x15a9   : > { %v2055_v18 = vmul.f32 %v2053_v63, %v2044_v28 }
0x15ab   : > { %2057 = vrot.lane.b32.xlu0 %v2055_v18, %s4828_s28 }
0x15af   : > { %721 = vrot.lane.b32.xlu0 %v720_v25, %s4828_s28 }
0x15b3   : > { %1113 = vrot.lane.b32.xlu0 %v1112_v48, %s4828_s28 }
0x15b7   : > { %1505 = vrot.lane.b32.xlu0 %v1504_v31, %s4828_s28 }
0x15bb   : > { %1897 = vrot.lane.b32.xlu0 %v1896_v59, %s4828_s28 }
0x161d   : > { %v2058_v34 = vpop.permute.xlu0 %2057 }
0x161e   : > { %v2060_v35 = vadd.f32 %v2058_v34, %v2050_v30 }
0x1620   : > { %4750 = vtanh.f32 %v2060_v35  ;;  %2073 = vrot.lane.b32.xlu0 %v2060_v35, %s4829_s29 }
0x1621   : > { %v722_v36 = vpop.permute.xlu0 %721 }
0x1622   : > { %725 = vst.msk [vmem:[%s4917_s18] sm:$0x1] %vm724_vm3, %v722_v36 }
0x1625   : > { %v1114_v38 = vpop.permute.xlu0 %1113 }
0x1626   : > { %3906 = vst.msk [vmem:[%s4917_s18 + $0x2] sm:$0x1] %vm724_vm3, %v1114_v38 }
0x1629   : > { %v1506_v41 = vpop.permute.xlu0 %1505 }
0x162a   : > { %v4751_v42 = vpop.eup %4750  ;;  %3918 = vst.msk [vmem:[%s4917_s18 + $0x4] sm:$0x1] %vm724_vm3, %v1506_v41 }
0x162b   : > { %2063 = vrot.lane.b32.xlu1 %v4751_v42, %s4827_s27 }
0x162d   : > { %v1898_v14 = vpop.permute.xlu0 %1897 }
0x162e   : > { %3930 = vst.msk [vmem:[%s4917_s18 + $0x6] sm:$0x1] %vm724_vm3, %v1898_v14 }
0x162f   : > { %917 = vrot.lane.b32.xlu1 %v916_v46, %s4828_s28 }
0x1633   : > { %1309 = vrot.lane.b32.xlu1 %v1308_v44, %s4828_s28 }
0x1637   : > { %1701 = vrot.lane.b32.xlu1 %v1700_v47, %s4828_s28 }
0x1692   : > { %v2074_v49 = vpop.permute.xlu0 %2073 }
0x1693   : > { %2076 = vst.msk [vmem:[#allocation3] sm:$0x3] %vm468_vm0, %v2074_v49 }
0x169d   : > { %v2064_v57 = vpop.permute.xlu1 %2063 }
0x169e   : > { %v2066_v50 = vmul.f32 %v2064_v57, %v2044_v28 }
0x16a0   : > { %v2077_v51 = vpack.c.bf16 %v2066_v50, %v2066_v50  ;;  %2068 = vrot.lane.b32.xlu1 %v2066_v50, %s4828_s28 }
0x16a1   : > { %v918_v19 = vpop.permute.xlu1 %917 }
0x16a2   : > { %v2085_v20 = vrot.slane %v2077_v51, %v712_v61  ;;  %3900 = vst.msk [vmem:[%s4917_s18 + $0x1] sm:$0x1] %vm724_vm3, %v918_v19 }
0x16a4   : > { %v2092_v16 = vrot.slane %v2085_v20, %v712_v61 }
0x16a5   : > { %v1310_v52 = vpop.permute.xlu1 %1309 }
0x16a6   : > { %3912 = vst.msk [vmem:[%s4917_s18 + $0x3] sm:$0x1] %vm724_vm3, %v1310_v52  ;;  %2093 = vrot.lane.b32.xlu1 %v2092_v16, %s4828_s28 }
0x16a9   : > { %v1702_v53 = vpop.permute.xlu1 %1701 }
0x16aa   : > { %3924 = vst.msk [vmem:[%s4917_s18 + $0x5] sm:$0x1] %vm724_vm3, %v1702_v53 }
0x1712   : > { %v2069_v22 = vpop.permute.xlu1 %2068 }
0x1713   : > { %2071 = vst.msk [vmem:[#allocation2] sm:$0x3] %vm468_vm0, %v2069_v22 }
0x1718   : > { %v2094_v54 = vpop.permute.xlu1 %2093 }
0x1719   : > { %3936 = vst.msk [vmem:[%s4917_s18 + $0x7] sm:$0x1] %vm724_vm3, %v2094_v54 }
0x171a PF: > { %p3937_p6 = scmp.ne.s32.totalorder %s4814_s21, 1 }
0x171b   : > { %v5316_v55 = vcombine.low (!%p3937_p6), %v4919_v4, %v4921_v5  ;;  %v4831_v15 = vmov (!%p3937_p6), 0.0   ;;  %vm4832_vm4 = vmmov (!%p3937_p6), 0   ;;  %v5324_v23 = vcombine.low (!%p3937_p6), %v4923_v6, %v4925_v7  ;;  %v2102_v56 = vld [vmem:[#allocation2] sm:$0x3] (!%p3937_p6)  ;;  %s4833_s19 = smov (!%p3937_p6), 64   ;;  %s4834_s20 = smov (!%p3937_p6), 32  }
0x171c   : > { %2101 = sbr.rel (%p3937_p6) target bundleno = 11809 (0x2e21), region = 56  ;;  %4331 = vmatprep.subr.bf16.mxu0 (!%p3937_p6), %v4831_v15  ;;  %4335 = vmatprep.mubr.msk.bf16.mxu0 (!%p3937_p6), %vm4832_vm4, %v4831_v15  ;;  %v2104_v4 = vpack.c.bf16 (!%p3937_p6), %v2102_v56, %v2102_v56  ;;  %vm2117_vm5 = vcmask (!%p3937_p6), 261120   ;;  %v5335_v5 = vcombine.low (!%p3937_p6), %v4910_v2, %v4912_v3  ;;  %v5344_v6 = vcombine.low (!%p3937_p6), %v4927_v8, %v4929_v9  ;;  %v3941_v2 = vld [vmem:[%s5696_s0 + $0x7] sm:$0x1] (!%p3937_p6)  ;;  %v3945_v8 = vld [vmem:[%s5697_s1 + $0xf] sm:$0x1] (!%p3937_p6) }
0x171d   : > { %4332 = vmatpush3.bf16.msra.mxu0 (!%p3937_p6), %v5316_v55  ;;  %4355 = vmatprep.subr.bf16.mxu1 (!%p3937_p6), %v4831_v15  ;;  %v5356_v3 = vcombine.low (!%p3937_p6), %v4931_v10, %v4933_v11  ;;  %v5362_v7 = vcombine.low (!%p3937_p6), %v4935_v12, %v4937_v13  ;;  %v2162_v9 = vlaneseq (!%p3937_p6)  ;;  %v2103_v63 = vld [vmem:[#allocation3] sm:$0x3] (!%p3937_p6)  ;;  %s4835_s25 = smov (!%p3937_p6), 96   ;;  %v3951_v37 = vld [vmem:[%s5696_s0 + $0x6] sm:$0x1] (!%p3937_p6)  ;;  %vm2341_vm6 = vcmask (!%p3937_p6), 253952  }
0x171e   : > { %4333 = vmatprep.subr.bf16.mxu0 (!%p3937_p6), %v4831_v15  ;;  %4356 = vmatpush3.bf16.msra.mxu1 (!%p3937_p6), %v5316_v55  ;;  %v3953_v38 = vld [vmem:[%s5697_s1 + $0xe] sm:$0x1] (!%p3937_p6) }
0x171f   : > { %4357 = vmatprep.subr.bf16.mxu1 (!%p3937_p6), %v4831_v15  ;;  %4359 = vmatprep.mubr.msk.bf16.mxu1 (!%p3937_p6), %vm4832_vm4, %v4831_v15  ;;  %v5379_v10 = vshrl.u32 (!%p3937_p6), %v2162_v9, 7 }
0x1721   : > { %4334 = vmatpush3.bf16.msra.mxu0 (!%p3937_p6), %v5324_v23  ;;  %v2164_v11 = vsub.s32 (!%p3937_p6), 0, %v5379_v10 }
0x1722   : > { %4339 = vmatprep.subr.bf16.mxu0 (!%p3937_p6), %v4831_v15  ;;  %4358 = vmatpush3.bf16.msra.mxu1 (!%p3937_p6), %v5324_v23 }
0x1723   : > { %4363 = vmatprep.subr.bf16.mxu1 %v4831_v15  ;;  %v5383_v12 = vrot.slane %v4905_v1, %v2164_v11 }
0x1724   : > { %4336 = vmatmul.mubr.msk.bf16.vlgmr.msra.gmra.mrb[0].mxu0 %vm2117_vm5, %v2104_v4 }
0x1725   : > { %4340 = vmatpush3.bf16.msra.mxu0 %v5335_v5  ;;  %4343 = vmatprep.mubr.msk.bf16.mxu0 %vm4832_vm4, %v4831_v15 }
0x1726   : > { %4341 = vmatprep.subr.bf16.mxu0 %v4831_v15 }
0x1729   : > { %4342 = vmatpush3.bf16.msra.mxu0 %v5344_v6 }
0x172a   : > { %4347 = vmatprep.subr.bf16.mxu0 %v4831_v15 }
0x1730   : > { %4344 = vmatmul.mubr.msk.bf16.vlgmr.msra.gmra.mrb[0].mxu0 %vm2117_vm5, %v3941_v2  ;;  %v3957_v2 = vld [vmem:[%s5696_s0 + $0x5] sm:$0x1] }
0x1731   : > { %4348 = vmatpush3.bf16.msra.mxu0 %v5356_v3  ;;  %4351 = vmatprep.mubr.msk.bf16.mxu0 %vm4832_vm4, %v4831_v15 }
0x1732   : > { %4349 = vmatprep.subr.bf16.mxu0 %v4831_v15 }
0x1735   : > { %4350 = vmatpush3.bf16.msra.mxu0 %v5362_v7 }
0x1736   : > { %4379 = vmatprep.subr.bf16.mxu0 %v4831_v15 }
0x173c   : > { %4352 = vmatmul.mubr.msk.bf16.vlgmr.msra.gmra.mrb[0].mxu0 %vm2117_vm5, %v3945_v8  ;;  %v3959_v8 = vld [vmem:[%s5697_s1 + $0xd] sm:$0x1] }
0x173d   : > { %4380 = vmatpush3.bf16.msra.mxu0 %v5316_v55  ;;  %4383 = vmatprep.mubr.msk.bf16.mxu0 %vm4832_vm4, %v4831_v15 }
0x173e   : > { %4381 = vmatprep.subr.bf16.mxu0 %v4831_v15 }
0x1741   : > { %4382 = vmatpush3.bf16.msra.mxu0 %v5324_v23 }
0x1742   : > { %4387 = vmatprep.subr.bf16.mxu0 %v4831_v15 }
0x180f   : > { %v2277_v13 = vpop.f32.mrb[0].mxu0 }
0x1810   : > { %v4595_v58 = vadd.f32 %v2277_v13, %v5383_v12  ;;  %v4353_v60 = vpop.f32.mrb[1].mxu0 }
0x1811   : > { %v2280_v61 = vpop.f32.mrb[2].mxu0 }
0x1812   : > { %4752 = vtanh.f32 %v4595_v58  ;;  %v4354_v62 = vpop.f32.mrb[3].mxu0  ;;  %v2284_v0 = vmul.f32 0.5, %v4595_v58 }
0x1814   : > { %4754 = vtanh.f32 %v2284_v0 }
0x181c   : > { %v4753_v28 = vpop.eup %4752 }
0x181d   : > { %2295 = vrot.lane.b32.xlu0 %v4753_v28, %s4833_s19 }
0x181e   : > { %v4755_v17 = vpop.eup %4754 }
0x181f   : > { %v2286_v1 = vadd.f32 1.0, %v4755_v17 }
0x1821   : > { %2290 = vrot.lane.b32.xlu0 %v2103_v63, %s4834_s20  ;;  %v2287_v18 = vmul.f32 0.5, %v2286_v1 }
0x188f   : > { %v2296_v21 = vpop.permute.xlu0 %2295 }
0x1890   : > { %v2298_v24 = vmul.f32 %v2296_v21, %v2287_v18 }
0x1892   : > { %2300 = vrot.lane.b32.xlu1 %v2298_v24, %s4834_s20 }
0x1893   : > { %v2291_v25 = vpop.permute.xlu0 %2290 }
0x1894   : > { %v2293_v26 = vmul.f32 %v2291_v25, %v2287_v18 }
0x1904   : > { %v2301_v27 = vpop.permute.xlu1 %2300 }
0x1905   : > { %v2303_v48 = vadd.f32 %v2301_v27, %v2293_v26 }
0x1907   : > { %4756 = vtanh.f32 %v2303_v48 }
0x1911   : > { %v4757_v29 = vpop.eup %4756 }
0x1912   : > { %2306 = vrot.lane.b32.xlu1 %v4757_v29, %s4833_s19 }
0x1916   : > { %2317 = vrot.lane.b32.xlu1 %v2303_v48, %s4835_s25 }
0x1984   : > { %v2307_v31 = vpop.permute.xlu1 %2306 }
0x1985   : > { %v5391_v59 = vmul.f32 %v2307_v31, %v2287_v18 }
0x1987   : > { %2311 = vrot.lane.b32.xlu0 %v5391_v59, %s4834_s20 }
0x1988   : > { %v2318_v33 = vpop.permute.xlu1 %2317 }
0x1989   : > { %2320 = vst.msk [vmem:[#allocation3] sm:$0x3] %vm468_vm0, %v2318_v33 }
0x1990   : > { %v2344_v30 = vld [vmem:[#allocation3] sm:$0x3] }
0x1991   : > { %2488 = vrot.lane.b32.xlu1 %v2344_v30, %s4834_s20 }
0x19f9   : > { %v2312_v34 = vpop.permute.xlu0 %2311 }
0x19fa   : > { %2315 = vst.msk [vmem:[#allocation2] sm:$0x3] %vm468_vm0, %v2312_v34 }
0x1a01   : > { %v2343_v35 = vld [vmem:[#allocation2] sm:$0x3] }
0x1a02   : > { %v2345_v36 = vpack.c.bf16 %v2343_v35, %v2343_v35  ;;  %v3963_v35 = vld [vmem:[%s5696_s0 + $0x4] sm:$0x1] }
0x1a03   : > { %v2489_v57 = vpop.permute.xlu1 %2488 }
0x1a04   : > { %4360 = vmatmul.mubr.msk.bf16.vlgmr.msra.gmra.mrb[0].mxu1 %vm2117_vm5, %v2345_v36  ;;  %v3965_v36 = vld [vmem:[%s5697_s1 + $0xc] sm:$0x1] }
0x1a05   : > { %4364 = vmatpush3.bf16.msra.mxu1 %v5335_v5  ;;  %4367 = vmatprep.mubr.msk.bf16.mxu1 %vm4832_vm4, %v4831_v15 }
0x1a06   : > { %4365 = vmatprep.subr.bf16.mxu1 %v4831_v15 }
0x1a09   : > { %4366 = vmatpush3.bf16.msra.mxu1 %v5344_v6 }
0x1a0a   : > { %4371 = vmatprep.subr.bf16.mxu1 %v4831_v15 }
0x1a10   : > { %4368 = vmatmul.mubr.msk.bf16.vlgmr.msra.gmra.mrb[0].mxu1 %vm2117_vm5, %v3951_v37 }
0x1a11   : > { %4372 = vmatpush3.bf16.msra.mxu1 %v5356_v3  ;;  %4375 = vmatprep.mubr.msk.bf16.mxu1 %vm4832_vm4, %v4831_v15 }
0x1a12   : > { %4373 = vmatprep.subr.bf16.mxu1 %v4831_v15 }
0x1a15   : > { %4374 = vmatpush3.bf16.msra.mxu1 %v5362_v7 }
0x1a16   : > { %4403 = vmatprep.subr.bf16.mxu1 %v4831_v15 }
0x1a1c   : > { %4376 = vmatmul.mubr.msk.bf16.vlgmr.msra.gmra.mrb[0].mxu1 %vm2117_vm5, %v3953_v38 }
0x1a1d   : > { %4404 = vmatpush3.bf16.msra.mxu1 %v5316_v55  ;;  %4407 = vmatprep.mubr.msk.bf16.mxu1 %vm4832_vm4, %v4831_v15 }
0x1a1e   : > { %4405 = vmatprep.subr.bf16.mxu1 %v4831_v15 }
0x1a21   : > { %4406 = vmatpush3.bf16.msra.mxu1 %v5324_v23 }
0x1a22   : > { %4411 = vmatprep.subr.bf16.mxu1 %v4831_v15 }
0x1aef   : > { %v2475_v39 = vpop.f32.mrb[0].mxu1 }
0x1af0   : > { %v4596_v40 = vadd.f32 %v2475_v39, %v5383_v12  ;;  %v4377_v41 = vpop.f32.mrb[1].mxu1 }
0x1af1   : > { %v2478_v42 = vpop.f32.mrb[2].mxu1 }
0x1af2   : > { %4758 = vtanh.f32 %v4596_v40  ;;  %v4378_v43 = vpop.f32.mrb[3].mxu1  ;;  %v2482_v14 = vmul.f32 0.5, %v4596_v40 }
0x1af4   : > { %4760 = vtanh.f32 %v2482_v14 }
0x1afc   : > { %v4759_v45 = vpop.eup %4758 }
0x1afd   : > { %2493 = vrot.lane.b32.xlu0 %v4759_v45, %s4833_s19 }
0x1afe   : > { %v4761_v46 = vpop.eup %4760 }
0x1aff   : > { %v2484_v32 = vadd.f32 1.0, %v4761_v46 }
0x1b01   : > { %v2485_v44 = vmul.f32 0.5, %v2484_v32 }
0x1b03   : > { %v2491_v50 = vmul.f32 %v2489_v57, %v2485_v44 }
0x1b6f   : > { %v2494_v47 = vpop.permute.xlu0 %2493 }
0x1b70   : > { %v2496_v49 = vmul.f32 %v2494_v47, %v2485_v44 }
0x1b72   : > { %2498 = vrot.lane.b32.xlu0 %v2496_v49, %s4834_s20 }
0x1be4   : > { %v2499_v51 = vpop.permute.xlu0 %2498 }
0x1be5   : > { %v2501_v19 = vadd.f32 %v2499_v51, %v2491_v50 }
0x1be7   : > { %4762 = vtanh.f32 %v2501_v19 }
0x1bf1   : > { %v4763_v20 = vpop.eup %4762 }
0x1bf2   : > { %2504 = vrot.lane.b32.xlu1 %v4763_v20, %s4833_s19 }
0x1bf6   : > { %2514 = vrot.lane.b32.xlu1 %v2501_v19, %s4835_s25 }
0x1c64   : > { %v2505_v16 = vpop.permute.xlu1 %2504 }
0x1c65   : > { %v5430_v52 = vmul.f32 %v2505_v16, %v2485_v44 }
0x1c67   : > { %2509 = vrot.lane.b32.xlu0 %v5430_v52, %s4834_s20 }
0x1c68   : > { %v2515_v53 = vpop.permute.xlu1 %2514 }
0x1c69   : > { %2517 = vst.msk [vmem:[#allocation3] sm:$0x3] %vm468_vm0, %v2515_v53 }
0x1c70   : > { %v2540_v22 = vld [vmem:[#allocation3] sm:$0x3] }
0x1c71   : > { %2684 = vrot.lane.b32.xlu1 %v2540_v22, %s4834_s20 }
0x1cd9   : > { %v2510_v54 = vpop.permute.xlu0 %2509 }
0x1cda   : > { %2512 = vst.msk [vmem:[#allocation2] sm:$0x3] %vm468_vm0, %v2510_v54 }
0x1ce1   : > { %v2539_v56 = vld [vmem:[#allocation2] sm:$0x3] }
0x1ce2   : > { %v2541_v4 = vpack.c.bf16 %v2539_v56, %v2539_v56 }
0x1ce3   : > { %v2685_v18 = vpop.permute.xlu1 %2684 }
0x1ce4   : > { %4384 = vmatmul.mubr.msk.bf16.vlgmr.msra.gmra.mrb[4].mxu0 %vm2117_vm5, %v2541_v4  ;;  %v3969_v4 = vld [vmem:[%s5696_s0 + $0x3] sm:$0x1] }
0x1ce5   : > { %4388 = vmatpush3.bf16.msra.mxu0 %v5335_v5  ;;  %4391 = vmatprep.mubr.msk.bf16.mxu0 %vm4832_vm4, %v4831_v15 }
0x1ce6   : > { %4389 = vmatprep.subr.bf16.mxu0 %v4831_v15 }
0x1ce9   : > { %4390 = vmatpush3.bf16.msra.mxu0 %v5344_v6 }
0x1cea   : > { %4395 = vmatprep.subr.bf16.mxu0 %v4831_v15 }
0x1cf0   : > { %4392 = vmatmul.mubr.msk.bf16.vlgmr.msra.gmra.mrb[4].mxu0 %vm2117_vm5, %v3957_v2  ;;  %v3971_v2 = vld [vmem:[%s5697_s1 + $0xb] sm:$0x1] }
0x1cf1   : > { %4396 = vmatpush3.bf16.msra.mxu0 %v5356_v3  ;;  %4399 = vmatprep.mubr.msk.bf16.mxu0 %vm4832_vm4, %v4831_v15 }
0x1cf2   : > { %4397 = vmatprep.subr.bf16.mxu0 %v4831_v15 }
0x1cf5   : > { %4398 = vmatpush3.bf16.msra.mxu0 %v5362_v7 }
0x1cf6   : > { %4427 = vmatprep.subr.bf16.mxu0 %v4831_v15 }
0x1cfc   : > { %4400 = vmatmul.mubr.msk.bf16.vlgmr.msra.gmra.mrb[4].mxu0 %vm2117_vm5, %v3959_v8 }
0x1cfd   : > { %4428 = vmatpush3.bf16.msra.mxu0 %v5316_v55  ;;  %4431 = vmatprep.mubr.msk.bf16.mxu0 %vm4832_vm4, %v4831_v15 }
0x1cfe   : > { %4429 = vmatprep.subr.bf16.mxu0 %v4831_v15 }
0x1d01   : > { %4430 = vmatpush3.bf16.msra.mxu0 %v5324_v23 }
0x1d02   : > { %4435 = vmatprep.subr.bf16.mxu0 %v4831_v15 }
0x1dcf   : > { %v2671_v9 = vpop.f32.mrb[4].mxu0 }
0x1dd0   : > { %v4597_v11 = vadd.f32 %v2671_v9, %v5383_v12  ;;  %v4401_v13 = vpop.f32.mrb[5].mxu0 }
0x1dd1   : > { %v2674_v58 = vpop.f32.mrb[6].mxu0 }
0x1dd2   : > { %4764 = vtanh.f32 %v4597_v11  ;;  %v4402_v60 = vpop.f32.mrb[7].mxu0  ;;  %v2678_v62 = vmul.f32 0.5, %v4597_v11 }
0x1dd4   : > { %4766 = vtanh.f32 %v2678_v62 }
0x1ddc   : > { %v4765_v61 = vpop.eup %4764 }
0x1ddd   : > { %2689 = vrot.lane.b32.xlu0 %v4765_v61, %s4833_s19 }
0x1dde   : > { %v4767_v28 = vpop.eup %4766 }
0x1ddf   : > { %v2680_v63 = vadd.f32 1.0, %v4767_v28 }
0x1de1   : > { %v2681_v0 = vmul.f32 0.5, %v2680_v63 }
0x1de3   : > { %v2687_v21 = vmul.f32 %v2685_v18, %v2681_v0 }
0x1e4f   : > { %v2690_v17 = vpop.permute.xlu0 %2689 }
0x1e50   : > { %v2692_v1 = vmul.f32 %v2690_v17, %v2681_v0 }
0x1e52   : > { %2694 = vrot.lane.b32.xlu0 %v2692_v1, %s4834_s20 }
0x1ec4   : > { %v2695_v24 = vpop.permute.xlu0 %2694 }
0x1ec5   : > { %v2697_v25 = vadd.f32 %v2695_v24, %v2687_v21 }
0x1ec7   : > { %4768 = vtanh.f32 %v2697_v25 }
0x1ed1   : > { %v4769_v26 = vpop.eup %4768 }
0x1ed2   : > { %2700 = vrot.lane.b32.xlu1 %v4769_v26, %s4833_s19 }
0x1ed6   : > { %2710 = vrot.lane.b32.xlu1 %v2697_v25, %s4835_s25 }
0x1f44   : > { %v2701_v27 = vpop.permute.xlu1 %2700 }
0x1f45   : > { %v5469_v48 = vmul.f32 %v2701_v27, %v2681_v0 }
0x1f47   : > { %2705 = vrot.lane.b32.xlu0 %v5469_v48, %s4834_s20 }
0x1f48   : > { %v2711_v29 = vpop.permute.xlu1 %2710 }
0x1f49   : > { %2713 = vst.msk [vmem:[#allocation3] sm:$0x3] %vm468_vm0, %v2711_v29 }
0x1f50   : > { %v2736_v31 = vld [vmem:[#allocation3] sm:$0x3] }
0x1f51   : > { %2880 = vrot.lane.b32.xlu1 %v2736_v31, %s4834_s20 }
0x1fb9   : > { %v2706_v33 = vpop.permute.xlu0 %2705 }
0x1fba   : > { %2708 = vst.msk [vmem:[#allocation2] sm:$0x3] %vm468_vm0, %v2706_v33 }
0x1fc1   : > { %v2735_v30 = vld [vmem:[#allocation2] sm:$0x3] }
0x1fc2   : > { %v2737_v34 = vpack.c.bf16 %v2735_v30, %v2735_v30 }
0x1fc3   : > { %v2881_v47 = vpop.permute.xlu1 %2880 }
0x1fc4   : > { %4408 = vmatmul.mubr.msk.bf16.vlgmr.msra.gmra.mrb[4].mxu1 %vm2117_vm5, %v2737_v34 }
0x1fc5   : > { %4412 = vmatpush3.bf16.msra.mxu1 %v5335_v5  ;;  %4415 = vmatprep.mubr.msk.bf16.mxu1 %vm4832_vm4, %v4831_v15 }
0x1fc6   : > { %4413 = vmatprep.subr.bf16.mxu1 %v4831_v15 }
0x1fc9   : > { %4414 = vmatpush3.bf16.msra.mxu1 %v5344_v6 }
0x1fca   : > { %4419 = vmatprep.subr.bf16.mxu1 %v4831_v15 }
0x1fd0   : > { %4416 = vmatmul.mubr.msk.bf16.vlgmr.msra.gmra.mrb[4].mxu1 %vm2117_vm5, %v3963_v35  ;;  %v3975_v35 = vld [vmem:[%s5696_s0 + $0x2] sm:$0x1] }
0x1fd1   : > { %4420 = vmatpush3.bf16.msra.mxu1 %v5356_v3  ;;  %4423 = vmatprep.mubr.msk.bf16.mxu1 %vm4832_vm4, %v4831_v15 }
0x1fd2   : > { %4421 = vmatprep.subr.bf16.mxu1 %v4831_v15 }
0x1fd5   : > { %4422 = vmatpush3.bf16.msra.mxu1 %v5362_v7 }
0x1fd6   : > { %4451 = vmatprep.subr.bf16.mxu1 %v4831_v15 }
0x1fdc   : > { %4424 = vmatmul.mubr.msk.bf16.vlgmr.msra.gmra.mrb[4].mxu1 %vm2117_vm5, %v3965_v36  ;;  %v3977_v36 = vld [vmem:[%s5697_s1 + $0xa] sm:$0x1] }
0x1fdd   : > { %4452 = vmatpush3.bf16.msra.mxu1 %v5316_v55  ;;  %4455 = vmatprep.mubr.msk.bf16.mxu1 %vm4832_vm4, %v4831_v15 }
0x1fde   : > { %4453 = vmatprep.subr.bf16.mxu1 %v4831_v15 }
0x1fe1   : > { %4454 = vmatpush3.bf16.msra.mxu1 %v5324_v23 }
0x1fe2   : > { %4459 = vmatprep.subr.bf16.mxu1 %v4831_v15 }
0x20af   : > { %v2867_v37 = vpop.f32.mrb[4].mxu1 }
0x20b0   : > { %v4598_v38 = vadd.f32 %v2867_v37, %v5383_v12  ;;  %v4425_v39 = vpop.f32.mrb[5].mxu1 }
0x20b1   : > { %v2870_v40 = vpop.f32.mrb[6].mxu1 }
0x20b2   : > { %4770 = vtanh.f32 %v4598_v38  ;;  %v4426_v41 = vpop.f32.mrb[7].mxu1  ;;  %v2874_v43 = vmul.f32 0.5, %v4598_v38 }
0x20b4   : > { %4772 = vtanh.f32 %v2874_v43 }
0x20bc   : > { %v4771_v42 = vpop.eup %4770 }
0x20bd   : > { %2885 = vrot.lane.b32.xlu0 %v4771_v42, %s4833_s19 }
0x20be   : > { %v4773_v45 = vpop.eup %4772 }
0x20bf   : > { %v2876_v14 = vadd.f32 1.0, %v4773_v45 }
0x20c1   : > { %v2877_v46 = vmul.f32 0.5, %v2876_v14 }
0x20c3   : > { %v2883_v49 = vmul.f32 %v2881_v47, %v2877_v46 }
0x212f   : > { %v2886_v32 = vpop.permute.xlu0 %2885 }
0x2130   : > { %v2888_v44 = vmul.f32 %v2886_v32, %v2877_v46 }
0x2132   : > { %2890 = vrot.lane.b32.xlu0 %v2888_v44, %s4834_s20 }
0x21a4   : > { %v2891_v57 = vpop.permute.xlu0 %2890 }
0x21a5   : > { %v2893_v50 = vadd.f32 %v2891_v57, %v2883_v49 }
0x21a7   : > { %4774 = vtanh.f32 %v2893_v50 }
0x21b1   : > { %v4775_v51 = vpop.eup %4774 }
0x21b2   : > { %2896 = vrot.lane.b32.xlu1 %v4775_v51, %s4833_s19 }
0x21b6   : > { %2906 = vrot.lane.b32.xlu1 %v2893_v50, %s4835_s25 }
0x2224   : > { %v2897_v19 = vpop.permute.xlu1 %2896 }
0x2225   : > { %v5508_v20 = vmul.f32 %v2897_v19, %v2877_v46 }
0x2227   : > { %2901 = vrot.lane.b32.xlu0 %v5508_v20, %s4834_s20 }
0x2228   : > { %v2907_v16 = vpop.permute.xlu1 %2906 }
0x2229   : > { %2909 = vst.msk [vmem:[#allocation3] sm:$0x3] %vm468_vm0, %v2907_v16 }
0x2230   : > { %v2932_v53 = vld [vmem:[#allocation3] sm:$0x3] }
0x2231   : > { %3076 = vrot.lane.b32.xlu1 %v2932_v53, %s4834_s20 }
0x2299   : > { %v2902_v22 = vpop.permute.xlu0 %2901 }
0x229a   : > { %2904 = vst.msk [vmem:[#allocation2] sm:$0x3] %vm468_vm0, %v2902_v22 }
0x22a1   : > { %v2931_v54 = vld [vmem:[#allocation2] sm:$0x3] }
0x22a2   : > { %v2933_v56 = vpack.c.bf16 %v2931_v54, %v2931_v54 }
0x22a3   : > { %v3077_v1 = vpop.permute.xlu1 %3076 }
0x22a4   : > { %4432 = vmatmul.mubr.msk.bf16.vlgmr.msra.gmra.mrb[8].mxu0 %vm2117_vm5, %v2933_v56  ;;  %v3981_v56 = vld [vmem:[%s5696_s0 + $0x1] sm:$0x1] }
0x22a5   : > { %4436 = vmatpush3.bf16.msra.mxu0 %v5335_v5  ;;  %4439 = vmatprep.mubr.msk.bf16.mxu0 %vm4832_vm4, %v4831_v15 }
0x22a6   : > { %4437 = vmatprep.subr.bf16.mxu0 %v4831_v15 }
0x22a9   : > { %4438 = vmatpush3.bf16.msra.mxu0 %v5344_v6 }
0x22aa   : > { %4443 = vmatprep.subr.bf16.mxu0 %v4831_v15 }
0x22b0   : > { %4440 = vmatmul.mubr.msk.bf16.vlgmr.msra.gmra.mrb[8].mxu0 %vm2117_vm5, %v3969_v4  ;;  %v3983_v4 = vld [vmem:[%s5697_s1 + $0x9] sm:$0x1] }
0x22b1   : > { %4444 = vmatpush3.bf16.msra.mxu0 %v5356_v3  ;;  %4447 = vmatprep.mubr.msk.bf16.mxu0 %vm4832_vm4, %v4831_v15 }
0x22b2   : > { %4445 = vmatprep.subr.bf16.mxu0 %v4831_v15 }
0x22b5   : > { %4446 = vmatpush3.bf16.msra.mxu0 %v5362_v7 }
0x22b6   : > { %4475 = vmatprep.subr.bf16.mxu0 %v4831_v15 }
0x22bc   : > { %4448 = vmatmul.mubr.msk.bf16.vlgmr.msra.gmra.mrb[8].mxu0 %vm2117_vm5, %v3971_v2 }
0x22bd   : > { %4476 = vmatpush3.bf16.msra.mxu0 %v5316_v55  ;;  %4479 = vmatprep.mubr.msk.bf16.mxu0 %vm4832_vm4, %v4831_v15 }
0x22be   : > { %4477 = vmatprep.subr.bf16.mxu0 %v4831_v15 }
0x22c1   : > { %4478 = vmatpush3.bf16.msra.mxu0 %v5324_v23 }
0x22c2   : > { %4483 = vmatprep.subr.bf16.mxu0 %v4831_v15 }
0x238f   : > { %v3063_v8 = vpop.f32.mrb[8].mxu0 }
0x2390   : > { %v4599_v9 = vadd.f32 %v3063_v8, %v5383_v12  ;;  %v4449_v11 = vpop.f32.mrb[9].mxu0 }
0x2391   : > { %v3066_v13 = vpop.f32.mrb[10].mxu0 }
0x2392   : > { %4776 = vtanh.f32 %v4599_v9  ;;  %v4450_v58 = vpop.f32.mrb[11].mxu0  ;;  %v3070_v61 = vmul.f32 0.5, %v4599_v9 }
0x2394   : > { %4778 = vtanh.f32 %v3070_v61 }
0x239c   : > { %v4777_v60 = vpop.eup %4776 }
0x239d   : > { %3081 = vrot.lane.b32.xlu0 %v4777_v60, %s4833_s19 }
0x239e   : > { %v4779_v62 = vpop.eup %4778 }
0x239f   : > { %v3072_v28 = vadd.f32 1.0, %v4779_v62 }
0x23a1   : > { %v3073_v63 = vmul.f32 0.5, %v3072_v28 }
0x23a3   : > { %v3079_v18 = vmul.f32 %v3077_v1, %v3073_v63 }
0x240f   : > { %v3082_v0 = vpop.permute.xlu0 %3081 }
0x2410   : > { %v3084_v17 = vmul.f32 %v3082_v0, %v3073_v63 }
0x2412   : > { %3086 = vrot.lane.b32.xlu0 %v3084_v17, %s4834_s20 }
0x2484   : > { %v3087_v21 = vpop.permute.xlu0 %3086 }
0x2485   : > { %v3089_v24 = vadd.f32 %v3087_v21, %v3079_v18 }
0x2487   : > { %4780 = vtanh.f32 %v3089_v24 }
0x2491   : > { %v4781_v25 = vpop.eup %4780 }
0x2492   : > { %3092 = vrot.lane.b32.xlu1 %v4781_v25, %s4833_s19 }
0x2496   : > { %3102 = vrot.lane.b32.xlu1 %v3089_v24, %s4835_s25 }
0x2504   : > { %v3093_v26 = vpop.permute.xlu1 %3092 }
0x2505   : > { %v5547_v27 = vmul.f32 %v3093_v26, %v3073_v63 }
0x2507   : > { %3097 = vrot.lane.b32.xlu0 %v5547_v27, %s4834_s20 }
0x2508   : > { %v3103_v29 = vpop.permute.xlu1 %3102 }
0x2509   : > { %3105 = vst.msk [vmem:[#allocation3] sm:$0x3] %vm468_vm0, %v3103_v29 }
0x2510   : > { %v3128_v31 = vld [vmem:[#allocation3] sm:$0x3] }
0x2511   : > { %3272 = vrot.lane.b32.xlu1 %v3128_v31, %s4834_s20 }
0x2579   : > { %v3098_v33 = vpop.permute.xlu0 %3097 }
0x257a   : > { %3100 = vst.msk [vmem:[#allocation2] sm:$0x3] %vm468_vm0, %v3098_v33 }
0x2581   : > { %v3127_v30 = vld [vmem:[#allocation2] sm:$0x3] }
0x2582   : > { %v3129_v34 = vpack.c.bf16 %v3127_v30, %v3127_v30 }
0x2584   : > { %4456 = vmatmul.mubr.msk.bf16.vlgmr.msra.gmra.mrb[8].mxu1 %vm2117_vm5, %v3129_v34 }
0x2585   : > { %4460 = vmatpush3.bf16.msra.mxu1 %v5335_v5  ;;  %4463 = vmatprep.mubr.msk.bf16.mxu1 %vm4832_vm4, %v4831_v15 }
0x2586   : > { %4461 = vmatprep.subr.bf16.mxu1 %v4831_v15 }
0x2589   : > { %4462 = vmatpush3.bf16.msra.mxu1 %v5344_v6 }
0x258a   : > { %4467 = vmatprep.subr.bf16.mxu1 %v4831_v15 }
0x2590   : > { %4464 = vmatmul.mubr.msk.bf16.vlgmr.msra.gmra.mrb[8].mxu1 %vm2117_vm5, %v3975_v35  ;;  %v3566_v35 = vld [vmem:[%s5696_s0] sm:$0x1] }
0x2591   : > { %4468 = vmatpush3.bf16.msra.mxu1 %v5356_v3  ;;  %4471 = vmatprep.mubr.msk.bf16.mxu1 %vm4832_vm4, %v4831_v15 }
0x2592   : > { %4469 = vmatprep.subr.bf16.mxu1 %v4831_v15 }
0x2595   : > { %4470 = vmatpush3.bf16.msra.mxu1 %v5362_v7 }
0x2596   : > { %4499 = vmatprep.subr.bf16.mxu1 %v4831_v15 }
0x259c   : > { %4472 = vmatmul.mubr.msk.bf16.vlgmr.msra.gmra.mrb[8].mxu1 %vm2117_vm5, %v3977_v36 }
0x259d   : > { %4500 = vmatpush3.bf16.msra.mxu1 %v5316_v55  ;;  %4503 = vmatprep.mubr.msk.bf16.mxu1 %vm4832_vm4, %v4831_v15 }
0x259e   : > { %4501 = vmatprep.subr.bf16.mxu1 %v4831_v15 }
0x25a1   : > { %4502 = vmatpush3.bf16.msra.mxu1 %v5324_v23  ;;  %v3273_v23 = vpop.permute.xlu1 %3272 }
0x25a2   : > { %4507 = vmatprep.subr.bf16.mxu1 %v4831_v15 }
0x266f   : > { %v3259_v37 = vpop.f32.mrb[8].mxu1 }
0x2670   : > { %v4600_v38 = vadd.f32 %v3259_v37, %v5383_v12  ;;  %v4473_v39 = vpop.f32.mrb[9].mxu1 }
0x2671   : > { %v3262_v40 = vpop.f32.mrb[10].mxu1 }
0x2672   : > { %4782 = vtanh.f32 %v4600_v38  ;;  %v4474_v41 = vpop.f32.mrb[11].mxu1  ;;  %v3266_v55 = vmul.f32 0.5, %v4600_v38 }
0x2674   : > { %4784 = vtanh.f32 %v3266_v55 }
0x267c   : > { %v4783_v42 = vpop.eup %4782 }
0x267d   : > { %3277 = vrot.lane.b32.xlu0 %v4783_v42, %s4833_s19 }
0x267e   : > { %v4785_v43 = vpop.eup %4784 }
0x267f   : > { %v3268_v45 = vadd.f32 1.0, %v4785_v43 }
0x2681   : > { %v3269_v14 = vmul.f32 0.5, %v3268_v45  ;;  %v2321_v45 = vpack.c.bf16 %v5391_v59, %v5391_v59 }
0x2683   : > { %v3275_v44 = vmul.f32 %v3273_v23, %v3269_v14 }
0x26ef   : > { %v3278_v46 = vpop.permute.xlu0 %3277 }
0x26f0   : > { %v3280_v32 = vmul.f32 %v3278_v46, %v3269_v14 }
0x26f2   : > { %3282 = vrot.lane.b32.xlu0 %v3280_v32, %s4834_s20  ;;  %v2714_v32 = vpack.c.bf16 %v5469_v48, %v5469_v48 }
0x2764   : > { %v3283_v47 = vpop.permute.xlu0 %3282 }
0x2765   : > { %v3285_v49 = vadd.f32 %v3283_v47, %v3275_v44  ;;  %v3106_v47 = vpack.c.bf16 %v5547_v27, %v5547_v27 }
0x2767   : > { %4786 = vtanh.f32 %v3285_v49 }
0x2771   : > { %v4787_v57 = vpop.eup %4786 }
0x2772   : > { %3288 = vrot.lane.b32.xlu1 %v4787_v57, %s4833_s19 }
0x2776   : > { %3298 = vrot.lane.b32.xlu1 %v3285_v49, %s4835_s25 }
0x27e4   : > { %v3289_v50 = vpop.permute.xlu1 %3288 }
0x27e5   : > { %v5586_v51 = vmul.f32 %v3289_v50, %v3269_v14 }
0x27e7   : > { %3293 = vrot.lane.b32.xlu0 %v5586_v51, %s4834_s20 }
0x27e8   : > { %v3299_v19 = vpop.permute.xlu1 %3298 }
0x27e9   : > { %3301 = vst.msk [vmem:[#allocation3] sm:$0x3] %vm468_vm0, %v3299_v19 }
0x27f0   : > { %v3324_v16 = vld [vmem:[#allocation3] sm:$0x3] }
0x27f1   : > { %3468 = vrot.lane.b32.xlu1 %v3324_v16, %s4834_s20 }
0x2859   : > { %v3294_v53 = vpop.permute.xlu0 %3293 }
0x285a   : > { %3296 = vst.msk [vmem:[#allocation2] sm:$0x3] %vm468_vm0, %v3294_v53 }
0x2861   : > { %v3323_v22 = vld [vmem:[#allocation2] sm:$0x3] }
0x2862   : > { %v3325_v54 = vpack.c.bf16 %v3323_v22, %v3323_v22 }
0x2863   : > { %v3469_v17 = vpop.permute.xlu1 %3468 }
0x2864   : > { %4480 = vmatmul.mubr.msk.bf16.vlgmr.msra.gmra.mrb[12].mxu0 %vm2117_vm5, %v3325_v54 }
0x2865   : > { %4484 = vmatpush3.bf16.msra.mxu0 %v5335_v5  ;;  %4487 = vmatprep.mubr.msk.bf16.mxu0 %vm4832_vm4, %v4831_v15 }
0x2866   : > { %4485 = vmatprep.subr.bf16.mxu0 %v4831_v15 }
0x2869   : > { %4486 = vmatpush3.bf16.msra.mxu0 %v5344_v6 }
0x286a   : > { %4491 = vmatprep.subr.bf16.mxu0 %v4831_v15 }
0x2870   : > { %4488 = vmatmul.mubr.msk.bf16.vlgmr.msra.gmra.mrb[12].mxu0 %vm2117_vm5, %v3981_v56  ;;  %v2518_v56 = vpack.c.bf16 %v5430_v52, %v5430_v52 }
0x2871   : > { %4492 = vmatpush3.bf16.msra.mxu0 %v5356_v3  ;;  %4495 = vmatprep.mubr.msk.bf16.mxu0 %vm4832_vm4, %v4831_v15 }
0x2872   : > { %4493 = vmatprep.subr.bf16.mxu0 %v4831_v15 }
0x2875   : > { %4494 = vmatpush3.bf16.msra.mxu0 %v5362_v7 }
0x287c   : > { %4496 = vmatmul.mubr.msk.bf16.vlgmr.msra.gmra.mrb[12].mxu0 %vm2117_vm5, %v3983_v4 }
0x294f   : > { %v3455_v2 = vpop.f32.mrb[12].mxu0 }
0x2950   : > { %v4601_v8 = vadd.f32 %v3455_v2, %v5383_v12  ;;  %v4497_v9 = vpop.f32.mrb[13].mxu0 }
0x2951   : > { %v3458_v11 = vpop.f32.mrb[14].mxu0 }
0x2952   : > { %4788 = vtanh.f32 %v4601_v8  ;;  %v4498_v13 = vpop.f32.mrb[15].mxu0  ;;  %v3462_v60 = vmul.f32 0.5, %v4601_v8  ;;  %v2910_v8 = vpack.c.bf16 %v5508_v20, %v5508_v20 }
0x2954   : > { %4790 = vtanh.f32 %v3462_v60 }
0x295c   : > { %v4789_v58 = vpop.eup %4788 }
0x295d   : > { %3473 = vrot.lane.b32.xlu0 %v4789_v58, %s4833_s19  ;;  %v3302_v58 = vpack.c.bf16 %v5586_v51, %v5586_v51 }
0x295e   : > { %v4791_v61 = vpop.eup %4790 }
0x295f   : > { %v3464_v62 = vadd.f32 1.0, %v4791_v61 }
0x2961   : > { %v3465_v28 = vmul.f32 0.5, %v3464_v62 }
0x2963   : > { %v3471_v1 = vmul.f32 %v3469_v17, %v3465_v28 }
0x29cf   : > { %v3474_v63 = vpop.permute.xlu0 %3473 }
0x29d0   : > { %v3476_v0 = vmul.f32 %v3474_v63, %v3465_v28 }
0x29d2   : > { %3478 = vrot.lane.b32.xlu0 %v3476_v0, %s4834_s20 }
0x2a44   : > { %v3479_v18 = vpop.permute.xlu0 %3478 }
0x2a45   : > { %v3481_v21 = vadd.f32 %v3479_v18, %v3471_v1 }
0x2a47   : > { %4792 = vtanh.f32 %v3481_v21 }
0x2a51   : > { %v4793_v24 = vpop.eup %4792 }
0x2a52   : > { %3484 = vrot.lane.b32.xlu1 %v4793_v24, %s4833_s19 }
0x2a56   : > { %3494 = vrot.lane.b32.xlu1 %v3481_v21, %s4835_s25 }
0x2ac4   : > { %v3485_v25 = vpop.permute.xlu1 %3484 }
0x2ac5   : > { %v3487_v26 = vmul.f32 %v3485_v25, %v3465_v28 }
0x2ac7   : > { %3489 = vrot.lane.b32.xlu0 %v3487_v26, %s4834_s20  ;;  %v3498_v57 = vpack.c.bf16 %v3487_v26, %v3487_v26 }
0x2ac8   : > { %v3495_v29 = vpop.permute.xlu1 %3494 }
0x2ac9   : > { %3497 = vst.msk [vmem:[#allocation3] sm:$0x3] %vm468_vm0, %v3495_v29 }
0x2ad0   : > { %v3520_v31 = vld [vmem:[#allocation3] sm:$0x3] }
0x2ad1   : > { %3662 = vrot.lane.b32.xlu1 %v3520_v31, %s4834_s20 }
0x2b39   : > { %v3490_v33 = vpop.permute.xlu0 %3489 }
0x2b3a   : > { %3492 = vst.msk [vmem:[#allocation2] sm:$0x3] %vm468_vm0, %v3490_v33 }
0x2b41   : > { %v3519_v30 = vld [vmem:[#allocation2] sm:$0x3] }
0x2b42   : > { %v3521_v34 = vpack.c.bf16 %v3519_v30, %v3519_v30 }
0x2b43   : > { %v3663_v16 = vpop.permute.xlu1 %3662 }
0x2b44   : > { %4504 = vmatmul.mubr.msk.bf16.vlgmr.msra.gmra.mrb[12].mxu1 %vm2117_vm5, %v3521_v34 }
0x2b45   : > { %4508 = vmatpush3.bf16.msra.mxu1 %v5335_v5  ;;  %4511 = vmatprep.mubr.msk.bf16.mxu1 %vm4832_vm4, %v4831_v15  ;;  %v3988_v5 = vld [vmem:[%s5697_s1 + $0x8] sm:$0x1] }
0x2b46   : > { %4509 = vmatprep.subr.bf16.mxu1 %v4831_v15 }
0x2b49   : > { %4510 = vmatpush3.bf16.msra.mxu1 %v5344_v6 }
0x2b4a   : > { %4515 = vmatprep.subr.bf16.mxu1 %v4831_v15 }
0x2b50   : > { %4512 = vmatmul.mubr.msk.bf16.vlgmr.msra.gmra.mrb[12].mxu1 %vm2117_vm5, %v3566_v35 }
0x2b51   : > { %4516 = vmatpush3.bf16.msra.mxu1 %v5356_v3  ;;  %4519 = vmatprep.mubr.msk.bf16.mxu1 %vm4832_vm4, %v4831_v15 }
0x2b52   : > { %4517 = vmatprep.subr.bf16.mxu1 %v4831_v15  ;;  %v4836_v15 = vmov 1966171168  }
0x2b55   : > { %4518 = vmatpush3.bf16.msra.mxu1 %v5362_v7  ;;  %v2324_v7 = vunpack.c.l.s4 %v4836_v15 }
0x2b57   : > { %v2325_v42 = vunpack.c.0.s8 %v2324_v7 }
0x2b59   : > { %v2328_v43 = vsub.s32 %v2325_v42, %v5379_v10 }
0x2b5b   : > { %v2329_v46 = vrot.slane %v2321_v45, %v2328_v43  ;;  %v2722_v44 = vrot.slane %v2714_v32, %v2328_v43  ;;  %v3114_v10 = vrot.slane %v3106_v47, %v2328_v43  ;;  %v3506_v50 = vrot.slane %v3498_v57, %v2328_v43 }
0x2b5c   : > { %4520 = vmatmul.mubr.msk.bf16.vlgmr.msra.gmra.mrb[12].mxu1 %vm2117_vm5, %v3988_v5  ;;  %v2526_v2 = vrot.slane %v2518_v56, %v2328_v43  ;;  %v2918_v13 = vrot.slane %v2910_v8, %v2328_v43  ;;  %v3310_v52 = vrot.slane %v3302_v58, %v2328_v43 }
0x2b5d   : > { %v2336_v49 = vrot.slane %v2329_v46, %v2328_v43  ;;  %v2729_v59 = vrot.slane %v2722_v44, %v2328_v43  ;;  %v3121_v19 = vrot.slane %v3114_v10, %v2328_v43  ;;  %v3513_v48 = vrot.slane %v3506_v50, %v2328_v43 }
0x2b5e   : > { %v2533_v61 = vrot.slane %v2526_v2, %v2328_v43  ;;  %v2925_v20 = vrot.slane %v2918_v13, %v2328_v43  ;;  %v3317_v62 = vrot.slane %v3310_v52, %v2328_v43 }
0x2c2f   : > { %v3649_v6 = vpop.f32.mrb[12].mxu1 }
0x2c30   : > { %v4602_v36 = vadd.f32 %v3649_v6, %v5383_v12  ;;  %v4521_v37 = vpop.f32.mrb[13].mxu1 }
0x2c31   : > { %v3652_v38 = vpop.f32.mrb[14].mxu1 }
0x2c32   : > { %4794 = vtanh.f32 %v4602_v36  ;;  %v4522_v3 = vpop.f32.mrb[15].mxu1  ;;  %v3656_v40 = vmul.f32 0.5, %v4602_v36 }
0x2c34   : > { %4796 = vtanh.f32 %v3656_v40 }
0x2c3c   : > { %v4795_v39 = vpop.eup %4794 }
0x2c3d   : > { %3667 = vrot.lane.b32.xlu0 %v4795_v39, %s4833_s19 }
0x2c3e   : > { %v4797_v41 = vpop.eup %4796 }
0x2c3f   : > { %v3658_v55 = vadd.f32 1.0, %v4797_v41 }
0x2c41   : > { %v3659_v12 = vmul.f32 0.5, %v3658_v55 }
0x2c43   : > { %v3665_v27 = vmul.f32 %v3663_v16, %v3659_v12 }
0x2caf   : > { %v3668_v14 = vpop.permute.xlu0 %3667 }
0x2cb0   : > { %v3670_v23 = vmul.f32 %v3668_v14, %v3659_v12 }
0x2cb2   : > { %3672 = vrot.lane.b32.xlu0 %v3670_v23, %s4834_s20 }
0x2cb6   : > { %2337 = vrot.lane.b32.xlu0 %v2336_v49, %s4834_s20 }
0x2cba   : > { %2730 = vrot.lane.b32.xlu0 %v2729_v59, %s4834_s20 }
0x2cbe   : > { %3122 = vrot.lane.b32.xlu0 %v3121_v19, %s4834_s20 }
0x2cc2   : > { %3514 = vrot.lane.b32.xlu0 %v3513_v48, %s4834_s20 }
0x2d24   : > { %v3673_v53 = vpop.permute.xlu0 %3672 }
0x2d25   : > { %v3675_v22 = vadd.f32 %v3673_v53, %v3665_v27 }
0x2d27   : > { %4798 = vtanh.f32 %v3675_v22  ;;  %3688 = vrot.lane.b32.xlu0 %v3675_v22, %s4835_s25 }
0x2d28   : > { %v2338_v54 = vpop.permute.xlu0 %2337 }
0x2d29   : > { %3949 = vst.msk [vmem:[%s4917_s18 + $0x7] sm:$0x1] %vm2341_vm6, %v2338_v54 }
0x2d2c   : > { %v2731_v4 = vpop.permute.xlu0 %2730 }
0x2d2d   : > { %3961 = vst.msk [vmem:[%s4917_s18 + $0x5] sm:$0x1] %vm2341_vm6, %v2731_v4 }
0x2d30   : > { %v3123_v9 = vpop.permute.xlu0 %3122 }
0x2d31   : > { %v4799_v11 = vpop.eup %4798  ;;  %3973 = vst.msk [vmem:[%s4917_s18 + $0x3] sm:$0x1] %vm2341_vm6, %v3123_v9 }
0x2d32   : > { %3678 = vrot.lane.b32.xlu1 %v4799_v11, %s4833_s19 }
0x2d34   : > { %v3515_v60 = vpop.permute.xlu0 %3514 }
0x2d35   : > { %3985 = vst.msk [vmem:[%s4917_s18 + $0x1] sm:$0x1] %vm2341_vm6, %v3515_v60 }
0x2d36   : > { %2534 = vrot.lane.b32.xlu1 %v2533_v61, %s4834_s20 }
0x2d3a   : > { %2926 = vrot.lane.b32.xlu1 %v2925_v20, %s4834_s20 }
0x2d3e   : > { %3318 = vrot.lane.b32.xlu1 %v3317_v62, %s4834_s20 }
0x2d99   : > { %v3689_v28 = vpop.permute.xlu0 %3688 }
0x2d9a   : > { %3691 = vst.msk [vmem:[#allocation3] sm:$0x3] %vm468_vm0, %v3689_v28 }
0x2da4   : > { %v3679_v51 = vpop.permute.xlu1 %3678 }
0x2da5   : > { %v3681_v63 = vmul.f32 %v3679_v51, %v3659_v12 }
0x2da7   : > { %v3692_v0 = vpack.c.bf16 %v3681_v63, %v3681_v63  ;;  %3683 = vrot.lane.b32.xlu1 %v3681_v63, %s4834_s20 }
0x2da8   : > { %v2535_v17 = vpop.permute.xlu1 %2534 }
0x2da9   : > { %v3700_v1 = vrot.slane %v3692_v0, %v2328_v43  ;;  %3955 = vst.msk [vmem:[%s4917_s18 + $0x6] sm:$0x1] %vm2341_vm6, %v2535_v17 }
0x2dab   : > { %v3707_v18 = vrot.slane %v3700_v1, %v2328_v43 }
0x2dac   : > { %v2927_v21 = vpop.permute.xlu1 %2926 }
0x2dad   : > { %3967 = vst.msk [vmem:[%s4917_s18 + $0x4] sm:$0x1] %vm2341_vm6, %v2927_v21  ;;  %3708 = vrot.lane.b32.xlu1 %v3707_v18, %s4834_s20 }
0x2db0   : > { %v3319_v24 = vpop.permute.xlu1 %3318 }
0x2db1   : > { %3979 = vst.msk [vmem:[%s4917_s18 + $0x2] sm:$0x1] %vm2341_vm6, %v3319_v24 }
0x2e19   : > { %v3684_v25 = vpop.permute.xlu1 %3683 }
0x2e1a   : > { %3686 = vst.msk [vmem:[#allocation2] sm:$0x3] %vm468_vm0, %v3684_v25 }
0x2e1f   : > { %v3709_v26 = vpop.permute.xlu1 %3708 }
0x2e20   : > { %3711 = vst.msk [vmem:[%s4917_s18] sm:$0x1] %vm2341_vm6, %v3709_v26 }
0x2e21 PF: > { %s16_s23 = sadd.s32 1, %s4822_s23   ;;  %s5703_s21 = smov %s4818_s22 }
0x2e22   : > { %p13_p7 = scmp.ge.s32.totalorder %s16_s23, 4   ;;  %s5704_s22 = smov %s5706_s24 }
0x2e24   :  { %15 = sbr.rel (!%p13_p7) target bundleno = 2 (0x2), region = 143 }

</bundles_post_ra>
